<compile_context>
chip_gen: v6e
topology: v6e:2x2x1
jax: 0.10.0
libtpu: 0.0.40
codegen_flags: <defaults>
</compile_context>

<pallas_src>
import math

import jax
import jax.numpy as jnp
from jax import lax
from jax.experimental import pallas as pl
from jax.experimental.pallas import tpu as pltpu


# ----------------------------------------------------------------------------- kernel


def _make_kernel(L, rec_in_idx, rec_out_idx, NB, H, BB, C, sf, out_w, clipval):
    """Fused C-step HebbianNetwork chunk kernel (static config baked in)."""

    def kernel(x_ref, rec0_ref, hebb0_ref, wm_ref, vec_ref,
               out_ref, hebb_ref, rec_scr):
        c = pl.program_id(1)                    # time-chunk index (innermost, sequential)

        # First chunk of each batch group: seed the carried state. The trace is carried
        # directly in the revisited hebb output block (constant index along the time axis).
        @pl.when(c == 0)
        def _():
            rec_scr[...] = rec0_ref[...]
            hebb_ref[...] = hebb0_ref[...]

        w_pl = wm_ref[L]                        # (H, H) static plastic weight
        alpha = wm_ref[L + 1]                   # (H, H)
        bmf = vec_ref[L:L + 1, :]               # modfanout bias   (1, H)
        wmf = vec_ref[L + 1:L + 2, :]           # modfanout weight (1, H)
        lane = lax.broadcasted_iota(jnp.int32, (BB, H), 1)
        amask = lane < NB

        rv = rec_scr[...]                       # (BB, H) recurrent_vals, carried in-chunk

        for s in range(C):                      # statically unrolled per-step serial chain
            x = x_ref[s]                        # (BB, H) zero-padded inputs for this step
            hebb = hebb_ref[...]                # (BB, H, H) plastic trace (in place)

            # --- plastic recurrent injection: static term on the MXU, hebbian term on
            #     the VPU; (w + alpha*hebb) is never materialized. --------------------
            rec_inj = (jnp.dot(rv, w_pl, preferred_element_type=jnp.float32)
                       + jnp.sum(rv[:, :, None] * hebb * alpha[None, :, :], axis=1))

            # --- hidden layers (tanh) ---------------------------------------------------
            h = x
            rec_vals = jnp.zeros((BB, H), jnp.float32)      # initialZeroState()
            for i in range(L - 1):
                pre = (jnp.dot(h, wm_ref[i], preferred_element_type=jnp.float32)
                       + vec_ref[i:i + 1, :])
                if i == rec_in_idx:
                    pre = pre + rec_inj
                h = jnp.tanh(pre)
                if i == rec_out_idx:
                    rec_vals = h

            # --- fused [output layer | h2mod] matmul: lanes [0:NB] = logits,
            #     lane NB = h2mod pre-activation, remaining lanes zero-weighted. -----
            o = (jnp.dot(h, wm_ref[L - 1], preferred_element_type=jnp.float32)
                 + vec_ref[L - 1:L, :])                      # (BB, H)
            if sf:
                om = jnp.where(amask, o, -1e30)
                m = jnp.max(om, axis=-1, keepdims=True)
                e = jnp.exp(om - m)                          # masked lanes underflow to 0
                ssum = jnp.sum(e, axis=-1, keepdims=True)
                act = e * pl.reciprocal(ssum, approx=True)   # EUP vrcp, off the VALU
            else:
                act = jnp.where(amask, o, 0.0)

            # --- neuromodulated Hebbian trace update ------------------------------------
            if rec_out_idx == L - 2:
                h2m_pre = o[:, NB:NB + 1]                    # reuse the fused matmul
            else:
                # TODO(synk): fold this h2mod column into a spare padded output lane of
                # layer rec_out_idx+1 once hidden widths are padded past rec_size.
                h2m_pre = (jnp.dot(rec_vals, wm_ref[L - 1][:, NB:NB + 1],
                                   preferred_element_type=jnp.float32)
                           + vec_ref[L - 1:L, NB:NB + 1])
            myeta = jnp.tanh(h2m_pre)                        # (BB, 1)
            eta = myeta * wmf + bmf                          # (BB, H)
            # TODO(synk): a lane-dense (BB, H*H) trace layout would lift the 25% lane
            # utilization of this elementwise update while H stays at 32.
            hebb_ref[...] = jnp.clip(
                hebb + rv[:, :, None] * (eta * rec_vals)[:, None, :],
                -clipval, clipval)

            rv = rec_vals                                    # recurrent_vals for step t+1

            # single lane-dense store: [act | rec_layer_values | zero pad]
            parts = [act, rec_vals]
            if out_w > 2 * H:
                parts.append(jnp.zeros((BB, out_w - 2 * H), jnp.float32))
            out_ref[s] = jnp.concatenate(parts, axis=-1)

        rec_scr[...] = rv                                    # carried to the next chunk

    return kernel


# ----------------------------------------------------------------------------- packing


def _pack_params(layer_params, w, alpha, h2mod, modfanout, *, H, NB):
    """Pack all weights into one (L+2,H,H) slab and all vectors into one (L+2,H) slab."""
    L = len(layer_params)
    wmats, vecs = [], []
    for i in range(L - 1):                                   # hidden layers (zero padded)
        W, b = layer_params[i]
        Wp = jnp.zeros((H, H), jnp.float32).at[:W.shape[0], :W.shape[1]].set(W)
        bp = jnp.zeros((H,), jnp.float32).at[:b.shape[-1]].set(b.reshape(-1))
        wmats.append(Wp)
        vecs.append(bp)
    # fused [output layer | h2mod] matrix and bias
    Wl, bl = layer_params[L - 1]                             # (H, NB), (1, NB)
    Wh, bh = h2mod                                           # (H, 1),  (1, 1)
    Wcat = jnp.zeros((H, H), jnp.float32)
    Wcat = Wcat.at[:, :NB].set(Wl).at[:, NB:NB + 1].set(Wh)
    bcat = jnp.zeros((H,), jnp.float32)
    bcat = bcat.at[:NB].set(bl.reshape(-1)).at[NB].set(bh.reshape(-1)[0])
    Wmf, bmf = modfanout                                     # (1, H), (1, H)
    wmats += [Wcat, w, alpha]
    vecs += [bcat, bmf.reshape(-1), Wmf.reshape(-1)]
    return jnp.stack(wmats, axis=0), jnp.stack(vecs, axis=0)


# ----------------------------------------------------------------------------- wrapper


def hebbian_rollout(x_seq, recurrent_vals0, hebb0, layer_params, w, alpha,
                    h2mod, modfanout, *, rec_layer_in, rec_layer_out, sf,
                    clipval=2.0, steps_per_block=None, batch_block=None):
    """Runs T chained HebbianNetwork.forward steps inside one pallas_call.

    recurrent_vals_{t+1} = rec_layer_values_t, hebb_{t+1} = hebb_return_t.
    Returns (act_dis_seq [T,B,NB], rec_layer_values_seq [T,B,H], final hebb [B,H,H]).
    T=1 with batch_block=B reproduces a single module forward exactly.
    """
    T, B, isize = x_seq.shape
    L = len(layer_params)                                    # networksize
    H = int(w.shape[0])                                      # rec_size
    NB = int(layer_params[-1][0].shape[1])
    if steps_per_block is None:
        steps_per_block = math.gcd(T, 8)                     # amortize per-grid-step overhead
    if batch_block is None:
        batch_block = B                                      # pass B//2 to feed both v7x cores
    C, BB = int(steps_per_block), int(batch_block)
    assert T % C == 0, "steps_per_block must divide T"
    assert B % BB == 0 and BB % 8 == 0, "batch_block must divide B and be a multiple of 8"
    assert isize <= H and NB + 1 <= H
    for i in range(L - 1):
        assert layer_params[i][0].shape[1] == H, "hidden widths must equal rec_size"
    out_w = max(128, -(-2 * H // 128) * 128)                 # lane-dense output width

    x_pad = jnp.zeros((T, B, H), jnp.float32).at[:, :, :isize].set(
        x_seq.astype(jnp.float32))
    wmats, vecs = _pack_params(layer_params, w, alpha, h2mod, modfanout, H=H, NB=NB)

    kernel = _make_kernel(L, rec_layer_in, rec_layer_out, NB, H, BB, C, sf, out_w, clipval)

    G, NC = B // BB, T // C
    combined, hebb_final = pl.pallas_call(
        kernel,
        out_shape=(
            jax.ShapeDtypeStruct((T, B, out_w), jnp.float32),
            jax.ShapeDtypeStruct((B, H, H), jnp.float32),
        ),
        grid_spec=pltpu.PrefetchScalarGridSpec(
            num_scalar_prefetch=0,
            grid=(G, NC),                                    # (batch groups, time chunks)
            in_specs=[
                pl.BlockSpec((C, BB, H), lambda g, c: (c, g, 0)),     # per-chunk inputs
                pl.BlockSpec((BB, H), lambda g, c: (g, 0)),           # initial recurrent_vals
                pl.BlockSpec((BB, H, H), lambda g, c: (g, 0, 0)),     # initial hebb trace
                pl.BlockSpec((L + 2, H, H), lambda g, c: (0, 0, 0)),  # packed weight slab
                pl.BlockSpec((L + 2, H), lambda g, c: (0, 0)),        # packed bias/vector slab
            ],
            out_specs=(
                pl.BlockSpec((C, BB, out_w), lambda g, c: (c, g, 0)), # [act | rec_vals] per step
                pl.BlockSpec((BB, H, H), lambda g, c: (g, 0, 0)),     # hebb trace (revisited=carried)
            ),
            scratch_shapes=[
                pltpu.VMEM((BB, H), jnp.float32),            # carried recurrent_vals
            ],
        ),
        compiler_params=pltpu.CompilerParams(
            dimension_semantics=("parallel", "arbitrary")),  # batch groups parallel; time serial
        # TODO(synk): for H>=256 audit VMEM (set vmem_limit_bytes), use Buffered(1) on the
        # constant-index blocks, alias hebb0->hebb output, and cast matmul operands to bf16.
    )(x_pad, recurrent_vals0.astype(jnp.float32), hebb0.astype(jnp.float32), wmats, vecs)

    act_seq = combined[:, :, :NB]
    rec_seq = combined[:, :, H:2 * H]
    return act_seq, rec_seq, hebb_final


# ----------------------------------------------------------------------------- reference


def _init_linear(key, fan_in, fan_out):
    """Deterministic stand-in for torch.nn.Linear default init (weights pre-transposed)."""
    kw, kb = jax.random.split(key)
    bound = 1.0 / jnp.sqrt(float(fan_in))
    W = jax.random.uniform(kw, (fan_in, fan_out), jnp.float32, -bound, bound)
    b = jax.random.uniform(kb, (1, fan_out), jnp.float32, -bound, bound)
    return W, b


def _forward_step_ref(x, rec_vals, hebb, layer_params, w, alpha, h2mod, modfanout,
                      rec_layer_in, rec_layer_out, sf, clipval=2.0):
    """Pure-JAX transcription of HebbianNetwork.forward (one step)."""
    L = len(layer_params)
    B, H = rec_vals.shape[0], w.shape[0]
    h = x
    rec_layer_values = jnp.zeros((B, H), jnp.float32)
    for i in range(L - 1):
        W, b = layer_params[i]
        pre = h @ W + b
        if i == rec_layer_in:
            plastic = w[None] + alpha[None] * hebb
            pre = pre + jnp.einsum('br,brs->bs', rec_vals, plastic)
        h = jnp.tanh(pre)
        if i == rec_layer_out:
            rec_layer_values = h
    Wl, bl = layer_params[L - 1]
    logits = h @ Wl + bl
    act = jax.nn.softmax(logits, axis=1) if sf else logits
    Wh, bh = h2mod
    myeta = jnp.tanh(rec_layer_values @ Wh + bh)                       # (B, 1)
    deltahebb = rec_vals[:, :, None] * rec_layer_values[:, None, :]    # (B, H, H)
    Wmf, bmf = modfanout
    eta = myeta @ Wmf + bmf                                            # (B, H)
    hebb_new = jnp.clip(hebb + eta[:, None, :] * deltahebb, -clipval, clipval)
    return act, rec_layer_values, hebb_new


# ----------------------------------------------------------------------------- main


def _build_and_check(key, *, isize, hsizes, NB, rec_layer_in, rec_layer_out, sf,
                     B, T, steps_per_block, batch_block, act_atol):
    L = len(hsizes) + 1                        # networksize
    H = hsizes[rec_layer_out]                  # rec_size = inputsizes[rec_layer_out + 1]
    keys = jax.random.split(key, L + 8)

    inputsizes = [isize] + list(hsizes)
    outputsizes = list(hsizes) + [NB]
    layer_params = [_init_linear(keys[i], inputsizes[i], outputsizes[i]) for i in range(L)]
    h2mod = _init_linear(keys[L], H, 1)
    modfanout = _init_linear(keys[L + 1], 1, H)
    w = 0.001 * jax.random.uniform(keys[L + 2], (H, H), jnp.float32)
    alpha = 0.001 * jax.random.uniform(keys[L + 3], (H, H), jnp.float32)

    x_seq = jax.random.normal(keys[L + 4], (T, B, isize), jnp.float32)
    # initialZeroState / initialZeroHebb would be zeros; nonzero exercises the plastic path.
    rec0 = 0.1 * jax.random.normal(keys[L + 5], (B, H), jnp.float32)
    hebb0 = 0.01 * jax.random.normal(keys[L + 6], (B, H, H), jnp.float32)

    act_seq, rec_seq, hebb_final = hebbian_rollout(
        x_seq, rec0, hebb0, layer_params, w, alpha, h2mod, modfanout,
        rec_layer_in=rec_layer_in, rec_layer_out=rec_layer_out, sf=sf,
        steps_per_block=steps_per_block, batch_block=batch_block)
    jax.block_until_ready((act_seq, rec_seq, hebb_final))

    # Cross-check against a pure-JAX transcription of the PyTorch module, chained T steps.
    rv, hb = rec0, hebb0
    for t in range(T):
        a_ref, r_ref, hb = _forward_step_ref(
            x_seq[t], rv, hb, layer_params, w, alpha, h2mod, modfanout,
            rec_layer_in, rec_layer_out, sf)
        assert jnp.allclose(act_seq[t], a_ref, atol=act_atol), f"act_dis mismatch at step {t}"
        assert jnp.allclose(rec_seq[t], r_ref, atol=1e-4), f"rec_layer_values mismatch at step {t}"
        rv = r_ref
    assert jnp.allclose(hebb_final, hb, atol=1e-4), "final hebb trace mismatch"
    assert act_seq.shape == (T, B, NB)
    assert rec_seq.shape == (T, B, H)
    assert hebb_final.shape == (B, H, H)


if __name__ == "__main__":
    key = jax.random.PRNGKey(0)
    k1, k2 = jax.random.split(key)

    # Pole-balance config: networksize=2, recurrent tap on layer 0, softmax policy head.
    # B=32 environments stacked (review: larger batch), split into 2 batch groups so the
    # chunked rollout exposes a "parallel" grid axis for v7x's second TensorCore.
    # act tolerance relaxed slightly because of the approx (EUP) softmax reciprocal.
    _build_and_check(k1, isize=4, hsizes=[32], NB=2, rec_layer_in=0, rec_layer_out=0,
                     sf=True, B=32, T=8, steps_per_block=4, batch_block=16,
                     act_atol=5e-3)

    # Deeper config exercising the non-fused h2mod branch (rec_layer_out != L-2) and sf=False.
    _build_and_check(k2, isize=4, hsizes=[32, 32], NB=3, rec_layer_in=1, rec_layer_out=0,
                     sf=False, B=16, T=4, steps_per_block=2, batch_block=16,
                     act_atol=1e-4)

    print("KERNEL_OK")
</pallas_src>

<mosaic_0001>
module attributes {stable_mosaic.version = 11 : i64} {
  func.func @kernel(%arg0: i32, %arg1: i32, %arg2: memref<4x16x32xf32, #tpu.memory_space<vmem>>, %arg3: memref<16x32xf32, #tpu.memory_space<vmem>>, %arg4: memref<16x32x32xf32, #tpu.memory_space<vmem>>, %arg5: memref<4x32x32xf32, #tpu.memory_space<vmem>>, %arg6: memref<4x32xf32, #tpu.memory_space<vmem>>, %arg7: memref<4x16x128xf32, #tpu.memory_space<vmem>>, %arg8: memref<16x32x32xf32, #tpu.memory_space<vmem>>, %arg9: memref<16x32xf32, #tpu.memory_space<vmem>>) attributes {dimension_semantics = [#tpu.dimension_semantics<parallel>, #tpu.dimension_semantics<arbitrary>], iteration_bounds = array<i64: 2, 2>, scalar_prefetch = 0 : i64, scratch_operands = 1 : i64, tpu.core_type = #tpu.core_type<tc>, window_params = [{transform_indices = @transform_0, window_bounds = array<i64: 4, 16, 32>}, {transform_indices = @transform_1, window_bounds = array<i64: 16, 32>}, {transform_indices = @transform_2, window_bounds = array<i64: 16, 32, 32>}, {pipeline_mode = #tpu.pipeline_mode<synchronous>, transform_indices = @transform_3, window_bounds = array<i64: 4, 32, 32>}, {pipeline_mode = #tpu.pipeline_mode<synchronous>, transform_indices = @transform_4, window_bounds = array<i64: 4, 32>}, {transform_indices = @transform_5, window_bounds = array<i64: 4, 16, 128>}, {transform_indices = @transform_6, window_bounds = array<i64: 16, 32, 32>}]} {
    %c0_i32 = arith.constant 0 : i32
    %0 = arith.cmpi eq, %arg1, %c0_i32 : i32
    %1 = arith.extui %0 : i1 to i32
    %c0_i32_0 = arith.constant 0 : i32
    %2 = arith.cmpi ne, %1, %c0_i32_0 : i32
    scf.if %2 {
      %c0_138 = arith.constant 0 : index
      %c0_139 = arith.constant 0 : index
      %262 = vector.load %arg3[%c0_138, %c0_139] : memref<16x32xf32, #tpu.memory_space<vmem>>, vector<16x32xf32>
      %c0_140 = arith.constant 0 : index
      %c0_141 = arith.constant 0 : index
      %263 = vector.load %arg9[%c0_140, %c0_141] : memref<16x32xf32, #tpu.memory_space<vmem>>, vector<16x32xf32>
      tpu.vector_store %arg9[%c0_140, %c0_141], %262 {strides = array<i32>} : memref<16x32xf32, #tpu.memory_space<vmem>>, vector<16x32xf32>,
      %c0_142 = arith.constant 0 : index
      %c0_143 = arith.constant 0 : index
      %c0_144 = arith.constant 0 : index
      %264 = vector.load %arg4[%c0_142, %c0_143, %c0_144] : memref<16x32x32xf32, #tpu.memory_space<vmem>>, vector<16x32x32xf32>
      %c0_145 = arith.constant 0 : index
      %c0_146 = arith.constant 0 : index
      %c0_147 = arith.constant 0 : index
      %265 = vector.load %arg8[%c0_145, %c0_146, %c0_147] : memref<16x32x32xf32, #tpu.memory_space<vmem>>, vector<16x32x32xf32>
      tpu.vector_store %arg8[%c0_145, %c0_146, %c0_147], %264 {strides = array<i32>} : memref<16x32x32xf32, #tpu.memory_space<vmem>>, vector<16x32x32xf32>,
    } else {
    }
    %c2 = arith.constant 2 : index
    %c0 = arith.constant 0 : index
    %c0_1 = arith.constant 0 : index
    %3 = vector.load %arg5[%c2, %c0, %c0_1] : memref<4x32x32xf32, #tpu.memory_space<vmem>>, vector<1x32x32xf32>
    %4 = vector.shape_cast %3 : vector<1x32x32xf32> to vector<32x32xf32>
    %c3 = arith.constant 3 : index
    %c0_2 = arith.constant 0 : index
    %c0_3 = arith.constant 0 : index
    %5 = vector.load %arg5[%c3, %c0_2, %c0_3] : memref<4x32x32xf32, #tpu.memory_space<vmem>>, vector<1x32x32xf32>
    %6 = vector.shape_cast %5 : vector<1x32x32xf32> to vector<32x32xf32>
    %c2_4 = arith.constant 2 : index
    %c0_5 = arith.constant 0 : index
    %7 = vector.load %arg6[%c2_4, %c0_5] : memref<4x32xf32, #tpu.memory_space<vmem>>, vector<1x32xf32>
    %c3_6 = arith.constant 3 : index
    %c0_7 = arith.constant 0 : index
    %8 = vector.load %arg6[%c3_6, %c0_7] : memref<4x32xf32, #tpu.memory_space<vmem>>, vector<1x32xf32>
    %9 = tpu.iota {dimensions = array<i32: 1>} : vector<16x32xi32>
    %c2_i32 = arith.constant 2 : i32
    %10 = vector.broadcast %c2_i32 : i32 to vector<16x32xi32>
    %11 = arith.cmpi slt, %9, %10 : vector<16x32xi32>
    %c0_8 = arith.constant 0 : index
    %c0_9 = arith.constant 0 : index
    %12 = vector.load %arg9[%c0_8, %c0_9] : memref<16x32xf32, #tpu.memory_space<vmem>>, vector<16x32xf32>
    %c0_10 = arith.constant 0 : index
    %c0_11 = arith.constant 0 : index
    %c0_12 = arith.constant 0 : index
    %13 = vector.load %arg2[%c0_10, %c0_11, %c0_12] : memref<4x16x32xf32, #tpu.memory_space<vmem>>, vector<1x16x32xf32>
    %14 = vector.shape_cast %13 : vector<1x16x32xf32> to vector<16x32xf32>
    %c0_13 = arith.constant 0 : index
    %c0_14 = arith.constant 0 : index
    %c0_15 = arith.constant 0 : index
    %15 = vector.load %arg8[%c0_13, %c0_14, %c0_15] : memref<16x32x32xf32, #tpu.memory_space<vmem>>, vector<16x32x32xf32>
    %cst = arith.constant dense<0.000000e+00> : vector<16x32xf32>
    %16 = tpu.matmul %12, %4, %cst {dimension_numbers = #tpu.dot_dimension_numbers<[1], [0], [0], [1], [0, 0, 1, 1], [], []>} : vector<16x32xf32>, vector<32x32xf32>, vector<16x32xf32> -> vector<16x32xf32>
    %17 = vector.shape_cast %12 : vector<16x32xf32> to vector<16x32x1xf32>
    %18 = vector.broadcast %17 : vector<16x32x1xf32> to vector<16x32x32xf32>
    %19 = arith.mulf %18, %15 : vector<16x32x32xf32>
    %20 = vector.shape_cast %6 : vector<32x32xf32> to vector<1x32x32xf32>
    %21 = vector.broadcast %20 : vector<1x32x32xf32> to vector<16x32x32xf32>
    %22 = arith.mulf %19, %21 : vector<16x32x32xf32>
    %cst_16 = arith.constant dense<0.000000e+00> : vector<16x32xf32>
    %23 = vector.multi_reduction <add>, %22, %cst_16 [1] : vector<16x32x32xf32> to vector<16x32xf32>
    %24 = arith.addf %16, %23 : vector<16x32xf32>
    %c0_17 = arith.constant 0 : index
    %c0_18 = arith.constant 0 : index
    %c0_19 = arith.constant 0 : index
    %25 = vector.load %arg5[%c0_17, %c0_18, %c0_19] : memref<4x32x32xf32, #tpu.memory_space<vmem>>, vector<1x32x32xf32>
    %26 = vector.shape_cast %25 : vector<1x32x32xf32> to vector<32x32xf32>
    %cst_20 = arith.constant dense<0.000000e+00> : vector<16x32xf32>
    %27 = tpu.matmul %14, %26, %cst_20 {dimension_numbers = #tpu.dot_dimension_numbers<[1], [0], [0], [1], [0, 0, 1, 1], [], []>} : vector<16x32xf32>, vector<32x32xf32>, vector<16x32xf32> -> vector<16x32xf32>
    %c0_21 = arith.constant 0 : index
    %c0_22 = arith.constant 0 : index
    %28 = vector.load %arg6[%c0_21, %c0_22] : memref<4x32xf32, #tpu.memory_space<vmem>>, vector<1x32xf32>
    %29 = vector.broadcast %28 : vector<1x32xf32> to vector<16x32xf32>
    %30 = arith.addf %27, %29 : vector<16x32xf32>
    %31 = arith.addf %30, %24 : vector<16x32xf32>
    %32 = math.tanh %31 : vector<16x32xf32>
    %c1 = arith.constant 1 : index
    %c0_23 = arith.constant 0 : index
    %c0_24 = arith.constant 0 : index
    %33 = vector.load %arg5[%c1, %c0_23, %c0_24] : memref<4x32x32xf32, #tpu.memory_space<vmem>>, vector<1x32x32xf32>
    %34 = vector.shape_cast %33 : vector<1x32x32xf32> to vector<32x32xf32>
    %cst_25 = arith.constant dense<0.000000e+00> : vector<16x32xf32>
    %35 = tpu.matmul %32, %34, %cst_25 {dimension_numbers = #tpu.dot_dimension_numbers<[1], [0], [0], [1], [0, 0, 1, 1], [], []>} : vector<16x32xf32>, vector<32x32xf32>, vector<16x32xf32> -> vector<16x32xf32>
    %c1_26 = arith.constant 1 : index
    %c0_27 = arith.constant 0 : index
    %36 = vector.load %arg6[%c1_26, %c0_27] : memref<4x32xf32, #tpu.memory_space<vmem>>, vector<1x32xf32>
    %37 = vector.broadcast %36 : vector<1x32xf32> to vector<16x32xf32>
    %38 = arith.addf %35, %37 : vector<16x32xf32>
    %cst_28 = arith.constant -1.000000e+30 : f32
    %39 = vector.broadcast %cst_28 : f32 to vector<16x32xf32>
    %40 = arith.select %11, %38, %39 : vector<16x32xi1>, vector<16x32xf32>
    %cst_29 = arith.constant dense<0xFF800000> : vector<16xf32>
    %41 = vector.multi_reduction <maximumf>, %40, %cst_29 [1] : vector<16x32xf32> to vector<16xf32>
    %42 = vector.shape_cast %41 : vector<16xf32> to vector<16x1xf32>
    %43 = vector.broadcast %42 : vector<16x1xf32> to vector<16x32xf32>
    %44 = arith.subf %40, %43 : vector<16x32xf32>
    %45 = math.exp %44 : vector<16x32xf32>
    %cst_30 = arith.constant dense<0.000000e+00> : vector<16xf32>
    %46 = vector.multi_reduction <add>, %45, %cst_30 [1] : vector<16x32xf32> to vector<16xf32>
    %47 = vector.shape_cast %46 : vector<16xf32> to vector<16x1xf32>
    %48 = tpu.reciprocal %47 {approx = true} : vector<16x1xf32> -> vector<16x1xf32>
    %49 = vector.broadcast %48 : vector<16x1xf32> to vector<16x32xf32>
    %50 = arith.mulf %45, %49 : vector<16x32xf32>
    %51 = vector.extract_strided_slice %38 {offsets = [0, 2], sizes = [16, 1], strides = [1, 1]} : vector<16x32xf32> to vector<16x1xf32>
    %52 = math.tanh %51 : vector<16x1xf32>
    %53 = vector.broadcast %52 : vector<16x1xf32> to vector<16x32xf32>
    %54 = vector.broadcast %8 : vector<1x32xf32> to vector<16x32xf32>
    %55 = arith.mulf %53, %54 : vector<16x32xf32>
    %56 = vector.broadcast %7 : vector<1x32xf32> to vector<16x32xf32>
    %57 = arith.addf %55, %56 : vector<16x32xf32>
    %58 = vector.shape_cast %12 : vector<16x32xf32> to vector<16x32x1xf32>
    %59 = arith.mulf %57, %32 : vector<16x32xf32>
    %60 = vector.shape_cast %59 : vector<16x32xf32> to vector<16x1x32xf32>
    %61 = vector.broadcast %58 : vector<16x32x1xf32> to vector<16x32x32xf32>
    %62 = vector.broadcast %60 : vector<16x1x32xf32> to vector<16x32x32xf32>
    %63 = arith.mulf %61, %62 : vector<16x32x32xf32>
    %64 = arith.addf %15, %63 : vector<16x32x32xf32>
    %cst_31 = arith.constant -2.000000e+00 : f32
    %cst_32 = arith.constant 2.000000e+00 : f32
    %65 = vector.broadcast %cst_31 : f32 to vector<16x32x32xf32>
    %66 = arith.maximumf %65, %64 : vector<16x32x32xf32>
    %67 = vector.broadcast %cst_32 : f32 to vector<16x32x32xf32>
    %68 = arith.minimumf %67, %66 : vector<16x32x32xf32>
    %c0_33 = arith.constant 0 : index
    %c0_34 = arith.constant 0 : index
    %c0_35 = arith.constant 0 : index
    %69 = vector.load %arg8[%c0_33, %c0_34, %c0_35] : memref<16x32x32xf32, #tpu.memory_space<vmem>>, vector<16x32x32xf32>
    tpu.vector_store %arg8[%c0_33, %c0_34, %c0_35], %68 {strides = array<i32>} : memref<16x32x32xf32, #tpu.memory_space<vmem>>, vector<16x32x32xf32>,
    %cst_36 = arith.constant 0.000000e+00 : f32
    %70 = vector.broadcast %cst_36 : f32 to vector<16x64xf32>
    %71 = tpu.concatenate %50, %32, %70 in 1 : vector<16x32xf32>, vector<16x32xf32>, vector<16x64xf32> -> vector<16x128xf32>
    %c0_37 = arith.constant 0 : index
    %c0_38 = arith.constant 0 : index
    %c0_39 = arith.constant 0 : index
    %72 = vector.load %arg7[%c0_37, %c0_38, %c0_39] : memref<4x16x128xf32, #tpu.memory_space<vmem>>, vector<1x16x128xf32>
    %73 = vector.shape_cast %72 : vector<1x16x128xf32> to vector<16x128xf32>
    %74 = vector.shape_cast %71 : vector<16x128xf32> to vector<1x16x128xf32>
    tpu.vector_store %arg7[%c0_37, %c0_38, %c0_39], %74 {strides = array<i32>} : memref<4x16x128xf32, #tpu.memory_space<vmem>>, vector<1x16x128xf32>,
    %c1_40 = arith.constant 1 : index
    %c0_41 = arith.constant 0 : index
    %c0_42 = arith.constant 0 : index
    %75 = vector.load %arg2[%c1_40, %c0_41, %c0_42] : memref<4x16x32xf32, #tpu.memory_space<vmem>>, vector<1x16x32xf32>
    %76 = vector.shape_cast %75 : vector<1x16x32xf32> to vector<16x32xf32>
    %c0_43 = arith.constant 0 : index
    %c0_44 = arith.constant 0 : index
    %c0_45 = arith.constant 0 : index
    %77 = vector.load %arg8[%c0_43, %c0_44, %c0_45] : memref<16x32x32xf32, #tpu.memory_space<vmem>>, vector<16x32x32xf32>
    %cst_46 = arith.constant dense<0.000000e+00> : vector<16x32xf32>
    %78 = tpu.matmul %32, %4, %cst_46 {dimension_numbers = #tpu.dot_dimension_numbers<[1], [0], [0], [1], [0, 0, 1, 1], [], []>} : vector<16x32xf32>, vector<32x32xf32>, vector<16x32xf32> -> vector<16x32xf32>
    %79 = vector.shape_cast %32 : vector<16x32xf32> to vector<16x32x1xf32>
    %80 = vector.broadcast %79 : vector<16x32x1xf32> to vector<16x32x32xf32>
    %81 = arith.mulf %80, %77 : vector<16x32x32xf32>
    %82 = vector.shape_cast %6 : vector<32x32xf32> to vector<1x32x32xf32>
    %83 = vector.broadcast %82 : vector<1x32x32xf32> to vector<16x32x32xf32>
    %84 = arith.mulf %81, %83 : vector<16x32x32xf32>
    %cst_47 = arith.constant dense<0.000000e+00> : vector<16x32xf32>
    %85 = vector.multi_reduction <add>, %84, %cst_47 [1] : vector<16x32x32xf32> to vector<16x32xf32>
    %86 = arith.addf %78, %85 : vector<16x32xf32>
    %c0_48 = arith.constant 0 : index
    %c0_49 = arith.constant 0 : index
    %c0_50 = arith.constant 0 : index
    %87 = vector.load %arg5[%c0_48, %c0_49, %c0_50] : memref<4x32x32xf32, #tpu.memory_space<vmem>>, vector<1x32x32xf32>
    %88 = vector.shape_cast %87 : vector<1x32x32xf32> to vector<32x32xf32>
    %cst_51 = arith.constant dense<0.000000e+00> : vector<16x32xf32>
    %89 = tpu.matmul %76, %88, %cst_51 {dimension_numbers = #tpu.dot_dimension_numbers<[1], [0], [0], [1], [0, 0, 1, 1], [], []>} : vector<16x32xf32>, vector<32x32xf32>, vector<16x32xf32> -> vector<16x32xf32>
    %c0_52 = arith.constant 0 : index
    %c0_53 = arith.constant 0 : index
    %90 = vector.load %arg6[%c0_52, %c0_53] : memref<4x32xf32, #tpu.memory_space<vmem>>, vector<1x32xf32>
    %91 = vector.broadcast %90 : vector<1x32xf32> to vector<16x32xf32>
    %92 = arith.addf %89, %91 : vector<16x32xf32>
    %93 = arith.addf %92, %86 : vector<16x32xf32>
    %94 = math.tanh %93 : vector<16x32xf32>
    %c1_54 = arith.constant 1 : index
    %c0_55 = arith.constant 0 : index
    %c0_56 = arith.constant 0 : index
    %95 = vector.load %arg5[%c1_54, %c0_55, %c0_56] : memref<4x32x32xf32, #tpu.memory_space<vmem>>, vector<1x32x32xf32>
    %96 = vector.shape_cast %95 : vector<1x32x32xf32> to vector<32x32xf32>
    %cst_57 = arith.constant dense<0.000000e+00> : vector<16x32xf32>
    %97 = tpu.matmul %94, %96, %cst_57 {dimension_numbers = #tpu.dot_dimension_numbers<[1], [0], [0], [1], [0, 0, 1, 1], [], []>} : vector<16x32xf32>, vector<32x32xf32>, vector<16x32xf32> -> vector<16x32xf32>
    %c1_58 = arith.constant 1 : index
    %c0_59 = arith.constant 0 : index
    %98 = vector.load %arg6[%c1_58, %c0_59] : memref<4x32xf32, #tpu.memory_space<vmem>>, vector<1x32xf32>
    %99 = vector.broadcast %98 : vector<1x32xf32> to vector<16x32xf32>
    %100 = arith.addf %97, %99 : vector<16x32xf32>
    %cst_60 = arith.constant -1.000000e+30 : f32
    %101 = vector.broadcast %cst_60 : f32 to vector<16x32xf32>
    %102 = arith.select %11, %100, %101 : vector<16x32xi1>, vector<16x32xf32>
    %cst_61 = arith.constant dense<0xFF800000> : vector<16xf32>
    %103 = vector.multi_reduction <maximumf>, %102, %cst_61 [1] : vector<16x32xf32> to vector<16xf32>
    %104 = vector.shape_cast %103 : vector<16xf32> to vector<16x1xf32>
    %105 = vector.broadcast %104 : vector<16x1xf32> to vector<16x32xf32>
    %106 = arith.subf %102, %105 : vector<16x32xf32>
    %107 = math.exp %106 : vector<16x32xf32>
    %cst_62 = arith.constant dense<0.000000e+00> : vector<16xf32>
    %108 = vector.multi_reduction <add>, %107, %cst_62 [1] : vector<16x32xf32> to vector<16xf32>
    %109 = vector.shape_cast %108 : vector<16xf32> to vector<16x1xf32>
    %110 = tpu.reciprocal %109 {approx = true} : vector<16x1xf32> -> vector<16x1xf32>
    %111 = vector.broadcast %110 : vector<16x1xf32> to vector<16x32xf32>
    %112 = arith.mulf %107, %111 : vector<16x32xf32>
    %113 = vector.extract_strided_slice %100 {offsets = [0, 2], sizes = [16, 1], strides = [1, 1]} : vector<16x32xf32> to vector<16x1xf32>
    %114 = math.tanh %113 : vector<16x1xf32>
    %115 = vector.broadcast %114 : vector<16x1xf32> to vector<16x32xf32>
    %116 = vector.broadcast %8 : vector<1x32xf32> to vector<16x32xf32>
    %117 = arith.mulf %115, %116 : vector<16x32xf32>
    %118 = vector.broadcast %7 : vector<1x32xf32> to vector<16x32xf32>
    %119 = arith.addf %117, %118 : vector<16x32xf32>
    %120 = vector.shape_cast %32 : vector<16x32xf32> to vector<16x32x1xf32>
    %121 = arith.mulf %119, %94 : vector<16x32xf32>
    %122 = vector.shape_cast %121 : vector<16x32xf32> to vector<16x1x32xf32>
    %123 = vector.broadcast %120 : vector<16x32x1xf32> to vector<16x32x32xf32>
    %124 = vector.broadcast %122 : vector<16x1x32xf32> to vector<16x32x32xf32>
    %125 = arith.mulf %123, %124 : vector<16x32x32xf32>
    %126 = arith.addf %77, %125 : vector<16x32x32xf32>
    %cst_63 = arith.constant -2.000000e+00 : f32
    %cst_64 = arith.constant 2.000000e+00 : f32
    %127 = vector.broadcast %cst_63 : f32 to vector<16x32x32xf32>
    %128 = arith.maximumf %127, %126 : vector<16x32x32xf32>
    %129 = vector.broadcast %cst_64 : f32 to vector<16x32x32xf32>
    %130 = arith.minimumf %129, %128 : vector<16x32x32xf32>
    %c0_65 = arith.constant 0 : index
    %c0_66 = arith.constant 0 : index
    %c0_67 = arith.constant 0 : index
    %131 = vector.load %arg8[%c0_65, %c0_66, %c0_67] : memref<16x32x32xf32, #tpu.memory_space<vmem>>, vector<16x32x32xf32>
    tpu.vector_store %arg8[%c0_65, %c0_66, %c0_67], %130 {strides = array<i32>} : memref<16x32x32xf32, #tpu.memory_space<vmem>>, vector<16x32x32xf32>,
    %cst_68 = arith.constant 0.000000e+00 : f32
    %132 = vector.broadcast %cst_68 : f32 to vector<16x64xf32>
    %133 = tpu.concatenate %112, %94, %132 in 1 : vector<16x32xf32>, vector<16x32xf32>, vector<16x64xf32> -> vector<16x128xf32>
    %c1_69 = arith.constant 1 : index
    %c0_70 = arith.constant 0 : index
    %c0_71 = arith.constant 0 : index
    %134 = vector.load %arg7[%c1_69, %c0_70, %c0_71] : memref<4x16x128xf32, #tpu.memory_space<vmem>>, vector<1x16x128xf32>
    %135 = vector.shape_cast %134 : vector<1x16x128xf32> to vector<16x128xf32>
    %136 = vector.shape_cast %133 : vector<16x128xf32> to vector<1x16x128xf32>
    tpu.vector_store %arg7[%c1_69, %c0_70, %c0_71], %136 {strides = array<i32>} : memref<4x16x128xf32, #tpu.memory_space<vmem>>, vector<1x16x128xf32>,
    %c2_72 = arith.constant 2 : index
    %c0_73 = arith.constant 0 : index
    %c0_74 = arith.constant 0 : index
    %137 = vector.load %arg2[%c2_72, %c0_73, %c0_74] : memref<4x16x32xf32, #tpu.memory_space<vmem>>, vector<1x16x32xf32>
    %138 = vector.shape_cast %137 : vector<1x16x32xf32> to vector<16x32xf32>
    %c0_75 = arith.constant 0 : index
    %c0_76 = arith.constant 0 : index
    %c0_77 = arith.constant 0 : index
    %139 = vector.load %arg8[%c0_75, %c0_76, %c0_77] : memref<16x32x32xf32, #tpu.memory_space<vmem>>, vector<16x32x32xf32>
    %cst_78 = arith.constant dense<0.000000e+00> : vector<16x32xf32>
    %140 = tpu.matmul %94, %4, %cst_78 {dimension_numbers = #tpu.dot_dimension_numbers<[1], [0], [0], [1], [0, 0, 1, 1], [], []>} : vector<16x32xf32>, vector<32x32xf32>, vector<16x32xf32> -> vector<16x32xf32>
    %141 = vector.shape_cast %94 : vector<16x32xf32> to vector<16x32x1xf32>
    %142 = vector.broadcast %141 : vector<16x32x1xf32> to vector<16x32x32xf32>
    %143 = arith.mulf %142, %139 : vector<16x32x32xf32>
    %144 = vector.shape_cast %6 : vector<32x32xf32> to vector<1x32x32xf32>
    %145 = vector.broadcast %144 : vector<1x32x32xf32> to vector<16x32x32xf32>
    %146 = arith.mulf %143, %145 : vector<16x32x32xf32>
    %cst_79 = arith.constant dense<0.000000e+00> : vector<16x32xf32>
    %147 = vector.multi_reduction <add>, %146, %cst_79 [1] : vector<16x32x32xf32> to vector<16x32xf32>
    %148 = arith.addf %140, %147 : vector<16x32xf32>
    %c0_80 = arith.constant 0 : index
    %c0_81 = arith.constant 0 : index
    %c0_82 = arith.constant 0 : index
    %149 = vector.load %arg5[%c0_80, %c0_81, %c0_82] : memref<4x32x32xf32, #tpu.memory_space<vmem>>, vector<1x32x32xf32>
    %150 = vector.shape_cast %149 : vector<1x32x32xf32> to vector<32x32xf32>
    %cst_83 = arith.constant dense<0.000000e+00> : vector<16x32xf32>
    %151 = tpu.matmul %138, %150, %cst_83 {dimension_numbers = #tpu.dot_dimension_numbers<[1], [0], [0], [1], [0, 0, 1, 1], [], []>} : vector<16x32xf32>, vector<32x32xf32>, vector<16x32xf32> -> vector<16x32xf32>
    %c0_84 = arith.constant 0 : index
    %c0_85 = arith.constant 0 : index
    %152 = vector.load %arg6[%c0_84, %c0_85] : memref<4x32xf32, #tpu.memory_space<vmem>>, vector<1x32xf32>
    %153 = vector.broadcast %152 : vector<1x32xf32> to vector<16x32xf32>
    %154 = arith.addf %151, %153 : vector<16x32xf32>
    %155 = arith.addf %154, %148 : vector<16x32xf32>
    %156 = math.tanh %155 : vector<16x32xf32>
    %c1_86 = arith.constant 1 : index
    %c0_87 = arith.constant 0 : index
    %c0_88 = arith.constant 0 : index
    %157 = vector.load %arg5[%c1_86, %c0_87, %c0_88] : memref<4x32x32xf32, #tpu.memory_space<vmem>>, vector<1x32x32xf32>
    %158 = vector.shape_cast %157 : vector<1x32x32xf32> to vector<32x32xf32>
    %cst_89 = arith.constant dense<0.000000e+00> : vector<16x32xf32>
    %159 = tpu.matmul %156, %158, %cst_89 {dimension_numbers = #tpu.dot_dimension_numbers<[1], [0], [0], [1], [0, 0, 1, 1], [], []>} : vector<16x32xf32>, vector<32x32xf32>, vector<16x32xf32> -> vector<16x32xf32>
    %c1_90 = arith.constant 1 : index
    %c0_91 = arith.constant 0 : index
    %160 = vector.load %arg6[%c1_90, %c0_91] : memref<4x32xf32, #tpu.memory_space<vmem>>, vector<1x32xf32>
    %161 = vector.broadcast %160 : vector<1x32xf32> to vector<16x32xf32>
    %162 = arith.addf %159, %161 : vector<16x32xf32>
    %cst_92 = arith.constant -1.000000e+30 : f32
    %163 = vector.broadcast %cst_92 : f32 to vector<16x32xf32>
    %164 = arith.select %11, %162, %163 : vector<16x32xi1>, vector<16x32xf32>
    %cst_93 = arith.constant dense<0xFF800000> : vector<16xf32>
    %165 = vector.multi_reduction <maximumf>, %164, %cst_93 [1] : vector<16x32xf32> to vector<16xf32>
    %166 = vector.shape_cast %165 : vector<16xf32> to vector<16x1xf32>
    %167 = vector.broadcast %166 : vector<16x1xf32> to vector<16x32xf32>
    %168 = arith.subf %164, %167 : vector<16x32xf32>
    %169 = math.exp %168 : vector<16x32xf32>
    %cst_94 = arith.constant dense<0.000000e+00> : vector<16xf32>
    %170 = vector.multi_reduction <add>, %169, %cst_94 [1] : vector<16x32xf32> to vector<16xf32>
    %171 = vector.shape_cast %170 : vector<16xf32> to vector<16x1xf32>
    %172 = tpu.reciprocal %171 {approx = true} : vector<16x1xf32> -> vector<16x1xf32>
    %173 = vector.broadcast %172 : vector<16x1xf32> to vector<16x32xf32>
    %174 = arith.mulf %169, %173 : vector<16x32xf32>
    %175 = vector.extract_strided_slice %162 {offsets = [0, 2], sizes = [16, 1], strides = [1, 1]} : vector<16x32xf32> to vector<16x1xf32>
    %176 = math.tanh %175 : vector<16x1xf32>
    %177 = vector.broadcast %176 : vector<16x1xf32> to vector<16x32xf32>
    %178 = vector.broadcast %8 : vector<1x32xf32> to vector<16x32xf32>
    %179 = arith.mulf %177, %178 : vector<16x32xf32>
    %180 = vector.broadcast %7 : vector<1x32xf32> to vector<16x32xf32>
    %181 = arith.addf %179, %180 : vector<16x32xf32>
    %182 = vector.shape_cast %94 : vector<16x32xf32> to vector<16x32x1xf32>
    %183 = arith.mulf %181, %156 : vector<16x32xf32>
    %184 = vector.shape_cast %183 : vector<16x32xf32> to vector<16x1x32xf32>
    %185 = vector.broadcast %182 : vector<16x32x1xf32> to vector<16x32x32xf32>
    %186 = vector.broadcast %184 : vector<16x1x32xf32> to vector<16x32x32xf32>
    %187 = arith.mulf %185, %186 : vector<16x32x32xf32>
    %188 = arith.addf %139, %187 : vector<16x32x32xf32>
    %cst_95 = arith.constant -2.000000e+00 : f32
    %cst_96 = arith.constant 2.000000e+00 : f32
    %189 = vector.broadcast %cst_95 : f32 to vector<16x32x32xf32>
    %190 = arith.maximumf %189, %188 : vector<16x32x32xf32>
    %191 = vector.broadcast %cst_96 : f32 to vector<16x32x32xf32>
    %192 = arith.minimumf %191, %190 : vector<16x32x32xf32>
    %c0_97 = arith.constant 0 : index
    %c0_98 = arith.constant 0 : index
    %c0_99 = arith.constant 0 : index
    %193 = vector.load %arg8[%c0_97, %c0_98, %c0_99] : memref<16x32x32xf32, #tpu.memory_space<vmem>>, vector<16x32x32xf32>
    tpu.vector_store %arg8[%c0_97, %c0_98, %c0_99], %192 {strides = array<i32>} : memref<16x32x32xf32, #tpu.memory_space<vmem>>, vector<16x32x32xf32>,
    %cst_100 = arith.constant 0.000000e+00 : f32
    %194 = vector.broadcast %cst_100 : f32 to vector<16x64xf32>
    %195 = tpu.concatenate %174, %156, %194 in 1 : vector<16x32xf32>, vector<16x32xf32>, vector<16x64xf32> -> vector<16x128xf32>
    %c2_101 = arith.constant 2 : index
    %c0_102 = arith.constant 0 : index
    %c0_103 = arith.constant 0 : index
    %196 = vector.load %arg7[%c2_101, %c0_102, %c0_103] : memref<4x16x128xf32, #tpu.memory_space<vmem>>, vector<1x16x128xf32>
    %197 = vector.shape_cast %196 : vector<1x16x128xf32> to vector<16x128xf32>
    %198 = vector.shape_cast %195 : vector<16x128xf32> to vector<1x16x128xf32>
    tpu.vector_store %arg7[%c2_101, %c0_102, %c0_103], %198 {strides = array<i32>} : memref<4x16x128xf32, #tpu.memory_space<vmem>>, vector<1x16x128xf32>,
    %c3_104 = arith.constant 3 : index
    %c0_105 = arith.constant 0 : index
    %c0_106 = arith.constant 0 : index
    %199 = vector.load %arg2[%c3_104, %c0_105, %c0_106] : memref<4x16x32xf32, #tpu.memory_space<vmem>>, vector<1x16x32xf32>
    %200 = vector.shape_cast %199 : vector<1x16x32xf32> to vector<16x32xf32>
    %c0_107 = arith.constant 0 : index
    %c0_108 = arith.constant 0 : index
    %c0_109 = arith.constant 0 : index
    %201 = vector.load %arg8[%c0_107, %c0_108, %c0_109] : memref<16x32x32xf32, #tpu.memory_space<vmem>>, vector<16x32x32xf32>
    %cst_110 = arith.constant dense<0.000000e+00> : vector<16x32xf32>
    %202 = tpu.matmul %156, %4, %cst_110 {dimension_numbers = #tpu.dot_dimension_numbers<[1], [0], [0], [1], [0, 0, 1, 1], [], []>} : vector<16x32xf32>, vector<32x32xf32>, vector<16x32xf32> -> vector<16x32xf32>
    %203 = vector.shape_cast %156 : vector<16x32xf32> to vector<16x32x1xf32>
    %204 = vector.broadcast %203 : vector<16x32x1xf32> to vector<16x32x32xf32>
    %205 = arith.mulf %204, %201 : vector<16x32x32xf32>
    %206 = vector.shape_cast %6 : vector<32x32xf32> to vector<1x32x32xf32>
    %207 = vector.broadcast %206 : vector<1x32x32xf32> to vector<16x32x32xf32>
    %208 = arith.mulf %205, %207 : vector<16x32x32xf32>
    %cst_111 = arith.constant dense<0.000000e+00> : vector<16x32xf32>
    %209 = vector.multi_reduction <add>, %208, %cst_111 [1] : vector<16x32x32xf32> to vector<16x32xf32>
    %210 = arith.addf %202, %209 : vector<16x32xf32>
    %c0_112 = arith.constant 0 : index
    %c0_113 = arith.constant 0 : index
    %c0_114 = arith.constant 0 : index
    %211 = vector.load %arg5[%c0_112, %c0_113, %c0_114] : memref<4x32x32xf32, #tpu.memory_space<vmem>>, vector<1x32x32xf32>
    %212 = vector.shape_cast %211 : vector<1x32x32xf32> to vector<32x32xf32>
    %cst_115 = arith.constant dense<0.000000e+00> : vector<16x32xf32>
    %213 = tpu.matmul %200, %212, %cst_115 {dimension_numbers = #tpu.dot_dimension_numbers<[1], [0], [0], [1], [0, 0, 1, 1], [], []>} : vector<16x32xf32>, vector<32x32xf32>, vector<16x32xf32> -> vector<16x32xf32>
    %c0_116 = arith.constant 0 : index
    %c0_117 = arith.constant 0 : index
    %214 = vector.load %arg6[%c0_116, %c0_117] : memref<4x32xf32, #tpu.memory_space<vmem>>, vector<1x32xf32>
    %215 = vector.broadcast %214 : vector<1x32xf32> to vector<16x32xf32>
    %216 = arith.addf %213, %215 : vector<16x32xf32>
    %217 = arith.addf %216, %210 : vector<16x32xf32>
    %218 = math.tanh %217 : vector<16x32xf32>
    %c1_118 = arith.constant 1 : index
    %c0_119 = arith.constant 0 : index
    %c0_120 = arith.constant 0 : index
    %219 = vector.load %arg5[%c1_118, %c0_119, %c0_120] : memref<4x32x32xf32, #tpu.memory_space<vmem>>, vector<1x32x32xf32>
    %220 = vector.shape_cast %219 : vector<1x32x32xf32> to vector<32x32xf32>
    %cst_121 = arith.constant dense<0.000000e+00> : vector<16x32xf32>
    %221 = tpu.matmul %218, %220, %cst_121 {dimension_numbers = #tpu.dot_dimension_numbers<[1], [0], [0], [1], [0, 0, 1, 1], [], []>} : vector<16x32xf32>, vector<32x32xf32>, vector<16x32xf32> -> vector<16x32xf32>
    %c1_122 = arith.constant 1 : index
    %c0_123 = arith.constant 0 : index
    %222 = vector.load %arg6[%c1_122, %c0_123] : memref<4x32xf32, #tpu.memory_space<vmem>>, vector<1x32xf32>
    %223 = vector.broadcast %222 : vector<1x32xf32> to vector<16x32xf32>
    %224 = arith.addf %221, %223 : vector<16x32xf32>
    %cst_124 = arith.constant -1.000000e+30 : f32
    %225 = vector.broadcast %cst_124 : f32 to vector<16x32xf32>
    %226 = arith.select %11, %224, %225 : vector<16x32xi1>, vector<16x32xf32>
    %cst_125 = arith.constant dense<0xFF800000> : vector<16xf32>
    %227 = vector.multi_reduction <maximumf>, %226, %cst_125 [1] : vector<16x32xf32> to vector<16xf32>
    %228 = vector.shape_cast %227 : vector<16xf32> to vector<16x1xf32>
    %229 = vector.broadcast %228 : vector<16x1xf32> to vector<16x32xf32>
    %230 = arith.subf %226, %229 : vector<16x32xf32>
    %231 = math.exp %230 : vector<16x32xf32>
    %cst_126 = arith.constant dense<0.000000e+00> : vector<16xf32>
    %232 = vector.multi_reduction <add>, %231, %cst_126 [1] : vector<16x32xf32> to vector<16xf32>
    %233 = vector.shape_cast %232 : vector<16xf32> to vector<16x1xf32>
    %234 = tpu.reciprocal %233 {approx = true} : vector<16x1xf32> -> vector<16x1xf32>
    %235 = vector.broadcast %234 : vector<16x1xf32> to vector<16x32xf32>
    %236 = arith.mulf %231, %235 : vector<16x32xf32>
    %237 = vector.extract_strided_slice %224 {offsets = [0, 2], sizes = [16, 1], strides = [1, 1]} : vector<16x32xf32> to vector<16x1xf32>
    %238 = math.tanh %237 : vector<16x1xf32>
    %239 = vector.broadcast %238 : vector<16x1xf32> to vector<16x32xf32>
    %240 = vector.broadcast %8 : vector<1x32xf32> to vector<16x32xf32>
    %241 = arith.mulf %239, %240 : vector<16x32xf32>
    %242 = vector.broadcast %7 : vector<1x32xf32> to vector<16x32xf32>
    %243 = arith.addf %241, %242 : vector<16x32xf32>
    %244 = vector.shape_cast %156 : vector<16x32xf32> to vector<16x32x1xf32>
    %245 = arith.mulf %243, %218 : vector<16x32xf32>
    %246 = vector.shape_cast %245 : vector<16x32xf32> to vector<16x1x32xf32>
    %247 = vector.broadcast %244 : vector<16x32x1xf32> to vector<16x32x32xf32>
    %248 = vector.broadcast %246 : vector<16x1x32xf32> to vector<16x32x32xf32>
    %249 = arith.mulf %247, %248 : vector<16x32x32xf32>
    %250 = arith.addf %201, %249 : vector<16x32x32xf32>
    %cst_127 = arith.constant -2.000000e+00 : f32
    %cst_128 = arith.constant 2.000000e+00 : f32
    %251 = vector.broadcast %cst_127 : f32 to vector<16x32x32xf32>
    %252 = arith.maximumf %251, %250 : vector<16x32x32xf32>
    %253 = vector.broadcast %cst_128 : f32 to vector<16x32x32xf32>
    %254 = arith.minimumf %253, %252 : vector<16x32x32xf32>
    %c0_129 = arith.constant 0 : index
    %c0_130 = arith.constant 0 : index
    %c0_131 = arith.constant 0 : index
    %255 = vector.load %arg8[%c0_129, %c0_130, %c0_131] : memref<16x32x32xf32, #tpu.memory_space<vmem>>, vector<16x32x32xf32>
    tpu.vector_store %arg8[%c0_129, %c0_130, %c0_131], %254 {strides = array<i32>} : memref<16x32x32xf32, #tpu.memory_space<vmem>>, vector<16x32x32xf32>,
    %cst_132 = arith.constant 0.000000e+00 : f32
    %256 = vector.broadcast %cst_132 : f32 to vector<16x64xf32>
    %257 = tpu.concatenate %236, %218, %256 in 1 : vector<16x32xf32>, vector<16x32xf32>, vector<16x64xf32> -> vector<16x128xf32>
    %c3_133 = arith.constant 3 : index
    %c0_134 = arith.constant 0 : index
    %c0_135 = arith.constant 0 : index
    %258 = vector.load %arg7[%c3_133, %c0_134, %c0_135] : memref<4x16x128xf32, #tpu.memory_space<vmem>>, vector<1x16x128xf32>
    %259 = vector.shape_cast %258 : vector<1x16x128xf32> to vector<16x128xf32>
    %260 = vector.shape_cast %257 : vector<16x128xf32> to vector<1x16x128xf32>
    tpu.vector_store %arg7[%c3_133, %c0_134, %c0_135], %260 {strides = array<i32>} : memref<4x16x128xf32, #tpu.memory_space<vmem>>, vector<1x16x128xf32>,
    %c0_136 = arith.constant 0 : index
    %c0_137 = arith.constant 0 : index
    %261 = vector.load %arg9[%c0_136, %c0_137] : memref<16x32xf32, #tpu.memory_space<vmem>>, vector<16x32xf32>
    tpu.vector_store %arg9[%c0_136, %c0_137], %218 {strides = array<i32>} : memref<16x32xf32, #tpu.memory_space<vmem>>, vector<16x32xf32>,
    return
  }
  func.func @transform_0(%arg0: i32, %arg1: i32) -> (i32, i32, i32) {
    %c0_i32 = arith.constant 0 : i32
    %c0_i32_0 = arith.constant 0 : i32
    return %arg1, %arg0, %c0_i32 : i32, i32, i32
  }
  func.func @transform_1(%arg0: i32, %arg1: i32) -> (i32, i32) {
    %c0_i32 = arith.constant 0 : i32
    %c0_i32_0 = arith.constant 0 : i32
    return %arg0, %c0_i32 : i32, i32
  }
  func.func @transform_2(%arg0: i32, %arg1: i32) -> (i32, i32, i32) {
    %c0_i32 = arith.constant 0 : i32
    %c0_i32_0 = arith.constant 0 : i32
    %c0_i32_1 = arith.constant 0 : i32
    return %arg0, %c0_i32, %c0_i32_0 : i32, i32, i32
  }
  func.func @transform_3(%arg0: i32, %arg1: i32) -> (i32, i32, i32) {
    %c0_i32 = arith.constant 0 : i32
    %c0_i32_0 = arith.constant 0 : i32
    %c0_i32_1 = arith.constant 0 : i32
    %c0_i32_2 = arith.constant 0 : i32
    return %c0_i32, %c0_i32_0, %c0_i32_1 : i32, i32, i32
  }
  func.func @transform_4(%arg0: i32, %arg1: i32) -> (i32, i32) {
    %c0_i32 = arith.constant 0 : i32
    %c0_i32_0 = arith.constant 0 : i32
    %c0_i32_1 = arith.constant 0 : i32
    return %c0_i32, %c0_i32_0 : i32, i32
  }
  func.func @transform_5(%arg0: i32, %arg1: i32) -> (i32, i32, i32) {
    %c0_i32 = arith.constant 0 : i32
    %c0_i32_0 = arith.constant 0 : i32
    return %arg1, %arg0, %c0_i32 : i32, i32, i32
  }
  func.func @transform_6(%arg0: i32, %arg1: i32) -> (i32, i32, i32) {
    %c0_i32 = arith.constant 0 : i32
    %c0_i32_0 = arith.constant 0 : i32
    %c0_i32_1 = arith.constant 0 : i32
    return %arg0, %c0_i32, %c0_i32_0 : i32, i32, i32
  }
}

</mosaic_0001>

<bundles_post_ra>
// kernel: tpu_custom_call.1
= control target key start
LH: loop header
LB: loop body
LE: loop exit
PB: predicated region body
PF: predicated region fallthrough
CT: control target
= control target key end

     0   :  { %s13424_s0 = inlined_call_operand.hbm [shape: f32[8,32,32], index: 0, kind: input, shape index: {}]   ;;  %s13425_s1 = inlined_call_operand.hbm [shape: f32[32,32], index: 1, kind: input, shape index: {}]   ;;  %s13426_s2 = inlined_call_operand.hbm [shape: f32[32,32,32], index: 2, kind: input, shape index: {}]   ;;  %s13427_s3 = inlined_call_operand.hbm [shape: f32[4,32,32], index: 3, kind: input, shape index: {}]   ;;  %s13428_s4 = inlined_call_operand.vmem [shape: f32[4,32], index: 4, kind: input, shape index: {}]   ;;  %s13429_s5 = inlined_call_operand.hbm [shape: f32[8,32,128], index: 5, kind: output, shape index: {0}]   ;;  %s13430_s6 = inlined_call_operand.hbm [shape: f32[32,32,32], index: 6, kind: output, shape index: {1}]  }
   0x1   :  { %13791 = sst [smem:[#allocation152_spill]] %s13424_s0 }
   0x2   :  { %13792 = sst [smem:[#allocation153_spill]] %s13427_s3 }
   0x3   :  { %13793 = sst [smem:[#allocation154_spill]] %s13428_s4 }
   0x4   :  { %13794 = sst [smem:[#allocation155_spill]] %s13429_s5 }
   0x5   :  { %13795 = sst [smem:[#allocation156_spill]] %s13430_s6 }
   0x6   :  { %12 = vsyncpa [#allocation4], 0 }
   0x7   :  { %14 = vsyncpa [#allocation4 + $0x1], 0 }
   0x8   :  { %15 = vsyncpa [#allocation7], 0 }
   0x9   :  { %17 = vsyncpa [#allocation7 + $0x1], 0 }
   0xa   :  { %18 = vsyncpa [#allocation10], 0 }
   0xb   :  { %19 = vsyncpa [#allocation5], 0 }
   0xc   :  { %21 = vsyncpa [#allocation5 + $0x1], 0 }
   0xd   :  { %22 = vsyncpa [#allocation13], 0 }
   0xe   :  { %24 = vsyncpa [#allocation13 + $0x1], 0  ;;  %s8316_s21 = smov 0   ;;  %s8318_s22 = smov 0  }
   0xf   :  { %s8320_s23 = smov 0   ;;  %s8322_s24 = smov 0  }
  0x10   :  { %s8324_s25 = smov 0   ;;  %s8326_s26 = smov 0  }
  0x11   :  { %s8328_s27 = smov 0   ;;  %s8330_s28 = smov 0  }
  0x12   :  { %s8332_s29 = smov 0   ;;  %s8334_s30 = smov 0  }
  0x13   :  { %s8336_s7 = smov 0  }
  0x14 LB: > { %13796 = sst [smem:[#allocation24_spill]] %s8213_s21  ;;  %s8372_s8 = sadd.s32 4294967295, %s8253_s7   ;;  %s8253_s7 = sphi %s8336_s7, %s30_s7   ;;  %s8249_s30 = sphi %s8334_s30, %s14584_s30   ;;  %s8245_s29 = sphi %s8332_s29, %s14576_s29   ;;  %s8241_s28 = sphi %s8330_s28, %s14583_s28   ;;  %s8237_s27 = sphi %s8328_s27, %s14575_s27   ;;  %s8233_s26 = sphi %s8326_s26, %s14574_s26   ;;  %s8229_s25 = sphi %s8324_s25, %s14582_s25   ;;  %s8225_s24 = sphi %s8322_s24, %s14581_s24   ;;  %s8221_s23 = sphi %s8320_s23, %s14580_s23   ;;  %s8217_s22 = sphi %s8318_s22, %s14579_s22   ;;  %s8213_s21 = sphi %s8316_s21, %s14578_s21  }
  0x15   : > { %13797 = sst [smem:[#allocation25_spill]] %s8225_s24  ;;  %s7053_s9 = sadd.s32 4294967294, %s8253_s7  }
  0x16   : > { %13798 = sst [smem:[#allocation26_spill]] %s8233_s26  ;;  %s39_s10 = sadd.s32 1, %s8245_s29 }
  0x17   : > { %13799 = sst [smem:[#allocation27_spill]] %s8241_s28  ;;  %s42_s11 = sadd.s32 1, %s8249_s30 }
  0x18   : > { %13800 = sst [smem:[#allocation28_spill]] %s8245_s29  ;;  %p40_p0 = scmp.ge.s32.totalorder %s39_s10, 2 }
  0x19   : > { %s51_s12 = sadd.s32 1, %s8233_s26  ;;  %p58_p1 = scmp.ne.s32.totalorder %s8233_s26, %s8229_s25 }
  0x1a   : > { %p59_p2 = scmp.eq.s32.totalorder %s8253_s7, 0  ;;  %s14586_s10 = smov (%p40_p0, %s39_s10), 0 }
  0x1b   : > { %13801 = sst [smem:[#allocation29_spill]] %s14586_s10  ;;  %s14588_s11 = smov (!%p40_p0, %s42_s11), %s8249_s30 }
  0x1c   : > { %s46_s13 = ssub.s32 %s8245_s29, %s14586_s10  ;;  %p8391_p3 = por %p59_p2, %p58_p1 }
  0x1d   : > { %p44_p4 = scmp.ge.s32.totalorder %s14588_s11, 2  ;;  %p13433_p5 = scmp.ne.s32.totalorder %s8229_s25, %s8225_s24 }
  0x1e   : > { %p13435_p6 = scmp.eq.s32.totalorder %s8372_s8, 0  ;;  %s77_s15 = sadd.s32 1, %s8221_s23 }
  0x1f   : > { %s14590_s11 = smov (%p44_p4, %s14588_s11), 0  ;;  %p84_p8 = scmp.ne.s32.totalorder %s8221_s23, %s8217_s22 }
  0x20   : > { %13803 = sst [smem:[#allocation30_spill]] %s14590_s11  ;;  %p8406_p7 = por %p13435_p6, %p13433_p5 }
  0x21   : > { %s47_s17 = ssub.s32 %s8249_s30, %s14590_s11  ;;  %p90_p9 = scmp.ne.s32.totalorder %s8217_s22, %s8213_s21 }
  0x22   : > { %s13804_s16 = scalar_select %p8406_p7, 1, 0 }
  0x23   : > { %s48_s18 = sor.u32 %s47_s17, %s46_s13  ;;  %p75_p10 = scmp.eq.s32.totalorder %s47_s17, 0 }
  0x24   : > { %p49_p11 = scmp.eq.s32.totalorder %s48_s18, 0  ;;  %p8421_p12 = por %p84_p8, %p59_p2 }
  0x25   : > { %s8426_s20 = scalar_select %p75_p10, %s8221_s23, %s77_s15  }
  0x26   : > { %s13805_s19 = scalar_select %p8421_p12, 1, 0 }
  0x27   : > { %13806 = sst [smem:[#allocation31_spill]] %s8426_s20  ;;  %p8436_p13 = por %p90_p9, %p13435_p6 }
  0x28   : > { %s8429_s10 = scalar_select %p49_p11, %s8233_s26, %s51_s12  }
  0x29   : > { %s13808_s11 = scalar_select %p8436_p13, 1, 0 }
  0x2a   : > { %13807 = sst [smem:[#allocation32_spill]] %s8429_s10  ;;  %p184_p0 = scmp.eq.s32.totalorder %s8372_s8, 3 }
  0x2b   : > { %p190_p4 = scmp.eq.s32.totalorder %s7053_s9, 3  ;;  %p7054_p5 = scmp.ge.s32.totalorder %s8253_s7, 1 }
  0x2c   : > { %p8445_p7 = por %p184_p0, %p58_p1  ;;  %p8452_p2 = por %p184_p0, %p84_p8 }
  0x2d   : > { %p13813_p10 = scmp.ne.s32.totalorder %s8229_s25, %s8225_s24  ;;  %p8466_p6 = por %p190_p4, %p90_p9 }
  0x2e   : > { %s13809_s13 = scalar_select %p8445_p7, 1, 0 }
  0x2f   : > { %s13811_s15 = scalar_select %p8452_p2, 1, 0 }
  0x30   : > { %13810 = sst [smem:[#allocation33_spill]] %s13809_s13  ;;  %p8459_p11 = por %p190_p4, %p13813_p10 }
  0x31   : > { %13812 = sst [smem:[#allocation34_spill]] %s13811_s15  ;;  %p223_p13 = scmp.lt.s32.totalorder %s8253_s7, 5 }
  0x32   : > { %s13814_s12 = scalar_select %p8459_p11, 1, 0 }
  0x33   : > { %s13816_s17 = scalar_select %p8466_p6, 1, 0 }
  0x34   : > { %13815 = sst [smem:[#allocation35_spill]] %s13814_s12  ;;  %p8471_p1 = pnand %p7054_p5, %p223_p13 }
  0x35   : > { %13817 = sst [smem:[#allocation36_spill]] %s13816_s17  ;;  %s8255_s18 = smov [#allocation9]  }
  0x36   : > { %s235_s10 = sshll.u32 %s8255_s18, 4  ;;  %p7630_p8 = pneg %p8471_p1  ;;  %s236_s10 = int_to_ptr.vmem [resolvable:$true] %s235_s10 }
  0x37   : > { %p13819_p0 = scmp.eq.s32.totalorder %s8372_s8, 0  ;;  %s8054_s20 = scalar_lea.vmem %s236_s10, 2048 }
  0x38   : > { %p8055_p11 = scmp.ne.s32.totalorder %s236_s10, %s8054_s20  ;;  %p8062_p7 = scmp.lt.s32.totalorder %s236_s10, %s236_s10 }
  0x39   : > { %p7631_p10 = pnand %p7630_p8, %p13819_p0  ;;  %p8063_p6 = scmp.lt.s32.totalorder %s8054_s20, %s8054_s20 }
  0x3b   : > { %p8045_p2 = pneg %p7631_p10  ;;  %p8064_p12 = por %p8063_p6, %p8062_p7 }
  0x3d   : > { %p8057_p9 = pnand %p8055_p11, %p8045_p2 }
  0x3f   : > { %p8058_p4 = pneg %p8057_p9 }
  0x41   : > { %p8065_p5 = pnand %p8064_p12, %p8058_p4 }
  0x43   : > { %8068 = shalt.err (!%p8065_p5)
}
  0x44   : > { %s8256_s17 = smov 128   ;;  %s8257_s21 = smov 8  }
  0x45   : > { %s13820_s3 = sld [smem:[#allocation153_spill]]  ;;  %p7056_p13 = scmp.ge.s32.totalorder %s8253_s7, 4 }
  0x47   : > { %248 = sbr.rel (%p7056_p13) target bundleno = 121 (0x79), region = 24 }
  0x4b   : > { %7633 = dma.hbm_to_vmem [thread:$0]  (!%p7631_p10), %s13820_s3, 2048, %s236_s10, [#allocation10], %s8256_s17, %s8256_s17, %s8257_s21  }
  0x4c   : > { %s252_s20 = sand.u32 1, %s8233_s26   ;;  %s7059_s18 = sshll.u32 %s8249_s30, 1 }
  0x4d   : > { %s7057_s6 = sshll.u32 %s252_s20, 6  ;;  %s7392_s15 = sshll.u32 %s8245_s29, 4 }
  0x4e   : > { %s263_s5 = sadd.s32 %s7392_s15, %s7059_s18  ;;  %s256_s13 = scalar_lea.vmem [#allocation3], %s7057_s6 }
  0x4f   : > { %s278_s24 = sshll.u32 %s256_s13, 4  ;;  %s7061_s21 = sshll.u32 %s263_s5, 7  ;;  %s279_s24 = int_to_ptr.vmem [resolvable:$true] %s278_s24 }
  0x50   : > { %s7605_s10 = scalar_select %p8391_p3, [#allocation0], [#allocation18] }
  0x51   : > { %s8258_s12 = smov 512   ;;  %s8259_s3 = smov 256  }
  0x52   : > { %7606 = sst [smem:[#allocation15]] (%p8391_p3), %s8258_s12  ;;  %s8260_s26 = smov 2  }
  0x53   : > { %s270_s17 = sld [smem:[%s7605_s10]]   ;;  %s8261_s15 = smov 128  }
  0x54   : > { %7607 = sst [smem:[#allocation15 + $0x1]] (%p8391_p3), %s8259_s3  ;;  %s8262_s18 = smov 8  }
  0x55   : > { %7608 = sst [smem:[#allocation15 + $0x2]] (%p8391_p3), %s8260_s26  ;;  %s253_s29 = scalar_lea.sflag [#allocation4], %s252_s20 }
  0x56   : > { %7609 = sst [smem:[#allocation15 + $0x3]] (%p8391_p3), %s8261_s15  ;;  %s8263_s3 = smov 131072  }
  0x57   : > { %s13821_s0 = sld [smem:[#allocation152_spill]]  ;;  %s301_s26 = sand.u32 1, %s8253_s7  }
  0x58   : > { %7610 = sst [smem:[#allocation15 + $0x4]] (%p8391_p3), %s8261_s15  ;;  %s303_s28 = sand.u32 1, %s8221_s23  }
  0x59   : > { %7611 = sst [smem:[#allocation15 + $0x5]] (%p8391_p3), %s8262_s18  ;;  %s7062_s10 = sshll.u32 %s270_s17, 26 }
  0x5a   : > { %s7063_s12 = sadd.s32 134217728, %s7062_s10  ;;  %s7064_s4 = sshll.u32 %s303_s28, 4 }
  0x5b   : > { %s7393_s6 = sshll.u32 %s8249_s30, 8  ;;  %s7067_s17 = sshll.u32 %s303_s28, 9 }
  0x5c   : > { %s311_s15 = scalar_lea.hbm %s13425_s1, %s7393_s6  ;;  %s8511_s20 = scalar_lea.sflag [#allocation7], %s301_s26 }
  0x5d   : > { %s265_s5 = scalar_lea.hbm %s13821_s0, %s7061_s21  ;;  %s305_s0 = scalar_lea.vmem [#allocation6], %s7064_s4 }
  0x5e   : > { %7612 = dma.general (%p8391_p3), %s265_s5, 1024, %s279_s24, %s253_s29, %s8263_s3, [#allocation15], %s7063_s12, 0  }
  0x5f   : > { %s312_s18 = sshll.u32 %s305_s0, 4  ;;  %p13822_p6 = scmp.ne.s32.totalorder %s13805_s19, 0  ;;  %s313_s18 = int_to_ptr.vmem [resolvable:$true] %s312_s18 }
  0x60   : > { %s8081_s14 = scalar_lea.vmem %s313_s18, 256  ;;  %s8264_s29 = smov [#allocation6]  }
  0x61   : > { %p8082_p3 = scmp.ne.s32.totalorder %s313_s18, %s8081_s14  ;;  %s8085_s24 = sshll.u32 %s8264_s29, 4  ;;  %s8086_s24 = int_to_ptr.vmem [resolvable:$false] %s8085_s24 }
  0x62   : > { %s8087_s5 = scalar_lea.vmem %s8086_s24, 512  ;;  %p8088_p2 = scmp.lt.s32.totalorder %s313_s18, %s8086_s24 }
  0x63   : > { %p8083_p7 = pnand %p8082_p3, %p13822_p6  ;;  %p8089_p11 = scmp.lt.s32.totalorder %s8087_s5, %s8081_s14 }
  0x65   : > { %p8084_p12 = pneg %p8083_p7  ;;  %p8090_p8 = por %p8089_p11, %p8088_p2 }
  0x67   : > { %p8091_p0 = pnand %p8090_p8, %p8084_p12 }
  0x69   : > { %8094 = shalt.err (!%p8091_p0)
}
  0x6a   : > { %s8265_s4 = smov 128   ;;  %s8266_s0 = smov 8  }
  0x6b   : > { %7613 = dma.hbm_to_vmem [thread:$0]  (%p13822_p6), %s311_s15, 256, %s313_s18, %s8511_s20, %s8265_s4, %s8265_s4, %s8266_s0  }
  0x6c   : > { %s7395_s28 = sshll.u32 %s8249_s30, 13  ;;  %s326_s26 = scalar_lea.vmem [#allocation8], %s7067_s17 }
  0x6d   : > { %s333_s3 = scalar_lea.hbm %s13426_s2, %s7395_s28  ;;  %s334_s6 = sshll.u32 %s326_s26, 4  ;;  %s335_s6 = int_to_ptr.vmem [resolvable:$true] %s334_s6 }
  0x6e   : > { %s8107_s21 = scalar_lea.vmem %s335_s6, 8192  ;;  %s8267_s13 = smov [#allocation8]  }
  0x6f   : > { %p8108_p10 = scmp.ne.s32.totalorder %s335_s6, %s8107_s21  ;;  %s8111_s14 = sshll.u32 %s8267_s13, 4  ;;  %s8112_s14 = int_to_ptr.vmem [resolvable:$false] %s8111_s14 }
  0x70   : > { %s8113_s29 = scalar_lea.vmem %s8112_s14, 16384  ;;  %p8114_p5 = scmp.lt.s32.totalorder %s335_s6, %s8112_s14 }
  0x71   : > { %p8109_p9 = pnand %p8108_p10, %p13822_p6  ;;  %p8115_p13 = scmp.lt.s32.totalorder %s8113_s29, %s8107_s21 }
  0x73   : > { %p8110_p4 = pneg %p8109_p9  ;;  %p8116_p3 = por %p8115_p13, %p8114_p5 }
  0x75   : > { %p8117_p7 = pnand %p8116_p3, %p8110_p4 }
  0x77   : > { %8120 = shalt.err (!%p8117_p7)
}
  0x78   : > { %7614 = dma.hbm_to_vmem [thread:$0]  (%p13822_p6), %s333_s3, 8192, %s335_s6, %s8511_s20, %s8265_s4, %s8265_s4, %s8266_s0  }
  0x79 PF: > { %346 = sbr.rel (%p8471_p1) target bundleno = 2592 (0xa20), region = 40 }
  0x7e   : > { %s8530_s15 = sand.u32 1, %s8229_s25   ;;  %p13823_p12 = scmp.ne.s32.totalorder %s13804_s16, 0 }
  0x7f   : > { %s7072_s18 = sshll.u32 %s8530_s15, 6  ;;  %s349_s17 = scalar_lea.sflag [#allocation4], %s8530_s15 }
  0x80   : > { %s8534_s24 = scalar_lea.vmem [#allocation3], %s7072_s18 }
  0x81   : > { %8192 = dma.done.wait (%p13823_p12), %s349_s17, 1024  }
  0x82   : > { %8194 = vsyncadd (%p13823_p12), %s349_s17, 4294966272  ;;  %s357_s19 = sand.u32 1, %s8372_s8   ;;  %s8542_s9 = sand.u32 1, %s8217_s22  }
  0x83   : > { %s7073_s20 = sshll.u32 %s8542_s9, 4  ;;  %s358_s5 = scalar_lea.sflag [#allocation7], %s357_s19 }
  0x84   : > { %s361_s4 = scalar_lea.vmem [#allocation6], %s7073_s20  ;;  %p13824_p1 = scmp.ne.s32.totalorder %s13808_s11, 0 }
  0x86   : > { %8196 = dma.done.wait (%p13824_p1), %s358_s5, 8448  }
  0x87   : > { %8198 = vsyncadd (%p13824_p1), %s358_s5, 4294958848  ;;  %s7074_s0 = sshll.u32 %s8542_s9, 9  ;;  %p13825_p6 = scmp.eq.s32.totalorder %s8372_s8, 0 }
  0x88   : > { %s8550_s16 = scalar_lea.vmem [#allocation8], %s7074_s0 }
  0x89   : > { %8200 = dma.done.wait (%p13825_p6), [#allocation10], 2048   ;;  %p13826_p2 = pmov %p13825_p6 }
  0x8a   : > { %s8556_s28 = scalar_lea.vmem [#allocation11], %s7072_s18  ;;  %s8558_s10 = scalar_lea.vmem [#allocation12], %s7074_s0 }
  0x8b   : > { %8202 = vsyncadd (%p13826_p2), [#allocation10], 4294965248  ;;  %p7078_p11 = scmp.ne.s32.totalorder %s8237_s27, 0 }
  0x8d   : > { %428 = sbr.rel (%p7078_p11) target bundleno = 180 (0xb4), region = 60 }
  0x92   : > { %v429_v0 = vld [vmem:[%s361_s4] sm:$0xff]  ;;  %vm431_vm0 = vcmask 261120   ;;  %v430_v1 = vld [vmem:[%s361_s4 + $0x8] sm:$0xff] }
  0x93   : > { %v434_v2 = vld [vmem:[%s8550_s16] sm:$0xff]  ;;  %432 = vst.msk [vmem:[#allocation2] sm:$0xff] %vm431_vm0, %v429_v0  ;;  %433 = vst.msk [vmem:[#allocation2 + $0x8] sm:$0xff] %vm431_vm0, %v430_v1  ;;  %v435_v3 = vld [vmem:[%s8550_s16 + $0x8] sm:$0xff] }
  0x94   : > { %498 = vst.msk [vmem:[%s8558_s10] sm:$0xff] %vm431_vm0, %v434_v2  ;;  %v436_v4 = vld [vmem:[%s8550_s16 + $0x10] sm:$0xff]  ;;  %v437_v5 = vld [vmem:[%s8550_s16 + $0x18] sm:$0xff]  ;;  %499 = vst.msk [vmem:[%s8558_s10 + $0x8] sm:$0xff] %vm431_vm0, %v435_v3 }
  0x95   : > { %500 = vst.msk [vmem:[%s8558_s10 + $0x10] sm:$0xff] %vm431_vm0, %v436_v4  ;;  %501 = vst.msk [vmem:[%s8558_s10 + $0x18] sm:$0xff] %vm431_vm0, %v437_v5  ;;  %v438_v6 = vld [vmem:[%s8550_s16 + $0x20] sm:$0xff]  ;;  %v439_v7 = vld [vmem:[%s8550_s16 + $0x28] sm:$0xff] }
  0x96   : > { %v440_v8 = vld [vmem:[%s8550_s16 + $0x30] sm:$0xff]  ;;  %502 = vst.msk [vmem:[%s8558_s10 + $0x20] sm:$0xff] %vm431_vm0, %v438_v6  ;;  %503 = vst.msk [vmem:[%s8558_s10 + $0x28] sm:$0xff] %vm431_vm0, %v439_v7  ;;  %v441_v9 = vld [vmem:[%s8550_s16 + $0x38] sm:$0xff] }
  0x97   : > { %504 = vst.msk [vmem:[%s8558_s10 + $0x30] sm:$0xff] %vm431_vm0, %v440_v8  ;;  %v442_v10 = vld [vmem:[%s8550_s16 + $0x40] sm:$0xff]  ;;  %v443_v11 = vld [vmem:[%s8550_s16 + $0x48] sm:$0xff]  ;;  %505 = vst.msk [vmem:[%s8558_s10 + $0x38] sm:$0xff] %vm431_vm0, %v441_v9 }
  0x98   : > { %506 = vst.msk [vmem:[%s8558_s10 + $0x40] sm:$0xff] %vm431_vm0, %v442_v10  ;;  %507 = vst.msk [vmem:[%s8558_s10 + $0x48] sm:$0xff] %vm431_vm0, %v443_v11  ;;  %v444_v12 = vld [vmem:[%s8550_s16 + $0x50] sm:$0xff]  ;;  %v445_v13 = vld [vmem:[%s8550_s16 + $0x58] sm:$0xff] }
  0x99   : > { %v446_v14 = vld [vmem:[%s8550_s16 + $0x60] sm:$0xff]  ;;  %508 = vst.msk [vmem:[%s8558_s10 + $0x50] sm:$0xff] %vm431_vm0, %v444_v12  ;;  %509 = vst.msk [vmem:[%s8558_s10 + $0x58] sm:$0xff] %vm431_vm0, %v445_v13  ;;  %v447_v15 = vld [vmem:[%s8550_s16 + $0x68] sm:$0xff] }
  0x9a   : > { %510 = vst.msk [vmem:[%s8558_s10 + $0x60] sm:$0xff] %vm431_vm0, %v446_v14  ;;  %v448_v16 = vld [vmem:[%s8550_s16 + $0x70] sm:$0xff]  ;;  %v449_v17 = vld [vmem:[%s8550_s16 + $0x78] sm:$0xff]  ;;  %511 = vst.msk [vmem:[%s8558_s10 + $0x68] sm:$0xff] %vm431_vm0, %v447_v15 }
  0x9b   : > { %512 = vst.msk [vmem:[%s8558_s10 + $0x70] sm:$0xff] %vm431_vm0, %v448_v16  ;;  %513 = vst.msk [vmem:[%s8558_s10 + $0x78] sm:$0xff] %vm431_vm0, %v449_v17  ;;  %v450_v18 = vld [vmem:[%s8550_s16 + $0x80] sm:$0xff]  ;;  %v451_v19 = vld [vmem:[%s8550_s16 + $0x88] sm:$0xff] }
  0x9c   : > { %v452_v20 = vld [vmem:[%s8550_s16 + $0x90] sm:$0xff]  ;;  %514 = vst.msk [vmem:[%s8558_s10 + $0x80] sm:$0xff] %vm431_vm0, %v450_v18  ;;  %515 = vst.msk [vmem:[%s8558_s10 + $0x88] sm:$0xff] %vm431_vm0, %v451_v19  ;;  %v453_v21 = vld [vmem:[%s8550_s16 + $0x98] sm:$0xff] }
  0x9d   : > { %516 = vst.msk [vmem:[%s8558_s10 + $0x90] sm:$0xff] %vm431_vm0, %v452_v20  ;;  %v454_v22 = vld [vmem:[%s8550_s16 + $0xa0] sm:$0xff]  ;;  %v455_v23 = vld [vmem:[%s8550_s16 + $0xa8] sm:$0xff]  ;;  %517 = vst.msk [vmem:[%s8558_s10 + $0x98] sm:$0xff] %vm431_vm0, %v453_v21 }
  0x9e   : > { %518 = vst.msk [vmem:[%s8558_s10 + $0xa0] sm:$0xff] %vm431_vm0, %v454_v22  ;;  %519 = vst.msk [vmem:[%s8558_s10 + $0xa8] sm:$0xff] %vm431_vm0, %v455_v23  ;;  %v456_v24 = vld [vmem:[%s8550_s16 + $0xb0] sm:$0xff]  ;;  %v457_v25 = vld [vmem:[%s8550_s16 + $0xb8] sm:$0xff] }
  0x9f   : > { %v458_v26 = vld [vmem:[%s8550_s16 + $0xc0] sm:$0xff]  ;;  %520 = vst.msk [vmem:[%s8558_s10 + $0xb0] sm:$0xff] %vm431_vm0, %v456_v24  ;;  %521 = vst.msk [vmem:[%s8558_s10 + $0xb8] sm:$0xff] %vm431_vm0, %v457_v25  ;;  %v459_v27 = vld [vmem:[%s8550_s16 + $0xc8] sm:$0xff] }
  0xa0   : > { %522 = vst.msk [vmem:[%s8558_s10 + $0xc0] sm:$0xff] %vm431_vm0, %v458_v26  ;;  %v460_v28 = vld [vmem:[%s8550_s16 + $0xd0] sm:$0xff]  ;;  %v461_v29 = vld [vmem:[%s8550_s16 + $0xd8] sm:$0xff]  ;;  %523 = vst.msk [vmem:[%s8558_s10 + $0xc8] sm:$0xff] %vm431_vm0, %v459_v27 }
  0xa1   : > { %524 = vst.msk [vmem:[%s8558_s10 + $0xd0] sm:$0xff] %vm431_vm0, %v460_v28  ;;  %525 = vst.msk [vmem:[%s8558_s10 + $0xd8] sm:$0xff] %vm431_vm0, %v461_v29  ;;  %v462_v30 = vld [vmem:[%s8550_s16 + $0xe0] sm:$0xff]  ;;  %v463_v31 = vld [vmem:[%s8550_s16 + $0xe8] sm:$0xff] }
  0xa2   : > { %v464_v32 = vld [vmem:[%s8550_s16 + $0xf0] sm:$0xff]  ;;  %526 = vst.msk [vmem:[%s8558_s10 + $0xe0] sm:$0xff] %vm431_vm0, %v462_v30  ;;  %527 = vst.msk [vmem:[%s8558_s10 + $0xe8] sm:$0xff] %vm431_vm0, %v463_v31  ;;  %v465_v33 = vld [vmem:[%s8550_s16 + $0xf8] sm:$0xff] }
  0xa3   : > { %528 = vst.msk [vmem:[%s8558_s10 + $0xf0] sm:$0xff] %vm431_vm0, %v464_v32  ;;  %v466_v34 = vld [vmem:[%s8550_s16 + $0x100] sm:$0xff]  ;;  %v467_v35 = vld [vmem:[%s8550_s16 + $0x108] sm:$0xff]  ;;  %529 = vst.msk [vmem:[%s8558_s10 + $0xf8] sm:$0xff] %vm431_vm0, %v465_v33 }
  0xa4   : > { %530 = vst.msk [vmem:[%s8558_s10 + $0x100] sm:$0xff] %vm431_vm0, %v466_v34  ;;  %531 = vst.msk [vmem:[%s8558_s10 + $0x108] sm:$0xff] %vm431_vm0, %v467_v35  ;;  %v468_v36 = vld [vmem:[%s8550_s16 + $0x110] sm:$0xff]  ;;  %v469_v37 = vld [vmem:[%s8550_s16 + $0x118] sm:$0xff] }
  0xa5   : > { %v470_v38 = vld [vmem:[%s8550_s16 + $0x120] sm:$0xff]  ;;  %532 = vst.msk [vmem:[%s8558_s10 + $0x110] sm:$0xff] %vm431_vm0, %v468_v36  ;;  %533 = vst.msk [vmem:[%s8558_s10 + $0x118] sm:$0xff] %vm431_vm0, %v469_v37  ;;  %v471_v39 = vld [vmem:[%s8550_s16 + $0x128] sm:$0xff] }
  0xa6   : > { %534 = vst.msk [vmem:[%s8558_s10 + $0x120] sm:$0xff] %vm431_vm0, %v470_v38  ;;  %v472_v40 = vld [vmem:[%s8550_s16 + $0x130] sm:$0xff]  ;;  %v473_v41 = vld [vmem:[%s8550_s16 + $0x138] sm:$0xff]  ;;  %535 = vst.msk [vmem:[%s8558_s10 + $0x128] sm:$0xff] %vm431_vm0, %v471_v39 }
  0xa7   : > { %536 = vst.msk [vmem:[%s8558_s10 + $0x130] sm:$0xff] %vm431_vm0, %v472_v40  ;;  %537 = vst.msk [vmem:[%s8558_s10 + $0x138] sm:$0xff] %vm431_vm0, %v473_v41  ;;  %v474_v42 = vld [vmem:[%s8550_s16 + $0x140] sm:$0xff]  ;;  %v475_v43 = vld [vmem:[%s8550_s16 + $0x148] sm:$0xff] }
  0xa8   : > { %v476_v44 = vld [vmem:[%s8550_s16 + $0x150] sm:$0xff]  ;;  %538 = vst.msk [vmem:[%s8558_s10 + $0x140] sm:$0xff] %vm431_vm0, %v474_v42  ;;  %539 = vst.msk [vmem:[%s8558_s10 + $0x148] sm:$0xff] %vm431_vm0, %v475_v43  ;;  %v477_v45 = vld [vmem:[%s8550_s16 + $0x158] sm:$0xff] }
  0xa9   : > { %540 = vst.msk [vmem:[%s8558_s10 + $0x150] sm:$0xff] %vm431_vm0, %v476_v44  ;;  %v478_v46 = vld [vmem:[%s8550_s16 + $0x160] sm:$0xff]  ;;  %v479_v47 = vld [vmem:[%s8550_s16 + $0x168] sm:$0xff]  ;;  %541 = vst.msk [vmem:[%s8558_s10 + $0x158] sm:$0xff] %vm431_vm0, %v477_v45 }
  0xaa   : > { %542 = vst.msk [vmem:[%s8558_s10 + $0x160] sm:$0xff] %vm431_vm0, %v478_v46  ;;  %543 = vst.msk [vmem:[%s8558_s10 + $0x168] sm:$0xff] %vm431_vm0, %v479_v47  ;;  %v480_v48 = vld [vmem:[%s8550_s16 + $0x170] sm:$0xff]  ;;  %v481_v49 = vld [vmem:[%s8550_s16 + $0x178] sm:$0xff] }
  0xab   : > { %v482_v50 = vld [vmem:[%s8550_s16 + $0x180] sm:$0xff]  ;;  %544 = vst.msk [vmem:[%s8558_s10 + $0x170] sm:$0xff] %vm431_vm0, %v480_v48  ;;  %545 = vst.msk [vmem:[%s8558_s10 + $0x178] sm:$0xff] %vm431_vm0, %v481_v49  ;;  %v483_v51 = vld [vmem:[%s8550_s16 + $0x188] sm:$0xff] }
  0xac   : > { %546 = vst.msk [vmem:[%s8558_s10 + $0x180] sm:$0xff] %vm431_vm0, %v482_v50  ;;  %v484_v52 = vld [vmem:[%s8550_s16 + $0x190] sm:$0xff]  ;;  %v485_v53 = vld [vmem:[%s8550_s16 + $0x198] sm:$0xff]  ;;  %547 = vst.msk [vmem:[%s8558_s10 + $0x188] sm:$0xff] %vm431_vm0, %v483_v51 }
  0xad   : > { %548 = vst.msk [vmem:[%s8558_s10 + $0x190] sm:$0xff] %vm431_vm0, %v484_v52  ;;  %549 = vst.msk [vmem:[%s8558_s10 + $0x198] sm:$0xff] %vm431_vm0, %v485_v53  ;;  %v486_v54 = vld [vmem:[%s8550_s16 + $0x1a0] sm:$0xff]  ;;  %v487_v55 = vld [vmem:[%s8550_s16 + $0x1a8] sm:$0xff] }
  0xae   : > { %v488_v56 = vld [vmem:[%s8550_s16 + $0x1b0] sm:$0xff]  ;;  %550 = vst.msk [vmem:[%s8558_s10 + $0x1a0] sm:$0xff] %vm431_vm0, %v486_v54  ;;  %551 = vst.msk [vmem:[%s8558_s10 + $0x1a8] sm:$0xff] %vm431_vm0, %v487_v55  ;;  %v489_v57 = vld [vmem:[%s8550_s16 + $0x1b8] sm:$0xff] }
  0xaf   : > { %552 = vst.msk [vmem:[%s8558_s10 + $0x1b0] sm:$0xff] %vm431_vm0, %v488_v56  ;;  %v490_v58 = vld [vmem:[%s8550_s16 + $0x1c0] sm:$0xff]  ;;  %v491_v59 = vld [vmem:[%s8550_s16 + $0x1c8] sm:$0xff]  ;;  %553 = vst.msk [vmem:[%s8558_s10 + $0x1b8] sm:$0xff] %vm431_vm0, %v489_v57 }
  0xb0   : > { %554 = vst.msk [vmem:[%s8558_s10 + $0x1c0] sm:$0xff] %vm431_vm0, %v490_v58  ;;  %555 = vst.msk [vmem:[%s8558_s10 + $0x1c8] sm:$0xff] %vm431_vm0, %v491_v59  ;;  %v492_v60 = vld [vmem:[%s8550_s16 + $0x1d0] sm:$0xff]  ;;  %v493_v61 = vld [vmem:[%s8550_s16 + $0x1d8] sm:$0xff] }
  0xb1   : > { %v494_v62 = vld [vmem:[%s8550_s16 + $0x1e0] sm:$0xff]  ;;  %556 = vst.msk [vmem:[%s8558_s10 + $0x1d0] sm:$0xff] %vm431_vm0, %v492_v60  ;;  %557 = vst.msk [vmem:[%s8558_s10 + $0x1d8] sm:$0xff] %vm431_vm0, %v493_v61  ;;  %v495_v63 = vld [vmem:[%s8550_s16 + $0x1e8] sm:$0xff] }
  0xb2   : > { %558 = vst.msk [vmem:[%s8558_s10 + $0x1e0] sm:$0xff] %vm431_vm0, %v494_v62  ;;  %v496_v0 = vld [vmem:[%s8550_s16 + $0x1f0] sm:$0xff]  ;;  %v497_v1 = vld [vmem:[%s8550_s16 + $0x1f8] sm:$0xff]  ;;  %559 = vst.msk [vmem:[%s8558_s10 + $0x1e8] sm:$0xff] %vm431_vm0, %v495_v63 }
  0xb3   : > { %560 = vst.msk [vmem:[%s8558_s10 + $0x1f0] sm:$0xff] %vm431_vm0, %v496_v0  ;;  %561 = vst.msk [vmem:[%s8558_s10 + $0x1f8] sm:$0xff] %vm431_vm0, %v497_v1 }
  0xb4 PF: > { %v13453_v2 = vlaneseq  ;;  %v8755_v3 = vld [vmem:[#allocation2] sm:$0xff]  ;;  %v1409_v4 = vld [vmem:[#allocation9 + $0x18] sm:$0xff]  ;;  %vm1077_vm1 = vcmask 261120   ;;  %v1407_v9 = vld [vmem:[#allocation9 + $0x8] sm:$0xff]  ;;  %vm1302_vm2 = vcmask 1041409   ;;  %vm1304_vm3 = vcmask 1042434  }
  0xb5   : > { %7482 = vmatprep.subr.mxu1 %v1409_v4  ;;  %v566_v5 = vld [vmem:[#allocation9 + $0x58] sm:$0xff]  ;;  %v565_v6 = vld [vmem:[#allocation9 + $0x50] sm:$0xff]  ;;  %7479 = vmatprep.mubr.msk.f32.mxu0 %vm1077_vm1, %v8755_v3  ;;  %v564_v10 = vld [vmem:[#allocation9 + $0x48] sm:$0xff]  ;;  %vm1306_vm4 = vcmask 1043459   ;;  %vm1308_vm5 = vcmask 1044484   ;;  %vm1310_vm6 = vcmask 1045509  }
  0xb6   : > { %v1408_v7 = vld [vmem:[#allocation9 + $0x10] sm:$0xff]  ;;  %v8760_v8 = vshrl.u32 %v13453_v2, 7  ;;  %7471 = vmatprep.subr.mxu0 %v566_v5  ;;  %7483 = vmatpush3.msra.mxu1 %v1409_v4  ;;  %v563_v15 = vld [vmem:[#allocation9 + $0x40] sm:$0xff]  ;;  %v580_v19 = vld [vmem:[%s8534_s24 + $0x8] sm:$0xff]  ;;  %vm1312_vm7 = vcmask 1046534   ;;  %vm1314_vm8 = vcmask 1047559  }
  0xb7   : > { %7472 = vmatpush3.msra.mxu0 %v566_v5  ;;  %7484 = vmatprep.subr.mxu1 %v1408_v7  ;;  %v1406_v16 = vld [vmem:[#allocation9] sm:$0xff]  ;;  %v8780_v21 = vld [vmem:[#allocation2 + $0x8] sm:$0xff]  ;;  %v1503_v53 = vld [vmem:[#allocation9 + $0x30] sm:$0xff]  ;;  %s13897_s12 = sld [smem:[#allocation154_spill]]  ;;  %s8270_s29 = smov 32   ;;  %vm2149_vm10 = vcmask 523264  }
  0xb8   : > { %v8763_v11 = vsub.s32 1, %v8760_v8  ;;  %v8766_v12 = vsub.s32 0, %v8760_v8  ;;  %7473 = vmatprep.subr.mxu0 %v565_v6  ;;  %7485 = vmatpush3.msra.mxu1 %v1408_v7  ;;  %v8773_v17 = vsub.s32 2, %v8760_v8  ;;  %v579_v18 = vld [vmem:[%s8534_s24] sm:$0xff]  ;;  %v8790_v24 = vsub.s32 3, %v8760_v8  ;;  %v1504_v52 = vld [vmem:[#allocation9 + $0x38] sm:$0xff] }
  0xb9   : > { %7474 = vmatpush3.msra.mxu0 %v565_v6  ;;  %7486 = vmatprep.subr.mxu1 %v1407_v9  ;;  %v8797_v27 = vsub.s32 4, %v8760_v8  ;;  %v8804_v30 = vsub.s32 5, %v8760_v8  ;;  %v8811_v33 = vsub.s32 6, %v8760_v8  ;;  %v8818_v36 = vsub.s32 7, %v8760_v8  ;;  %v1502_v60 = vld [vmem:[#allocation9 + $0x28] sm:$0xff]  ;;  %v1501_v61 = vld [vmem:[#allocation9 + $0x20] sm:$0xff] }
  0xba   : > { %13827 = vst [vmem:[#allocation37_spill] sm:$0xff] %v8763_v11  ;;  %v667_v13 = vrot.slane %v8755_v3, %v8763_v11  ;;  %v648_v14 = vrot.slane %v8755_v3, %v8766_v12  ;;  %7475 = vmatprep.subr.mxu0 %v564_v10  ;;  %13828 = vst [vmem:[#allocation38_spill] sm:$0xff] %v8773_v17  ;;  %7487 = vmatpush3.msra.mxu1 %v1407_v9  ;;  %s6816_s0 = scalar_lea.sflag [#allocation5], %s8530_s15  ;;  %s6821_s16 = scalar_lea.sflag [#allocation13], %s8542_s9 }
  0xbb   : > { %7476 = vmatpush3.msra.mxu0 %v564_v10  ;;  %7488 = vmatprep.subr.mxu1 %v1406_v16  ;;  %v686_v20 = vrot.slane %v8755_v3, %v8773_v17  ;;  %v800_v22 = vrot.slane %v8780_v21, %v8766_v12  ;;  %v819_v23 = vrot.slane %v8780_v21, %v8763_v11 }
  0xbc   : > { %669 = vbcast.lane.b32.xlu1 %v667_v13, 256  ;;  %650 = vbcast.lane.b32.xlu0 %v648_v14, 256  ;;  %13829 = vst [vmem:[#allocation39_spill] sm:$0xff] %v8790_v24  ;;  %v705_v25 = vrot.slane %v8755_v3, %v8790_v24  ;;  %v838_v26 = vrot.slane %v8780_v21, %v8773_v17  ;;  %13830 = vst [vmem:[#allocation40_spill] sm:$0xff] %v8797_v27 }
  0xbd   : > { %7477 = vmatprep.subr.mxu0 %v563_v15  ;;  %7489 = vmatpush3.msra.mxu1 %v1406_v16  ;;  %v724_v28 = vrot.slane %v8755_v3, %v8797_v27  ;;  %v857_v29 = vrot.slane %v8780_v21, %v8790_v24  ;;  %13831 = vst [vmem:[#allocation41_spill] sm:$0xff] %v8804_v30  ;;  %13832 = vst [vmem:[#allocation42_spill] sm:$0xff] %v8811_v33  ;;  %v583_v16 = vld [vmem:[%s8558_s10 + $0x10] sm:$0xff] }
  0xbe   : > { %7478 = vmatpush3.msra.mxu0 %v563_v15  ;;  %7490 = vmatprep.mubr.msk.f32.mxu1 %vm1077_vm1, %v579_v18  ;;  %v743_v31 = vrot.slane %v8755_v3, %v8804_v30  ;;  %v876_v32 = vrot.slane %v8780_v21, %v8797_v27  ;;  %v762_v34 = vrot.slane %v8755_v3, %v8811_v33  ;;  %v8885_v18 = vld [vmem:[#allocation9 + $0x68] sm:$0xff] }
  0xbf   : > { %7491 = vmatmul.mubr.msk.f32.vlgmr.msra.gmra.mxu1 %vm1077_vm1, %v580_v19  ;;  %7480 = vmatmul.mubr.msk.f32.vlgmr.msra.gmra.mxu0 %vm1077_vm1, %v8780_v21  ;;  %v895_v35 = vrot.slane %v8780_v21, %v8804_v30  ;;  %13833 = vst [vmem:[#allocation43_spill] sm:$0xff] %v8818_v36  ;;  %v781_v37 = vrot.slane %v8755_v3, %v8818_v36  ;;  %v590_v19 = vld [vmem:[%s8558_s10 + $0x48] sm:$0xff] }
  0xc0   : > { %673 = vbcast.lane.b32.xlu1 %v667_v13, 264  ;;  %654 = vbcast.lane.b32.xlu0 %v648_v14, 264  ;;  %v914_v38 = vrot.slane %v8780_v21, %v8811_v33  ;;  %v933_v39 = vrot.slane %v8780_v21, %v8818_v36 }
  0xc1   : > { %7504 = vmatprep.subr.mxu1 %v566_v5  ;;  %7493 = vmatprep.subr.mxu0 %v1504_v52 }
  0xc2   : > { %7505 = vmatpush3.msra.mxu1 %v566_v5  ;;  %7494 = vmatpush3.msra.mxu0 %v1504_v52  ;;  %v586_v5 = vld [vmem:[%s8558_s10 + $0x28] sm:$0xff]  ;;  %v8906_v52 = vld [vmem:[#allocation9 + $0x70] sm:$0xff] }
  0xc3   : > { %7506 = vmatprep.subr.mxu1 %v565_v6  ;;  %7495 = vmatprep.subr.mxu0 %v1503_v53 }
  0xc4   : > { %692 = vbcast.lane.b32.xlu1 %v686_v20, 264  ;;  %688 = vbcast.lane.b32.xlu0 %v686_v20, 256 }
  0xc5   : > { %7507 = vmatpush3.msra.mxu1 %v565_v6  ;;  %7496 = vmatpush3.msra.mxu0 %v1503_v53  ;;  %v582_v6 = vld [vmem:[%s8558_s10 + $0x8] sm:$0xff] }
  0xc6   : > { %7508 = vmatprep.subr.mxu1 %v564_v10  ;;  %7497 = vmatprep.subr.mxu0 %v1502_v60 }
  0xc7   : > { %7509 = vmatpush3.msra.mxu1 %v564_v10  ;;  %7498 = vmatpush3.msra.mxu0 %v1502_v60  ;;  %v585_v10 = vld [vmem:[%s8558_s10 + $0x20] sm:$0xff] }
  0xc8   : > { %806 = vbcast.lane.b32.xlu1 %v800_v22, 264  ;;  %802 = vbcast.lane.b32.xlu0 %v800_v22, 256 }
  0xc9   : > { %7510 = vmatprep.subr.mxu1 %v563_v15  ;;  %7499 = vmatprep.subr.mxu0 %v1501_v61 }
  0xca   : > { %7511 = vmatpush3.msra.mxu1 %v563_v15  ;;  %7500 = vmatpush3.msra.mxu0 %v1501_v61 }
  0xcc   : > { %825 = vbcast.lane.b32.xlu1 %v819_v23, 264  ;;  %821 = vbcast.lane.b32.xlu0 %v819_v23, 256 }
  0xd0   : > { %677 = vbcast.lane.b32.xlu1 %v667_v13, 272  ;;  %658 = vbcast.lane.b32.xlu0 %v648_v14, 272 }
  0xd4   : > { %711 = vbcast.lane.b32.xlu1 %v705_v25, 264  ;;  %707 = vbcast.lane.b32.xlu0 %v705_v25, 256 }
  0xd8   : > { %844 = vbcast.lane.b32.xlu1 %v838_v26, 264  ;;  %840 = vbcast.lane.b32.xlu0 %v838_v26, 256 }
  0xdc   : > { %726 = vbcast.lane.b32.xlu1 %v724_v28, 256  ;;  %696 = vbcast.lane.b32.xlu0 %v686_v20, 272 }
  0xe0   : > { %810 = vbcast.lane.b32.xlu1 %v800_v22, 272  ;;  %730 = vbcast.lane.b32.xlu0 %v724_v28, 264 }
  0xe4   : > { %859 = vbcast.lane.b32.xlu1 %v857_v29, 256  ;;  %829 = vbcast.lane.b32.xlu0 %v819_v23, 272 }
  0xe8   : > { %662 = vbcast.lane.b32.xlu1 %v648_v14, 280  ;;  %863 = vbcast.lane.b32.xlu0 %v857_v29, 264 }
  0xec   : > { %715 = vbcast.lane.b32.xlu1 %v705_v25, 272  ;;  %681 = vbcast.lane.b32.xlu0 %v667_v13, 280  ;;  %v581_v13 = vld [vmem:[%s8558_s10] sm:$0xff] }
  0xf0   : > { %749 = vbcast.lane.b32.xlu1 %v743_v31, 264  ;;  %745 = vbcast.lane.b32.xlu0 %v743_v31, 256 }
  0xf4   : > { %878 = vbcast.lane.b32.xlu1 %v876_v32, 256  ;;  %848 = vbcast.lane.b32.xlu0 %v838_v26, 272 }
  0xf8   : > { %700 = vbcast.lane.b32.xlu1 %v686_v20, 280  ;;  %882 = vbcast.lane.b32.xlu0 %v876_v32, 264  ;;  %v587_v20 = vld [vmem:[%s8558_s10 + $0x30] sm:$0xff] }
  0xfc   : > { %764 = vbcast.lane.b32.xlu1 %v762_v34, 256  ;;  %734 = vbcast.lane.b32.xlu0 %v724_v28, 272 }
 0x100   : > { %814 = vbcast.lane.b32.xlu1 %v800_v22, 280  ;;  %768 = vbcast.lane.b32.xlu0 %v762_v34, 264 }
 0x104   : > { %867 = vbcast.lane.b32.xlu1 %v857_v29, 272  ;;  %833 = vbcast.lane.b32.xlu0 %v819_v23, 280 }
 0x108   : > { %901 = vbcast.lane.b32.xlu1 %v895_v35, 264  ;;  %897 = vbcast.lane.b32.xlu0 %v895_v35, 256 }
 0x10c   : > { %753 = vbcast.lane.b32.xlu1 %v743_v31, 272  ;;  %719 = vbcast.lane.b32.xlu0 %v705_v25, 280  ;;  %v589_v25 = vld [vmem:[%s8558_s10 + $0x40] sm:$0xff] }
 0x110   : > { %787 = vbcast.lane.b32.xlu1 %v781_v37, 264  ;;  %783 = vbcast.lane.b32.xlu0 %v781_v37, 256 }
 0x114   : > { %886 = vbcast.lane.b32.xlu1 %v876_v32, 272  ;;  %852 = vbcast.lane.b32.xlu0 %v838_v26, 280  ;;  %v614_v26 = vld [vmem:[%s8558_s10 + $0x108] sm:$0xff] }
 0x118   : > { %920 = vbcast.lane.b32.xlu1 %v914_v38, 264  ;;  %916 = vbcast.lane.b32.xlu0 %v914_v38, 256 }
 0x11c   : > { %772 = vbcast.lane.b32.xlu1 %v762_v34, 272  ;;  %738 = vbcast.lane.b32.xlu0 %v724_v28, 280  ;;  %v584_v28 = vld [vmem:[%s8558_s10 + $0x18] sm:$0xff] }
 0x120   : > { %905 = vbcast.lane.b32.xlu1 %v895_v35, 272  ;;  %871 = vbcast.lane.b32.xlu0 %v857_v29, 280  ;;  %v8897_v29 = vld [vmem:[#allocation9 + $0x60] sm:$0xff] }
 0x124   : > { %939 = vbcast.lane.b32.xlu1 %v933_v39, 264  ;;  %935 = vbcast.lane.b32.xlu0 %v933_v39, 256 }
 0x128   : > { %791 = vbcast.lane.b32.xlu1 %v781_v37, 272  ;;  %757 = vbcast.lane.b32.xlu0 %v743_v31, 280 }
 0x12c   : > { %924 = vbcast.lane.b32.xlu1 %v914_v38, 272  ;;  %890 = vbcast.lane.b32.xlu0 %v876_v32, 280 }
 0x12e   : > { %v8826_v40 = vpop.permute.xlu1 %669  ;;  %v8828_v41 = vpop.permute.xlu0 %650 }
 0x12f   : > { %13834 = vst [vmem:[#allocation44_spill] sm:$0xff] %v8826_v40  ;;  %13835 = vst [vmem:[#allocation45_spill] sm:$0xff] %v8828_v41  ;;  %v953_v23 = vmul.f32 %v8826_v40, %v585_v10  ;;  %v949_v31 = vmul.f32 %v8828_v41, %v581_v13  ;;  %v598_v41 = vld [vmem:[%s8558_s10 + $0x88] sm:$0xff] }
 0x130   : > { %909 = vbcast.lane.b32.xlu1 %v895_v35, 280  ;;  %776 = vbcast.lane.b32.xlu0 %v762_v34, 280  ;;  %v588_v34 = vld [vmem:[%s8558_s10 + $0x38] sm:$0xff] }
 0x131   : > { %v1017_v13 = vmul.f32 %v953_v23, %v8897_v29 }
 0x132   : > { %v8830_v42 = vpop.permute.xlu1 %673  ;;  %v8832_v43 = vpop.permute.xlu0 %654 }
 0x133   : > { %13836 = vst [vmem:[#allocation46_spill] sm:$0xff] %v8830_v42  ;;  %13837 = vst [vmem:[#allocation47_spill] sm:$0xff] %v8832_v43  ;;  %v954_v14 = vmul.f32 %v8830_v42, %v586_v5  ;;  %v950_v15 = vmul.f32 %v8832_v43, %v582_v6 }
 0x134   : > { %795 = vbcast.lane.b32.xlu1 %v781_v37, 280  ;;  %943 = vbcast.lane.b32.xlu0 %v933_v39, 272 }
 0x135   : > { %v1018_v35 = vmul.f32 %v954_v14, %v8885_v18  ;;  %v1014_v37 = vmul.f32 %v950_v15, %v8885_v18  ;;  %v618_v14 = vld [vmem:[%s8558_s10 + $0x128] sm:$0xff]  ;;  %v8918_v15 = vld [vmem:[#allocation9 + $0x78] sm:$0xff] }
 0x136   : > { %v8834_v44 = vpop.permute.xlu1 %692  ;;  %v8836_v45 = vpop.permute.xlu0 %688 }
 0x137   : > { %13838 = vst [vmem:[#allocation48_spill] sm:$0xff] %v8834_v44  ;;  %13839 = vst [vmem:[#allocation49_spill] sm:$0xff] %v8836_v45  ;;  %v957_v60 = vmul.f32 %v8836_v45, %v589_v25  ;;  %v617_v25 = vld [vmem:[%s8558_s10 + $0x120] sm:$0xff]  ;;  %v1079_v2 = vsel %vm1077_vm1, %v1014_v37, 0.0  ;;  %v1091_v37 = vsel %vm1077_vm1, %v1017_v13, 0.0 }
 0x138   : > { %947 = vbcast.lane.b32.xlu1 %v933_v39, 280  ;;  %928 = vbcast.lane.b32.xlu0 %v914_v38, 280  ;;  %v958_v38 = vmul.f32 %v8834_v44, %v590_v19  ;;  %v613_v39 = vld [vmem:[%s8558_s10 + $0x100] sm:$0xff]  ;;  %v1013_v19 = vmul.f32 %v949_v31, %v8897_v29 }
 0x139   : > { %v1021_v45 = vmul.f32 %v957_v60, %v8897_v29 }
 0x13a   : > { %v8838_v46 = vpop.permute.xlu1 %806  ;;  %v8840_v47 = vpop.permute.xlu0 %802  ;;  %v1022_v44 = vmul.f32 %v958_v38, %v8885_v18  ;;  %v1078_v60 = vsel %vm1077_vm1, %v1013_v19, 0.0 }
 0x13b   : > { %v982_v61 = vmul.f32 %v8838_v46, %v614_v26  ;;  %v1080_v42 = vadd.f32 %v1079_v2, %v1078_v60 }
 0x13c   : > { %v1105_v40 = vsel %vm1077_vm1, %v1022_v44, 0.0 }
 0x13e   : > { %v8842_v48 = vpop.permute.xlu1 %825  ;;  %v8844_v49 = vpop.permute.xlu0 %821 }
 0x13f   : > { %13840 = vst [vmem:[#allocation50_spill] sm:$0xff] %v8842_v48  ;;  %13841 = vst [vmem:[#allocation51_spill] sm:$0xff] %v8844_v49  ;;  %v986_v31 = vmul.f32 %v8842_v48, %v618_v14  ;;  %v985_v38 = vmul.f32 %v8844_v49, %v617_v25  ;;  %v593_v25 = vld [vmem:[%s8558_s10 + $0x60] sm:$0xff]  ;;  %v619_v48 = vld [vmem:[%s8558_s10 + $0x130] sm:$0xff] }
 0x142   : > { %v8846_v50 = vpop.permute.xlu1 %677  ;;  %v8848_v51 = vpop.permute.xlu0 %658 }
 0x143   : > { %13842 = vst [vmem:[#allocation52_spill] sm:$0xff] %v8846_v50  ;;  %13843 = vst [vmem:[#allocation53_spill] sm:$0xff] %v8848_v51  ;;  %v951_v32 = vmul.f32 %v8848_v51, %v583_v16  ;;  %v955_v53 = vmul.f32 %v8846_v50, %v587_v20  ;;  %v981_v20 = vmul.f32 %v8840_v47, %v613_v39  ;;  %v591_v39 = vld [vmem:[%s8558_s10 + $0x50] sm:$0xff] }
 0x145   : > { %v1015_v26 = vmul.f32 %v951_v32, %v8906_v52  ;;  %v1019_v23 = vmul.f32 %v955_v53, %v8906_v52  ;;  %v1045_v14 = vmul.f32 %v981_v20, %v8897_v29  ;;  %v1050_v20 = vmul.f32 %v986_v31, %v8885_v18 }
 0x146   : > { %v8850_v54 = vpop.permute.xlu1 %711  ;;  %v8852_v55 = vpop.permute.xlu0 %707 }
 0x147   : > { %13844 = vst [vmem:[#allocation54_spill] sm:$0xff] %v8850_v54  ;;  %13845 = vst [vmem:[#allocation55_spill] sm:$0xff] %v8852_v55  ;;  %v1081_v50 = vsel %vm1077_vm1, %v1015_v26, 0.0  ;;  %v1094_v13 = vsel %vm1077_vm1, %v1019_v23, 0.0  ;;  %v622_v26 = vld [vmem:[%s8558_s10 + $0x148] sm:$0xff]  ;;  %v1049_v23 = vmul.f32 %v985_v38, %v8897_v29 }
 0x148   : > { %v1082_v60 = vadd.f32 %v1081_v50, %v1080_v42 }
 0x14a   : > { %v8854_v56 = vpop.permute.xlu1 %844  ;;  %v8856_v57 = vpop.permute.xlu0 %840 }
 0x14b   : > { %13846 = vst [vmem:[#allocation56_spill] sm:$0xff] %v8854_v56  ;;  %13847 = vst [vmem:[#allocation57_spill] sm:$0xff] %v8856_v57  ;;  %v990_v49 = vmul.f32 %v8854_v56, %v622_v26 }
 0x14e   : > { %v8858_v58 = vpop.permute.xlu1 %726  ;;  %v8860_v59 = vpop.permute.xlu0 %696 }
 0x14f   : > { %13848 = vst [vmem:[#allocation58_spill] sm:$0xff] %v8858_v58  ;;  %13849 = vst [vmem:[#allocation59_spill] sm:$0xff] %v8860_v59  ;;  %v959_v51 = vmul.f32 %v8860_v59, %v591_v39  ;;  %v615_v39 = vld [vmem:[%s8558_s10 + $0x110] sm:$0xff]  ;;  %v1182_v59 = vsel %vm1077_vm1, %v1045_v14, 0.0 }
 0x151   : > { %v1023_v42 = vmul.f32 %v959_v51, %v8906_v52 }
 0x152   : > { %v8862_v62 = vpop.permute.xlu1 %810  ;;  %v8864_v63 = vpop.permute.xlu0 %730 }
 0x153   : > { %13850 = vst [vmem:[#allocation60_spill] sm:$0xff] %v8864_v63  ;;  %v983_v14 = vmul.f32 %v8862_v62, %v615_v39  ;;  %v966_v26 = vmul.f32 %v8864_v63, %v598_v41  ;;  %v626_v63 = vld [vmem:[%s8558_s10 + $0x168] sm:$0xff] }
 0x156   : > { %v8866_v0 = vpop.permute.xlu1 %859  ;;  %v8868_v1 = vpop.permute.xlu0 %829 }
 0x157   : > { %13851 = vst [vmem:[#allocation61_spill] sm:$0xff] %v8866_v0  ;;  %13852 = vst [vmem:[#allocation62_spill] sm:$0xff] %v8868_v1 }
 0x15a   : > { %v8870_v3 = vpop.permute.xlu1 %662  ;;  %v8872_v4 = vpop.permute.xlu0 %863 }
 0x15b   : > { %13853 = vst [vmem:[#allocation63_spill] sm:$0xff] %v8870_v3  ;;  %13854 = vst [vmem:[#allocation64_spill] sm:$0xff] %v8872_v4  ;;  %v952_v5 = vmul.f32 %v8870_v3, %v584_v28  ;;  %v1092_v28 = vsel %vm1077_vm1, %v1018_v35, 0.0  ;;  %v594_v3 = vld [vmem:[%s8558_s10 + $0x68] sm:$0xff] }
 0x15c   : > { %v962_v43 = vmul.f32 %v8850_v54, %v594_v3  ;;  %v1107_v54 = vsel %vm1077_vm1, %v1023_v42, 0.0  ;;  %v620_v42 = vld [vmem:[%s8558_s10 + $0x138] sm:$0xff] }
 0x15d   : > { %v1016_v32 = vmul.f32 %v952_v5, %v8918_v15  ;;  %v592_v5 = vld [vmem:[%s8558_s10 + $0x58] sm:$0xff] }
 0x15e   : > { %v8876_v7 = vpop.permute.xlu1 %715  ;;  %v8878_v9 = vpop.permute.xlu0 %681 }
 0x15f   : > { %13855 = vst [vmem:[#allocation65_spill] sm:$0xff] %v8876_v7  ;;  %13856 = vst [vmem:[#allocation66_spill] sm:$0xff] %v8878_v9  ;;  %v956_v16 = vmul.f32 %v8878_v9, %v588_v34  ;;  %v1046_v34 = vmul.f32 %v982_v61, %v8885_v18  ;;  %v1093_v61 = vadd.f32 %v1092_v28, %v1091_v37  ;;  %v621_v28 = vld [vmem:[%s8558_s10 + $0x140] sm:$0xff]  ;;  %v1083_v2 = vsel %vm1077_vm1, %v1016_v32, 0.0 }
 0x160   : > { %v961_v32 = vmul.f32 %v8852_v55, %v593_v25  ;;  %v989_v38 = vmul.f32 %v8856_v57, %v621_v28  ;;  %v1084_v50 = vadd.f32 %v1083_v2, %v1082_v60  ;;  %v597_v25 = vld [vmem:[%s8558_s10 + $0x80] sm:$0xff]  ;;  %v987_v28 = vmul.f32 %v8868_v1, %v619_v48  ;;  %v602_v57 = vld [vmem:[%s8558_s10 + $0xa8] sm:$0xff] }
 0x161   : > { %v1020_v53 = vmul.f32 %v956_v16, %v8918_v15  ;;  %v1104_v16 = vsel %vm1077_vm1, %v1021_v45, 0.0  ;;  %v1183_v19 = vsel %vm1077_vm1, %v1046_v34, 0.0  ;;  %v1095_v31 = vadd.f32 %v1094_v13, %v1093_v61 }
 0x162   : > { %v8889_v21 = vpop.permute.xlu1 %749  ;;  %v8891_v22 = vpop.permute.xlu0 %745  ;;  %v1195_v13 = vsel %vm1077_vm1, %v1049_v23, 0.0  ;;  %v1106_v2 = vadd.f32 %v1105_v40, %v1104_v16  ;;  %v1026_v60 = vmul.f32 %v962_v43, %v8885_v18  ;;  %v1025_v39 = vmul.f32 %v961_v32, %v8897_v29  ;;  %v616_v43 = vld [vmem:[%s8558_s10 + $0x118] sm:$0xff] }
 0x163   : > { %13857 = vst [vmem:[#allocation67_spill] sm:$0xff] %v8889_v21  ;;  %13858 = vst [vmem:[#allocation68_spill] sm:$0xff] %v8891_v22  ;;  %v1096_v45 = vsel %vm1077_vm1, %v1020_v53, 0.0  ;;  %v1196_v53 = vsel %vm1077_vm1, %v1050_v20, 0.0  ;;  %v1184_v20 = vadd.f32 %v1183_v19, %v1182_v59  ;;  %v1053_v23 = vmul.f32 %v989_v38, %v8897_v29 }
 0x164   : > { %v1085_v41 = vrot.slane %v1084_v50, 4  ;;  %v1197_v48 = vadd.f32 %v1196_v53, %v1195_v13  ;;  %v965_v55 = vmul.f32 %v8858_v58, %v597_v25  ;;  %v1047_v40 = vmul.f32 %v983_v14, %v8906_v52 }
 0x165   : > { %v1030_v19 = vmul.f32 %v966_v26, %v8885_v18  ;;  %v1051_v32 = vmul.f32 %v987_v28, %v8906_v52  ;;  %v1118_v53 = vsel %vm1077_vm1, %v1026_v60, 0.0  ;;  %v1117_v14 = vsel %vm1077_vm1, %v1025_v39, 0.0  ;;  %v595_v26 = vld [vmem:[%s8558_s10 + $0x70] sm:$0xff] }
 0x166   : > { %v8912_v6 = vpop.permute.xlu1 %878  ;;  %v8914_v10 = vpop.permute.xlu0 %848  ;;  %v1108_v13 = vadd.f32 %v1107_v54, %v1106_v2  ;;  %v994_v25 = vmul.f32 %v8872_v4, %v626_v63  ;;  %v1086_v56 = vadd.f32 %v1085_v41, %v1084_v50  ;;  %v1185_v63 = vsel %vm1077_vm1, %v1047_v40, 0.0  ;;  %v596_v4 = vld [vmem:[%s8558_s10 + $0x78] sm:$0xff] }
 0x167   : > { %v1131_v50 = vsel %vm1077_vm1, %v1030_v19, 0.0 }
 0x16a   : > { %v8934_v9 = vpop.permute.xlu1 %700  ;;  %v8936_v35 = vpop.permute.xlu0 %882 }
 0x16b   : > { %13859 = vst [vmem:[#allocation69_spill] sm:$0xff] %v8934_v9  ;;  %13860 = vst [vmem:[#allocation70_spill] sm:$0xff] %v8936_v35  ;;  %v960_v34 = vmul.f32 %v8934_v9, %v592_v5  ;;  %v1097_v5 = vadd.f32 %v1096_v45, %v1095_v31  ;;  %v625_v45 = vld [vmem:[%s8558_s10 + $0x160] sm:$0xff]  ;;  %v1054_v31 = vmul.f32 %v990_v49, %v8885_v18  ;;  %v1208_v9 = vsel %vm1077_vm1, %v1053_v23, 0.0 }
 0x16c   : > { %v970_v23 = vmul.f32 %v8889_v21, %v602_v57 }
 0x16d   : > { %v1024_v51 = vmul.f32 %v960_v34, %v8918_v15  ;;  %v1098_v59 = vrot.slane %v1097_v5, 4  ;;  %v993_v34 = vmul.f32 %v8866_v0, %v625_v45  ;;  %v1209_v58 = vsel %vm1077_vm1, %v1054_v31, 0.0  ;;  %v601_v45 = vld [vmem:[%s8558_s10 + $0xa0] sm:$0xff] }
 0x16e   : > { %v8956_v37 = vpop.permute.xlu1 %764  ;;  %v8958_v44 = vpop.permute.xlu0 %734  ;;  %v1198_v31 = vsel %vm1077_vm1, %v1051_v32, 0.0  ;;  %v969_v41 = vmul.f32 %v8891_v22, %v601_v45  ;;  %v629_v32 = vld [vmem:[%s8558_s10 + $0x180] sm:$0xff]  ;;  %v630_v45 = vld [vmem:[%s8558_s10 + $0x188] sm:$0xff]  ;;  %v1034_v21 = vmul.f32 %v970_v23, %v8885_v18  ;;  %v599_v22 = vld [vmem:[%s8558_s10 + $0x90] sm:$0xff] }
 0x16f   : > { %13861 = vst [vmem:[#allocation71_spill] sm:$0xff] %v8956_v37  ;;  %13862 = vst [vmem:[#allocation72_spill] sm:$0xff] %v8958_v44  ;;  %v1109_v38 = vsel %vm1077_vm1, %v1024_v51, 0.0  ;;  %v1029_v51 = vmul.f32 %v965_v55, %v8897_v29  ;;  %v1099_v0 = vadd.f32 %v1098_v59, %v1097_v5  ;;  %v1057_v2 = vmul.f32 %v993_v34, %v8897_v29 }
 0x170   : > { %v1110_v1 = vadd.f32 %v1109_v38, %v1108_v13  ;;  %v1058_v55 = vmul.f32 %v994_v25, %v8885_v18  ;;  %v963_v5 = vmul.f32 %v8876_v7, %v595_v26  ;;  %v1119_v59 = vadd.f32 %v1118_v53, %v1117_v14  ;;  %v606_v7 = vld [vmem:[%s8558_s10 + $0xc8] sm:$0xff] }
 0x171   : > { %v1087_v38 = vrot.slane %v1086_v56, 2  ;;  %v1130_v19 = vsel %vm1077_vm1, %v1029_v51, 0.0  ;;  %v1100_v34 = vrot.slane %v1099_v0, 2  ;;  %v1221_v14 = vsel %vm1077_vm1, %v1057_v2, 0.0 }
 0x172   : > { %v8974_v61 = vpop.permute.xlu1 %814  ;;  %v8976_v3 = vpop.permute.xlu0 %768  ;;  %v1111_v13 = vrot.slane %v1110_v1, 4  ;;  %v1199_v26 = vadd.f32 %v1198_v31, %v1197_v48  ;;  %v1027_v51 = vmul.f32 %v963_v5, %v8906_v52  ;;  %v998_v31 = vmul.f32 %v8936_v35, %v630_v45  ;;  %v627_v45 = vld [vmem:[%s8558_s10 + $0x170] sm:$0xff]  ;;  %v633_v35 = vld [vmem:[%s8558_s10 + $0x1a0] sm:$0xff] }
 0x173   : > { %13863 = vst [vmem:[#allocation73_spill] sm:$0xff] %v8976_v3  ;;  %v984_v28 = vmul.f32 %v8974_v61, %v616_v43  ;;  %v9025_v43 = vadd.f32 %v1209_v58, %v1208_v9  ;;  %v1186_v58 = vadd.f32 %v1185_v63, %v1184_v20  ;;  %v9036_v9 = vadd.f32 %v1131_v50, %v1130_v19 }
 0x174   : > { %v997_v20 = vmul.f32 %v8912_v6, %v629_v32  ;;  %v1101_v50 = vadd.f32 %v1100_v34, %v1099_v0  ;;  %v1112_v2 = vadd.f32 %v1111_v13, %v1110_v1  ;;  %v974_v19 = vmul.f32 %v8976_v3, %v606_v7 }
 0x175   : > { %v1048_v40 = vmul.f32 %v984_v28, %v8918_v15  ;;  %v1222_v28 = vsel %vm1077_vm1, %v1058_v55, 0.0  ;;  %v1120_v0 = vsel %vm1077_vm1, %v1027_v51, 0.0  ;;  %v1144_v1 = vsel %vm1077_vm1, %v1034_v21, 0.0 }
 0x176   : > { %v8993_v16 = vpop.permute.xlu1 %867  ;;  %v8995_v49 = vpop.permute.xlu0 %833  ;;  %v1113_v7 = vrot.slane %v1112_v2, 2 }
 0x177   : > { %13864 = vst [vmem:[#allocation74_spill] sm:$0xff] %v8995_v49  ;;  %v988_v60 = vmul.f32 %v8995_v49, %v620_v42  ;;  %v623_v42 = vld [vmem:[%s8558_s10 + $0x150] sm:$0xff]  ;;  %v1088_v49 = vadd.f32 %v1087_v38, %v1086_v56  ;;  %v1187_v48 = vsel %vm1077_vm1, %v1048_v40, 0.0  ;;  %v605_v56 = vld [vmem:[%s8558_s10 + $0xc0] sm:$0xff]  ;;  %v967_v38 = vmul.f32 %v8958_v44, %v599_v22 }
 0x178   : > { %v991_v63 = vmul.f32 %v8914_v10, %v623_v42  ;;  %v1188_v32 = vadd.f32 %v1187_v48, %v1186_v58  ;;  %v624_v42 = vld [vmem:[%s8558_s10 + $0x158] sm:$0xff]  ;;  %v973_v51 = vmul.f32 %v8956_v37, %v605_v56  ;;  %v1121_v48 = vadd.f32 %v1120_v0, %v1119_v59  ;;  %v603_v59 = vld [vmem:[%s8558_s10 + $0xb0] sm:$0xff] }
 0x179   : > { %v1052_v57 = vmul.f32 %v988_v60, %v8918_v15  ;;  %v1033_v60 = vmul.f32 %v969_v41, %v8897_v29  ;;  %v9056_v41 = vadd.f32 %v1222_v28, %v1221_v14  ;;  %v1089_v13 = vrot.slane %v1088_v49, 1 }
 0x17a   : > { %v9013_v39 = vpop.permute.xlu1 %901  ;;  %v9015_v54 = vpop.permute.xlu0 %897  ;;  %v1055_v14 = vmul.f32 %v991_v63, %v8906_v52  ;;  %v1102_v28 = vrot.slane %v1101_v50, 1  ;;  %v995_v56 = vmul.f32 %v8993_v16, %v627_v45 }
 0x17b   : > { %13865 = vst [vmem:[#allocation75_spill] sm:$0xff] %v9013_v39  ;;  %v1200_v55 = vsel %vm1077_vm1, %v1052_v57, 0.0  ;;  %v1143_v34 = vsel %vm1077_vm1, %v1033_v60, 0.0  ;;  %v1061_v57 = vmul.f32 %v997_v20, %v8897_v29  ;;  %v1031_v60 = vmul.f32 %v967_v38, %v8906_v52  ;;  %v634_v38 = vld [vmem:[%s8558_s10 + $0x1a8] sm:$0xff] }
 0x17c   : > { %v1201_v22 = vadd.f32 %v1200_v55, %v1199_v26  ;;  %v1038_v20 = vmul.f32 %v974_v19, %v8885_v18  ;;  %v9079_v55 = vadd.f32 %v1144_v1, %v1143_v34  ;;  %v1090_v3 = vadd.f32 %v1089_v13, %v1088_v49 }
 0x17d   : > { %v1234_v37 = vsel %vm1077_vm1, %v1061_v57, 0.0  ;;  %v1211_v44 = vsel %vm1077_vm1, %v1055_v14, 0.0  ;;  %v1114_v19 = vadd.f32 %v1113_v7, %v1112_v2  ;;  %v1103_v49 = vadd.f32 %v1102_v28, %v1101_v50 }
 0x17e   : > { %v9032_v25 = vpop.permute.xlu1 %753  ;;  %v9034_v53 = vpop.permute.xlu0 %719  ;;  %v1133_v13 = vsel %vm1077_vm1, %v1031_v60, 0.0  ;;  %v1157_v57 = vsel %vm1077_vm1, %v1038_v20, 0.0  ;;  %v1059_v2 = vmul.f32 %v995_v56, %v8906_v52  ;;  %v1002_v7 = vmul.f32 %v9013_v39, %v634_v38 }
 0x17f   : > { %13866 = vst [vmem:[#allocation76_spill] sm:$0xff] %v9032_v25  ;;  %13867 = vst [vmem:[#allocation77_spill] sm:$0xff] %v9034_v53  ;;  %v964_v40 = vmul.f32 %v9034_v53, %v596_v4  ;;  %v1062_v4 = vmul.f32 %v998_v31, %v8885_v18  ;;  %v1189_v31 = vrot.slane %v1188_v32, 4  ;;  %v1202_v53 = vrot.slane %v1201_v22, 4 }
 0x180   : > { %v971_v60 = vmul.f32 %v9032_v25, %v603_v59  ;;  %v1115_v20 = vrot.slane %v1114_v19, 1  ;;  %v1303_v38 = vsel %vm1302_vm2, %v1103_v49, %v1090_v3 }
 0x181   : > { %v1028_v63 = vmul.f32 %v964_v40, %v8918_v15  ;;  %v1235_v40 = vsel %vm1077_vm1, %v1062_v4, 0.0  ;;  %v1190_v45 = vadd.f32 %v1189_v31, %v1188_v32  ;;  %v1001_v4 = vmul.f32 %v9015_v54, %v633_v35 }
 0x182   : > { %v9052_v5 = vpop.permute.xlu1 %787  ;;  %v9054_v23 = vpop.permute.xlu0 %783  ;;  %v9102_v50 = vadd.f32 %v1235_v40, %v1234_v37  ;;  %v1203_v28 = vadd.f32 %v1202_v53, %v1201_v22  ;;  %v609_v53 = vld [vmem:[%s8558_s10 + $0xe0] sm:$0xff]  ;;  %v1116_v49 = vadd.f32 %v1115_v20, %v1114_v19 }
 0x183   : > { %13868 = vst [vmem:[#allocation78_spill] sm:$0xff] %v9052_v5  ;;  %13869 = vst [vmem:[#allocation79_spill] sm:$0xff] %v9054_v23  ;;  %v1122_v14 = vsel %vm1077_vm1, %v1028_v63, 0.0  ;;  %v1191_v40 = vrot.slane %v1190_v45, 2  ;;  %v1065_v59 = vmul.f32 %v1001_v4, %v8897_v29  ;;  %v977_v4 = vmul.f32 %v9054_v23, %v609_v53 }
 0x184   : > { %v1123_v63 = vadd.f32 %v1122_v14, %v1121_v48  ;;  %v1224_v48 = vsel %vm1077_vm1, %v1059_v2, 0.0  ;;  %v9125_v14 = vld [vmem:[%s8558_s10 + $0x1c8] sm:$0xff] }
 0x185   : > { %13875 = vst [vmem:[#allocation85_spill] sm:$0xff] %v9125_v14  ;;  %v9148_v20 = vadd.f32 %v1191_v40, %v1190_v45 }
 0x186   : > { %v9071_v21 = vpop.permute.xlu1 %886  ;;  %v9073_v58 = vpop.permute.xlu0 %852  ;;  %v1124_v2 = vrot.slane %v1123_v63, 4 }
 0x187   : > { %v992_v26 = vmul.f32 %v9073_v58, %v624_v42  ;;  %v1037_v42 = vmul.f32 %v973_v51, %v8897_v29  ;;  %v600_v51 = vld [vmem:[%s8558_s10 + $0x98] sm:$0xff] }
 0x189   : > { %v1056_v0 = vmul.f32 %v992_v26, %v8918_v15  ;;  %v1212_v26 = vadd.f32 %v1211_v44, %v9025_v43  ;;  %v1156_v32 = vsel %vm1077_vm1, %v1037_v42, 0.0  ;;  %v1134_v44 = vadd.f32 %v1133_v13, %v9036_v9  ;;  %v610_v43 = vld [vmem:[%s8558_s10 + $0xe8] sm:$0xff]  ;;  %v9128_v9 = vld [vmem:[%s8558_s10 + $0x178] sm:$0xff] }
 0x18a   : > { %v9090_v1 = vpop.permute.xlu1 %920  ;;  %v9092_v34 = vpop.permute.xlu0 %916  ;;  %v9112_v37 = vadd.f32 %v1157_v57, %v1156_v32  ;;  %v1066_v42 = vmul.f32 %v1002_v7, %v8885_v18  ;;  %13876 = vst [vmem:[#allocation86_spill] sm:$0xff] %v9128_v9  ;;  %v1204_v13 = vrot.slane %v1203_v28, 2  ;;  %v1035_v57 = vmul.f32 %v971_v60, %v8906_v52 }
 0x18b   : > { %13870 = vst [vmem:[#allocation80_spill] sm:$0xff] %v9090_v1  ;;  %13871 = vst [vmem:[#allocation81_spill] sm:$0xff] %v9092_v34  ;;  %v1213_v31 = vsel %vm1077_vm1, %v1056_v0, 0.0  ;;  %v9122_v0 = vld [vmem:[%s8558_s10 + $0x190] sm:$0xff]  ;;  %v978_v7 = vmul.f32 %v9052_v5, %v610_v43  ;;  %v1247_v5 = vsel %vm1077_vm1, %v1065_v59, 0.0 }
 0x18c   : > { %13874 = vst [vmem:[#allocation84_spill] sm:$0xff] %v9122_v0  ;;  %v1214_v32 = vadd.f32 %v1213_v31, %v1212_v26  ;;  %v999_v39 = vmul.f32 %v9071_v21, %v9122_v0  ;;  %v1006_v26 = vmul.f32 %v9090_v1, %v9125_v14  ;;  %v1225_v31 = vadd.f32 %v1224_v48, %v9056_v41  ;;  %v9206_v1 = vld [vmem:[%s8558_s10 + $0x198] sm:$0xff] }
 0x18d   : > { %v1248_v43 = vsel %vm1077_vm1, %v1066_v42, 0.0  ;;  %v1146_v23 = vsel %vm1077_vm1, %v1035_v57, 0.0  ;;  %v1125_v0 = vadd.f32 %v1124_v2, %v1123_v63  ;;  %v1042_v45 = vmul.f32 %v978_v7, %v8885_v18  ;;  %13885 = vst [vmem:[#allocation95_spill] sm:$0xff] %v9206_v1 }
 0x18e   : > { %v9107_v35 = vpop.permute.xlu1 %772  ;;  %v9109_v56 = vpop.permute.xlu0 %738  ;;  %v1215_v14 = vrot.slane %v1214_v32, 4  ;;  %v1041_v42 = vmul.f32 %v977_v4, %v8897_v29  ;;  %v1063_v59 = vmul.f32 %v999_v39, %v8906_v52  ;;  %v9172_v63 = vsel %vm1304_vm3, %v1116_v49, %v1303_v38  ;;  %v9186_v38 = vld [vmem:[%s8558_s10 + $0x1e0] sm:$0xff] }
 0x18f   : > { %13872 = vst [vmem:[#allocation82_spill] sm:$0xff] %v9107_v35  ;;  %13873 = vst [vmem:[#allocation83_spill] sm:$0xff] %v9109_v56  ;;  %v968_v22 = vmul.f32 %v9109_v56, %v600_v51  ;;  %v9132_v51 = vld [vmem:[%s8558_s10 + $0x1c0] sm:$0xff]  ;;  %v1249_v57 = vadd.f32 %v1248_v43, %v1247_v5  ;;  %v1147_v4 = vadd.f32 %v1146_v23, %v9079_v55  ;;  %v1126_v5 = vrot.slane %v1125_v0, 2 }
 0x190   : > { %13877 = vst [vmem:[#allocation87_spill] sm:$0xff] %v9132_v51  ;;  %v1005_v53 = vmul.f32 %v9092_v34, %v9132_v51  ;;  %v1216_v51 = vadd.f32 %v1215_v14, %v1214_v32  ;;  %13882 = vst [vmem:[#allocation92_spill] sm:$0xff] %v9186_v38  ;;  %v1170_v49 = vsel %vm1077_vm1, %v1042_v45, 0.0  ;;  %v1169_v23 = vsel %vm1077_vm1, %v1041_v42, 0.0  ;;  %v611_v32 = vld [vmem:[%s8558_s10 + $0xf0] sm:$0xff] }
 0x191   : > { %v1032_v3 = vmul.f32 %v968_v22, %v8918_v15  ;;  %v9154_v22 = vadd.f32 %v1204_v13, %v1203_v28  ;;  %v1070_v13 = vmul.f32 %v1006_v26, %v8885_v18  ;;  %v9183_v26 = vld [vmem:[%s8558_s10 + $0x1e8] sm:$0xff]  ;;  %v1237_v55 = vsel %vm1077_vm1, %v1063_v59, 0.0 }
 0x192   : > { %v9137_v25 = vpop.permute.xlu1 %905  ;;  %v9139_v56 = vpop.permute.xlu0 %871  ;;  %v1069_v2 = vmul.f32 %v1005_v53, %v8897_v29  ;;  %13881 = vst [vmem:[#allocation91_spill] sm:$0xff] %v9183_v26  ;;  %v1217_v42 = vrot.slane %v1216_v51, 2 }
 0x193   : > { %v1135_v60 = vsel %vm1077_vm1, %v1032_v3, 0.0  ;;  %v996_v19 = vmul.f32 %v9139_v56, %v9128_v9  ;;  %v607_v3 = vld [vmem:[%s8558_s10 + $0xd0] sm:$0xff]  ;;  %v1261_v14 = vsel %vm1077_vm1, %v1070_v13, 0.0 }
 0x194   : > { %v1136_v40 = vadd.f32 %v1135_v60, %v1134_v44  ;;  %v9161_v9 = vld [vmem:[%s8558_s10 + $0x1b0] sm:$0xff]  ;;  %v975_v7 = vmul.f32 %v9107_v35, %v607_v3  ;;  %v604_v60 = vld [vmem:[%s8558_s10 + $0xb8] sm:$0xff]  ;;  %v1260_v35 = vsel %vm1077_vm1, %v1069_v2, 0.0  ;;  %v1171_v2 = vadd.f32 %v1170_v49, %v1169_v23 }
 0x195   : > { %13878 = vst [vmem:[#allocation88_spill] sm:$0xff] %v9161_v9  ;;  %v1060_v41 = vmul.f32 %v996_v19, %v8918_v15  ;;  %v1003_v39 = vmul.f32 %v9137_v25, %v9161_v9 }
 0x196   : > { %v9164_v48 = vpop.permute.xlu1 %939  ;;  %v9166_v28 = vpop.permute.xlu0 %935  ;;  %v1137_v43 = vrot.slane %v1136_v40, 4  ;;  %v1039_v45 = vmul.f32 %v975_v7, %v8906_v52 }
 0x197   : > { %13879 = vst [vmem:[#allocation89_spill] sm:$0xff] %v9164_v48  ;;  %13880 = vst [vmem:[#allocation90_spill] sm:$0xff] %v9166_v28  ;;  %v1226_v53 = vsel %vm1077_vm1, %v1060_v41, 0.0  ;;  %v1010_v41 = vmul.f32 %v9164_v48, %v9183_v26  ;;  %v1009_v9 = vmul.f32 %v9166_v28, %v9186_v38  ;;  %v1067_v59 = vmul.f32 %v1003_v39, %v8906_v52  ;;  %v9222_v39 = vld [vmem:[%s8558_s10 + $0x1d0] sm:$0xff] }
 0x198   : > { %v1227_v13 = vadd.f32 %v1226_v53, %v1225_v31  ;;  %v1138_v7 = vadd.f32 %v1137_v43, %v1136_v40  ;;  %v1238_v38 = vadd.f32 %v1237_v55, %v9102_v50  ;;  %v9218_v28 = vadd.f32 %v1261_v14, %v1260_v35  ;;  %13886 = vst [vmem:[#allocation96_spill] sm:$0xff] %v9222_v39  ;;  %v9230_v43 = vld [vmem:[%s8558_s10 + $0x1b8] sm:$0xff] }
 0x199   : > { %v1074_v40 = vmul.f32 %v1010_v41, %v8885_v18  ;;  %13887 = vst [vmem:[#allocation97_spill] sm:$0xff] %v9230_v43  ;;  %v608_v53 = vld [vmem:[%s8558_s10 + $0xd8] sm:$0xff]  ;;  %v9233_v50 = vadd.f32 %v1217_v42, %v1216_v51  ;;  %v1250_v35 = vsel %vm1077_vm1, %v1067_v59, 0.0 }
 0x19a   : > { %v9190_v3 = vpop.permute.xlu1 %791  ;;  %v9192_v19 = vpop.permute.xlu0 %757  ;;  %v1139_v55 = vrot.slane %v1138_v7, 2  ;;  %v1251_v42 = vadd.f32 %v1250_v35, %v1249_v57 }
 0x19b   : > { %13883 = vst [vmem:[#allocation93_spill] sm:$0xff] %v9190_v3  ;;  %13884 = vst [vmem:[#allocation94_spill] sm:$0xff] %v9192_v19  ;;  %v972_v44 = vmul.f32 %v9192_v19, %v604_v60  ;;  %v9210_v60 = vadd.f32 %v1126_v5, %v1125_v0  ;;  %v979_v19 = vmul.f32 %v9190_v3, %v611_v32  ;;  %v9253_v3 = vld [vmem:[%s8558_s10 + $0x1f0] sm:$0xff] }
 0x19c   : > { %v1073_v5 = vmul.f32 %v1009_v9, %v8897_v29  ;;  %13889 = vst [vmem:[#allocation99_spill] sm:$0xff] %v9253_v3 }
 0x19d   : > { %v1036_v34 = vmul.f32 %v972_v44, %v8918_v15  ;;  %v1159_v44 = vsel %vm1077_vm1, %v1039_v45, 0.0  ;;  %v1043_v14 = vmul.f32 %v979_v19, %v8906_v52  ;;  %v1274_v19 = vsel %vm1077_vm1, %v1074_v40, 0.0 }
 0x19e   : > { %v9213_v26 = vpop.permute.xlu1 %924  ;;  %v9215_v48 = vpop.permute.xlu0 %890  ;;  %v1160_v51 = vadd.f32 %v1159_v44, %v9112_v37  ;;  %v1273_v59 = vsel %vm1077_vm1, %v1073_v5, 0.0 }
 0x19f   : > { %v1148_v31 = vsel %vm1077_vm1, %v1036_v34, 0.0  ;;  %v1000_v0 = vmul.f32 %v9215_v48, %v9206_v1  ;;  %v1228_v34 = vrot.slane %v1227_v13, 4  ;;  %v1007_v18 = vmul.f32 %v9213_v26, %v9222_v39 }
 0x1a0   : > { %v1149_v49 = vadd.f32 %v1148_v31, %v1147_v4  ;;  %v1172_v57 = vsel %vm1077_vm1, %v1043_v14, 0.0 }
 0x1a1   : > { %v1064_v23 = vmul.f32 %v1000_v0, %v8918_v15  ;;  %v612_v0 = vld [vmem:[%s8558_s10 + $0xf8] sm:$0xff]  ;;  %v1229_v39 = vadd.f32 %v1228_v34, %v1227_v13  ;;  %v1071_v40 = vmul.f32 %v1007_v18, %v8906_v52 }
 0x1a2   : > { %v1150_v32 = vrot.slane %v1149_v49, 4  ;;  %v9240_v29 = vpop.permute.xlu1 %909  ;;  %v9242_v9 = vpop.permute.xlu0 %776  ;;  %v9274_v18 = vld [vmem:[%s8558_s10 + $0x1d8] sm:$0xff] }
 0x1a3   : > { %13888 = vst [vmem:[#allocation98_spill] sm:$0xff] %v9242_v9  ;;  %v1239_v4 = vsel %vm1077_vm1, %v1064_v23, 0.0  ;;  %v1004_v45 = vmul.f32 %v9240_v29, %v9230_v43  ;;  %v976_v41 = vmul.f32 %v9242_v9, %v608_v53  ;;  %v9257_v23 = vadd.f32 %v1139_v55, %v1138_v7  ;;  %13893 = vst [vmem:[#allocation103_spill] sm:$0xff] %v9274_v18 }
 0x1a4   : > { %v1240_v31 = vadd.f32 %v1239_v4, %v1238_v38  ;;  %v1151_v1 = vadd.f32 %v1150_v32, %v1149_v49  ;;  %v1275_v7 = vadd.f32 %v1274_v19, %v1273_v59  ;;  %v9271_v4 = vld [vmem:[%s8558_s10 + $0x1f8] sm:$0xff] }
 0x1a5   : > { %v1068_v37 = vmul.f32 %v1004_v45, %v8918_v15  ;;  %v1040_v44 = vmul.f32 %v976_v41, %v8918_v15  ;;  %13892 = vst [vmem:[#allocation102_spill] sm:$0xff] %v9271_v4  ;;  %v1230_v45 = vrot.slane %v1229_v39, 2 }
 0x1a6   : > { %v1241_v53 = vrot.slane %v1240_v31, 4  ;;  %v9261_v5 = vpop.permute.xlu1 %795  ;;  %v9263_v38 = vpop.permute.xlu0 %943  ;;  %v1152_v41 = vrot.slane %v1151_v1, 2 }
 0x1a7   : > { %13890 = vst [vmem:[#allocation100_spill] sm:$0xff] %v9261_v5  ;;  %13891 = vst [vmem:[#allocation101_spill] sm:$0xff] %v9263_v38  ;;  %v1252_v13 = vsel %vm1077_vm1, %v1068_v37, 0.0  ;;  %v1161_v49 = vsel %vm1077_vm1, %v1040_v44, 0.0  ;;  %v980_v35 = vmul.f32 %v9261_v5, %v612_v0  ;;  %v1011_v34 = vmul.f32 %v9263_v38, %v9253_v3 }
 0x1a8   : > { %v1242_v55 = vadd.f32 %v1241_v53, %v1240_v31  ;;  %v1253_v32 = vadd.f32 %v1252_v13, %v1251_v42  ;;  %v1162_v14 = vadd.f32 %v1161_v49, %v1160_v51  ;;  %v1173_v44 = vadd.f32 %v1172_v57, %v1171_v2 }
 0x1a9   : > { %v1044_v9 = vmul.f32 %v980_v35, %v8918_v15  ;;  %v1075_v37 = vmul.f32 %v1011_v34, %v8906_v52  ;;  %v1263_v0 = vsel %vm1077_vm1, %v1071_v40, 0.0 }
 0x1aa   : > { %v1254_v5 = vrot.slane %v1253_v32, 4  ;;  %v1163_v43 = vrot.slane %v1162_v14, 4  ;;  %v9279_v3 = vpop.permute.xlu1 %947  ;;  %v9281_v19 = vpop.permute.xlu0 %928  ;;  %v1243_v52 = vrot.slane %v1242_v55, 2  ;;  %v1264_v53 = vadd.f32 %v1263_v0, %v9218_v28 }
 0x1ab   : > { %13894 = vst [vmem:[#allocation104_spill] sm:$0xff] %v9279_v3  ;;  %13895 = vst [vmem:[#allocation105_spill] sm:$0xff] %v9281_v19  ;;  %v1174_v51 = vsel %vm1077_vm1, %v1044_v9, 0.0  ;;  %v1276_v42 = vsel %vm1077_vm1, %v1075_v37, 0.0  ;;  %v1012_v59 = vmul.f32 %v9279_v3, %v9271_v4  ;;  %v1008_v31 = vmul.f32 %v9281_v19, %v9274_v18 }
 0x1ac   : > { %v1255_v2 = vadd.f32 %v1254_v5, %v1253_v32  ;;  %v1164_v57 = vadd.f32 %v1163_v43, %v1162_v14  ;;  %v1175_v40 = vadd.f32 %v1174_v51, %v1173_v44  ;;  %v1153_v9 = vadd.f32 %v1152_v41, %v1151_v1  ;;  %v7492_v1 = vpop.f32.mrf.mxu1 }
 0x1ad   : > { %v1076_v13 = vmul.f32 %v1012_v59, %v8918_v15  ;;  %v1072_v49 = vmul.f32 %v1008_v31, %v8918_v15  ;;  %v1277_v37 = vadd.f32 %v1276_v42, %v1275_v7  ;;  %v1128_v18 = vrot.slane %v9210_v60, 1 }
 0x1ae   : > { %v1256_v35 = vrot.slane %v1255_v2, 2  ;;  %v1176_v34 = vrot.slane %v1175_v40, 4  ;;  %v1165_v4 = vrot.slane %v1164_v57, 2  ;;  %v1231_v3 = vadd.f32 %v1230_v45, %v1229_v39 }
 0x1af   : > { %v1278_v43 = vsel %vm1077_vm1, %v1076_v13, 0.0  ;;  %v1265_v5 = vsel %vm1077_vm1, %v1072_v49, 0.0  ;;  %v1141_v28 = vrot.slane %v9257_v23, 1  ;;  %v1244_v32 = vadd.f32 %v1243_v52, %v1242_v55 }
 0x1b0   : > { %v1279_v14 = vadd.f32 %v1278_v43, %v1277_v37  ;;  %v1266_v15 = vadd.f32 %v1265_v5, %v1264_v53  ;;  %v1257_v41 = vadd.f32 %v1256_v35, %v1255_v2  ;;  %v1154_v44 = vrot.slane %v1153_v9, 1 }
 0x1b1   : > { %v1166_v7 = vadd.f32 %v1165_v4, %v1164_v57  ;;  %v1177_v0 = vadd.f32 %v1176_v34, %v1175_v40  ;;  %v13896_v51 = vrot.slane %v9148_v20, 1  ;;  %v1219_v45 = vrot.slane %v9233_v50, 1  ;;  %v7081_v4 = vld [vmem:[%s13897_s12] ss:$0 sm:$0xff]  ;;  %v1487_v57 = vpop.f32.mrf.mxu1  ;;  %v7481_v34 = vpop.f32.mrf.mxu0 }
 0x1b2   : > { %v1280_v42 = vrot.slane %v1279_v14, 4  ;;  %v1267_v59 = vrot.slane %v1266_v15, 4  ;;  %v1129_v31 = vadd.f32 %v1128_v18, %v9210_v60  ;;  %v1232_v13 = vrot.slane %v1231_v3, 1 }
 0x1b3   : > { %v1194_v39 = vadd.f32 %v13896_v51, %v9148_v20  ;;  %v1167_v55 = vrot.slane %v1166_v7, 1  ;;  %v1178_v52 = vrot.slane %v1177_v0, 2  ;;  %v1245_v53 = vrot.slane %v1244_v32, 1 }
 0x1b4   : > { %v1268_v49 = vadd.f32 %v1267_v59, %v1266_v15  ;;  %v1281_v37 = vadd.f32 %v1280_v42, %v1279_v14  ;;  %v1142_v2 = vadd.f32 %v1141_v28, %v9257_v23  ;;  %v13898_v20 = vrot.slane %v9154_v22, 1 }
 0x1b5   : > { %v1258_v35 = vrot.slane %v1257_v41, 1  ;;  %v1155_v60 = vadd.f32 %v1154_v44, %v1153_v9  ;;  %v1179_v18 = vadd.f32 %v1178_v52, %v1177_v0  ;;  %v1220_v43 = vadd.f32 %v1219_v45, %v9233_v50  ;;  %v1397_v0 = vpop.f32.mrf.mxu0 }
 0x1b6   : > { %v1207_v40 = vadd.f32 %v13898_v20, %v9154_v22  ;;  %v1269_v5 = vrot.slane %v1268_v49, 2  ;;  %v1282_v15 = vrot.slane %v1281_v37, 2  ;;  %v1168_v14 = vadd.f32 %v1167_v55, %v1166_v7 }
 0x1b7   : > { %v1233_v51 = vadd.f32 %v1232_v13, %v1231_v3  ;;  %v1180_v42 = vrot.slane %v1179_v18, 1  ;;  %v1307_v59 = vsel %vm1306_vm4, %v1129_v31, %v9172_v63  ;;  %v1488_v23 = vadd.f32 %v7081_v4, %v1487_v57 }
 0x1b8   : > { %v1246_v28 = vadd.f32 %v1245_v53, %v1244_v32  ;;  %v1270_v38 = vadd.f32 %v1269_v5, %v1268_v49  ;;  %v1283_v19 = vadd.f32 %v1282_v15, %v1281_v37  ;;  %v1309_v22 = vsel %vm1308_vm5, %v1142_v2, %v1307_v59  ;;  %v2970_v59 = vld [vmem:[#allocation9 + $0x10] sm:$0xff] }
 0x1b9   : > { %v1259_v20 = vadd.f32 %v1258_v35, %v1257_v41  ;;  %v1316_v9 = vsel %vm1302_vm2, %v1207_v40, %v1194_v39  ;;  %v1181_v44 = vadd.f32 %v1180_v42, %v1179_v18  ;;  %v1311_v50 = vsel %vm1310_vm6, %v1155_v60, %v1309_v22  ;;  %v2971_v42 = vld [vmem:[#allocation9 + $0x18] sm:$0xff]  ;;  %v2968_v22 = vld [vmem:[#allocation9] sm:$0xff] }
 0x1ba   : > { %v1271_v45 = vrot.slane %v1270_v38, 1  ;;  %v1284_v7 = vrot.slane %v1283_v19, 1  ;;  %v1317_v3 = vsel %vm1304_vm3, %v1220_v43, %v1316_v9  ;;  %v1313_v13 = vsel %vm1312_vm7, %v1168_v14, %v1311_v50  ;;  %7515 = vmatprep.subr.mxu0 %v2971_v42 }
 0x1bb   : > { %v1318_v63 = vsel %vm1306_vm4, %v1233_v51, %v1317_v3  ;;  %v1315_v32 = vsel %vm1314_vm8, %v1181_v44, %v1313_v13  ;;  %v1493_v57 = vadd.f32 %v7492_v1, %v7081_v4  ;;  %v8268_v9 = vmov 2   ;;  %v7154_v44 = vld [vmem:[%s8534_s24 + $0x18] sm:$0xff]  ;;  %v7824_v3 = vld [vmem:[#allocation9 + $0x40] sm:$0xff]  ;;  %v7084_v13 = vld [vmem:[%s13897_s12 + $0x1] ss:$0 sm:$0xff] }
 0x1bc   : > { %v1272_v31 = vadd.f32 %v1271_v45, %v1270_v38  ;;  %v1285_v55 = vadd.f32 %v1284_v7, %v1283_v19  ;;  %v1319_v41 = vsel %vm1308_vm5, %v1246_v28, %v1318_v63  ;;  %v1398_v52 = vadd.f32 %v1397_v0, %v1315_v32  ;;  %v2969_v28 = vld [vmem:[#allocation9 + $0x8] sm:$0xff]  ;;  %7755 = vset.pattern.permute.xlu1 %v8268_v9  ;;  %v7821_v0 = vld [vmem:[#allocation9 + $0x58] sm:$0xff]  ;;  %v7822_v45 = vld [vmem:[#allocation9 + $0x50] sm:$0xff] }
 0x1bd   : > { %v1320_v39 = vsel %vm1310_vm6, %v1259_v20, %v1319_v41  ;;  %v7153_v20 = vld [vmem:[%s8534_s24 + $0x10] sm:$0xff]  ;;  %7756 = vset.pattern.permute.xlu0 %v8268_v9  ;;  %v7823_v7 = vld [vmem:[#allocation9 + $0x48] sm:$0xff] }
 0x1be   : > { %v1321_v53 = vsel %vm1312_vm7, %v1272_v31, %v1320_v39  ;;  %v1496_v49 = vadd.f32 %v1488_v23, %v1398_v52 }
 0x1bf   : > { %v1322_v37 = vsel %vm1314_vm8, %v1285_v55, %v1321_v53 }
 0x1c0   : > { %v1403_v2 = vadd.f32 %v7481_v34, %v1322_v37  ;;  %7757 = vtanh.f32 %v1496_v49 }
 0x1c2   : > { %v1497_v40 = vadd.f32 %v1493_v57, %v1403_v2 }
 0x1c4   : > { %7759 = vtanh.f32 %v1497_v40 }
 0x1cd   : > { %v9322_v35 = vpop.eup %7757 }
 0x1ce   : > { %13899 = vst [vmem:[#allocation106_spill] sm:$0xff] %v9322_v35  ;;  %7501 = vmatprep.mubr.msk.f32.mxu0 %vm1077_vm1, %v9322_v35  ;;  %7512 = vmatprep.mubr.msk.f32.mxu1 %vm1077_vm1, %v9322_v35  ;;  %v2224_v43 = vrot.slane %v9322_v35, %v8766_v12  ;;  %v2243_v5 = vrot.slane %v9322_v35, %v8763_v11 }
 0x1cf   : > { %v2262_v15 = vrot.slane %v9322_v35, %v8773_v17  ;;  %v2281_v14 = vrot.slane %v9322_v35, %v8790_v24  ;;  %v9374_v51 = vrot.slane %v9322_v35, %v8797_v27  ;;  %v9380_v23 = vrot.slane %v9322_v35, %v8804_v30 }
 0x1d0   : > { %v2338_v50 = vrot.slane %v9322_v35, %v8811_v33  ;;  %v2357_v49 = vrot.slane %v9322_v35, %v8818_v36 }
 0x1d1   : > { %v9328_v38 = vpop.eup %7759 }
 0x1d2   : > { %13900 = vst [vmem:[#allocation107_spill] sm:$0xff] %v9328_v38  ;;  %7502 = vmatmul.mubr.msk.f32.vlgmr.msra.gmra.mxu0 %vm1077_vm1, %v9328_v38  ;;  %7513 = vmatmul.mubr.msk.f32.vlgmr.msra.gmra.mxu1 %vm1077_vm1, %v9328_v38  ;;  %v2376_v19 = vrot.slane %v9328_v38, %v8766_v12  ;;  %v2395_v1 = vrot.slane %v9328_v38, %v8763_v11  ;;  %v7087_v11 = vld [vmem:[%s13897_s12 + $0x3] ss:$0 sm:$0xff] }
 0x1d3   : > { %v9340_v4 = vrot.slane %v9328_v38, %v8773_v17  ;;  %v9346_v34 = vrot.slane %v9328_v38, %v8790_v24  ;;  %v9352_v60 = vrot.slane %v9328_v38, %v8797_v27  ;;  %v9360_v18 = vrot.slane %v9328_v38, %v8804_v30  ;;  %7516 = vmatpush3.msra.mxu0 %v2971_v42 }
 0x1d4   : > { %2382 = vbcast.lane.b32.xlu0 %v2376_v19, 264  ;;  %2378 = vbcast.lane.b32.xlu1 %v2376_v19, 256  ;;  %v2490_v57 = vrot.slane %v9328_v38, %v8811_v33  ;;  %v8269_v30 = vmov 1966171168  }
 0x1d5   : > { %7517 = vmatprep.subr.mxu0 %v2970_v59  ;;  %7523 = vmatprep.mubr.msk.f32.mxu0 %vm1077_vm1, %v7153_v20  ;;  %v1645_v27 = vunpack.c.l.s4 %v8269_v30 }
 0x1d6   : > { %7518 = vmatpush3.msra.mxu0 %v2970_v59 }
 0x1d7   : > { %7519 = vmatprep.subr.mxu0 %v2969_v28 }
 0x1d8   : > { %2401 = vbcast.lane.b32.xlu0 %v2395_v1, 264  ;;  %2397 = vbcast.lane.b32.xlu1 %v2395_v1, 256 }
 0x1d9   : > { %7520 = vmatpush3.msra.mxu0 %v2969_v28 }
 0x1da   : > { %7521 = vmatprep.subr.mxu0 %v2968_v22 }
 0x1db   : > { %7522 = vmatpush3.msra.mxu0 %v2968_v22 }
 0x1dc   : > { %2420 = vbcast.lane.b32.xlu0 %v9340_v4, 264  ;;  %2416 = vbcast.lane.b32.xlu1 %v9340_v4, 256 }
 0x1dd   : > { %7524 = vmatmul.mubr.msk.f32.vlgmr.msra.gmra.mxu0 %vm1077_vm1, %v7154_v44  ;;  %7537 = vmatprep.subr.mxu0 %v7821_v0 }
 0x1de   : > { %7538 = vmatpush3.msra.mxu0 %v7821_v0 }
 0x1df   : > { %7539 = vmatprep.subr.mxu0 %v7822_v45 }
 0x1e0   : > { %2386 = vbcast.lane.b32.xlu0 %v2376_v19, 272  ;;  %2405 = vbcast.lane.b32.xlu1 %v2395_v1, 272 }
 0x1e1   : > { %7540 = vmatpush3.msra.mxu0 %v7822_v45 }
 0x1e2   : > { %7541 = vmatprep.subr.mxu0 %v7823_v7 }
 0x1e3   : > { %7542 = vmatpush3.msra.mxu0 %v7823_v7 }
 0x1e4   : > { %2435 = vbcast.lane.b32.xlu0 %v9346_v34, 256  ;;  %2439 = vbcast.lane.b32.xlu1 %v9346_v34, 264 }
 0x1e5   : > { %7543 = vmatprep.subr.mxu0 %v7824_v3 }
 0x1e6   : > { %7544 = vmatpush3.msra.mxu0 %v7824_v3 }
 0x1e8   : > { %2454 = vbcast.lane.b32.xlu0 %v9352_v60, 256  ;;  %2424 = vbcast.lane.b32.xlu1 %v9340_v4, 272 }
 0x1ec   : > { %2390 = vbcast.lane.b32.xlu0 %v2376_v19, 280  ;;  %2458 = vbcast.lane.b32.xlu1 %v9352_v60, 264 }
 0x1f0   : > { %2443 = vbcast.lane.b32.xlu0 %v9346_v34, 272  ;;  %2409 = vbcast.lane.b32.xlu1 %v2395_v1, 280 }
 0x1f4   : > { %2477 = vbcast.lane.b32.xlu0 %v9360_v18, 264  ;;  %2473 = vbcast.lane.b32.xlu1 %v9360_v18, 256 }
 0x1f8   : > { %2230 = vbcast.lane.b32.xlu0 %v2224_v43, 264  ;;  %2226 = vbcast.lane.b32.xlu1 %v2224_v43, 256 }
 0x1fc   : > { %2249 = vbcast.lane.b32.xlu0 %v2243_v5, 264  ;;  %2245 = vbcast.lane.b32.xlu1 %v2243_v5, 256 }
 0x200   : > { %2268 = vbcast.lane.b32.xlu0 %v2262_v15, 264  ;;  %2264 = vbcast.lane.b32.xlu1 %v2262_v15, 256 }
 0x204   : > { %2253 = vbcast.lane.b32.xlu0 %v2243_v5, 272  ;;  %2234 = vbcast.lane.b32.xlu1 %v2224_v43, 272 }
 0x208   : > { %2287 = vbcast.lane.b32.xlu0 %v2281_v14, 264  ;;  %2283 = vbcast.lane.b32.xlu1 %v2281_v14, 256 }
 0x20c   : > { %2302 = vbcast.lane.b32.xlu0 %v9374_v51, 256  ;;  %2272 = vbcast.lane.b32.xlu1 %v2262_v15, 272 }
 0x210   : > { %2238 = vbcast.lane.b32.xlu0 %v2224_v43, 280  ;;  %2306 = vbcast.lane.b32.xlu1 %v9374_v51, 264 }
 0x214   : > { %2291 = vbcast.lane.b32.xlu0 %v2281_v14, 272  ;;  %2257 = vbcast.lane.b32.xlu1 %v2243_v5, 280 }
 0x218   : > { %2325 = vbcast.lane.b32.xlu0 %v9380_v23, 264  ;;  %2321 = vbcast.lane.b32.xlu1 %v9380_v23, 256 }
 0x21c   : > { %2276 = vbcast.lane.b32.xlu0 %v2262_v15, 280  ;;  %2310 = vbcast.lane.b32.xlu1 %v9374_v51, 272 }
 0x220   : > { %2340 = vbcast.lane.b32.xlu0 %v2338_v50, 256  ;;  %2344 = vbcast.lane.b32.xlu1 %v2338_v50, 264 }
 0x224   : > { %2329 = vbcast.lane.b32.xlu0 %v9380_v23, 272  ;;  %2295 = vbcast.lane.b32.xlu1 %v2281_v14, 280 }
 0x246   : > { %v9401_v52 = vpop.permute.xlu1 %2378  ;;  %v9403_v53 = vpop.permute.xlu0 %2382 }
 0x247   : > { %13903 = vst [vmem:[#allocation110_spill] sm:$0xff] %v9403_v53  ;;  %v13950_v53 = vld [vmem:[#allocation61_spill] sm:$0xff] }
 0x24a   : > { %v9407_v37 = vpop.permute.xlu1 %2397  ;;  %v9409_v2 = vpop.permute.xlu0 %2401 }
 0x24b   : > { %13904 = vst [vmem:[#allocation111_spill] sm:$0xff] %v9407_v37  ;;  %13905 = vst [vmem:[#allocation112_spill] sm:$0xff] %v9409_v2 }
 0x24e   : > { %v9415_v40 = vpop.permute.xlu1 %2416  ;;  %v9417_v19 = vpop.permute.xlu0 %2420 }
 0x24f   : > { %13906 = vst [vmem:[#allocation113_spill] sm:$0xff] %v9415_v40  ;;  %13907 = vst [vmem:[#allocation114_spill] sm:$0xff] %v9417_v19 }
 0x252   : > { %v9420_v1 = vpop.permute.xlu1 %2405  ;;  %v9422_v43 = vpop.permute.xlu0 %2386 }
 0x253   : > { %13908 = vst [vmem:[#allocation115_spill] sm:$0xff] %v9420_v1  ;;  %13909 = vst [vmem:[#allocation116_spill] sm:$0xff] %v9422_v43  ;;  %v13949_v43 = vld [vmem:[#allocation56_spill] sm:$0xff] }
 0x256   : > { %v9428_v5 = vpop.permute.xlu1 %2439  ;;  %v9430_v15 = vpop.permute.xlu0 %2435 }
 0x257   : > { %13910 = vst [vmem:[#allocation117_spill] sm:$0xff] %v9428_v5  ;;  %13911 = vst [vmem:[#allocation118_spill] sm:$0xff] %v9430_v15  ;;  %v7838_v5 = vld [vmem:[%s8558_s10 + $0x168] sm:$0xff] }
 0x25a   : > { %v9433_v14 = vpop.permute.xlu1 %2424 }
 0x25b   : > { %13912 = vst [vmem:[#allocation119_spill] sm:$0xff] %v9433_v14 }
 0x292   : > { %v7503_v63 = vpop.f32.mrf.mxu0 }
 0x293   : > { %v9395_v32 = vadd.f32 %v7503_v63, %v7084_v13 }
 0x294   : > { %v1582_v31 = vpop.f32.mrf.mxu0 }
 0x295   : > { %13901 = vst [vmem:[#allocation108_spill] sm:$0xff] %v9395_v32  ;;  %7761 = vtanh.f32 %v9395_v32  ;;  %v9398_v55 = vadd.f32 %v7084_v13, %v1582_v31 }
 0x297   : > { %13902 = vst [vmem:[#allocation109_spill] sm:$0xff] %v9398_v55  ;;  %7763 = vtanh.f32 %v9398_v55 }
 0x2a2   : > { %v7762_v41 = vpop.eup %7761 }
 0x2a3   : > { %1624 = vperm.xlu1 %7755, %v7762_v41  }
 0x2a4   : > { %v7764_v39 = vpop.eup %7763 }
 0x2a5   : > { %1619 = vperm.xlu0 %7756, %v7764_v39  }
 0x2a7   : > { %2359 = vbcast.lane.b32.xlu1 %v2357_v49, 256 }
 0x2a9   : > { %2363 = vbcast.lane.b32.xlu0 %v2357_v49, 264 }
 0x2ab   : > { %2428 = vbcast.lane.b32.xlu1 %v9340_v4, 280  ;;  %v2509_v4 = vrot.slane %v9328_v38, %v8818_v36 }
 0x2ad   : > { %2462 = vbcast.lane.b32.xlu0 %v9352_v60, 272 }
 0x2af   : > { %2492 = vbcast.lane.b32.xlu1 %v2490_v57, 256 }
 0x2b1   : > { %2496 = vbcast.lane.b32.xlu0 %v2490_v57, 264 }
 0x2b3   : > { %2314 = vbcast.lane.b32.xlu1 %v9374_v51, 280  ;;  %v9435_v51 = vpop.permute.xlu0 %2454 }
 0x2b4   : > { %13913 = vst [vmem:[#allocation120_spill] sm:$0xff] %v9435_v51 }
 0x2b5   : > { %2348 = vbcast.lane.b32.xlu0 %v2338_v50, 272 }
 0x2b7   : > { %2447 = vbcast.lane.b32.xlu1 %v9346_v34, 280  ;;  %v9438_v34 = vpop.permute.xlu1 %2458  ;;  %v9440_v42 = vpop.permute.xlu0 %2390 }
 0x2b8   : > { %13914 = vst [vmem:[#allocation121_spill] sm:$0xff] %v9438_v34  ;;  %13915 = vst [vmem:[#allocation122_spill] sm:$0xff] %v9440_v42  ;;  %v13948_v42 = vld [vmem:[#allocation57_spill] sm:$0xff] }
 0x2b9   : > { %2481 = vbcast.lane.b32.xlu0 %v9360_v18, 272 }
 0x2bb   : > { %2511 = vbcast.lane.b32.xlu1 %v2509_v4, 256  ;;  %v9443_v59 = vpop.permute.xlu1 %2409 }
 0x2bc   : > { %13916 = vst [vmem:[#allocation123_spill] sm:$0xff] %v9443_v59 }
 0x2bd   : > { %2515 = vbcast.lane.b32.xlu0 %v2509_v4, 264 }
 0x2bf   : > { %2333 = vbcast.lane.b32.xlu1 %v9380_v23, 280  ;;  %v9445_v23 = vpop.permute.xlu0 %2443  ;;  %v9447_v28 = vpop.permute.xlu1 %2473 }
 0x2c0   : > { %13917 = vst [vmem:[#allocation124_spill] sm:$0xff] %v9445_v23  ;;  %13918 = vst [vmem:[#allocation125_spill] sm:$0xff] %v9447_v28  ;;  %v7829_v28 = vld [vmem:[%s8558_s10 + $0x120] sm:$0xff] }
 0x2c1   : > { %2367 = vbcast.lane.b32.xlu0 %v2357_v49, 272 }
 0x2c3   : > { %2466 = vbcast.lane.b32.xlu1 %v9352_v60, 280  ;;  %v9449_v22 = vpop.permute.xlu0 %2477  ;;  %v9451_v60 = vpop.permute.xlu1 %2226 }
 0x2c4   : > { %13919 = vst [vmem:[#allocation126_spill] sm:$0xff] %v9449_v22  ;;  %13920 = vst [vmem:[#allocation127_spill] sm:$0xff] %v9451_v60  ;;  %v7826_v22 = vld [vmem:[%s8558_s10 + $0x108] sm:$0xff] }
 0x2c5   : > { %2500 = vbcast.lane.b32.xlu0 %v2490_v57, 272 }
 0x2c7   : > { %2352 = vbcast.lane.b32.xlu1 %v2338_v50, 280  ;;  %v9453_v20 = vpop.permute.xlu0 %2230  ;;  %v9455_v9 = vpop.permute.xlu1 %2245 }
 0x2c8   : > { %13921 = vst [vmem:[#allocation128_spill] sm:$0xff] %v9453_v20  ;;  %13922 = vst [vmem:[#allocation129_spill] sm:$0xff] %v9455_v9 }
 0x2c9   : > { %2485 = vbcast.lane.b32.xlu0 %v9360_v18, 280 }
 0x2cb   : > { %2519 = vbcast.lane.b32.xlu1 %v2509_v4, 272  ;;  %v9457_v44 = vpop.permute.xlu0 %2249  ;;  %v9459_v18 = vpop.permute.xlu1 %2264 }
 0x2cc   : > { %13923 = vst [vmem:[#allocation130_spill] sm:$0xff] %v9457_v44  ;;  %13924 = vst [vmem:[#allocation131_spill] sm:$0xff] %v9459_v18 }
 0x2cd   : > { %2371 = vbcast.lane.b32.xlu0 %v2357_v49, 280 }
 0x2cf   : > { %2504 = vbcast.lane.b32.xlu1 %v2490_v57, 280  ;;  %v9461_v50 = vpop.permute.xlu0 %2268  ;;  %v9463_v0 = vpop.permute.xlu1 %2234 }
 0x2d0   : > { %13925 = vst [vmem:[#allocation132_spill] sm:$0xff] %v9461_v50  ;;  %13926 = vst [vmem:[#allocation133_spill] sm:$0xff] %v9463_v0 }
 0x2d1   : > { %2523 = vbcast.lane.b32.xlu0 %v2509_v4, 280 }
 0x2d3   : > { %v9465_v45 = vpop.permute.xlu0 %2253  ;;  %v9467_v7 = vpop.permute.xlu1 %2283 }
 0x2d4   : > { %13927 = vst [vmem:[#allocation134_spill] sm:$0xff] %v9465_v45  ;;  %13928 = vst [vmem:[#allocation135_spill] sm:$0xff] %v9467_v7 }
 0x2d7   : > { %v9469_v3 = vpop.permute.xlu0 %2287  ;;  %v9471_v13 = vpop.permute.xlu1 %2272 }
 0x2d8   : > { %13929 = vst [vmem:[#allocation136_spill] sm:$0xff] %v9469_v3  ;;  %13930 = vst [vmem:[#allocation137_spill] sm:$0xff] %v9471_v13  ;;  %v7088_v3 = vld [vmem:[%s13897_s12 + $0x2] ss:$0 sm:$0xff] }
 0x2db   : > { %v9473_v63 = vpop.permute.xlu0 %2302  ;;  %v9475_v31 = vpop.permute.xlu1 %2306 }
 0x2dc   : > { %13931 = vst [vmem:[#allocation138_spill] sm:$0xff] %v9473_v63  ;;  %13932 = vst [vmem:[#allocation139_spill] sm:$0xff] %v9475_v31 }
 0x2df   : > { %v9477_v41 = vpop.permute.xlu0 %2238  ;;  %v9479_v39 = vpop.permute.xlu1 %2257 }
 0x2e0   : > { %13933 = vst [vmem:[#allocation140_spill] sm:$0xff] %v9477_v41  ;;  %13934 = vst [vmem:[#allocation141_spill] sm:$0xff] %v9479_v39 }
 0x2e3   : > { %v9481_v49 = vpop.permute.xlu0 %2291  ;;  %v9483_v57 = vpop.permute.xlu1 %2321 }
 0x2e4   : > { %13935 = vst [vmem:[#allocation142_spill] sm:$0xff] %v9481_v49  ;;  %13936 = vst [vmem:[#allocation143_spill] sm:$0xff] %v9483_v57  ;;  %v1646_v49 = vunpack.c.0.s8 %v1645_v27  ;;  %v13960_v57 = vld [vmem:[#allocation104_spill] sm:$0xff] }
 0x2e6   : > { %v9506_v50 = vsub.s32 %v1646_v49, %v8760_v8 }
 0x2e7   : > { %v9485_v4 = vpop.permute.xlu0 %2325  ;;  %v9487_v55 = vpop.permute.xlu1 %2310 }
 0x2e8   : > { %13937 = vst [vmem:[#allocation144_spill] sm:$0xff] %v9485_v4  ;;  %13938 = vst [vmem:[#allocation145_spill] sm:$0xff] %v9487_v55  ;;  %v13959_v4 = vld [vmem:[#allocation101_spill] sm:$0xff] }
 0x2eb   : > { %v9489_v32 = vpop.permute.xlu0 %2276  ;;  %v9491_v36 = vpop.permute.xlu1 %2344 }
 0x2ec   : > { %13939 = vst [vmem:[#allocation146_spill] sm:$0xff] %v9489_v32  ;;  %13940 = vst [vmem:[#allocation147_spill] sm:$0xff] %v9491_v36  ;;  %v7841_v36 = vld [vmem:[%s8558_s10 + $0x188] sm:$0xff] }
 0x2ef   : > { %v9493_v33 = vpop.permute.xlu0 %2340  ;;  %v9495_v24 = vpop.permute.xlu1 %2295 }
 0x2f0   : > { %13941 = vst [vmem:[#allocation148_spill] sm:$0xff] %v9493_v33  ;;  %13942 = vst [vmem:[#allocation149_spill] sm:$0xff] %v9495_v24 }
 0x2f3   : > { %v9497_v17 = vpop.permute.xlu0 %2329 }
 0x2f4   : > { %13943 = vst [vmem:[#allocation150_spill] sm:$0xff] %v9497_v17  ;;  %v13952_v17 = vld [vmem:[#allocation70_spill] sm:$0xff] }
 0x31e   : > { %v1625_v7 = vpop.permute.xlu1 %1624 }
 0x31f   : > { %v1632_v32 = vmul.f32 %v7087_v11, %v1625_v7 }
 0x320   : > { %v1620_v13 = vpop.permute.xlu0 %1619 }
 0x321   : > { %v1638_v30 = vadd.f32 %v7088_v3, %v1632_v32  ;;  %v1631_v18 = vmul.f32 %v7087_v11, %v1620_v13 }
 0x323   : > { %v1640_v24 = vmul.f32 %v9328_v38, %v1638_v30  ;;  %v1637_v39 = vadd.f32 %v7088_v3, %v1631_v18 }
 0x325   : > { %v1692_v45 = vcombine.high %v1640_v24, %v1640_v24  ;;  %v1699_v44 = vrot.slane %v1640_v24, %v9506_v50  ;;  %v1639_v27 = vmul.f32 %v9322_v35, %v1637_v39 }
 0x327   : > { %v1706_v9 = vrot.slane %v1692_v45, %v9506_v50  ;;  %v1707_v41 = vcombine.high %v1699_v44, %v1699_v44  ;;  %v1715_v0 = vrot.slane %v1699_v44, %v9506_v50  ;;  %v1643_v7 = vcombine.high %v1639_v27, %v1639_v27 }
 0x328   : > { %v9514_v20 = vrot.slane %v1639_v27, %v9506_v50 }
 0x329   : > { %v1708_v8 = vcombine.high %v1706_v9, %v1706_v9  ;;  %v1722_v11 = vrot.slane %v1706_v9, %v9506_v50  ;;  %v1729_v32 = vrot.slane %v1707_v41, %v9506_v50  ;;  %v1737_v18 = vcombine.high %v1715_v0, %v1715_v0 }
 0x32a   : > { %v1776_v3 = vrot.slane %v1715_v0, %v8766_v12  ;;  %v9520_v24 = vrot.slane %v1643_v7, %v9506_v50  ;;  %v9526_v44 = vrot.slane %v9514_v20, %v9506_v50 }
 0x32b   : > { %v1736_v13 = vrot.slane %v1708_v8, %v9506_v50  ;;  %v1738_v39 = vcombine.high %v1722_v11, %v1722_v11  ;;  %v1739_v49 = vcombine.high %v1729_v32, %v1729_v32  ;;  %v1780_v9 = vrot.slane %v1729_v32, %v8766_v12  ;;  %v13944_v32 = vld [vmem:[#allocation51_spill] sm:$0xff] }
 0x32c   : > { %v1784_v41 = vrot.slane %v1737_v18, %v8766_v12  ;;  %v1792_v0 = vrot.slane %v1722_v11, %v8766_v12  ;;  %v1853_v30 = vmul.f32 %v1776_v3, %v8840_v47  ;;  %v1854_v27 = vmul.f32 %v1776_v3, %v8838_v46  ;;  %v13945_v18 = vld [vmem:[#allocation50_spill] sm:$0xff] }
 0x32d   : > { %v1740_v7 = vcombine.high %v1736_v13, %v1736_v13  ;;  %v1788_v45 = vrot.slane %v1739_v49, %v8766_v12  ;;  %v1796_v35 = vrot.slane %v1736_v13, %v8766_v12  ;;  %v1800_v38 = vrot.slane %v1738_v39, %v8766_v12  ;;  %v13946_v47 = vld [vmem:[#allocation62_spill] sm:$0xff] }
 0x32e   : > { %v1855_v8 = vmul.f32 %v1776_v3, %v8862_v62  ;;  %v1856_v60 = vmul.f32 %v1776_v3, %v8974_v61  ;;  %v1857_v59 = vmul.f32 %v1780_v9, %v13944_v32  ;;  %v1858_v1 = vmul.f32 %v1780_v9, %v13945_v18  ;;  %v13947_v46 = vld [vmem:[#allocation74_spill] sm:$0xff]  ;;  %v13951_v3 = vld [vmem:[#allocation64_spill] sm:$0xff] }
 0x32f   : > { %v1804_v11 = vrot.slane %v1740_v7, %v8766_v12  ;;  %v1859_v2 = vmul.f32 %v1780_v9, %v13946_v47  ;;  %v1860_v37 = vmul.f32 %v1780_v9, %v13947_v46  ;;  %v1861_v49 = vmul.f32 %v1784_v41, %v13948_v42  ;;  %v13956_v46 = vld [vmem:[#allocation105_spill] sm:$0xff] }
 0x330   : > { %v1862_v13 = vmul.f32 %v1784_v41, %v13949_v43  ;;  %v1863_v39 = vmul.f32 %v1784_v41, %v8914_v10  ;;  %v1864_v62 = vmul.f32 %v1784_v41, %v9073_v58  ;;  %v1865_v61 = vmul.f32 %v1788_v45, %v13950_v53  ;;  %v13953_v43 = vld [vmem:[#allocation75_spill] sm:$0xff] }
 0x331   : > { %v1866_v32 = vmul.f32 %v1788_v45, %v13951_v3  ;;  %v1867_v18 = vmul.f32 %v1788_v45, %v8993_v16  ;;  %v1868_v7 = vmul.f32 %v1788_v45, %v9139_v56  ;;  %v1869_v47 = vmul.f32 %v1792_v0, %v8912_v6  ;;  %v13954_v56 = vld [vmem:[#allocation81_spill] sm:$0xff]  ;;  %v13955_v45 = vld [vmem:[#allocation80_spill] sm:$0xff] }
 0x332   : > { %v1870_v9 = vmul.f32 %v1792_v0, %v13952_v17  ;;  %v1871_v42 = vmul.f32 %v1792_v0, %v9071_v21  ;;  %v1872_v10 = vmul.f32 %v1792_v0, %v9215_v48  ;;  %v1873_v58 = vmul.f32 %v1796_v35, %v9015_v54  ;;  %v13957_v0 = vld [vmem:[#allocation90_spill] sm:$0xff]  ;;  %v13958_v3 = vld [vmem:[#allocation89_spill] sm:$0xff] }
 0x333   : > { %v1874_v53 = vmul.f32 %v1796_v35, %v13953_v43  ;;  %v1875_v41 = vmul.f32 %v1796_v35, %v9137_v25  ;;  %v1876_v16 = vmul.f32 %v1796_v35, %v9240_v29  ;;  %v1877_v6 = vmul.f32 %v1800_v38, %v13954_v56  ;;  %v7825_v35 = vld [vmem:[%s8558_s10 + $0x100] sm:$0xff] }
 0x334   : > { %v1878_v17 = vmul.f32 %v1800_v38, %v13955_v45  ;;  %v1879_v21 = vmul.f32 %v1800_v38, %v9213_v26  ;;  %v1880_v48 = vmul.f32 %v1800_v38, %v13956_v46  ;;  %v1881_v54 = vmul.f32 %v1804_v11, %v13957_v0  ;;  %v7827_v26 = vld [vmem:[%s8558_s10 + $0x110] sm:$0xff]  ;;  %v7828_v46 = vld [vmem:[%s8558_s10 + $0x118] sm:$0xff] }
 0x335   : > { %v1882_v43 = vmul.f32 %v1804_v11, %v13958_v3  ;;  %v1883_v25 = vmul.f32 %v1804_v11, %v13959_v4  ;;  %v1884_v29 = vmul.f32 %v1804_v11, %v13960_v57  ;;  %v1917_v56 = vadd.f32 %v7825_v35, %v1853_v30  ;;  %v7830_v4 = vld [vmem:[%s8558_s10 + $0x128] sm:$0xff]  ;;  %v7831_v57 = vld [vmem:[%s8558_s10 + $0x130] sm:$0xff]  ;;  %v7832_v11 = vld [vmem:[%s8558_s10 + $0x138] sm:$0xff] }
 0x336   : > { %v9570_v45 = vadd.f32 %v7826_v22, %v1854_v27  ;;  %v1919_v38 = vadd.f32 %v7827_v26, %v1855_v8  ;;  %v1920_v0 = vadd.f32 %v7828_v46, %v1856_v60  ;;  %v1921_v3 = vadd.f32 %v7829_v28, %v1857_v59  ;;  %v7833_v22 = vld [vmem:[%s8558_s10 + $0x140] sm:$0xff]  ;;  %v7834_v8 = vld [vmem:[%s8558_s10 + $0x148] sm:$0xff]  ;;  %v7835_v60 = vld [vmem:[%s8558_s10 + $0x150] sm:$0xff] }
 0x337   : > { %v9576_v23 = vadd.f32 %v7830_v4, %v1858_v1  ;;  %v1923_v30 = vadd.f32 %v7831_v57, %v1859_v2  ;;  %v1924_v35 = vadd.f32 %v7832_v11, %v1860_v37  ;;  %v1925_v27 = vadd.f32 %v7833_v22, %v1861_v49  ;;  %v7836_v59 = vld [vmem:[%s8558_s10 + $0x158] sm:$0xff]  ;;  %v7837_v1 = vld [vmem:[%s8558_s10 + $0x160] sm:$0xff]  ;;  %v7839_v2 = vld [vmem:[%s8558_s10 + $0x170] sm:$0xff] }
 0x338   : > { %v9582_v26 = vadd.f32 %v7834_v8, %v1862_v13  ;;  %v1927_v46 = vadd.f32 %v7835_v60, %v1863_v39  ;;  %v1928_v28 = vadd.f32 %v7836_v59, %v1864_v62  ;;  %v1929_v4 = vadd.f32 %v7837_v1, %v1865_v61  ;;  %v13961_v57 = vld [vmem:[#allocation86_spill] sm:$0xff]  ;;  %v7840_v49 = vld [vmem:[%s8558_s10 + $0x180] sm:$0xff]  ;;  %v13962_v8 = vld [vmem:[#allocation84_spill] sm:$0xff] }
 0x339   : > { %v9588_v15 = vadd.f32 %v7838_v5, %v1866_v32  ;;  %v1931_v37 = vadd.f32 %v7839_v2, %v1867_v18  ;;  %v1932_v11 = vadd.f32 %v1868_v7, %v13961_v57  ;;  %v1933_v22 = vadd.f32 %v7840_v49, %v1869_v47  ;;  %v13963_v60 = vld [vmem:[#allocation95_spill] sm:$0xff]  ;;  %v7842_v59 = vld [vmem:[%s8558_s10 + $0x1a0] sm:$0xff]  ;;  %v7843_v5 = vld [vmem:[%s8558_s10 + $0x1a8] sm:$0xff] }
 0x33a   : > { %v9594_v13 = vadd.f32 %v7841_v36, %v1870_v9  ;;  %v9597_v39 = vadd.f32 %v1871_v42, %v13962_v8  ;;  %v9600_v62 = vadd.f32 %v1872_v10, %v13963_v60  ;;  %v9603_v61 = vadd.f32 %v7842_v59, %v1873_v58  ;;  %v13964_v18 = vld [vmem:[#allocation88_spill] sm:$0xff]  ;;  %v13965_v7 = vld [vmem:[#allocation97_spill] sm:$0xff]  ;;  %v13966_v36 = vld [vmem:[#allocation87_spill] sm:$0xff] }
 0x33b   : > { %v9606_v32 = vadd.f32 %v7843_v5, %v1874_v53  ;;  %v9609_v1 = vadd.f32 %v1875_v41, %v13964_v18  ;;  %v9612_v47 = vadd.f32 %v1876_v16, %v13965_v7  ;;  %v9615_v9 = vadd.f32 %v1877_v6, %v13966_v36  ;;  %v13967_v42 = vld [vmem:[#allocation85_spill] sm:$0xff]  ;;  %v13968_v10 = vld [vmem:[#allocation96_spill] sm:$0xff]  ;;  %v13969_v58 = vld [vmem:[#allocation103_spill] sm:$0xff] }
 0x33c   : > { %v9618_v2 = vadd.f32 %v1878_v17, %v13967_v42  ;;  %v9621_v57 = vadd.f32 %v1879_v21, %v13968_v10  ;;  %v9624_v49 = vadd.f32 %v1880_v48, %v13969_v58  ;;  %v13970_v53 = vld [vmem:[#allocation92_spill] sm:$0xff]  ;;  %v13971_v41 = vld [vmem:[#allocation91_spill] sm:$0xff]  ;;  %v13973_v6 = vld [vmem:[#allocation102_spill] sm:$0xff]  ;;  %v7121_v5 = vclamps-f32 %v1917_v56, 2.0 }
 0x33d   : > { %v9627_v8 = vadd.f32 %v1881_v54, %v13970_v53  ;;  %v9630_v60 = vadd.f32 %v1882_v43, %v13971_v41  ;;  %v13972_v16 = vld [vmem:[#allocation99_spill] sm:$0xff]  ;;  %v9636_v17 = vadd.f32 %v1884_v29, %v13973_v6  ;;  %v7122_v21 = vclamps-f32 %v9570_v45, 2.0 }
 0x33e   : > { %v9633_v59 = vadd.f32 %v1883_v25, %v13972_v16  ;;  %v7123_v48 = vclamps-f32 %v1919_v38, 2.0  ;;  %v7124_v18 = vclamps-f32 %v1920_v0, 2.0  ;;  %v7125_v54 = vclamps-f32 %v1921_v3, 2.0  ;;  %2109 = vst.msk [vmem:[%s8558_s10 + $0x100] sm:$0xff] %vm1077_vm1, %v7121_v5  ;;  %v13976_v6 = vld [vmem:[#allocation47_spill] sm:$0xff]  ;;  %v13977_v5 = vld [vmem:[#allocation53_spill] sm:$0xff] }
 0x33f   : > { %v7126_v7 = vclamps-f32 %v9576_v23, 2.0  ;;  %v7127_v43 = vclamps-f32 %v1923_v30, 2.0  ;;  %v7128_v36 = vclamps-f32 %v1924_v35, 2.0  ;;  %v7129_v25 = vclamps-f32 %v1925_v27, 2.0  ;;  %2110 = vst.msk [vmem:[%s8558_s10 + $0x108] sm:$0xff] %vm1077_vm1, %v7122_v21 }
 0x340   : > { %v7130_v29 = vclamps-f32 %v9582_v26, 2.0  ;;  %v7131_v56 = vclamps-f32 %v1927_v46, 2.0  ;;  %v7132_v42 = vclamps-f32 %v1928_v28, 2.0  ;;  %v7133_v45 = vclamps-f32 %v1929_v4, 2.0  ;;  %2111 = vst.msk [vmem:[%s8558_s10 + $0x110] sm:$0xff] %vm1077_vm1, %v7123_v48  ;;  %2112 = vst.msk [vmem:[%s8558_s10 + $0x118] sm:$0xff] %vm1077_vm1, %v7124_v18  ;;  %v9743_v48 = vpop.permute.xlu1 %2359  ;;  %v9745_v18 = vpop.permute.xlu0 %2363 }
 0x341   : > { %2113 = vst.msk [vmem:[%s8558_s10 + $0x120] sm:$0xff] %vm1077_vm1, %v7125_v54  ;;  %v7134_v23 = vclamps-f32 %v9588_v15, 2.0  ;;  %v7135_v38 = vclamps-f32 %v1931_v37, 2.0  ;;  %v7136_v0 = vclamps-f32 %v1932_v11, 2.0  ;;  %v7137_v3 = vclamps-f32 %v1933_v22, 2.0  ;;  %2114 = vst.msk [vmem:[%s8558_s10 + $0x128] sm:$0xff] %vm1077_vm1, %v7126_v7 }
 0x342   : > { %2115 = vst.msk [vmem:[%s8558_s10 + $0x130] sm:$0xff] %vm1077_vm1, %v7127_v43  ;;  %2116 = vst.msk [vmem:[%s8558_s10 + $0x138] sm:$0xff] %vm1077_vm1, %v7128_v36  ;;  %v7138_v30 = vclamps-f32 %v9594_v13, 2.0  ;;  %v7139_v35 = vclamps-f32 %v9597_v39, 2.0  ;;  %v7140_v15 = vclamps-f32 %v9600_v62, 2.0  ;;  %v7141_v27 = vclamps-f32 %v9603_v61, 2.0 }
 0x343   : > { %2117 = vst.msk [vmem:[%s8558_s10 + $0x140] sm:$0xff] %vm1077_vm1, %v7129_v25  ;;  %2118 = vst.msk [vmem:[%s8558_s10 + $0x148] sm:$0xff] %vm1077_vm1, %v7130_v29  ;;  %v7142_v26 = vclamps-f32 %v9606_v32, 2.0  ;;  %v7143_v46 = vclamps-f32 %v9609_v1, 2.0  ;;  %v7144_v28 = vclamps-f32 %v9612_v47, 2.0  ;;  %v7145_v4 = vclamps-f32 %v9615_v9, 2.0 }
 0x344   : > { %2119 = vst.msk [vmem:[%s8558_s10 + $0x150] sm:$0xff] %vm1077_vm1, %v7131_v56  ;;  %2120 = vst.msk [vmem:[%s8558_s10 + $0x158] sm:$0xff] %vm1077_vm1, %v7132_v42  ;;  %v7146_v37 = vclamps-f32 %v9618_v2, 2.0  ;;  %v7147_v11 = vclamps-f32 %v9621_v57, 2.0  ;;  %v7148_v22 = vclamps-f32 %v9624_v49, 2.0  ;;  %v7149_v13 = vclamps-f32 %v9627_v8, 2.0 }
 0x345   : > { %2121 = vst.msk [vmem:[%s8558_s10 + $0x160] sm:$0xff] %vm1077_vm1, %v7133_v45  ;;  %2122 = vst.msk [vmem:[%s8558_s10 + $0x168] sm:$0xff] %vm1077_vm1, %v7134_v23  ;;  %v7150_v39 = vclamps-f32 %v9630_v60, 2.0  ;;  %v7151_v62 = vclamps-f32 %v9633_v59, 2.0  ;;  %v7152_v61 = vclamps-f32 %v9636_v17, 2.0  ;;  %v1659_v32 = vcombine.high %v9520_v24, %v9520_v24  ;;  %v13980_v7 = vld [vmem:[#allocation63_spill] sm:$0xff] }
 0x346   : > { %2123 = vst.msk [vmem:[%s8558_s10 + $0x170] sm:$0xff] %vm1077_vm1, %v7135_v38  ;;  %2124 = vst.msk [vmem:[%s8558_s10 + $0x178] sm:$0xff] %vm1077_vm1, %v7136_v0  ;;  %v1673_v1 = vrot.slane %v9520_v24, %v9506_v50  ;;  %v13974_v47 = vcombine.high %v9514_v20, %v9514_v20  ;;  %v1688_v2 = vcombine.high %v9526_v44, %v9526_v44  ;;  %v13981_v36 = vld [vmem:[#allocation44_spill] sm:$0xff]  ;;  %v13982_v29 = vld [vmem:[#allocation46_spill] sm:$0xff] }
 0x347   : > { %2125 = vst.msk [vmem:[%s8558_s10 + $0x180] sm:$0xff] %vm1077_vm1, %v7137_v3  ;;  %2126 = vst.msk [vmem:[%s8558_s10 + $0x188] sm:$0xff] %vm1077_vm1, %v7138_v30  ;;  %v1744_v10 = vrot.slane %v9526_v44, %v8766_v12  ;;  %v1687_v57 = vrot.slane %v1659_v32, %v9506_v50  ;;  %v13975_v44 = vld [vmem:[#allocation45_spill] sm:$0xff]  ;;  %v13983_v42 = vld [vmem:[#allocation52_spill] sm:$0xff] }
 0x348   : > { %2127 = vst.msk [vmem:[%s8558_s10 + $0x190] sm:$0xff] %vm1077_vm1, %v7139_v35  ;;  %2128 = vst.msk [vmem:[%s8558_s10 + $0x198] sm:$0xff] %vm1077_vm1, %v7140_v15  ;;  %v1680_v9 = vrot.slane %v13974_v47, %v9506_v50  ;;  %v1689_v24 = vcombine.high %v1673_v1, %v1673_v1  ;;  %v1752_v20 = vrot.slane %v1688_v2, %v8766_v12  ;;  %v13984_v23 = vld [vmem:[#allocation66_spill] sm:$0xff]  ;;  %v13985_v0 = vld [vmem:[#allocation49_spill] sm:$0xff] }
 0x349   : > { %2129 = vst.msk [vmem:[%s8558_s10 + $0x1a0] sm:$0xff] %vm1077_vm1, %v7141_v27  ;;  %2130 = vst.msk [vmem:[%s8558_s10 + $0x1a8] sm:$0xff] %vm1077_vm1, %v7142_v26  ;;  %v1691_v53 = vcombine.high %v1687_v57, %v1687_v57  ;;  %v1760_v8 = vrot.slane %v1673_v1, %v8766_v12  ;;  %v1764_v41 = vrot.slane %v1687_v57, %v8766_v12  ;;  %v13986_v30 = vld [vmem:[#allocation48_spill] sm:$0xff]  ;;  %v13987_v15 = vld [vmem:[#allocation59_spill] sm:$0xff] }
 0x34a   : > { %2131 = vst.msk [vmem:[%s8558_s10 + $0x1b0] sm:$0xff] %vm1077_vm1, %v7143_v46  ;;  %2132 = vst.msk [vmem:[%s8558_s10 + $0x1b8] sm:$0xff] %vm1077_vm1, %v7144_v28  ;;  %v1690_v58 = vcombine.high %v1680_v9, %v1680_v9  ;;  %v1748_v49 = vrot.slane %v1680_v9, %v8766_v12  ;;  %v1821_v60 = vmul.f32 %v1744_v10, %v13975_v44  ;;  %v13988_v26 = vld [vmem:[#allocation69_spill] sm:$0xff]  ;;  %v13989_v28 = vld [vmem:[#allocation55_spill] sm:$0xff] }
 0x34b   : > { %2133 = vst.msk [vmem:[%s8558_s10 + $0x1c0] sm:$0xff] %vm1077_vm1, %v7145_v4  ;;  %2134 = vst.msk [vmem:[%s8558_s10 + $0x1c8] sm:$0xff] %vm1077_vm1, %v7146_v37  ;;  %v1768_v59 = vrot.slane %v1689_v24, %v8766_v12  ;;  %v1822_v17 = vmul.f32 %v1744_v10, %v13976_v6  ;;  %v1823_v21 = vmul.f32 %v1744_v10, %v13977_v5  ;;  %v13990_v37 = vld [vmem:[#allocation54_spill] sm:$0xff]  ;;  %v13994_v1 = vld [vmem:[#allocation60_spill] sm:$0xff] }
 0x34c   : > { %2135 = vst.msk [vmem:[%s8558_s10 + $0x1d0] sm:$0xff] %vm1077_vm1, %v7147_v11  ;;  %2136 = vst.msk [vmem:[%s8558_s10 + $0x1d8] sm:$0xff] %vm1077_vm1, %v7148_v22  ;;  %v1756_v16 = vrot.slane %v1690_v58, %v8766_v12  ;;  %v1772_v54 = vrot.slane %v1691_v53, %v8766_v12  ;;  %v1824_v43 = vmul.f32 %v1744_v10, %v13980_v7  ;;  %v13991_v22 = vld [vmem:[#allocation65_spill] sm:$0xff]  ;;  %v13995_v9 = vld [vmem:[#allocation72_spill] sm:$0xff] }
 0x34d   : > { %2137 = vst.msk [vmem:[%s8558_s10 + $0x1e0] sm:$0xff] %vm1077_vm1, %v7149_v13  ;;  %2138 = vst.msk [vmem:[%s8558_s10 + $0x1e8] sm:$0xff] %vm1077_vm1, %v7150_v39  ;;  %v1825_v25 = vmul.f32 %v1748_v49, %v13981_v36  ;;  %v1826_v56 = vmul.f32 %v1748_v49, %v13982_v29  ;;  %v1827_v45 = vmul.f32 %v1748_v49, %v13983_v42  ;;  %v13992_v39 = vld [vmem:[#allocation77_spill] sm:$0xff]  ;;  %v13996_v10 = vld [vmem:[#allocation83_spill] sm:$0xff]  ;;  %v9787_v29 = vpop.permute.xlu1 %2428  ;;  %v9789_v42 = vpop.permute.xlu0 %2462 }
 0x34e   : > { %2139 = vst.msk [vmem:[%s8558_s10 + $0x1f0] sm:$0xff] %vm1077_vm1, %v7151_v62  ;;  %2140 = vst.msk [vmem:[%s8558_s10 + $0x1f8] sm:$0xff] %vm1077_vm1, %v7152_v61  ;;  %v1828_v38 = vmul.f32 %v1748_v49, %v13984_v23  ;;  %v1829_v3 = vmul.f32 %v1752_v20, %v13985_v0  ;;  %v1830_v35 = vmul.f32 %v1752_v20, %v13986_v30  ;;  %v13993_v61 = vld [vmem:[#allocation58_spill] sm:$0xff]  ;;  %v13997_v24 = vld [vmem:[#allocation68_spill] sm:$0xff] }
 0x34f   : > { %13978 = vst [vmem:[#allocation51_spill] sm:$0xff] %v9743_v48  ;;  %13979 = vst [vmem:[#allocation50_spill] sm:$0xff] %v9745_v18  ;;  %v1831_v27 = vmul.f32 %v1752_v20, %v13987_v15  ;;  %v1832_v46 = vmul.f32 %v1752_v20, %v13988_v26  ;;  %v1833_v4 = vmul.f32 %v1756_v16, %v13989_v28  ;;  %v13998_v49 = vld [vmem:[#allocation67_spill] sm:$0xff]  ;;  %v13999_v53 = vld [vmem:[#allocation76_spill] sm:$0xff] }
 0x350   : > { %v1834_v11 = vmul.f32 %v1756_v16, %v13990_v37  ;;  %v1835_v13 = vmul.f32 %v1756_v16, %v13991_v22  ;;  %v1836_v62 = vmul.f32 %v1756_v16, %v13992_v39  ;;  %v1837_v32 = vmul.f32 %v1760_v8, %v13993_v61  ;;  %v14000_v16 = vld [vmem:[#allocation94_spill] sm:$0xff]  ;;  %v14001_v5 = vld [vmem:[#allocation71_spill] sm:$0xff]  ;;  %v14002_v36 = vld [vmem:[#allocation73_spill] sm:$0xff]  ;;  %14003 = vst [vmem:[#allocation62_spill] sm:$0xff] %v9787_v29 }
 0x351   : > { %v1838_v47 = vmul.f32 %v1760_v8, %v13994_v1  ;;  %v9764_v2 = vmul.f32 %v1760_v8, %v13995_v9  ;;  %v9767_v57 = vmul.f32 %v1760_v8, %v13996_v10  ;;  %v9770_v58 = vmul.f32 %v1764_v41, %v13997_v24  ;;  %14004 = vst [vmem:[#allocation74_spill] sm:$0xff] %v9789_v42  ;;  %v14005_v23 = vld [vmem:[#allocation82_spill] sm:$0xff]  ;;  %v3065_v22 = vld [vmem:[#allocation9 + $0x38] sm:$0xff]  ;;  %v3064_v39 = vld [vmem:[#allocation9 + $0x30] sm:$0xff] }
 0x352   : > { %v9773_v20 = vmul.f32 %v1764_v41, %v13998_v49  ;;  %v9776_v44 = vmul.f32 %v1764_v41, %v13999_v53  ;;  %v9779_v6 = vmul.f32 %v1764_v41, %v14000_v16  ;;  %v9782_v7 = vmul.f32 %v1768_v59, %v14001_v5  ;;  %v14006_v30 = vld [vmem:[#allocation98_spill] sm:$0xff]  ;;  %v14007_v41 = vld [vmem:[#allocation79_spill] sm:$0xff]  ;;  %v14009_v61 = vld [vmem:[#allocation93_spill] sm:$0xff]  ;;  %7526 = vmatprep.subr.mxu1 %v3065_v22 }
 0x353   : > { %v9785_v8 = vmul.f32 %v1768_v59, %v14002_v36  ;;  %v9792_v0 = vmul.f32 %v1768_v59, %v14005_v23  ;;  %v9795_v15 = vmul.f32 %v1768_v59, %v14006_v30  ;;  %v9798_v26 = vmul.f32 %v1772_v54, %v14007_v41  ;;  %v14008_v28 = vld [vmem:[#allocation78_spill] sm:$0xff]  ;;  %v14010_v9 = vld [vmem:[#allocation100_spill] sm:$0xff]  ;;  %v7844_v24 = vld [vmem:[%s8558_s10] sm:$0xff]  ;;  %7527 = vmatpush3.msra.mxu1 %v3065_v22 }
 0x354   : > { %v9801_v37 = vmul.f32 %v1772_v54, %v14008_v28  ;;  %v9804_v1 = vmul.f32 %v1772_v54, %v14009_v61  ;;  %v9807_v10 = vmul.f32 %v1772_v54, %v14010_v9  ;;  %v9810_v59 = vadd.f32 %v7844_v24, %v1821_v60  ;;  %v7845_v49 = vld [vmem:[%s8558_s10 + $0x8] sm:$0xff]  ;;  %v7846_v16 = vld [vmem:[%s8558_s10 + $0x10] sm:$0xff]  ;;  %v7847_v36 = vld [vmem:[%s8558_s10 + $0x18] sm:$0xff]  ;;  %7528 = vmatprep.subr.mxu1 %v3064_v39 }
 0x355   : > { %v9813_v53 = vadd.f32 %v7845_v49, %v1822_v17  ;;  %v9816_v5 = vadd.f32 %v7846_v16, %v1823_v21  ;;  %v9819_v23 = vadd.f32 %v7847_v36, %v1824_v43  ;;  %v7848_v54 = vld [vmem:[%s8558_s10 + $0x20] sm:$0xff]  ;;  %v7849_v60 = vld [vmem:[%s8558_s10 + $0x28] sm:$0xff]  ;;  %v7850_v28 = vld [vmem:[%s8558_s10 + $0x30] sm:$0xff]  ;;  %7529 = vmatpush3.msra.mxu1 %v3064_v39 }
 0x356   : > { %v9822_v30 = vadd.f32 %v7848_v54, %v1825_v25  ;;  %v9825_v41 = vadd.f32 %v7849_v60, %v1826_v56  ;;  %v3063_v17 = vld [vmem:[#allocation9 + $0x28] sm:$0xff]  ;;  %v9828_v61 = vadd.f32 %v7850_v28, %v1827_v45  ;;  %v7851_v21 = vld [vmem:[%s8558_s10 + $0x38] sm:$0xff]  ;;  %v7852_v43 = vld [vmem:[%s8558_s10 + $0x40] sm:$0xff] }
 0x357   : > { %v9831_v9 = vadd.f32 %v7851_v21, %v1828_v38  ;;  %v9834_v24 = vadd.f32 %v7852_v43, %v1829_v3  ;;  %v7853_v25 = vld [vmem:[%s8558_s10 + $0x48] sm:$0xff]  ;;  %v7854_v56 = vld [vmem:[%s8558_s10 + $0x50] sm:$0xff]  ;;  %v7855_v16 = vld [vmem:[%s8558_s10 + $0x58] sm:$0xff]  ;;  %7530 = vmatprep.subr.mxu1 %v3063_v17 }
 0x358   : > { %v9837_v49 = vadd.f32 %v7853_v25, %v1830_v35  ;;  %v9840_v22 = vadd.f32 %v7854_v56, %v1831_v27  ;;  %v9843_v45 = vadd.f32 %v7855_v16, %v1832_v46  ;;  %v7856_v36 = vld [vmem:[%s8558_s10 + $0x60] sm:$0xff]  ;;  %v7857_v38 = vld [vmem:[%s8558_s10 + $0x68] sm:$0xff]  ;;  %v7858_v3 = vld [vmem:[%s8558_s10 + $0x70] sm:$0xff]  ;;  %v9865_v25 = vpop.permute.xlu0 %2496  ;;  %7531 = vmatpush3.msra.mxu1 %v3063_v17 }
 0x359   : > { %v9846_v54 = vadd.f32 %v7856_v36, %v1833_v4  ;;  %v9849_v60 = vadd.f32 %v7857_v38, %v1834_v11  ;;  %v9852_v35 = vadd.f32 %v7858_v3, %v1835_v13  ;;  %v7859_v28 = vld [vmem:[%s8558_s10 + $0x78] sm:$0xff]  ;;  %v7860_v21 = vld [vmem:[%s8558_s10 + $0x80] sm:$0xff]  ;;  %v7861_v4 = vld [vmem:[%s8558_s10 + $0x88] sm:$0xff]  ;;  %v9863_v11 = vpop.permute.xlu1 %2492  ;;  %14012 = vst [vmem:[#allocation56_spill] sm:$0xff] %v9865_v25 }
 0x35a   : > { %v9855_v27 = vadd.f32 %v7859_v28, %v1836_v62  ;;  %v9858_v46 = vadd.f32 %v7860_v21, %v1837_v32  ;;  %v9861_v43 = vadd.f32 %v7861_v4, %v1838_v47  ;;  %14011 = vst [vmem:[#allocation57_spill] sm:$0xff] %v9863_v11  ;;  %v3062_v13 = vld [vmem:[#allocation9 + $0x20] sm:$0xff]  ;;  %v7862_v39 = vld [vmem:[%s8558_s10 + $0x90] sm:$0xff]  ;;  %v7863_v56 = vld [vmem:[%s8558_s10 + $0x98] sm:$0xff] }
 0x35b   : > { %v9869_v62 = vadd.f32 %v7862_v39, %v9764_v2  ;;  %v9873_v32 = vadd.f32 %v7863_v56, %v9767_v57  ;;  %v7864_v47 = vld [vmem:[%s8558_s10 + $0xa0] sm:$0xff]  ;;  %v7865_v36 = vld [vmem:[%s8558_s10 + $0xa8] sm:$0xff]  ;;  %v7866_v3 = vld [vmem:[%s8558_s10 + $0xb0] sm:$0xff]  ;;  %7532 = vmatprep.subr.mxu1 %v3062_v13 }
 0x35c   : > { %v9877_v16 = vadd.f32 %v7864_v47, %v9770_v58  ;;  %v9881_v38 = vadd.f32 %v7865_v36, %v9773_v20  ;;  %v9885_v2 = vadd.f32 %v7866_v3, %v9776_v44  ;;  %v7867_v28 = vld [vmem:[%s8558_s10 + $0xb8] sm:$0xff]  ;;  %v7868_v21 = vld [vmem:[%s8558_s10 + $0xc0] sm:$0xff]  ;;  %v7869_v4 = vld [vmem:[%s8558_s10 + $0xc8] sm:$0xff]  ;;  %7533 = vmatpush3.msra.mxu1 %v3062_v13  ;;  %v7093_v13 = vclamps-f32 %v9822_v30, 2.0 }
 0x35d   : > { %v9889_v57 = vadd.f32 %v7867_v28, %v9779_v6  ;;  %v9893_v58 = vadd.f32 %v7868_v21, %v9782_v7  ;;  %v9897_v20 = vadd.f32 %v7869_v4, %v9785_v8  ;;  %v7870_v17 = vld [vmem:[%s8558_s10 + $0xd0] sm:$0xff]  ;;  %v7871_v44 = vld [vmem:[%s8558_s10 + $0xd8] sm:$0xff]  ;;  %v7872_v6 = vld [vmem:[%s8558_s10 + $0xe0] sm:$0xff]  ;;  %v7091_v21 = vclamps-f32 %v9816_v5, 2.0  ;;  %v9937_v5 = vpop.permute.xlu1 %2314 }
 0x35e   : > { %v9901_v39 = vadd.f32 %v7870_v17, %v9792_v0  ;;  %v9905_v56 = vadd.f32 %v7871_v44, %v9795_v15  ;;  %v9909_v47 = vadd.f32 %v7872_v6, %v9798_v26  ;;  %v7873_v36 = vld [vmem:[%s8558_s10 + $0xe8] sm:$0xff]  ;;  %v7874_v8 = vld [vmem:[%s8558_s10 + $0xf0] sm:$0xff]  ;;  %v7875_v0 = vld [vmem:[%s8558_s10 + $0xf8] sm:$0xff]  ;;  %v7089_v15 = vclamps-f32 %v9810_v59, 2.0  ;;  %14013 = vst [vmem:[#allocation61_spill] sm:$0xff] %v9937_v5 }
 0x35f   : > { %v9913_v7 = vadd.f32 %v7873_v36, %v9801_v37  ;;  %v9917_v3 = vadd.f32 %v7874_v8, %v9804_v1  ;;  %v9921_v28 = vadd.f32 %v7875_v0, %v9807_v10  ;;  %v7090_v26 = vclamps-f32 %v9813_v53, 2.0  ;;  %2079 = vst.msk [vmem:[%s8558_s10 + $0x10] sm:$0xff] %vm1077_vm1, %v7091_v21  ;;  %2081 = vst.msk [vmem:[%s8558_s10 + $0x20] sm:$0xff] %vm1077_vm1, %v7093_v13  ;;  %v2199_v17 = vld [vmem:[%s8558_s10 + $0x150] sm:$0xff]  ;;  %v2206_v6 = vld [vmem:[%s8558_s10 + $0x188] sm:$0xff] }
 0x360   : > { %v7092_v37 = vclamps-f32 %v9819_v23, 2.0  ;;  %v7094_v1 = vclamps-f32 %v9825_v41, 2.0  ;;  %v7095_v4 = vclamps-f32 %v9828_v61, 2.0  ;;  %v7096_v10 = vclamps-f32 %v9831_v9, 2.0  ;;  %2077 = vst.msk [vmem:[%s8558_s10] sm:$0xff] %vm1077_vm1, %v7089_v15  ;;  %v9939_v23 = vpop.permute.xlu0 %2348  ;;  %v10039_v21 = vld [vmem:[#allocation9 + $0x60] sm:$0xff] }
 0x361   : > { %v7097_v59 = vclamps-f32 %v9834_v24, 2.0  ;;  %v7098_v53 = vclamps-f32 %v9837_v49, 2.0  ;;  %2078 = vst.msk [vmem:[%s8558_s10 + $0x8] sm:$0xff] %vm1077_vm1, %v7090_v26  ;;  %14014 = vst [vmem:[#allocation64_spill] sm:$0xff] %v9939_v23  ;;  %v7099_v30 = vclamps-f32 %v9840_v22, 2.0  ;;  %v7100_v41 = vclamps-f32 %v9843_v45, 2.0  ;;  %v10019_v8 = vpop.permute.xlu1 %2447 }
 0x362   : > { %v7101_v61 = vclamps-f32 %v9846_v54, 2.0  ;;  %v7102_v9 = vclamps-f32 %v9849_v60, 2.0  ;;  %2080 = vst.msk [vmem:[%s8558_s10 + $0x18] sm:$0xff] %vm1077_vm1, %v7092_v37  ;;  %2082 = vst.msk [vmem:[%s8558_s10 + $0x28] sm:$0xff] %vm1077_vm1, %v7094_v1  ;;  %v7103_v24 = vclamps-f32 %v9852_v35, 2.0  ;;  %v7104_v49 = vclamps-f32 %v9855_v27, 2.0 }
 0x363   : > { %v7105_v22 = vclamps-f32 %v9858_v46, 2.0  ;;  %v7106_v45 = vclamps-f32 %v9861_v43, 2.0  ;;  %2083 = vst.msk [vmem:[%s8558_s10 + $0x30] sm:$0xff] %vm1077_vm1, %v7095_v4  ;;  %2084 = vst.msk [vmem:[%s8558_s10 + $0x38] sm:$0xff] %vm1077_vm1, %v7096_v10  ;;  %v2197_v54 = vld [vmem:[%s8558_s10 + $0x140] sm:$0xff]  ;;  %v2198_v60 = vld [vmem:[%s8558_s10 + $0x148] sm:$0xff]  ;;  %v2567_v0 = vmul.f32 %v9433_v14, %v2199_v17  ;;  %v2574_v26 = vmul.f32 %v9438_v34, %v2206_v6 }
 0x364   : > { %2085 = vst.msk [vmem:[%s8558_s10 + $0x40] sm:$0xff] %vm1077_vm1, %v7097_v59  ;;  %2086 = vst.msk [vmem:[%s8558_s10 + $0x48] sm:$0xff] %vm1077_vm1, %v7098_v53  ;;  %v7107_v35 = vclamps-f32 %v9869_v62, 2.0  ;;  %v7108_v27 = vclamps-f32 %v9873_v32, 2.0  ;;  %v7109_v46 = vclamps-f32 %v9877_v16, 2.0  ;;  %v7110_v43 = vclamps-f32 %v9881_v38, 2.0 }
 0x365   : > { %2087 = vst.msk [vmem:[%s8558_s10 + $0x50] sm:$0xff] %vm1077_vm1, %v7099_v30  ;;  %2088 = vst.msk [vmem:[%s8558_s10 + $0x58] sm:$0xff] %vm1077_vm1, %v7100_v41  ;;  %v2200_v62 = vld [vmem:[%s8558_s10 + $0x158] sm:$0xff]  ;;  %v7111_v32 = vclamps-f32 %v9885_v2, 2.0  ;;  %v7112_v16 = vclamps-f32 %v9889_v57, 2.0  ;;  %v7113_v38 = vclamps-f32 %v9893_v58, 2.0 }
 0x366   : > { %2089 = vst.msk [vmem:[%s8558_s10 + $0x60] sm:$0xff] %vm1077_vm1, %v7101_v61  ;;  %2090 = vst.msk [vmem:[%s8558_s10 + $0x68] sm:$0xff] %vm1077_vm1, %v7102_v9  ;;  %v7114_v44 = vclamps-f32 %v9897_v20, 2.0  ;;  %v2205_v2 = vld [vmem:[%s8558_s10 + $0x180] sm:$0xff]  ;;  %v7115_v57 = vclamps-f32 %v9901_v39, 2.0  ;;  %v7116_v58 = vclamps-f32 %v9905_v56, 2.0 }
 0x367   : > { %2091 = vst.msk [vmem:[%s8558_s10 + $0x70] sm:$0xff] %vm1077_vm1, %v7103_v24  ;;  %2092 = vst.msk [vmem:[%s8558_s10 + $0x78] sm:$0xff] %vm1077_vm1, %v7104_v49  ;;  %v7117_v20 = vclamps-f32 %v9909_v47, 2.0  ;;  %v7118_v36 = vclamps-f32 %v9913_v7, 2.0  ;;  %v7119_v39 = vclamps-f32 %v9917_v3, 2.0  ;;  %v7120_v56 = vclamps-f32 %v9921_v28, 2.0  ;;  %v10021_v3 = vpop.permute.xlu0 %2481 }
 0x368   : > { %2093 = vst.msk [vmem:[%s8558_s10 + $0x80] sm:$0xff] %vm1077_vm1, %v7105_v22  ;;  %2094 = vst.msk [vmem:[%s8558_s10 + $0x88] sm:$0xff] %vm1077_vm1, %v7106_v45  ;;  %v2565_v47 = vmul.f32 %v9415_v40, %v2197_v54  ;;  %v2566_v7 = vmul.f32 %v9417_v19, %v2198_v60  ;;  %v2568_v28 = vmul.f32 %v9787_v29, %v2200_v62  ;;  %v10042_v13 = vld [vmem:[#allocation9 + $0x68] sm:$0xff]  ;;  %v2207_v4 = vld [vmem:[%s8558_s10 + $0x190] sm:$0xff] }
 0x369   : > { %2095 = vst.msk [vmem:[%s8558_s10 + $0x90] sm:$0xff] %vm1077_vm1, %v7107_v35  ;;  %2096 = vst.msk [vmem:[%s8558_s10 + $0x98] sm:$0xff] %vm1077_vm1, %v7108_v27  ;;  %v2573_v15 = vmul.f32 %v9435_v51, %v2205_v2  ;;  %v10046_v10 = vld [vmem:[#allocation9 + $0x70] sm:$0xff]  ;;  %v2638_v30 = vmul.f32 %v10042_v13, %v2574_v26  ;;  %v2213_v41 = vld [vmem:[%s8558_s10 + $0x1c0] sm:$0xff]  ;;  %v2575_v54 = vmul.f32 %v9789_v42, %v2207_v4 }
 0x36a   : > { %2097 = vst.msk [vmem:[%s8558_s10 + $0xa0] sm:$0xff] %vm1077_vm1, %v7109_v46  ;;  %2098 = vst.msk [vmem:[%s8558_s10 + $0xa8] sm:$0xff] %vm1077_vm1, %v7110_v43  ;;  %v2629_v37 = vmul.f32 %v10039_v21, %v2565_v47  ;;  %v2630_v1 = vmul.f32 %v10042_v13, %v2566_v7  ;;  %v2631_v59 = vmul.f32 %v10046_v10, %v2567_v0  ;;  %v10054_v24 = vld [vmem:[#allocation9 + $0x78] sm:$0xff]  ;;  %v2214_v22 = vld [vmem:[%s8558_s10 + $0x1c8] sm:$0xff] }
 0x36b   : > { %2099 = vst.msk [vmem:[%s8558_s10 + $0xb0] sm:$0xff] %vm1077_vm1, %v7111_v32  ;;  %2100 = vst.msk [vmem:[%s8558_s10 + $0xb8] sm:$0xff] %vm1077_vm1, %v7112_v16  ;;  %v2637_v53 = vmul.f32 %v10039_v21, %v2573_v15  ;;  %v2632_v49 = vmul.f32 %v10054_v24, %v2568_v28  ;;  %v2810_v43 = vsel %vm1077_vm1, %v2638_v30, 0.0  ;;  %v2581_v17 = vmul.f32 %v9863_v11, %v2213_v41  ;;  %v10066_v32 = vpop.permute.xlu1 %2511  ;;  %v10068_v16 = vpop.permute.xlu0 %2515  ;;  %v2189_v26 = vld [vmem:[%s8558_s10 + $0x100] sm:$0xff]  ;;  %v14059_v51 = vld [vmem:[#allocation140_spill] sm:$0xff] }
 0x36c   : > { %2101 = vst.msk [vmem:[%s8558_s10 + $0xc0] sm:$0xff] %vm1077_vm1, %v7113_v38  ;;  %2102 = vst.msk [vmem:[%s8558_s10 + $0xc8] sm:$0xff] %vm1077_vm1, %v7114_v44  ;;  %v2783_v61 = vsel %vm1077_vm1, %v2629_v37, 0.0  ;;  %v2784_v9 = vsel %vm1077_vm1, %v2630_v1, 0.0  ;;  %v2786_v27 = vsel %vm1077_vm1, %v2631_v59, 0.0  ;;  %v2582_v44 = vmul.f32 %v9865_v25, %v2214_v22  ;;  %v2201_v22 = vld [vmem:[%s8558_s10 + $0x160] sm:$0xff] }
 0x36d   : > { %14015 = vst [vmem:[#allocation70_spill] sm:$0xff] %v10019_v8  ;;  %14016 = vst [vmem:[#allocation75_spill] sm:$0xff] %v10021_v3  ;;  %v2785_v45 = vadd.f32 %v2784_v9, %v2783_v61  ;;  %v2809_v46 = vsel %vm1077_vm1, %v2637_v53, 0.0  ;;  %v2645_v0 = vmul.f32 %v10039_v21, %v2581_v17  ;;  %v10101_v17 = vmul.f32 %v9401_v52, %v2189_v26  ;;  %v2167_v42 = vld [vmem:[%s8558_s10 + $0x50] sm:$0xff]  ;;  %v14058_v34 = vld [vmem:[#allocation133_spill] sm:$0xff] }
 0x36e   : > { %2103 = vst.msk [vmem:[%s8558_s10 + $0xd0] sm:$0xff] %vm1077_vm1, %v7115_v57  ;;  %2104 = vst.msk [vmem:[%s8558_s10 + $0xd8] sm:$0xff] %vm1077_vm1, %v7116_v58  ;;  %v2788_v58 = vsel %vm1077_vm1, %v2632_v49, 0.0  ;;  %v2811_v7 = vadd.f32 %v2810_v43, %v2809_v46  ;;  %v2646_v59 = vmul.f32 %v10042_v13, %v2582_v44  ;;  %v2202_v46 = vld [vmem:[%s8558_s10 + $0x168] sm:$0xff]  ;;  %v2203_v43 = vld [vmem:[%s8558_s10 + $0x170] sm:$0xff] }
 0x36f   : > { %2105 = vst.msk [vmem:[%s8558_s10 + $0xe0] sm:$0xff] %vm1077_vm1, %v7117_v20  ;;  %2106 = vst.msk [vmem:[%s8558_s10 + $0xe8] sm:$0xff] %vm1077_vm1, %v7118_v36  ;;  %v2173_v60 = vld [vmem:[%s8558_s10 + $0x80] sm:$0xff]  ;;  %v2174_v35 = vld [vmem:[%s8558_s10 + $0x88] sm:$0xff]  ;;  %v2787_v38 = vadd.f32 %v2786_v27, %v2785_v45  ;;  %v10093_v45 = vpop.permute.xlu1 %2333  ;;  %v2835_v44 = vsel %vm1077_vm1, %v2645_v0, 0.0 }
 0x370   : > { %2107 = vst.msk [vmem:[%s8558_s10 + $0xf0] sm:$0xff] %vm1077_vm1, %v7119_v39  ;;  %2108 = vst.msk [vmem:[%s8558_s10 + $0xf8] sm:$0xff] %vm1077_vm1, %v7120_v56  ;;  %v2175_v62 = vld [vmem:[%s8558_s10 + $0x90] sm:$0xff]  ;;  %v2541_v2 = vmul.f32 %v9473_v63, %v2173_v60  ;;  %v2542_v6 = vmul.f32 %v9475_v31, %v2174_v35  ;;  %v2176_v20 = vld [vmem:[%s8558_s10 + $0x98] sm:$0xff]  ;;  %v2639_v56 = vmul.f32 %v10046_v10, %v2575_v54  ;;  %v10095_v54 = vpop.permute.xlu0 %2367 }
 0x371   : > { %14017 = vst [vmem:[#allocation81_spill] sm:$0xff] %v10066_v32  ;;  %14018 = vst [vmem:[#allocation80_spill] sm:$0xff] %v10068_v16  ;;  %v2543_v36 = vmul.f32 %v9487_v55, %v2175_v62  ;;  %v2789_v39 = vadd.f32 %v2788_v58, %v2787_v38  ;;  %v2544_v53 = vmul.f32 %v9937_v5, %v2176_v20  ;;  %v2836_v58 = vsel %vm1077_vm1, %v2646_v59, 0.0  ;;  %v14065_v14 = vld [vmem:[#allocation132_spill] sm:$0xff] }
 0x372   : > { %v2605_v28 = vmul.f32 %v10039_v21, %v2541_v2  ;;  %v2606_v15 = vmul.f32 %v10042_v13, %v2542_v6  ;;  %14019 = vst [vmem:[#allocation105_spill] sm:$0xff] %v10093_v45  ;;  %14020 = vst [vmem:[#allocation90_spill] sm:$0xff] %v10095_v54  ;;  %v2812_v35 = vsel %vm1077_vm1, %v2639_v56, 0.0  ;;  %v14021_v2 = vld [vmem:[#allocation147_spill] sm:$0xff]  ;;  %v14069_v40 = vld [vmem:[#allocation136_spill] sm:$0xff] }
 0x373   : > { %v2181_v47 = vld [vmem:[%s8558_s10 + $0xc0] sm:$0xff]  ;;  %v2790_v4 = vrot.slane %v2789_v39, 4  ;;  %v2182_v30 = vld [vmem:[%s8558_s10 + $0xc8] sm:$0xff]  ;;  %v2607_v41 = vmul.f32 %v10046_v10, %v2543_v36  ;;  %v10104_v38 = vadd.f32 %v2812_v35, %v2811_v7  ;;  %v2608_v20 = vmul.f32 %v10054_v24, %v2544_v53  ;;  %v2204_v36 = vld [vmem:[%s8558_s10 + $0x178] sm:$0xff] }
 0x374   : > { %v2705_v61 = vsel %vm1077_vm1, %v2605_v28, 0.0  ;;  %v2706_v9 = vsel %vm1077_vm1, %v2606_v15, 0.0  ;;  %v2549_v49 = vmul.f32 %v9493_v33, %v2181_v47  ;;  %v2550_v6 = vmul.f32 %v14021_v2, %v2182_v30  ;;  %v14023_v7 = vld [vmem:[#allocation117_spill] sm:$0xff]  ;;  %v14028_v2 = vld [vmem:[#allocation126_spill] sm:$0xff] }
 0x375   : > { %v2791_v60 = vadd.f32 %v2790_v4, %v2789_v39  ;;  %v2707_v27 = vadd.f32 %v2706_v9, %v2705_v61  ;;  %v14022_v39 = vld [vmem:[#allocation118_spill] sm:$0xff]  ;;  %v2708_v47 = vsel %vm1077_vm1, %v2607_v41, 0.0  ;;  %v2183_v28 = vld [vmem:[%s8558_s10 + $0xd0] sm:$0xff]  ;;  %v2570_v26 = vmul.f32 %v14023_v7, %v2202_v46  ;;  %v14063_v7 = vld [vmem:[#allocation141_spill] sm:$0xff] }
 0x376   : > { %v2185_v57 = vld [vmem:[%s8558_s10 + $0xe0] sm:$0xff]  ;;  %v2186_v1 = vld [vmem:[%s8558_s10 + $0xe8] sm:$0xff]  ;;  %v2569_v56 = vmul.f32 %v14022_v39, %v2201_v22  ;;  %v2613_v15 = vmul.f32 %v10039_v21, %v2549_v49  ;;  %v2614_v59 = vmul.f32 %v10042_v13, %v2550_v6  ;;  %v2572_v9 = vmul.f32 %v10019_v8, %v2204_v36  ;;  %v10124_v49 = vpop.permute.xlu1 %2466  ;;  %v10126_v22 = vpop.permute.xlu0 %2500 }
 0x377   : > { %v2553_v37 = vmul.f32 %v9743_v48, %v2185_v57  ;;  %v2554_v62 = vmul.f32 %v9745_v18, %v2186_v1  ;;  %v14024_v1 = vld [vmem:[#allocation124_spill] sm:$0xff]  ;;  %v2792_v4 = vrot.slane %v2791_v60, 2  ;;  %v2634_v41 = vmul.f32 %v10042_v13, %v2570_v26  ;;  %14025 = vst [vmem:[#allocation89_spill] sm:$0xff] %v10124_v49  ;;  %14026 = vst [vmem:[#allocation101_spill] sm:$0xff] %v10126_v22  ;;  %v2210_v6 = vld [vmem:[%s8558_s10 + $0x1a8] sm:$0xff] }
 0x378   : > { %v2571_v0 = vmul.f32 %v14024_v1, %v2203_v43  ;;  %v2633_v53 = vmul.f32 %v10039_v21, %v2569_v56  ;;  %v2710_v46 = vsel %vm1077_vm1, %v2608_v20, 0.0  ;;  %v2551_v43 = vmul.f32 %v9939_v23, %v2183_v28  ;;  %v2211_v56 = vld [vmem:[%s8558_s10 + $0x1b0] sm:$0xff]  ;;  %v2177_v18 = vld [vmem:[%s8558_s10 + $0xa0] sm:$0xff]  ;;  %v2218_v33 = vld [vmem:[%s8558_s10 + $0x1e8] sm:$0xff] }
 0x379   : > { %v2617_v57 = vmul.f32 %v10039_v21, %v2553_v37  ;;  %v2709_v37 = vadd.f32 %v2708_v47, %v2707_v27  ;;  %v2618_v30 = vmul.f32 %v10042_v13, %v2554_v62  ;;  %v10129_v27 = vadd.f32 %v2836_v58, %v2835_v44  ;;  %v2209_v62 = vld [vmem:[%s8558_s10 + $0x1a0] sm:$0xff] }
 0x37a   : > { %v2635_v61 = vmul.f32 %v10046_v10, %v2571_v0  ;;  %v2731_v47 = vsel %vm1077_vm1, %v2613_v15, 0.0  ;;  %v2796_v36 = vsel %vm1077_vm1, %v2633_v53, 0.0  ;;  %v2797_v26 = vsel %vm1077_vm1, %v2634_v41, 0.0  ;;  %v14027_v23 = vld [vmem:[#allocation125_spill] sm:$0xff] }
 0x37b   : > { %v2744_v35 = vsel %vm1077_vm1, %v2617_v57, 0.0  ;;  %v2636_v0 = vmul.f32 %v10054_v24, %v2572_v9  ;;  %v2217_v57 = vld [vmem:[%s8558_s10 + $0x1e0] sm:$0xff]  ;;  %v10141_v44 = vadd.f32 %v2792_v4, %v2791_v60  ;;  %v10143_v58 = vadd.f32 %v2710_v46, %v2709_v37 }
 0x37c   : > { %v2732_v20 = vsel %vm1077_vm1, %v2614_v59, 0.0  ;;  %v2798_v28 = vadd.f32 %v2797_v26, %v2796_v36  ;;  %v2799_v48 = vsel %vm1077_vm1, %v2635_v61, 0.0  ;;  %v2577_v15 = vmul.f32 %v14027_v23, %v2209_v62  ;;  %v2178_v59 = vld [vmem:[%s8558_s10 + $0xa8] sm:$0xff]  ;;  %v10162_v26 = vpop.permute.xlu0 %2485  ;;  %v2165_v23 = vld [vmem:[%s8558_s10 + $0x40] sm:$0xff] }
 0x37d   : > { %v2578_v53 = vmul.f32 %v14028_v2, %v2210_v6  ;;  %v2579_v41 = vmul.f32 %v10021_v3, %v2211_v56  ;;  %v2745_v9 = vsel %vm1077_vm1, %v2618_v30, 0.0  ;;  %v2615_v60 = vmul.f32 %v10046_v10, %v2551_v43  ;;  %v14029_v6 = vld [vmem:[#allocation143_spill] sm:$0xff]  ;;  %v10160_v56 = vpop.permute.xlu1 %2352  ;;  %14031 = vst [vmem:[#allocation86_spill] sm:$0xff] %v10162_v26  ;;  %v2164_v3 = vld [vmem:[%s8558_s10 + $0x38] sm:$0xff] }
 0x37e   : > { %v2800_v4 = vadd.f32 %v2799_v48, %v2798_v28  ;;  %v2585_v37 = vmul.f32 %v10066_v32, %v2217_v57  ;;  %v2801_v46 = vsel %vm1077_vm1, %v2636_v0, 0.0  ;;  %v2641_v61 = vmul.f32 %v10039_v21, %v2577_v15  ;;  %14030 = vst [vmem:[#allocation104_spill] sm:$0xff] %v10160_v56  ;;  %v2179_v57 = vld [vmem:[%s8558_s10 + $0xb0] sm:$0xff]  ;;  %v2180_v28 = vld [vmem:[%s8558_s10 + $0xb8] sm:$0xff] }
 0x37f   : > { %v2642_v62 = vmul.f32 %v10042_v13, %v2578_v53  ;;  %v2545_v36 = vmul.f32 %v14029_v6, %v2177_v18  ;;  %v2733_v30 = vadd.f32 %v2732_v20, %v2731_v47  ;;  %v2643_v43 = vmul.f32 %v10046_v10, %v2579_v41  ;;  %v14032_v18 = vld [vmem:[#allocation144_spill] sm:$0xff]  ;;  %v14033_v41 = vld [vmem:[#allocation150_spill] sm:$0xff] }
 0x380   : > { %v2802_v5 = vadd.f32 %v2801_v46, %v2800_v4  ;;  %v2586_v48 = vmul.f32 %v10068_v16, %v2218_v33  ;;  %v10168_v0 = vadd.f32 %v2745_v9, %v2744_v35  ;;  %v2546_v6 = vmul.f32 %v14032_v18, %v2178_v59  ;;  %v2187_v46 = vld [vmem:[%s8558_s10 + $0xf0] sm:$0xff]  ;;  %v10289_v32 = vld [vmem:[%s8558_s10 + $0x138] sm:$0xff] }
 0x381   : > { %v2822_v31 = vsel %vm1077_vm1, %v2641_v61, 0.0  ;;  %v2823_v47 = vsel %vm1077_vm1, %v2642_v62, 0.0  ;;  %v2649_v20 = vmul.f32 %v10039_v21, %v2585_v37  ;;  %v2734_v33 = vsel %vm1077_vm1, %v2615_v60, 0.0  ;;  %14048 = vst [vmem:[#allocation45_spill] sm:$0xff] %v10289_v32 }
 0x382   : > { %v2803_v55 = vrot.slane %v2802_v5, 4  ;;  %v2547_v4 = vmul.f32 %v14033_v41, %v2179_v57  ;;  %v2548_v35 = vmul.f32 %v10093_v45, %v2180_v28  ;;  %v2609_v9 = vmul.f32 %v10039_v21, %v2545_v36  ;;  %v2208_v41 = vld [vmem:[%s8558_s10 + $0x198] sm:$0xff]  ;;  %v10187_v28 = vpop.permute.xlu1 %2519  ;;  %v10189_v36 = vpop.permute.xlu0 %2371 }
 0x383   : > { %v2735_v53 = vadd.f32 %v2734_v33, %v2733_v30  ;;  %v2825_v61 = vsel %vm1077_vm1, %v2643_v43, 0.0  ;;  %v2650_v15 = vmul.f32 %v10042_v13, %v2586_v48  ;;  %v2824_v62 = vadd.f32 %v2823_v47, %v2822_v31  ;;  %14034 = vst [vmem:[#allocation84_spill] sm:$0xff] %v10187_v28  ;;  %14035 = vst [vmem:[#allocation95_spill] sm:$0xff] %v10189_v36  ;;  %v2215_v43 = vld [vmem:[%s8558_s10 + $0x1d0] sm:$0xff] }
 0x384   : > { %v2804_v59 = vadd.f32 %v2803_v55, %v2802_v5  ;;  %v2610_v37 = vmul.f32 %v10042_v13, %v2546_v6  ;;  %v2611_v60 = vmul.f32 %v10046_v10, %v2547_v4  ;;  %v2718_v57 = vsel %vm1077_vm1, %v2609_v9, 0.0  ;;  %v2184_v6 = vld [vmem:[%s8558_s10 + $0xd8] sm:$0xff] }
 0x385   : > { %v2848_v55 = vsel %vm1077_vm1, %v2649_v20, 0.0  ;;  %v2555_v5 = vmul.f32 %v10095_v54, %v2187_v46  ;;  %v2576_v31 = vmul.f32 %v10124_v49, %v2208_v41  ;;  %v2612_v48 = vmul.f32 %v10054_v24, %v2548_v35  ;;  %v2212_v46 = vld [vmem:[%s8558_s10 + $0x1b8] sm:$0xff]  ;;  %v2219_v54 = vld [vmem:[%s8558_s10 + $0x1f0] sm:$0xff]  ;;  %v2166_v49 = vld [vmem:[%s8558_s10 + $0x48] sm:$0xff] }
 0x386   : > { %v2805_v30 = vrot.slane %v2804_v59, 2  ;;  %v2719_v47 = vsel %vm1077_vm1, %v2610_v37, 0.0  ;;  %v2583_v33 = vmul.f32 %v10126_v22, %v2215_v43  ;;  %v2552_v4 = vmul.f32 %v10160_v56, %v2184_v6  ;;  %v14055_v22 = vld [vmem:[#allocation123_spill] sm:$0xff] }
 0x387   : > { %v2849_v9 = vsel %vm1077_vm1, %v2650_v15, 0.0  ;;  %v2720_v45 = vadd.f32 %v2719_v47, %v2718_v57  ;;  %v2619_v18 = vmul.f32 %v10046_v10, %v2555_v5  ;;  %v2640_v20 = vmul.f32 %v10054_v24, %v2576_v31  ;;  %v10214_v47 = vpop.permute.xlu1 %2504 }
 0x388   : > { %v2721_v41 = vsel %vm1077_vm1, %v2611_v60, 0.0  ;;  %v2616_v63 = vmul.f32 %v10054_v24, %v2552_v4  ;;  %v2580_v35 = vmul.f32 %v10162_v26, %v2212_v46  ;;  %v2587_v37 = vmul.f32 %v10187_v28, %v2219_v54  ;;  %14036 = vst [vmem:[#allocation88_spill] sm:$0xff] %v10214_v47  ;;  %v10216_v4 = vpop.permute.xlu0 %2523  ;;  %v10286_v28 = vld [vmem:[%s8558_s10 + $0x130] sm:$0xff]  ;;  %v2162_v26 = vld [vmem:[%s8558_s10 + $0x28] sm:$0xff] }
 0x389   : > { %v2806_v43 = vadd.f32 %v2805_v30, %v2804_v59  ;;  %v2826_v6 = vadd.f32 %v2825_v61, %v2824_v62  ;;  %v2722_v56 = vadd.f32 %v2721_v41, %v2720_v45  ;;  %v2814_v15 = vsel %vm1077_vm1, %v2640_v20, 0.0  ;;  %14037 = vst [vmem:[#allocation97_spill] sm:$0xff] %v10216_v4  ;;  %v2188_v62 = vld [vmem:[%s8558_s10 + $0xf8] sm:$0xff]  ;;  %14047 = vst [vmem:[#allocation102_spill] sm:$0xff] %v10286_v28 }
 0x38a   : > { %v2723_v57 = vsel %vm1077_vm1, %v2612_v48, 0.0  ;;  %v2815_v5 = vadd.f32 %v2814_v15, %v10104_v38  ;;  %v2647_v60 = vmul.f32 %v10046_v10, %v2583_v33  ;;  %v2736_v31 = vsel %vm1077_vm1, %v2616_v63, 0.0  ;;  %v10224_v33 = vld [vmem:[%s8558_s10 + $0x1d8] sm:$0xff] }
 0x38b   : > { %v2850_v54 = vadd.f32 %v2849_v9, %v2848_v55  ;;  %v2724_v59 = vadd.f32 %v2723_v57, %v2722_v56  ;;  %v2747_v45 = vsel %vm1077_vm1, %v2619_v18, 0.0  ;;  %v2737_v61 = vadd.f32 %v2736_v31, %v2735_v53  ;;  %14038 = vst [vmem:[#allocation87_spill] sm:$0xff] %v10224_v33  ;;  %v10227_v63 = vld [vmem:[%s8558_s10 + $0x1f8] sm:$0xff] }
 0x38c   : > { %v2816_v30 = vrot.slane %v2815_v5, 4  ;;  %v2644_v48 = vmul.f32 %v10054_v24, %v2580_v35  ;;  %v2651_v20 = vmul.f32 %v10046_v10, %v2587_v37  ;;  %v2556_v38 = vmul.f32 %v10189_v36, %v2188_v62  ;;  %14039 = vst [vmem:[#allocation85_spill] sm:$0xff] %v10227_v63  ;;  %v10240_v37 = vld [vmem:[%s13897_s12] ss:$0 sm:$0xff] }
 0x38d   : > { %v2807_v46 = vrot.slane %v2806_v43, 1  ;;  %v2748_v41 = vadd.f32 %v2747_v45, %v10168_v0  ;;  %v2584_v56 = vmul.f32 %v10214_v47, %v10224_v33  ;;  %v2588_v53 = vmul.f32 %v10216_v4, %v10227_v63  ;;  %v10260_v63 = vld [vmem:[%s8558_s10 + $0x108] sm:$0xff] }
 0x38e   : > { %v2817_v18 = vadd.f32 %v2816_v30, %v2815_v5  ;;  %v2838_v55 = vsel %vm1077_vm1, %v2647_v60, 0.0  ;;  %v2827_v9 = vsel %vm1077_vm1, %v2644_v48, 0.0  ;;  %v2620_v35 = vmul.f32 %v10054_v24, %v2556_v38  ;;  %v7525_v30 = vpop.f32.mrf.mxu0  ;;  %14041 = vst [vmem:[#allocation96_spill] sm:$0xff] %v10260_v63  ;;  %v10283_v4 = vld [vmem:[%s8558_s10 + $0x128] sm:$0xff] }
 0x38f   : > { %v2725_v15 = vrot.slane %v2724_v59, 4  ;;  %v2738_v0 = vrot.slane %v2737_v61, 4  ;;  %v2828_v57 = vadd.f32 %v2827_v9, %v2826_v6  ;;  %v2851_v31 = vsel %vm1077_vm1, %v2651_v20, 0.0  ;;  %14046 = vst [vmem:[#allocation99_spill] sm:$0xff] %v10283_v4 }
 0x390   : > { %v2818_v5 = vrot.slane %v2817_v18, 2  ;;  %v2749_v60 = vsel %vm1077_vm1, %v2620_v35, 0.0  ;;  %v2648_v45 = vmul.f32 %v10054_v24, %v2584_v56  ;;  %v2652_v62 = vmul.f32 %v10054_v24, %v2588_v53 }
 0x391   : > { %v14040_v48 = vrot.slane %v10141_v44, 1  ;;  %v2839_v6 = vadd.f32 %v2838_v55, %v10129_v27  ;;  %v2829_v9 = vrot.slane %v2828_v57, 4  ;;  %v10253_v20 = vadd.f32 %v7525_v30, %v10240_v37 }
 0x392   : > { %v2852_v36 = vadd.f32 %v2851_v31, %v2850_v54  ;;  %v10255_v35 = vadd.f32 %v2749_v60, %v2748_v41  ;;  %v2840_v56 = vsel %vm1077_vm1, %v2648_v45, 0.0  ;;  %v2853_v53 = vsel %vm1077_vm1, %v2652_v62, 0.0  ;;  %v10276_v60 = vld [vmem:[%s8558_s10 + $0x120] sm:$0xff] }
 0x393   : > { %v10249_v38 = vadd.f32 %v14040_v48, %v10141_v44  ;;  %v10263_v44 = vld [vmem:[%s8558_s10 + $0x110] sm:$0xff]  ;;  %v10266_v48 = vld [vmem:[%s8558_s10 + $0x118] sm:$0xff]  ;;  %v14044_v27 = vrot.slane %v10143_v58, 4  ;;  %v10273_v54 = vadd.f32 %v2807_v46, %v2806_v43  ;;  %v2819_v41 = vadd.f32 %v2818_v5, %v2817_v18  ;;  %14045 = vst [vmem:[#allocation91_spill] sm:$0xff] %v10276_v60 }
 0x394   : > { %14042 = vst [vmem:[#allocation103_spill] sm:$0xff] %v10263_v44  ;;  %14043 = vst [vmem:[#allocation92_spill] sm:$0xff] %v10266_v48  ;;  %v2830_v31 = vadd.f32 %v2829_v9, %v2828_v57  ;;  %v10278_v45 = vadd.f32 %v2725_v15, %v2724_v59  ;;  %v10280_v62 = vadd.f32 %v2738_v0, %v2737_v61  ;;  %v14050_v46 = vld [vmem:[#allocation116_spill] sm:$0xff]  ;;  %v14051_v59 = vld [vmem:[#allocation122_spill] sm:$0xff] }
 0x395   : > { %v10271_v55 = vadd.f32 %v14044_v27, %v10143_v58  ;;  %v2841_v30 = vadd.f32 %v2840_v56, %v2839_v6  ;;  %v2854_v33 = vadd.f32 %v2853_v53, %v2852_v36  ;;  %v14049_v58 = vld [vmem:[#allocation110_spill] sm:$0xff]  ;;  %v2559_v18 = vmul.f32 %v14050_v46, %v10263_v44  ;;  %v14052_v57 = vld [vmem:[#allocation111_spill] sm:$0xff]  ;;  %v14053_v56 = vld [vmem:[#allocation112_spill] sm:$0xff] }
 0x396   : > { %v2831_v16 = vrot.slane %v2830_v31, 2  ;;  %v2558_v43 = vmul.f32 %v14049_v58, %v10260_v63  ;;  %v2560_v15 = vmul.f32 %v14051_v59, %v10266_v48  ;;  %v2561_v5 = vmul.f32 %v14052_v57, %v10276_v60  ;;  %v14054_v27 = vld [vmem:[#allocation115_spill] sm:$0xff] }
 0x397   : > { %v2842_v0 = vrot.slane %v2841_v30, 4  ;;  %v2855_v36 = vrot.slane %v2854_v33, 4  ;;  %v2820_v6 = vrot.slane %v2819_v41, 1  ;;  %v2562_v53 = vmul.f32 %v14053_v56, %v10283_v4 }
 0x398   : > { %v2832_v9 = vadd.f32 %v2831_v16, %v2830_v31  ;;  %v2563_v63 = vmul.f32 %v14054_v27, %v10286_v28  ;;  %v2564_v48 = vmul.f32 %v14055_v22, %v10289_v32  ;;  %v2621_v61 = vmul.f32 %v10039_v21, %v10101_v17  ;;  %v2157_v28 = vld [vmem:[%s8558_s10] sm:$0xff]  ;;  %v14070_v27 = vld [vmem:[#allocation142_spill] sm:$0xff] }
 0x399   : > { %v2843_v47 = vadd.f32 %v2842_v0, %v2841_v30  ;;  %v2856_v44 = vadd.f32 %v2855_v36, %v2854_v33  ;;  %v2622_v60 = vmul.f32 %v10042_v13, %v2558_v43  ;;  %v2623_v16 = vmul.f32 %v10046_v10, %v2559_v18 }
 0x39a   : > { %v2833_v25 = vrot.slane %v2832_v9, 1  ;;  %v2624_v31 = vmul.f32 %v10054_v24, %v2560_v15  ;;  %v2625_v30 = vmul.f32 %v10039_v21, %v2561_v5  ;;  %v2626_v33 = vmul.f32 %v10042_v13, %v2562_v53  ;;  %v2158_v53 = vld [vmem:[%s8558_s10 + $0x8] sm:$0xff] }
 0x39b   : > { %v2844_v4 = vrot.slane %v2843_v47, 2  ;;  %v2857_v11 = vrot.slane %v2856_v44, 2  ;;  %v2627_v0 = vmul.f32 %v10046_v10, %v2563_v63  ;;  %v2628_v17 = vmul.f32 %v10054_v24, %v2564_v48 }
 0x39c   : > { %v2757_v36 = vsel %vm1077_vm1, %v2621_v61, 0.0  ;;  %v2758_v43 = vsel %vm1077_vm1, %v2622_v60, 0.0  ;;  %v10317_v32 = vadd.f32 %v2820_v6, %v2819_v41  ;;  %v2760_v5 = vsel %vm1077_vm1, %v2623_v16, 0.0  ;;  %v2159_v41 = vld [vmem:[%s8558_s10 + $0x10] sm:$0xff] }
 0x39d   : > { %v2845_v18 = vadd.f32 %v2844_v4, %v2843_v47  ;;  %v2759_v15 = vadd.f32 %v2758_v43, %v2757_v36  ;;  %v2762_v63 = vsel %vm1077_vm1, %v2624_v31, 0.0  ;;  %v2770_v48 = vsel %vm1077_vm1, %v2625_v30, 0.0  ;;  %v2160_v36 = vld [vmem:[%s8558_s10 + $0x18] sm:$0xff]  ;;  %v2161_v43 = vld [vmem:[%s8558_s10 + $0x20] sm:$0xff] }
 0x39e   : > { %v2771_v61 = vsel %vm1077_vm1, %v2626_v33, 0.0  ;;  %v2773_v60 = vsel %vm1077_vm1, %v2627_v0, 0.0  ;;  %v2775_v4 = vsel %vm1077_vm1, %v2628_v17, 0.0  ;;  %v10331_v31 = vadd.f32 %v2833_v25, %v2832_v9  ;;  %v2163_v33 = vld [vmem:[%s8558_s10 + $0x30] sm:$0xff] }
 0x39f   : > { %v2761_v6 = vadd.f32 %v2760_v5, %v2759_v15  ;;  %v2772_v47 = vadd.f32 %v2771_v61, %v2770_v48  ;;  %v2846_v16 = vrot.slane %v2845_v18, 1  ;;  %v2858_v30 = vadd.f32 %v2857_v11, %v2856_v44  ;;  %v14056_v0 = vld [vmem:[#allocation127_spill] sm:$0xff]  ;;  %v14057_v15 = vld [vmem:[#allocation128_spill] sm:$0xff]  ;;  %v2169_v44 = vld [vmem:[%s8558_s10 + $0x60] sm:$0xff] }
 0x3a0   : > { %v2525_v2 = vmul.f32 %v14056_v0, %v2157_v28  ;;  %v2526_v5 = vmul.f32 %v14057_v15, %v2158_v53  ;;  %v2527_v25 = vmul.f32 %v14058_v34, %v2159_v41  ;;  %v2168_v11 = vld [vmem:[%s8558_s10 + $0x58] sm:$0xff]  ;;  %v2528_v8 = vmul.f32 %v14059_v51, %v2160_v36  ;;  %v14060_v28 = vld [vmem:[#allocation129_spill] sm:$0xff]  ;;  %v14061_v53 = vld [vmem:[#allocation130_spill] sm:$0xff] }
 0x3a1   : > { %v2763_v48 = vadd.f32 %v2762_v63, %v2761_v6  ;;  %v2774_v17 = vadd.f32 %v2773_v60, %v2772_v47  ;;  %v10337_v61 = vadd.f32 %v2846_v16, %v2845_v18  ;;  %v2859_v9 = vrot.slane %v2858_v30, 1  ;;  %v2170_v60 = vld [vmem:[%s8558_s10 + $0x68] sm:$0xff]  ;;  %v2171_v47 = vld [vmem:[%s8558_s10 + $0x70] sm:$0xff]  ;;  %v2172_v18 = vld [vmem:[%s8558_s10 + $0x78] sm:$0xff] }
 0x3a2   : > { %v2529_v0 = vmul.f32 %v14060_v28, %v2161_v43  ;;  %v2530_v15 = vmul.f32 %v14061_v53, %v2162_v26  ;;  %v14062_v16 = vld [vmem:[#allocation134_spill] sm:$0xff]  ;;  %v2532_v39 = vmul.f32 %v14063_v7, %v2164_v3  ;;  %v14064_v41 = vld [vmem:[#allocation131_spill] sm:$0xff]  ;;  %v2534_v19 = vmul.f32 %v14065_v14, %v2166_v49  ;;  %v14066_v36 = vld [vmem:[#allocation137_spill] sm:$0xff] }
 0x3a3   : > { %v2764_v63 = vrot.slane %v2763_v48, 4  ;;  %v2776_v6 = vadd.f32 %v2775_v4, %v2774_v17  ;;  %v2531_v1 = vmul.f32 %v14062_v16, %v2163_v33  ;;  %v10353_v29 = vadd.f32 %v2859_v9, %v2858_v30  ;;  %v14067_v26 = vld [vmem:[#allocation146_spill] sm:$0xff]  ;;  %v14068_v4 = vld [vmem:[#allocation135_spill] sm:$0xff]  ;;  %v14071_v16 = vld [vmem:[#allocation149_spill] sm:$0xff] }
 0x3a4   : > { %v2533_v34 = vmul.f32 %v14064_v41, %v2165_v23  ;;  %v2535_v51 = vmul.f32 %v14066_v36, %v2167_v42  ;;  %v2536_v53 = vmul.f32 %v14067_v26, %v2168_v11  ;;  %v2537_v17 = vmul.f32 %v14068_v4, %v2169_v44 }
 0x3a5   : > { %v2765_v43 = vadd.f32 %v2764_v63, %v2763_v48  ;;  %v2777_v28 = vrot.slane %v2776_v6, 4  ;;  %v2538_v22 = vmul.f32 %v14069_v40, %v2170_v60  ;;  %v2539_v33 = vmul.f32 %v14070_v27, %v2171_v47 }
 0x3a6   : > { %v2540_v3 = vmul.f32 %v14071_v16, %v2172_v18  ;;  %v2589_v30 = vmul.f32 %v10039_v21, %v2525_v2  ;;  %v2590_v49 = vmul.f32 %v10042_v13, %v2526_v5  ;;  %v2591_v42 = vmul.f32 %v10046_v10, %v2527_v25 }
 0x3a7   : > { %v2766_v9 = vrot.slane %v2765_v43, 2  ;;  %v2778_v23 = vadd.f32 %v2777_v28, %v2776_v6  ;;  %v2592_v48 = vmul.f32 %v10054_v24, %v2528_v8  ;;  %v2593_v11 = vmul.f32 %v10039_v21, %v2529_v0 }
 0x3a8   : > { %v2594_v44 = vmul.f32 %v10042_v13, %v2530_v15  ;;  %v2595_v63 = vmul.f32 %v10046_v10, %v2531_v1  ;;  %v2596_v18 = vmul.f32 %v10054_v24, %v2532_v39  ;;  %v2597_v2 = vmul.f32 %v10039_v21, %v2533_v34 }
 0x3a9   : > { %v2767_v60 = vadd.f32 %v2766_v9, %v2765_v43  ;;  %v2779_v47 = vrot.slane %v2778_v23, 2  ;;  %v2598_v28 = vmul.f32 %v10042_v13, %v2534_v19  ;;  %v2599_v5 = vmul.f32 %v10046_v10, %v2535_v51 }
 0x3aa   : > { %v2600_v25 = vmul.f32 %v10054_v24, %v2536_v53  ;;  %v2601_v8 = vmul.f32 %v10039_v21, %v2537_v17  ;;  %v2602_v15 = vmul.f32 %v10042_v13, %v2538_v22  ;;  %v2603_v1 = vmul.f32 %v10046_v10, %v2539_v33 }
 0x3ab   : > { %v2768_v6 = vrot.slane %v2767_v60, 1  ;;  %v2780_v0 = vadd.f32 %v2779_v47, %v2778_v23  ;;  %v2604_v43 = vmul.f32 %v10054_v24, %v2540_v3  ;;  %v2653_v39 = vsel %vm1077_vm1, %v2589_v30, 0.0 }
 0x3ac   : > { %v2654_v34 = vsel %vm1077_vm1, %v2590_v49, 0.0  ;;  %v2656_v19 = vsel %vm1077_vm1, %v2591_v42, 0.0  ;;  %v2658_v53 = vsel %vm1077_vm1, %v2592_v48, 0.0  ;;  %v2666_v21 = vsel %vm1077_vm1, %v2593_v11, 0.0 }
 0x3ad   : > { %v2781_v9 = vrot.slane %v2780_v0, 1  ;;  %v2655_v51 = vadd.f32 %v2654_v34, %v2653_v39  ;;  %v2769_v17 = vadd.f32 %v2768_v6, %v2767_v60  ;;  %v2667_v23 = vsel %vm1077_vm1, %v2594_v44, 0.0 }
 0x3ae   : > { %v2669_v13 = vsel %vm1077_vm1, %v2595_v63, 0.0  ;;  %v2679_v10 = vsel %vm1077_vm1, %v2597_v2, 0.0  ;;  %v2668_v33 = vadd.f32 %v2667_v23, %v2666_v21  ;;  %v2680_v3 = vsel %vm1077_vm1, %v2598_v28, 0.0 }
 0x3af   : > { %v2782_v24 = vadd.f32 %v2781_v9, %v2780_v0  ;;  %v2657_v22 = vadd.f32 %v2656_v19, %v2655_v51  ;;  %v2671_v30 = vsel %vm1077_vm1, %v2596_v18, 0.0  ;;  %v2681_v49 = vadd.f32 %v2680_v3, %v2679_v10 }
 0x3b0   : > { %v2682_v42 = vsel %vm1077_vm1, %v2599_v5, 0.0  ;;  %v2692_v48 = vsel %vm1077_vm1, %v2601_v8, 0.0  ;;  %v2670_v44 = vadd.f32 %v2669_v13, %v2668_v33  ;;  %v2693_v63 = vsel %vm1077_vm1, %v2602_v15, 0.0 }
 0x3b1   : > { %v2884_v11 = vsel %vm1302_vm2, %v2782_v24, %v2769_v17  ;;  %v2659_v60 = vadd.f32 %v2658_v53, %v2657_v22  ;;  %v2683_v2 = vadd.f32 %v2682_v42, %v2681_v49  ;;  %v2684_v6 = vsel %vm1077_vm1, %v2600_v25, 0.0 }
 0x3b2   : > { %v2885_v47 = vsel %vm1304_vm3, %v10249_v38, %v2884_v11  ;;  %v2694_v28 = vadd.f32 %v2693_v63, %v2692_v48  ;;  %v2672_v5 = vadd.f32 %v2671_v30, %v2670_v44  ;;  %v2695_v8 = vsel %vm1077_vm1, %v2603_v1, 0.0 }
 0x3b3   : > { %v2886_v18 = vsel %vm1306_vm4, %v10273_v54, %v2885_v47  ;;  %v2660_v0 = vrot.slane %v2659_v60, 4  ;;  %v14072_v39 = vrot.slane %v10255_v35, 4  ;;  %v2685_v19 = vadd.f32 %v2684_v6, %v2683_v2 }
 0x3b4   : > { %v2887_v15 = vsel %vm1308_vm5, %v10317_v32, %v2886_v18  ;;  %v2696_v38 = vadd.f32 %v2695_v8, %v2694_v28  ;;  %v2673_v51 = vrot.slane %v2672_v5, 4  ;;  %v2697_v54 = vsel %vm1077_vm1, %v2604_v43, 0.0 }
 0x3b5   : > { %v2752_v34 = vadd.f32 %v14072_v39, %v10255_v35  ;;  %v2888_v25 = vsel %vm1310_vm6, %v10331_v31, %v2887_v15  ;;  %v2661_v9 = vadd.f32 %v2660_v0, %v2659_v60  ;;  %v2714_v53 = vrot.slane %v10271_v55, 2  ;;  %v7514_v35 = vpop.f32.mrf.mxu1 }
 0x3b6   : > { %v2889_v1 = vsel %vm1312_vm7, %v10337_v61, %v2888_v25  ;;  %v2686_v21 = vrot.slane %v2685_v19, 4  ;;  %v2698_v17 = vadd.f32 %v2697_v54, %v2696_v38  ;;  %v2727_v23 = vrot.slane %v10278_v45, 2  ;;  %v3049_v54 = vpop.f32.mrf.mxu0 }
 0x3b7   : > { %v2890_v32 = vsel %vm1314_vm8, %v10353_v29, %v2889_v1  ;;  %v2662_v13 = vrot.slane %v2661_v9, 2  ;;  %v2674_v10 = vadd.f32 %v2673_v51, %v2672_v5  ;;  %v2753_v31 = vrot.slane %v2752_v34, 2 }
 0x3b8   : > { %v2965_v24 = vadd.f32 %v7514_v35, %v2890_v32  ;;  %v2687_v22 = vadd.f32 %v2686_v21, %v2685_v19  ;;  %v2699_v33 = vrot.slane %v2698_v17, 4  ;;  %v2740_v43 = vrot.slane %v10280_v62, 2 }
 0x3b9   : > { %v2663_v3 = vadd.f32 %v2662_v13, %v2661_v9  ;;  %v2675_v30 = vrot.slane %v2674_v10, 2  ;;  %v2715_v48 = vadd.f32 %v2714_v53, %v10271_v55  ;;  %v2728_v11 = vadd.f32 %v2727_v23, %v10278_v45  ;;  %v2959_v23 = vpop.f32.mrf.mxu1 }
 0x3ba   : > { %v3059_v61 = vadd.f32 %v10253_v20, %v2965_v24  ;;  %v2688_v49 = vrot.slane %v2687_v22, 2  ;;  %v2700_v42 = vadd.f32 %v2699_v33, %v2698_v17  ;;  %v2754_v47 = vadd.f32 %v2753_v31, %v2752_v34 }
 0x3bb   : > { %v2664_v60 = vrot.slane %v2663_v3, 1  ;;  %v2676_v29 = vadd.f32 %v2675_v30, %v2674_v10  ;;  %v2741_v2 = vadd.f32 %v2740_v43, %v10280_v62  ;;  %v2716_v0 = vrot.slane %v2715_v48, 1  ;;  %v14075_v43 = vld [vmem:[#allocation38_spill] sm:$0xff]  ;;  %v14077_v30 = vld [vmem:[#allocation39_spill] sm:$0xff] }
 0x3bc   : > { %7765 = vtanh.f32 %v3059_v61  ;;  %v2689_v44 = vadd.f32 %v2688_v49, %v2687_v22  ;;  %v2701_v63 = vrot.slane %v2700_v42, 2  ;;  %v2729_v8 = vrot.slane %v2728_v11, 1  ;;  %v14074_v22 = vld [vmem:[#allocation37_spill] sm:$0xff]  ;;  %v14078_v49 = vld [vmem:[#allocation40_spill] sm:$0xff] }
 0x3bd   : > { %v2677_v6 = vrot.slane %v2676_v29, 1  ;;  %v2665_v5 = vadd.f32 %v2664_v60, %v2663_v3  ;;  %v2755_v55 = vrot.slane %v2754_v47, 1  ;;  %v2742_v19 = vrot.slane %v2741_v2, 1 }
 0x3be   : > { %v2690_v28 = vrot.slane %v2689_v44, 1  ;;  %v2702_v18 = vadd.f32 %v2701_v63, %v2700_v42  ;;  %v2717_v9 = vadd.f32 %v2716_v0, %v2715_v48  ;;  %v2730_v34 = vadd.f32 %v2729_v8, %v2728_v11  ;;  %v14079_v48 = vld [vmem:[#allocation41_spill] sm:$0xff]  ;;  %v4523_v0 = vld [vmem:[#allocation9 + $0x10] sm:$0xff] }
 0x3bf   : > { %v2678_v20 = vadd.f32 %v2677_v6, %v2676_v29  ;;  %v2756_v51 = vadd.f32 %v2755_v55, %v2754_v47  ;;  %v2743_v53 = vadd.f32 %v2742_v19, %v2741_v2  ;;  %v3050_v35 = vadd.f32 %v10240_v37, %v3049_v54  ;;  %v4524_v2 = vld [vmem:[#allocation9 + $0x18] sm:$0xff]  ;;  %v7229_v8 = vld [vmem:[%s8534_s24 + $0x20] sm:$0xff]  ;;  %v7881_v55 = vld [vmem:[#allocation9 + $0x50] sm:$0xff] }
 0x3c0   : > { %v2691_v39 = vadd.f32 %v2690_v28, %v2689_v44  ;;  %v2703_v15 = vrot.slane %v2702_v18, 1  ;;  %7548 = vmatprep.subr.mxu1 %v4524_v2  ;;  %v14080_v28 = vld [vmem:[#allocation42_spill] sm:$0xff] }
 0x3c1   : > { %v2877_v45 = vsel %vm1302_vm2, %v2678_v20, %v2665_v5  ;;  %v4522_v5 = vld [vmem:[#allocation9 + $0x8] sm:$0xff]  ;;  %v4521_v20 = vld [vmem:[#allocation9] sm:$0xff] }
 0x3c2   : > { %v2704_v38 = vadd.f32 %v2703_v15, %v2702_v18  ;;  %v2878_v25 = vsel %vm1304_vm3, %v2691_v39, %v2877_v45  ;;  %v7230_v39 = vld [vmem:[%s8534_s24 + $0x28] sm:$0xff]  ;;  %v7880_v15 = vld [vmem:[#allocation9 + $0x58] sm:$0xff]  ;;  %v7883_v45 = vld [vmem:[#allocation9 + $0x40] sm:$0xff] }
 0x3c3   : > { %v7882_v19 = vld [vmem:[#allocation9 + $0x48] sm:$0xff] }
 0x3c4   : > { %v2879_v62 = vsel %vm1306_vm4, %v2704_v38, %v2878_v25  ;;  %v7160_v38 = vld [vmem:[%s13897_s12 + $0x1] ss:$0 sm:$0xff] }
 0x3c5   : > { %v2880_v1 = vsel %vm1308_vm5, %v2717_v9, %v2879_v62 }
 0x3c6   : > { %v2881_v21 = vsel %vm1310_vm6, %v2730_v34, %v2880_v1 }
 0x3c7   : > { %v2882_v17 = vsel %vm1312_vm7, %v2743_v53, %v2881_v21  ;;  %v14085_v21 = vld [vmem:[#allocation43_spill] sm:$0xff] }
 0x3c8   : > { %v2883_v32 = vsel %vm1314_vm8, %v2756_v51, %v2882_v17 }
 0x3c9   : > { %v10426_v13 = vpop.eup %7765  ;;  %v2960_v10 = vadd.f32 %v2959_v23, %v2883_v32 }
 0x3ca   : > { %14073 = vst [vmem:[#allocation47_spill] sm:$0xff] %v10426_v13  ;;  %v3929_v31 = vrot.slane %v10426_v13, %v8766_v12  ;;  %v3948_v33 = vrot.slane %v10426_v13, %v14074_v22  ;;  %v10434_v37 = vrot.slane %v10426_v13, %v14075_v43  ;;  %v10446_v61 = vrot.slane %v10426_v13, %v14077_v30 }
 0x3cb   : > { %v3058_v24 = vadd.f32 %v3050_v35, %v2960_v10  ;;  %v10456_v42 = vrot.slane %v10426_v13, %v14078_v49  ;;  %v10464_v11 = vrot.slane %v10426_v13, %v14079_v48  ;;  %v4043_v32 = vrot.slane %v10426_v13, %v14080_v28 }
 0x3cc   : > { %3935 = vbcast.lane.b32.xlu0 %v3929_v31, 264  ;;  %3931 = vbcast.lane.b32.xlu1 %v3929_v31, 256 }
 0x3cd   : > { %7767 = vtanh.f32 %v3058_v24 }
 0x3d0   : > { %3954 = vbcast.lane.b32.xlu0 %v3948_v33, 264  ;;  %3950 = vbcast.lane.b32.xlu1 %v3948_v33, 256 }
 0x3d4   : > { %3973 = vbcast.lane.b32.xlu0 %v10434_v37, 264  ;;  %3969 = vbcast.lane.b32.xlu1 %v10434_v37, 256 }
 0x3d8   : > { %3939 = vbcast.lane.b32.xlu0 %v3929_v31, 272  ;;  %3958 = vbcast.lane.b32.xlu1 %v3948_v33, 272 }
 0x3da   : > { %v10438_v3 = vpop.eup %7767 }
 0x3db   : > { %14076 = vst [vmem:[#allocation53_spill] sm:$0xff] %v10438_v3  ;;  %7534 = vmatprep.mubr.msk.f32.mxu1 %vm1077_vm1, %v10438_v3  ;;  %7545 = vmatprep.mubr.msk.f32.mxu0 %vm1077_vm1, %v10438_v3  ;;  %v3777_v60 = vrot.slane %v10438_v3, %v8766_v12  ;;  %v3796_v29 = vrot.slane %v10438_v3, %v14074_v22 }
 0x3dc   : > { %7535 = vmatmul.mubr.msk.f32.vlgmr.msra.gmra.mxu1 %vm1077_vm1, %v10426_v13  ;;  %7546 = vmatmul.mubr.msk.f32.vlgmr.msra.gmra.mxu0 %vm1077_vm1, %v10426_v13  ;;  %v3815_v44 = vrot.slane %v10438_v3, %v14075_v43  ;;  %v3834_v63 = vrot.slane %v10438_v3, %v14077_v30  ;;  %v10478_v47 = vrot.slane %v10438_v3, %v14078_v49  ;;  %v7884_v43 = vld [vmem:[%s13897_s12 + $0x3] ss:$0 sm:$0xff] }
 0x3dd   : > { %3988 = vbcast.lane.b32.xlu0 %v10446_v61, 256  ;;  %3992 = vbcast.lane.b32.xlu1 %v10446_v61, 264  ;;  %v10484_v6 = vrot.slane %v10438_v3, %v14079_v48  ;;  %v10491_v18 = vrot.slane %v10438_v3, %v14080_v28  ;;  %v3910_v17 = vrot.slane %v10438_v3, %v14085_v21 }
 0x3de   : > { %7549 = vmatpush3.msra.mxu1 %v4524_v2  ;;  %7556 = vmatprep.mubr.msk.f32.mxu1 %vm1077_vm1, %v7229_v8 }
 0x3df   : > { %7550 = vmatprep.subr.mxu1 %v4523_v0 }
 0x3e0   : > { %7551 = vmatpush3.msra.mxu1 %v4523_v0 }
 0x3e1   : > { %4007 = vbcast.lane.b32.xlu0 %v10456_v42, 256  ;;  %3977 = vbcast.lane.b32.xlu1 %v10434_v37, 272 }
 0x3e2   : > { %7552 = vmatprep.subr.mxu1 %v4522_v5 }
 0x3e3   : > { %7553 = vmatpush3.msra.mxu1 %v4522_v5 }
 0x3e4   : > { %7554 = vmatprep.subr.mxu1 %v4521_v20 }
 0x3e5   : > { %3943 = vbcast.lane.b32.xlu0 %v3929_v31, 280  ;;  %4011 = vbcast.lane.b32.xlu1 %v10456_v42, 264 }
 0x3e6   : > { %7555 = vmatpush3.msra.mxu1 %v4521_v20 }
 0x3e7   : > { %7557 = vmatmul.mubr.msk.f32.vlgmr.msra.gmra.mxu1 %vm1077_vm1, %v7230_v39  ;;  %7570 = vmatprep.subr.mxu1 %v7880_v15 }
 0x3e8   : > { %7571 = vmatpush3.msra.mxu1 %v7880_v15 }
 0x3e9   : > { %3996 = vbcast.lane.b32.xlu0 %v10446_v61, 272  ;;  %3962 = vbcast.lane.b32.xlu1 %v3948_v33, 280 }
 0x3ea   : > { %7572 = vmatprep.subr.mxu1 %v7881_v55 }
 0x3eb   : > { %7573 = vmatpush3.msra.mxu1 %v7881_v55 }
 0x3ec   : > { %7574 = vmatprep.subr.mxu1 %v7882_v19 }
 0x3ed   : > { %4030 = vbcast.lane.b32.xlu0 %v10464_v11, 264  ;;  %4026 = vbcast.lane.b32.xlu1 %v10464_v11, 256 }
 0x3ee   : > { %7575 = vmatpush3.msra.mxu1 %v7882_v19 }
 0x3ef   : > { %7576 = vmatprep.subr.mxu1 %v7883_v45 }
 0x3f0   : > { %7577 = vmatpush3.msra.mxu1 %v7883_v45 }
 0x3f1   : > { %3783 = vbcast.lane.b32.xlu0 %v3777_v60, 264  ;;  %3779 = vbcast.lane.b32.xlu1 %v3777_v60, 256 }
 0x3f5   : > { %3802 = vbcast.lane.b32.xlu0 %v3796_v29, 264  ;;  %3798 = vbcast.lane.b32.xlu1 %v3796_v29, 256 }
 0x3f9   : > { %3821 = vbcast.lane.b32.xlu0 %v3815_v44, 264  ;;  %3817 = vbcast.lane.b32.xlu1 %v3815_v44, 256 }
 0x3fd   : > { %3806 = vbcast.lane.b32.xlu0 %v3796_v29, 272  ;;  %3787 = vbcast.lane.b32.xlu1 %v3777_v60, 272 }
 0x401   : > { %3840 = vbcast.lane.b32.xlu0 %v3834_v63, 264  ;;  %3836 = vbcast.lane.b32.xlu1 %v3834_v63, 256 }
 0x405   : > { %3855 = vbcast.lane.b32.xlu0 %v10478_v47, 256  ;;  %3825 = vbcast.lane.b32.xlu1 %v3815_v44, 272 }
 0x409   : > { %3791 = vbcast.lane.b32.xlu0 %v3777_v60, 280  ;;  %3859 = vbcast.lane.b32.xlu1 %v10478_v47, 264 }
 0x40d   : > { %3844 = vbcast.lane.b32.xlu0 %v3834_v63, 272  ;;  %3810 = vbcast.lane.b32.xlu1 %v3796_v29, 280 }
 0x411   : > { %3878 = vbcast.lane.b32.xlu0 %v10484_v6, 264  ;;  %3874 = vbcast.lane.b32.xlu1 %v10484_v6, 256 }
 0x415   : > { %3829 = vbcast.lane.b32.xlu0 %v3815_v44, 280  ;;  %3863 = vbcast.lane.b32.xlu1 %v10478_v47, 272 }
 0x419   : > { %3893 = vbcast.lane.b32.xlu0 %v10491_v18, 256  ;;  %3897 = vbcast.lane.b32.xlu1 %v10491_v18, 264 }
 0x41d   : > { %3882 = vbcast.lane.b32.xlu0 %v10484_v6, 272  ;;  %3848 = vbcast.lane.b32.xlu1 %v3834_v63, 280 }
 0x43e   : > { %v10509_v54 = vpop.permute.xlu0 %3935  ;;  %v10511_v1 = vpop.permute.xlu1 %3931 }
 0x43f   : > { %14083 = vst [vmem:[#allocation46_spill] sm:$0xff] %v10509_v54  ;;  %14084 = vst [vmem:[#allocation52_spill] sm:$0xff] %v10511_v1  ;;  %v14132_v54 = vld [vmem:[#allocation118_spill] sm:$0xff]  ;;  %v14134_v1 = vld [vmem:[#allocation124_spill] sm:$0xff] }
 0x442   : > { %v10515_v35 = vpop.permute.xlu0 %3954  ;;  %v10517_v23 = vpop.permute.xlu1 %3950 }
 0x443   : > { %14086 = vst [vmem:[#allocation66_spill] sm:$0xff] %v10515_v35  ;;  %14087 = vst [vmem:[#allocation49_spill] sm:$0xff] %v10517_v23  ;;  %v14128_v35 = vld [vmem:[#allocation113_spill] sm:$0xff]  ;;  %v14129_v23 = vld [vmem:[#allocation114_spill] sm:$0xff] }
 0x446   : > { %v10523_v10 = vpop.permute.xlu0 %3973  ;;  %v10525_v31 = vpop.permute.xlu1 %3969 }
 0x447   : > { %14088 = vst [vmem:[#allocation48_spill] sm:$0xff] %v10523_v10  ;;  %14089 = vst [vmem:[#allocation59_spill] sm:$0xff] %v10525_v31 }
 0x44a   : > { %v10528_v24 = vpop.permute.xlu0 %3939  ;;  %v10531_v33 = vpop.permute.xlu1 %3958 }
 0x44b   : > { %14090 = vst [vmem:[#allocation69_spill] sm:$0xff] %v10528_v24  ;;  %14091 = vst [vmem:[#allocation55_spill] sm:$0xff] %v10531_v33  ;;  %v14131_v24 = vld [vmem:[#allocation62_spill] sm:$0xff] }
 0x44f   : > { %v10537_v60 = vpop.permute.xlu0 %3988  ;;  %v10539_v29 = vpop.permute.xlu1 %3992 }
 0x450   : > { %14092 = vst [vmem:[#allocation54_spill] sm:$0xff] %v10537_v60  ;;  %14093 = vst [vmem:[#allocation65_spill] sm:$0xff] %v10539_v29 }
 0x453   : > { %v10541_v44 = vpop.permute.xlu0 %4007  ;;  %v10544_v63 = vpop.permute.xlu1 %3977 }
 0x454   : > { %14094 = vst [vmem:[#allocation77_spill] sm:$0xff] %v10541_v44  ;;  %14095 = vst [vmem:[#allocation58_spill] sm:$0xff] %v10544_v63 }
 0x49c   : > { %v7536_v25 = vpop.f32.mrf.mxu1 }
 0x49d   : > { %v10503_v9 = vadd.f32 %v7536_v25, %v7160_v38 }
 0x49e   : > { %v3143_v34 = vpop.f32.mrf.mxu1 }
 0x49f   : > { %14081 = vst [vmem:[#allocation63_spill] sm:$0xff] %v10503_v9  ;;  %7769 = vtanh.f32 %v10503_v9  ;;  %v10506_v51 = vadd.f32 %v7160_v38, %v3143_v34 }
 0x4a1   : > { %14082 = vst [vmem:[#allocation44_spill] sm:$0xff] %v10506_v51  ;;  %7771 = vtanh.f32 %v10506_v51 }
 0x4ac   : > { %v7770_v62 = vpop.eup %7769 }
 0x4ad   : > { %3185 = vperm.xlu0 %7756, %v7770_v62  }
 0x4ae   : > { %v7772_v53 = vpop.eup %7771 }
 0x4af   : > { %3180 = vperm.xlu1 %7755, %v7772_v53  }
 0x4b1   : > { %3916 = vbcast.lane.b32.xlu0 %v3910_v17, 264 }
 0x4b3   : > { %3912 = vbcast.lane.b32.xlu1 %v3910_v17, 256 }
 0x4b5   : > { %4015 = vbcast.lane.b32.xlu0 %v10456_v42, 272 }
 0x4b7   : > { %3981 = vbcast.lane.b32.xlu1 %v10434_v37, 280  ;;  %v4062_v37 = vrot.slane %v10426_v13, %v14085_v21 }
 0x4b9   : > { %4049 = vbcast.lane.b32.xlu0 %v4043_v32, 264 }
 0x4bb   : > { %4045 = vbcast.lane.b32.xlu1 %v4043_v32, 256 }
 0x4bd   : > { %3901 = vbcast.lane.b32.xlu0 %v10491_v18, 272 }
 0x4bf   : > { %3867 = vbcast.lane.b32.xlu1 %v10478_v47, 280  ;;  %v10550_v47 = vpop.permute.xlu1 %4011 }
 0x4c0   : > { %14097 = vst [vmem:[#allocation72_spill] sm:$0xff] %v10550_v47 }
 0x4c1   : > { %4034 = vbcast.lane.b32.xlu0 %v10464_v11, 272 }
 0x4c3   : > { %4000 = vbcast.lane.b32.xlu1 %v10446_v61, 280  ;;  %v10547_v61 = vpop.permute.xlu0 %3943  ;;  %v10555_v0 = vpop.permute.xlu1 %3962 }
 0x4c4   : > { %14096 = vst [vmem:[#allocation60_spill] sm:$0xff] %v10547_v61  ;;  %14099 = vst [vmem:[#allocation68_spill] sm:$0xff] %v10555_v0  ;;  %v14130_v61 = vld [vmem:[#allocation119_spill] sm:$0xff] }
 0x4c5   : > { %4068 = vbcast.lane.b32.xlu0 %v4062_v37, 264 }
 0x4c7   : > { %4064 = vbcast.lane.b32.xlu1 %v4062_v37, 256  ;;  %v10553_v2 = vpop.permute.xlu0 %3996  ;;  %v10559_v5 = vpop.permute.xlu1 %4026 }
 0x4c8   : > { %14098 = vst [vmem:[#allocation83_spill] sm:$0xff] %v10553_v2  ;;  %14101 = vst [vmem:[#allocation76_spill] sm:$0xff] %v10559_v5 }
 0x4c9   : > { %3920 = vbcast.lane.b32.xlu0 %v3910_v17, 272 }
 0x4cb   : > { %3886 = vbcast.lane.b32.xlu1 %v10484_v6, 280  ;;  %v10557_v6 = vpop.permute.xlu0 %4030  ;;  %v10563_v20 = vpop.permute.xlu1 %3779 }
 0x4cc   : > { %14100 = vst [vmem:[#allocation67_spill] sm:$0xff] %v10557_v6  ;;  %14103 = vst [vmem:[#allocation71_spill] sm:$0xff] %v10563_v20 }
 0x4cd   : > { %4053 = vbcast.lane.b32.xlu0 %v4043_v32, 272 }
 0x4cf   : > { %4019 = vbcast.lane.b32.xlu1 %v10456_v42, 280  ;;  %v10561_v42 = vpop.permute.xlu0 %3783  ;;  %v10567_v8 = vpop.permute.xlu1 %3798 }
 0x4d0   : > { %14102 = vst [vmem:[#allocation94_spill] sm:$0xff] %v10561_v42  ;;  %14105 = vst [vmem:[#allocation82_spill] sm:$0xff] %v10567_v8 }
 0x4d1   : > { %4038 = vbcast.lane.b32.xlu0 %v10464_v11, 280 }
 0x4d3   : > { %3905 = vbcast.lane.b32.xlu1 %v10491_v18, 280  ;;  %v10565_v11 = vpop.permute.xlu0 %3802  ;;  %v10571_v39 = vpop.permute.xlu1 %3817 }
 0x4d4   : > { %14104 = vst [vmem:[#allocation73_spill] sm:$0xff] %v10565_v11  ;;  %14107 = vst [vmem:[#allocation79_spill] sm:$0xff] %v10571_v39 }
 0x4d5   : > { %3924 = vbcast.lane.b32.xlu0 %v3910_v17, 280 }
 0x4d7   : > { %4072 = vbcast.lane.b32.xlu1 %v4062_v37, 272  ;;  %v10569_v18 = vpop.permute.xlu0 %3821  ;;  %v10575_v55 = vpop.permute.xlu1 %3787 }
 0x4d8   : > { %14106 = vst [vmem:[#allocation98_spill] sm:$0xff] %v10569_v18  ;;  %14109 = vst [vmem:[#allocation93_spill] sm:$0xff] %v10575_v55 }
 0x4d9   : > { %4076 = vbcast.lane.b32.xlu0 %v4062_v37, 280 }
 0x4db   : > { %4057 = vbcast.lane.b32.xlu1 %v4043_v32, 280  ;;  %v10573_v15 = vpop.permute.xlu0 %3806  ;;  %v10579_v45 = vpop.permute.xlu1 %3836 }
 0x4dc   : > { %14108 = vst [vmem:[#allocation78_spill] sm:$0xff] %v10573_v15  ;;  %14111 = vst [vmem:[#allocation110_spill] sm:$0xff] %v10579_v45 }
 0x4df   : > { %v10577_v19 = vpop.permute.xlu0 %3840  ;;  %v10583_v25 = vpop.permute.xlu1 %3825 }
 0x4e0   : > { %14110 = vst [vmem:[#allocation100_spill] sm:$0xff] %v10577_v19  ;;  %14113 = vst [vmem:[#allocation122_spill] sm:$0xff] %v10583_v25  ;;  %v7885_v19 = vld [vmem:[%s13897_s12 + $0x2] ss:$0 sm:$0xff] }
 0x4e3   : > { %v10581_v38 = vpop.permute.xlu0 %3855  ;;  %v10587_v62 = vpop.permute.xlu1 %3859 }
 0x4e4   : > { %14112 = vst [vmem:[#allocation116_spill] sm:$0xff] %v10581_v38  ;;  %14115 = vst [vmem:[#allocation112_spill] sm:$0xff] %v10587_v62  ;;  %v14150_v38 = vld [vmem:[#allocation84_spill] sm:$0xff] }
 0x4e7   : > { %v10585_v34 = vpop.permute.xlu0 %3791  ;;  %v10591_v17 = vpop.permute.xlu1 %3810 }
 0x4e8   : > { %14114 = vst [vmem:[#allocation111_spill] sm:$0xff] %v10585_v34  ;;  %14117 = vst [vmem:[#allocation131_spill] sm:$0xff] %v10591_v17 }
 0x4eb   : > { %v10589_v53 = vpop.permute.xlu0 %3844  ;;  %v10595_v37 = vpop.permute.xlu1 %3874 }
 0x4ec   : > { %14116 = vst [vmem:[#allocation141_spill] sm:$0xff] %v10589_v53  ;;  %14119 = vst [vmem:[#allocation137_spill] sm:$0xff] %v10595_v37  ;;  %v14137_v37 = vld [vmem:[#allocation121_spill] sm:$0xff] }
 0x4ef   : > { %v10593_v32 = vpop.permute.xlu0 %3878  ;;  %v10599_v51 = vpop.permute.xlu1 %3863 }
 0x4f0   : > { %14118 = vst [vmem:[#allocation132_spill] sm:$0xff] %v10593_v32  ;;  %14121 = vst [vmem:[#allocation135_spill] sm:$0xff] %v10599_v51  ;;  %v14136_v32 = vld [vmem:[#allocation120_spill] sm:$0xff] }
 0x4f3   : > { %v10597_v9 = vpop.permute.xlu0 %3829  ;;  %v10603_v28 = vpop.permute.xlu1 %3897 }
 0x4f4   : > { %14120 = vst [vmem:[#allocation146_spill] sm:$0xff] %v10597_v9  ;;  %14123 = vst [vmem:[#allocation142_spill] sm:$0xff] %v10603_v28 }
 0x4f7   : > { %v10601_v21 = vpop.permute.xlu0 %3893  ;;  %v10607_v49 = vpop.permute.xlu1 %3848 }
 0x4f8   : > { %14122 = vst [vmem:[#allocation136_spill] sm:$0xff] %v10601_v21  ;;  %14125 = vst [vmem:[#allocation151_spill] sm:$0xff] %v10607_v49 }
 0x4fb   : > { %v10605_v48 = vpop.permute.xlu0 %3882 }
 0x4fc   : > { %14124 = vst [vmem:[#allocation149_spill] sm:$0xff] %v10605_v48  ;;  %v14135_v48 = vld [vmem:[#allocation70_spill] sm:$0xff] }
 0x528   : > { %v3186_v30 = vpop.permute.xlu0 %3185 }
 0x529   : > { %v3189_v22 = vmul.f32 %v7884_v43, %v3186_v30 }
 0x52a   : > { %v3181_v53 = vpop.permute.xlu1 %3180 }
 0x52b   : > { %v3191_v45 = vadd.f32 %v7885_v19, %v3189_v22  ;;  %v3188_v9 = vmul.f32 %v7884_v43, %v3181_v53 }
 0x52d   : > { %v3193_v25 = vmul.f32 %v10426_v13, %v3191_v45  ;;  %v3190_v18 = vadd.f32 %v7885_v19, %v3188_v9 }
 0x52f   : > { %v3245_v39 = vcombine.high %v3193_v25, %v3193_v25  ;;  %v3252_v17 = vrot.slane %v3193_v25, %v9506_v50  ;;  %v3192_v49 = vmul.f32 %v10438_v3, %v3190_v18 }
 0x531   : > { %v3259_v15 = vrot.slane %v3245_v39, %v9506_v50  ;;  %v3260_v11 = vcombine.high %v3252_v17, %v3252_v17  ;;  %v3268_v30 = vrot.slane %v3252_v17, %v9506_v50  ;;  %v3196_v8 = vcombine.high %v3192_v49, %v3192_v49 }
 0x532   : > { %v10621_v34 = vrot.slane %v3192_v49, %v9506_v50 }
 0x533   : > { %v3261_v55 = vcombine.high %v3259_v15, %v3259_v15  ;;  %v3275_v22 = vrot.slane %v3259_v15, %v9506_v50  ;;  %v3282_v43 = vrot.slane %v3260_v11, %v9506_v50  ;;  %v3290_v9 = vcombine.high %v3268_v30, %v3268_v30 }
 0x534   : > { %v3329_v19 = vrot.slane %v3268_v30, %v8766_v12  ;;  %v10627_v45 = vrot.slane %v3196_v8, %v9506_v50  ;;  %v10633_v39 = vrot.slane %v10621_v34, %v9506_v50 }
 0x535   : > { %v3289_v49 = vrot.slane %v3261_v55, %v9506_v50  ;;  %v3291_v25 = vcombine.high %v3275_v22, %v3275_v22  ;;  %v3292_v53 = vcombine.high %v3282_v43, %v3282_v43  ;;  %v3333_v15 = vrot.slane %v3282_v43, %v8766_v12 }
 0x536   : > { %v3337_v11 = vrot.slane %v3290_v9, %v8766_v12  ;;  %v3345_v17 = vrot.slane %v3275_v22, %v8766_v12  ;;  %v3406_v8 = vmul.f32 %v3329_v19, %v9401_v52  ;;  %v3407_v30 = vmul.f32 %v3329_v19, %v14049_v58  ;;  %v14126_v52 = vld [vmem:[#allocation115_spill] sm:$0xff] }
 0x537   : > { %v3293_v3 = vcombine.high %v3289_v49, %v3289_v49  ;;  %v3341_v18 = vrot.slane %v3292_v53, %v8766_v12  ;;  %v3349_v13 = vrot.slane %v3289_v49, %v8766_v12  ;;  %v3353_v42 = vrot.slane %v3291_v25, %v8766_v12  ;;  %v14127_v58 = vld [vmem:[#allocation123_spill] sm:$0xff] }
 0x538   : > { %v3408_v55 = vmul.f32 %v3329_v19, %v14050_v46  ;;  %v3409_v20 = vmul.f32 %v3329_v19, %v14051_v59  ;;  %v3410_v43 = vmul.f32 %v3333_v15, %v14052_v57  ;;  %v3411_v9 = vmul.f32 %v3333_v15, %v14053_v56  ;;  %v14133_v19 = vld [vmem:[#allocation117_spill] sm:$0xff] }
 0x539   : > { %v3357_v22 = vrot.slane %v3293_v3, %v8766_v12  ;;  %v3412_v0 = vmul.f32 %v3333_v15, %v14126_v52  ;;  %v3413_v33 = vmul.f32 %v3333_v15, %v14127_v58  ;;  %v3414_v53 = vmul.f32 %v3337_v11, %v14128_v35  ;;  %v14138_v35 = vld [vmem:[#allocation74_spill] sm:$0xff] }
 0x53a   : > { %v3415_v49 = vmul.f32 %v3337_v11, %v14129_v23  ;;  %v3416_v25 = vmul.f32 %v3337_v11, %v14130_v61  ;;  %v3417_v46 = vmul.f32 %v3337_v11, %v14131_v24  ;;  %v3418_v59 = vmul.f32 %v3341_v18, %v14132_v54  ;;  %v14139_v23 = vld [vmem:[#allocation89_spill] sm:$0xff]  ;;  %v14141_v24 = vld [vmem:[#allocation126_spill] sm:$0xff]  ;;  %v14142_v54 = vld [vmem:[#allocation75_spill] sm:$0xff] }
 0x53b   : > { %v3419_v57 = vmul.f32 %v3341_v18, %v14133_v19  ;;  %v3420_v56 = vmul.f32 %v3341_v18, %v14134_v1  ;;  %v3421_v3 = vmul.f32 %v3341_v18, %v14135_v48  ;;  %v3422_v52 = vmul.f32 %v3345_v17, %v14136_v32  ;;  %v14140_v61 = vld [vmem:[#allocation125_spill] sm:$0xff]  ;;  %v14143_v19 = vld [vmem:[#allocation86_spill] sm:$0xff]  ;;  %v14145_v48 = vld [vmem:[#allocation56_spill] sm:$0xff] }
 0x53c   : > { %v3423_v15 = vmul.f32 %v3345_v17, %v14137_v37  ;;  %v3424_v58 = vmul.f32 %v3345_v17, %v14138_v35  ;;  %v3425_v2 = vmul.f32 %v3345_v17, %v14139_v23  ;;  %v3426_v29 = vmul.f32 %v3349_v13, %v14140_v61  ;;  %v14144_v1 = vld [vmem:[#allocation57_spill] sm:$0xff]  ;;  %v14147_v37 = vld [vmem:[#allocation88_spill] sm:$0xff] }
 0x53d   : > { %v3427_v11 = vmul.f32 %v3349_v13, %v14141_v24  ;;  %v3428_v60 = vmul.f32 %v3349_v13, %v14142_v54  ;;  %v3429_v6 = vmul.f32 %v3349_v13, %v14143_v19  ;;  %v3430_v5 = vmul.f32 %v3353_v42, %v14144_v1  ;;  %v14146_v32 = vld [vmem:[#allocation101_spill] sm:$0xff]  ;;  %v14149_v23 = vld [vmem:[#allocation80_spill] sm:$0xff] }
 0x53e   : > { %v3431_v18 = vmul.f32 %v3353_v42, %v14145_v48  ;;  %v3432_v51 = vmul.f32 %v3353_v42, %v14146_v32  ;;  %v3433_v62 = vmul.f32 %v3353_v42, %v14147_v37  ;;  %v14148_v35 = vld [vmem:[#allocation81_spill] sm:$0xff]  ;;  %v3435_v61 = vmul.f32 %v3357_v22, %v14149_v23  ;;  %v14152_v1 = vld [vmem:[#allocation96_spill] sm:$0xff]  ;;  %v14153_v32 = vld [vmem:[#allocation103_spill] sm:$0xff] }
 0x53f   : > { %v3434_v17 = vmul.f32 %v3357_v22, %v14148_v35  ;;  %v3436_v24 = vmul.f32 %v3357_v22, %v14150_v38  ;;  %v14151_v54 = vld [vmem:[#allocation97_spill] sm:$0xff]  ;;  %v10679_v48 = vadd.f32 %v3407_v30, %v14152_v1  ;;  %v10682_v42 = vadd.f32 %v3408_v55, %v14153_v32  ;;  %v14154_v37 = vld [vmem:[#allocation92_spill] sm:$0xff]  ;;  %v14155_v23 = vld [vmem:[#allocation91_spill] sm:$0xff] }
 0x540   : > { %v3437_v28 = vmul.f32 %v3357_v22, %v14151_v54  ;;  %v7886_v13 = vld [vmem:[%s8558_s10 + $0x100] sm:$0xff]  ;;  %v10685_v35 = vadd.f32 %v3409_v20, %v14154_v37  ;;  %v10688_v21 = vadd.f32 %v3410_v43, %v14155_v23  ;;  %v14156_v38 = vld [vmem:[#allocation99_spill] sm:$0xff]  ;;  %v7888_v20 = vld [vmem:[%s8558_s10 + $0x148] sm:$0xff] }
 0x541   : > { %v10676_v19 = vadd.f32 %v7886_v13, %v3406_v8  ;;  %v10691_v22 = vadd.f32 %v3411_v9, %v14156_v38  ;;  %v14157_v8 = vld [vmem:[#allocation102_spill] sm:$0xff]  ;;  %v14158_v13 = vld [vmem:[#allocation45_spill] sm:$0xff]  ;;  %v10703_v32 = vadd.f32 %v7888_v20, %v3415_v49  ;;  %v7889_v43 = vld [vmem:[%s8558_s10 + $0x150] sm:$0xff] }
 0x542   : > { %v10694_v54 = vadd.f32 %v3412_v0, %v14157_v8  ;;  %v10697_v30 = vadd.f32 %v3413_v33, %v14158_v13  ;;  %v7887_v55 = vld [vmem:[%s8558_s10 + $0x140] sm:$0xff]  ;;  %v10706_v37 = vadd.f32 %v7889_v43, %v3416_v25  ;;  %v7890_v9 = vld [vmem:[%s8558_s10 + $0x158] sm:$0xff]  ;;  %v7892_v38 = vld [vmem:[%s8558_s10 + $0x168] sm:$0xff] }
 0x543   : > { %v10700_v1 = vadd.f32 %v7887_v55, %v3414_v53  ;;  %v10709_v0 = vadd.f32 %v7890_v9, %v3417_v46  ;;  %v7891_v23 = vld [vmem:[%s8558_s10 + $0x160] sm:$0xff]  ;;  %v10715_v53 = vadd.f32 %v7892_v38, %v3419_v57  ;;  %v7893_v8 = vld [vmem:[%s8558_s10 + $0x170] sm:$0xff]  ;;  %v7894_v13 = vld [vmem:[%s8558_s10 + $0x178] sm:$0xff] }
 0x544   : > { %v10712_v33 = vadd.f32 %v7891_v23, %v3418_v59  ;;  %v10718_v49 = vadd.f32 %v7893_v8, %v3420_v56  ;;  %v10721_v25 = vadd.f32 %v7894_v13, %v3421_v3  ;;  %v7895_v55 = vld [vmem:[%s8558_s10 + $0x180] sm:$0xff]  ;;  %v7896_v20 = vld [vmem:[%s8558_s10 + $0x188] sm:$0xff]  ;;  %v7897_v43 = vld [vmem:[%s8558_s10 + $0x190] sm:$0xff] }
 0x545   : > { %v10724_v46 = vadd.f32 %v7895_v55, %v3422_v52  ;;  %v10727_v59 = vadd.f32 %v7896_v20, %v3423_v15  ;;  %v10730_v57 = vadd.f32 %v7897_v43, %v3424_v58  ;;  %v7898_v9 = vld [vmem:[%s8558_s10 + $0x198] sm:$0xff]  ;;  %v7899_v56 = vld [vmem:[%s8558_s10 + $0x1a0] sm:$0xff]  ;;  %v7900_v3 = vld [vmem:[%s8558_s10 + $0x1a8] sm:$0xff] }
 0x546   : > { %v10733_v23 = vadd.f32 %v7898_v9, %v3425_v2  ;;  %v10736_v38 = vadd.f32 %v7899_v56, %v3426_v29  ;;  %v10739_v8 = vadd.f32 %v7900_v3, %v3427_v11  ;;  %v7901_v52 = vld [vmem:[%s8558_s10 + $0x1b0] sm:$0xff]  ;;  %v7902_v15 = vld [vmem:[%s8558_s10 + $0x1b8] sm:$0xff]  ;;  %v7903_v58 = vld [vmem:[%s8558_s10 + $0x1c0] sm:$0xff] }
 0x547   : > { %v10742_v13 = vadd.f32 %v7901_v52, %v3428_v60  ;;  %v10745_v55 = vadd.f32 %v7902_v15, %v3429_v6  ;;  %v10748_v20 = vadd.f32 %v7903_v58, %v3430_v5  ;;  %v7904_v2 = vld [vmem:[%s8558_s10 + $0x1c8] sm:$0xff]  ;;  %v7905_v9 = vld [vmem:[%s8558_s10 + $0x1d0] sm:$0xff]  ;;  %v7906_v11 = vld [vmem:[%s8558_s10 + $0x1e0] sm:$0xff]  ;;  %v7198_v58 = vclamps-f32 %v10685_v35, 2.0 }
 0x548   : > { %v10751_v43 = vadd.f32 %v7904_v2, %v3431_v18  ;;  %v10754_v29 = vadd.f32 %v7905_v9, %v3432_v51  ;;  %v14159_v56 = vld [vmem:[#allocation87_spill] sm:$0xff]  ;;  %v10760_v3 = vadd.f32 %v7906_v11, %v3434_v17  ;;  %v7907_v60 = vld [vmem:[%s8558_s10 + $0x1e8] sm:$0xff]  ;;  %v14160_v5 = vld [vmem:[#allocation85_spill] sm:$0xff]  ;;  %v7195_v51 = vclamps-f32 %v10676_v19, 2.0 }
 0x549   : > { %v10757_v63 = vadd.f32 %v3433_v62, %v14159_v56  ;;  %v10763_v52 = vadd.f32 %v7907_v60, %v3435_v61  ;;  %v7908_v6 = vld [vmem:[%s8558_s10 + $0x1f0] sm:$0xff]  ;;  %v10769_v18 = vadd.f32 %v3437_v28, %v14160_v5  ;;  %v7196_v62 = vclamps-f32 %v10679_v48, 2.0  ;;  %3665 = vst.msk [vmem:[%s8558_s10 + $0x118] sm:$0xff] %vm1077_vm1, %v7198_v58  ;;  %v14164_v58 = vld [vmem:[#allocation133_spill] sm:$0xff] }
 0x54a   : > { %v10766_v15 = vadd.f32 %v7908_v6, %v3436_v24  ;;  %v7197_v17 = vclamps-f32 %v10682_v42, 2.0  ;;  %v7199_v61 = vclamps-f32 %v10688_v21, 2.0  ;;  %v7200_v24 = vclamps-f32 %v10691_v22, 2.0  ;;  %3662 = vst.msk [vmem:[%s8558_s10 + $0x100] sm:$0xff] %vm1077_vm1, %v7195_v51 }
 0x54b   : > { %v7201_v2 = vclamps-f32 %v10694_v54, 2.0  ;;  %v7202_v28 = vclamps-f32 %v10697_v30, 2.0  ;;  %v7203_v19 = vclamps-f32 %v10700_v1, 2.0  ;;  %v7204_v48 = vclamps-f32 %v10703_v32, 2.0  ;;  %3663 = vst.msk [vmem:[%s8558_s10 + $0x108] sm:$0xff] %vm1077_vm1, %v7196_v62  ;;  %v14163_v62 = vld [vmem:[#allocation128_spill] sm:$0xff] }
 0x54c   : > { %v7205_v42 = vclamps-f32 %v10706_v37, 2.0  ;;  %v7206_v21 = vclamps-f32 %v10709_v0, 2.0  ;;  %v7207_v35 = vclamps-f32 %v10712_v33, 2.0  ;;  %3664 = vst.msk [vmem:[%s8558_s10 + $0x110] sm:$0xff] %vm1077_vm1, %v7197_v17  ;;  %3666 = vst.msk [vmem:[%s8558_s10 + $0x120] sm:$0xff] %vm1077_vm1, %v7199_v61  ;;  %v7208_v22 = vclamps-f32 %v10715_v53, 2.0 }
 0x54d   : > { %v7209_v54 = vclamps-f32 %v10718_v49, 2.0  ;;  %v7210_v30 = vclamps-f32 %v10721_v25, 2.0  ;;  %v7211_v1 = vclamps-f32 %v10724_v46, 2.0  ;;  %3667 = vst.msk [vmem:[%s8558_s10 + $0x128] sm:$0xff] %vm1077_vm1, %v7200_v24  ;;  %3668 = vst.msk [vmem:[%s8558_s10 + $0x130] sm:$0xff] %vm1077_vm1, %v7201_v2  ;;  %v7212_v32 = vclamps-f32 %v10727_v59, 2.0  ;;  %v10889_v24 = vpop.permute.xlu0 %3916 }
 0x54e   : > { %3669 = vst.msk [vmem:[%s8558_s10 + $0x138] sm:$0xff] %vm1077_vm1, %v7202_v28  ;;  %3670 = vst.msk [vmem:[%s8558_s10 + $0x140] sm:$0xff] %vm1077_vm1, %v7203_v19  ;;  %v7213_v37 = vclamps-f32 %v10730_v57, 2.0  ;;  %v7214_v0 = vclamps-f32 %v10733_v23, 2.0  ;;  %v7215_v33 = vclamps-f32 %v10736_v38, 2.0  ;;  %v7216_v53 = vclamps-f32 %v10739_v8, 2.0 }
 0x54f   : > { %3671 = vst.msk [vmem:[%s8558_s10 + $0x148] sm:$0xff] %vm1077_vm1, %v7204_v48  ;;  %3672 = vst.msk [vmem:[%s8558_s10 + $0x150] sm:$0xff] %vm1077_vm1, %v7205_v42  ;;  %v7217_v49 = vclamps-f32 %v10742_v13, 2.0  ;;  %v7218_v25 = vclamps-f32 %v10745_v55, 2.0  ;;  %v7219_v46 = vclamps-f32 %v10748_v20, 2.0  ;;  %v7220_v59 = vclamps-f32 %v10751_v43, 2.0 }
 0x550   : > { %3673 = vst.msk [vmem:[%s8558_s10 + $0x158] sm:$0xff] %vm1077_vm1, %v7206_v21  ;;  %3674 = vst.msk [vmem:[%s8558_s10 + $0x160] sm:$0xff] %vm1077_vm1, %v7207_v35  ;;  %v7221_v57 = vclamps-f32 %v10754_v29, 2.0  ;;  %v7222_v23 = vclamps-f32 %v10757_v63, 2.0  ;;  %v7223_v38 = vclamps-f32 %v10760_v3, 2.0  ;;  %v7224_v8 = vclamps-f32 %v10763_v52, 2.0 }
 0x551   : > { %3675 = vst.msk [vmem:[%s8558_s10 + $0x168] sm:$0xff] %vm1077_vm1, %v7208_v22  ;;  %3676 = vst.msk [vmem:[%s8558_s10 + $0x170] sm:$0xff] %vm1077_vm1, %v7209_v54  ;;  %v7225_v13 = vclamps-f32 %v10766_v15, 2.0  ;;  %v7226_v63 = vclamps-f32 %v10769_v18, 2.0  ;;  %v3212_v55 = vcombine.high %v10627_v45, %v10627_v45  ;;  %v3226_v20 = vrot.slane %v10627_v45, %v9506_v50  ;;  %v14166_v28 = vld [vmem:[#allocation140_spill] sm:$0xff]  ;;  %v14167_v48 = vld [vmem:[#allocation129_spill] sm:$0xff] }
 0x552   : > { %3677 = vst.msk [vmem:[%s8558_s10 + $0x178] sm:$0xff] %vm1077_vm1, %v7210_v30  ;;  %3678 = vst.msk [vmem:[%s8558_s10 + $0x180] sm:$0xff] %vm1077_vm1, %v7211_v1  ;;  %v14161_v43 = vcombine.high %v10621_v34, %v10621_v34  ;;  %v3241_v29 = vcombine.high %v10633_v39, %v10633_v39  ;;  %v3297_v56 = vrot.slane %v10633_v39, %v8766_v12  ;;  %v14162_v39 = vld [vmem:[#allocation127_spill] sm:$0xff]  ;;  %v14168_v21 = vld [vmem:[#allocation130_spill] sm:$0xff] }
 0x553   : > { %3679 = vst.msk [vmem:[%s8558_s10 + $0x188] sm:$0xff] %vm1077_vm1, %v7212_v32  ;;  %3680 = vst.msk [vmem:[%s8558_s10 + $0x190] sm:$0xff] %vm1077_vm1, %v7213_v37  ;;  %v3240_v11 = vrot.slane %v3212_v55, %v9506_v50  ;;  %v3242_v45 = vcombine.high %v3226_v20, %v3226_v20  ;;  %v3313_v6 = vrot.slane %v3226_v20, %v8766_v12  ;;  %v14169_v22 = vld [vmem:[#allocation134_spill] sm:$0xff]  ;;  %v10899_v37 = vpop.permute.xlu1 %3912  ;;  %v14178_v55 = vld [vmem:[#allocation105_spill] sm:$0xff] }
 0x554   : > { %3681 = vst.msk [vmem:[%s8558_s10 + $0x198] sm:$0xff] %vm1077_vm1, %v7214_v0  ;;  %3682 = vst.msk [vmem:[%s8558_s10 + $0x1a0] sm:$0xff] %vm1077_vm1, %v7215_v33  ;;  %v3233_v9 = vrot.slane %v14161_v43, %v9506_v50  ;;  %v3305_v34 = vrot.slane %v3241_v29, %v8766_v12  ;;  %v3374_v5 = vmul.f32 %v3297_v56, %v14162_v39  ;;  %v14179_v20 = vld [vmem:[#allocation148_spill] sm:$0xff]  ;;  %v14180_v43 = vld [vmem:[#allocation147_spill] sm:$0xff]  ;;  %v10921_v29 = vpop.permute.xlu0 %4015 }
 0x555   : > { %3683 = vst.msk [vmem:[%s8558_s10 + $0x1a8] sm:$0xff] %vm1077_vm1, %v7216_v53  ;;  %3684 = vst.msk [vmem:[%s8558_s10 + $0x1b0] sm:$0xff] %vm1077_vm1, %v7217_v49  ;;  %v3244_v52 = vcombine.high %v3240_v11, %v3240_v11  ;;  %v3317_v15 = vrot.slane %v3240_v11, %v8766_v12  ;;  %v3321_v51 = vrot.slane %v3242_v45, %v8766_v12  ;;  %v14183_v45 = vld [vmem:[#allocation104_spill] sm:$0xff]  ;;  %v14186_v39 = vld [vmem:[#allocation90_spill] sm:$0xff] }
 0x556   : > { %3685 = vst.msk [vmem:[%s8558_s10 + $0x1b8] sm:$0xff] %vm1077_vm1, %v7218_v25  ;;  %3686 = vst.msk [vmem:[%s8558_s10 + $0x1c0] sm:$0xff] %vm1077_vm1, %v7219_v46  ;;  %v3243_v3 = vcombine.high %v3233_v9, %v3233_v9  ;;  %v3301_v60 = vrot.slane %v3233_v9, %v8766_v12  ;;  %v3375_v17 = vmul.f32 %v3297_v56, %v14163_v62  ;;  %v14187_v62 = vld [vmem:[#allocation95_spill] sm:$0xff] }
 0x557   : > { %3687 = vst.msk [vmem:[%s8558_s10 + $0x1c8] sm:$0xff] %vm1077_vm1, %v7220_v59  ;;  %3688 = vst.msk [vmem:[%s8558_s10 + $0x1d0] sm:$0xff] %vm1077_vm1, %v7221_v57  ;;  %v3376_v61 = vmul.f32 %v3297_v56, %v14164_v58  ;;  %v3325_v2 = vrot.slane %v3244_v52, %v8766_v12  ;;  %v3377_v19 = vmul.f32 %v3297_v56, %v14166_v28  ;;  %v14171_v59 = vld [vmem:[#allocation138_spill] sm:$0xff]  ;;  %v14172_v57 = vld [vmem:[#allocation139_spill] sm:$0xff] }
 0x558   : > { %3689 = vst.msk [vmem:[%s8558_s10 + $0x1d8] sm:$0xff] %vm1077_vm1, %v7222_v23  ;;  %3690 = vst.msk [vmem:[%s8558_s10 + $0x1e0] sm:$0xff] %vm1077_vm1, %v7223_v38  ;;  %v3309_v18 = vrot.slane %v3243_v3, %v8766_v12  ;;  %v3378_v42 = vmul.f32 %v3301_v60, %v14167_v48  ;;  %v3379_v35 = vmul.f32 %v3301_v60, %v14168_v21  ;;  %v14173_v23 = vld [vmem:[#allocation145_spill] sm:$0xff]  ;;  %v14182_v56 = vld [vmem:[#allocation64_spill] sm:$0xff] }
 0x559   : > { %3691 = vst.msk [vmem:[%s8558_s10 + $0x1e8] sm:$0xff] %vm1077_vm1, %v7224_v8  ;;  %3692 = vst.msk [vmem:[%s8558_s10 + $0x1f0] sm:$0xff] %vm1077_vm1, %v7225_v13  ;;  %v3380_v54 = vmul.f32 %v3301_v60, %v14169_v22  ;;  %v3381_v30 = vmul.f32 %v3301_v60, %v14063_v7  ;;  %v3382_v1 = vmul.f32 %v3305_v34, %v14064_v41  ;;  %v14174_v38 = vld [vmem:[#allocation61_spill] sm:$0xff]  ;;  %v14184_v60 = vld [vmem:[#allocation51_spill] sm:$0xff]  ;;  %v10947_v22 = vpop.permute.xlu1 %3981 }
 0x55a   : > { %3693 = vst.msk [vmem:[%s8558_s10 + $0x1f8] sm:$0xff] %vm1077_vm1, %v7226_v63  ;;  %14165 = vst [vmem:[#allocation115_spill] sm:$0xff] %v10889_v24  ;;  %v3383_v32 = vmul.f32 %v3305_v34, %v14065_v14  ;;  %v3384_v0 = vmul.f32 %v3305_v34, %v14066_v36  ;;  %v3385_v33 = vmul.f32 %v3305_v34, %v14067_v26  ;;  %v14175_v36 = vld [vmem:[#allocation143_spill] sm:$0xff]  ;;  %v14176_v26 = vld [vmem:[#allocation144_spill] sm:$0xff] }
 0x55b   : > { %14170 = vst [vmem:[#allocation123_spill] sm:$0xff] %v10899_v37  ;;  %v3386_v53 = vmul.f32 %v3309_v18, %v14068_v4  ;;  %v3387_v49 = vmul.f32 %v3309_v18, %v14069_v40  ;;  %v3388_v25 = vmul.f32 %v3309_v18, %v14070_v27  ;;  %v3389_v46 = vmul.f32 %v3309_v18, %v14071_v16  ;;  %v14177_v63 = vld [vmem:[#allocation150_spill] sm:$0xff]  ;;  %v7909_v28 = vld [vmem:[%s8558_s10] sm:$0xff] }
 0x55c   : > { %v3390_v7 = vmul.f32 %v3313_v6, %v14171_v59  ;;  %v3391_v41 = vmul.f32 %v3313_v6, %v14172_v57  ;;  %v3392_v14 = vmul.f32 %v3313_v6, %v14173_v23  ;;  %v3393_v8 = vmul.f32 %v3313_v6, %v14174_v38  ;;  %14181 = vst [vmem:[#allocation113_spill] sm:$0xff] %v10921_v29  ;;  %v14185_v52 = vld [vmem:[#allocation50_spill] sm:$0xff]  ;;  %v7911_v59 = vld [vmem:[%s8558_s10 + $0x10] sm:$0xff]  ;;  %v7912_v23 = vld [vmem:[%s8558_s10 + $0x18] sm:$0xff] }
 0x55d   : > { %v3394_v13 = vmul.f32 %v3317_v15, %v14175_v36  ;;  %v3395_v4 = vmul.f32 %v3317_v15, %v14176_v26  ;;  %v3396_v40 = vmul.f32 %v3317_v15, %v14177_v63  ;;  %v3397_v27 = vmul.f32 %v3317_v15, %v14178_v55  ;;  %v4618_v15 = vld [vmem:[#allocation9 + $0x38] sm:$0xff]  ;;  %14188 = vst [vmem:[#allocation114_spill] sm:$0xff] %v10947_v22  ;;  %v7913_v38 = vld [vmem:[%s8558_s10 + $0x20] sm:$0xff]  ;;  %v7914_v36 = vld [vmem:[%s8558_s10 + $0x28] sm:$0xff] }
 0x55e   : > { %v10916_v16 = vmul.f32 %v3321_v51, %v14179_v20  ;;  %v10919_v9 = vmul.f32 %v3321_v51, %v14180_v43  ;;  %v10924_v11 = vmul.f32 %v3321_v51, %v14182_v56  ;;  %v10927_v3 = vmul.f32 %v3321_v51, %v14183_v45  ;;  %v7910_v51 = vld [vmem:[%s8558_s10 + $0x8] sm:$0xff]  ;;  %7559 = vmatprep.subr.mxu0 %v4618_v15  ;;  %v7915_v26 = vld [vmem:[%s8558_s10 + $0x30] sm:$0xff]  ;;  %v7920_v45 = vld [vmem:[%s8558_s10 + $0x58] sm:$0xff] }
 0x55f   : > { %v10930_v34 = vmul.f32 %v3325_v2, %v14184_v60  ;;  %v10933_v6 = vmul.f32 %v3325_v2, %v14185_v52  ;;  %v10936_v18 = vmul.f32 %v3325_v2, %v14186_v39  ;;  %v10939_v58 = vmul.f32 %v3325_v2, %v14187_v62  ;;  %7560 = vmatpush3.msra.mxu0 %v4618_v15  ;;  %v7925_v62 = vld [vmem:[%s8558_s10 + $0x80] sm:$0xff] }
 0x560   : > { %v10942_v48 = vadd.f32 %v7909_v28, %v3374_v5  ;;  %v10945_v21 = vadd.f32 %v7910_v51, %v3375_v17  ;;  %v10950_v57 = vadd.f32 %v7911_v59, %v3376_v61  ;;  %v10953_v2 = vadd.f32 %v7912_v23, %v3377_v19  ;;  %v7916_v61 = vld [vmem:[%s8558_s10 + $0x38] sm:$0xff]  ;;  %v7917_v19 = vld [vmem:[%s8558_s10 + $0x40] sm:$0xff]  ;;  %v7926_v28 = vld [vmem:[%s8558_s10 + $0x88] sm:$0xff]  ;;  %v10997_v51 = vpop.permute.xlu0 %4049 }
 0x561   : > { %v10956_v5 = vadd.f32 %v7913_v38, %v3378_v42  ;;  %v10959_v17 = vadd.f32 %v7914_v36, %v3379_v35  ;;  %v10962_v63 = vadd.f32 %v7915_v26, %v3380_v54  ;;  %v10965_v55 = vadd.f32 %v7916_v61, %v3381_v30  ;;  %v7918_v42 = vld [vmem:[%s8558_s10 + $0x48] sm:$0xff]  ;;  %v7919_v35 = vld [vmem:[%s8558_s10 + $0x50] sm:$0xff]  ;;  %v7921_v54 = vld [vmem:[%s8558_s10 + $0x60] sm:$0xff]  ;;  %14189 = vst [vmem:[#allocation119_spill] sm:$0xff] %v10997_v51 }
 0x562   : > { %v10968_v20 = vadd.f32 %v7917_v19, %v3382_v1  ;;  %v10971_v43 = vadd.f32 %v7918_v42, %v3383_v32  ;;  %v10974_v56 = vadd.f32 %v7919_v35, %v3384_v0  ;;  %v10977_v60 = vadd.f32 %v7920_v45, %v3385_v33  ;;  %v7922_v30 = vld [vmem:[%s8558_s10 + $0x68] sm:$0xff]  ;;  %v7923_v1 = vld [vmem:[%s8558_s10 + $0x70] sm:$0xff]  ;;  %v7924_v32 = vld [vmem:[%s8558_s10 + $0x78] sm:$0xff] }
 0x563   : > { %v10980_v52 = vadd.f32 %v7921_v54, %v3386_v53  ;;  %v10983_v15 = vadd.f32 %v7922_v30, %v3387_v49  ;;  %v10986_v39 = vadd.f32 %v7923_v1, %v3388_v25  ;;  %v10989_v0 = vadd.f32 %v7924_v32, %v3389_v46  ;;  %v7927_v49 = vld [vmem:[%s8558_s10 + $0x90] sm:$0xff]  ;;  %v7928_v25 = vld [vmem:[%s8558_s10 + $0x98] sm:$0xff]  ;;  %v7929_v46 = vld [vmem:[%s8558_s10 + $0xa0] sm:$0xff] }
 0x564   : > { %v10992_v33 = vadd.f32 %v7925_v62, %v3390_v7  ;;  %v10995_v53 = vadd.f32 %v7926_v28, %v3391_v41  ;;  %v11000_v59 = vadd.f32 %v7927_v49, %v3392_v14  ;;  %v11003_v23 = vadd.f32 %v7928_v25, %v3393_v8  ;;  %v7930_v7 = vld [vmem:[%s8558_s10 + $0xa8] sm:$0xff]  ;;  %v7931_v41 = vld [vmem:[%s8558_s10 + $0xb0] sm:$0xff]  ;;  %v7932_v61 = vld [vmem:[%s8558_s10 + $0xb8] sm:$0xff] }
 0x565   : > { %v11006_v38 = vadd.f32 %v7929_v46, %v3394_v13  ;;  %v11009_v36 = vadd.f32 %v7930_v7, %v3395_v4  ;;  %v11012_v26 = vadd.f32 %v7931_v41, %v3396_v40  ;;  %v11015_v19 = vadd.f32 %v7932_v61, %v3397_v27  ;;  %v7933_v14 = vld [vmem:[%s8558_s10 + $0xc0] sm:$0xff]  ;;  %v7934_v42 = vld [vmem:[%s8558_s10 + $0xc8] sm:$0xff]  ;;  %v11025_v4 = vpop.permute.xlu1 %4045  ;;  %v4617_v35 = vld [vmem:[#allocation9 + $0x30] sm:$0xff] }
 0x566   : > { %v11019_v8 = vadd.f32 %v7933_v14, %v10916_v16  ;;  %v11023_v13 = vadd.f32 %v7934_v42, %v10919_v9  ;;  %14190 = vst [vmem:[#allocation62_spill] sm:$0xff] %v11025_v4  ;;  %v4616_v45 = vld [vmem:[#allocation9 + $0x28] sm:$0xff]  ;;  %v7935_v40 = vld [vmem:[%s8558_s10 + $0xd0] sm:$0xff]  ;;  %v7936_v27 = vld [vmem:[%s8558_s10 + $0xd8] sm:$0xff]  ;;  %7561 = vmatprep.subr.mxu0 %v4617_v35  ;;  %v7166_v46 = vclamps-f32 %v10953_v2, 2.0  ;;  %v7168_v7 = vclamps-f32 %v10959_v17, 2.0 }
 0x567   : > { %v11029_v54 = vadd.f32 %v7935_v40, %v10924_v11  ;;  %v11033_v30 = vadd.f32 %v7936_v27, %v10927_v3  ;;  %v7937_v1 = vld [vmem:[%s8558_s10 + $0xe0] sm:$0xff]  ;;  %v7938_v32 = vld [vmem:[%s8558_s10 + $0xe8] sm:$0xff]  ;;  %v7939_v62 = vld [vmem:[%s8558_s10 + $0xf0] sm:$0xff]  ;;  %v7163_v3 = vclamps-f32 %v10942_v48, 2.0  ;;  %7562 = vmatpush3.msra.mxu0 %v4617_v35  ;;  %v7170_v48 = vclamps-f32 %v10965_v55, 2.0 }
 0x568   : > { %v11037_v16 = vadd.f32 %v7937_v1, %v10930_v34  ;;  %v11041_v9 = vadd.f32 %v7938_v32, %v10933_v6  ;;  %v11045_v28 = vadd.f32 %v7939_v62, %v10936_v18  ;;  %v7940_v11 = vld [vmem:[%s8558_s10 + $0xf8] sm:$0xff]  ;;  %v7164_v34 = vclamps-f32 %v10945_v21, 2.0  ;;  %v4615_v25 = vld [vmem:[#allocation9 + $0x20] sm:$0xff]  ;;  %7563 = vmatprep.subr.mxu0 %v4616_v45  ;;  %3633 = vst.msk [vmem:[%s8558_s10 + $0x18] sm:$0xff] %vm1077_vm1, %v7166_v46  ;;  %v14194_v32 = vld [vmem:[#allocation58_spill] sm:$0xff] }
 0x569   : > { %v11049_v49 = vadd.f32 %v7940_v11, %v10939_v58  ;;  %v7165_v6 = vclamps-f32 %v10950_v57, 2.0  ;;  %v7167_v18 = vclamps-f32 %v10956_v5, 2.0  ;;  %v7169_v58 = vclamps-f32 %v10962_v63, 2.0  ;;  %3630 = vst.msk [vmem:[%s8558_s10] sm:$0xff] %vm1077_vm1, %v7163_v3  ;;  %v11065_v57 = vpop.permute.xlu0 %3901  ;;  %7564 = vmatpush3.msra.mxu0 %v4616_v45  ;;  %3635 = vst.msk [vmem:[%s8558_s10 + $0x28] sm:$0xff] %vm1077_vm1, %v7168_v7  ;;  %v3753_v35 = vld [vmem:[%s8558_s10 + $0x158] sm:$0xff] }
 0x56a   : > { %v7171_v21 = vclamps-f32 %v10968_v20, 2.0  ;;  %v7172_v41 = vclamps-f32 %v10971_v43, 2.0  ;;  %3631 = vst.msk [vmem:[%s8558_s10 + $0x8] sm:$0xff] %vm1077_vm1, %v7164_v34  ;;  %14191 = vst [vmem:[#allocation118_spill] sm:$0xff] %v11065_v57  ;;  %v7173_v2 = vclamps-f32 %v10974_v56, 2.0  ;;  %v7174_v5 = vclamps-f32 %v10977_v60, 2.0  ;;  %7565 = vmatprep.subr.mxu0 %v4615_v25 }
 0x56b   : > { %v7175_v17 = vclamps-f32 %v10980_v52, 2.0  ;;  %v7176_v63 = vclamps-f32 %v10983_v15, 2.0  ;;  %3632 = vst.msk [vmem:[%s8558_s10 + $0x10] sm:$0xff] %vm1077_vm1, %v7165_v6  ;;  %3634 = vst.msk [vmem:[%s8558_s10 + $0x20] sm:$0xff] %vm1077_vm1, %v7167_v18  ;;  %v7177_v55 = vclamps-f32 %v10986_v39, 2.0  ;;  %v7178_v20 = vclamps-f32 %v10989_v0, 2.0  ;;  %v11092_v52 = vpop.permute.xlu1 %3867  ;;  %7566 = vmatpush3.msra.mxu0 %v4615_v25 }
 0x56c   : > { %v7179_v43 = vclamps-f32 %v10992_v33, 2.0  ;;  %v7180_v56 = vclamps-f32 %v10995_v53, 2.0  ;;  %3636 = vst.msk [vmem:[%s8558_s10 + $0x30] sm:$0xff] %vm1077_vm1, %v7169_v58  ;;  %3637 = vst.msk [vmem:[%s8558_s10 + $0x38] sm:$0xff] %vm1077_vm1, %v7170_v48  ;;  %v3750_v60 = vld [vmem:[%s8558_s10 + $0x140] sm:$0xff]  ;;  %v7181_v15 = vclamps-f32 %v11000_v59, 2.0  ;;  %v4121_v62 = vmul.f32 %v10947_v22, %v3753_v35 }
 0x56d   : > { %3638 = vst.msk [vmem:[%s8558_s10 + $0x40] sm:$0xff] %vm1077_vm1, %v7171_v21  ;;  %3639 = vst.msk [vmem:[%s8558_s10 + $0x48] sm:$0xff] %vm1077_vm1, %v7172_v41  ;;  %v7182_v39 = vclamps-f32 %v11003_v23, 2.0  ;;  %v7183_v0 = vclamps-f32 %v11006_v38, 2.0  ;;  %v7184_v33 = vclamps-f32 %v11009_v36, 2.0  ;;  %v3758_v53 = vld [vmem:[%s8558_s10 + $0x180] sm:$0xff]  ;;  %v4118_v1 = vmul.f32 %v10525_v31, %v3750_v60 }
 0x56e   : > { %14192 = vst [vmem:[#allocation117_spill] sm:$0xff] %v11092_v52  ;;  %3640 = vst.msk [vmem:[%s8558_s10 + $0x50] sm:$0xff] %vm1077_vm1, %v7173_v2  ;;  %v3759_v59 = vld [vmem:[%s8558_s10 + $0x188] sm:$0xff]  ;;  %v7185_v23 = vclamps-f32 %v11012_v26, 2.0  ;;  %v7186_v38 = vclamps-f32 %v11015_v19, 2.0  ;;  %v7187_v36 = vclamps-f32 %v11019_v8, 2.0 }
 0x56f   : > { %3641 = vst.msk [vmem:[%s8558_s10 + $0x58] sm:$0xff] %vm1077_vm1, %v7174_v5  ;;  %3642 = vst.msk [vmem:[%s8558_s10 + $0x60] sm:$0xff] %vm1077_vm1, %v7175_v17  ;;  %v7188_v61 = vclamps-f32 %v11023_v13, 2.0  ;;  %v3751_v26 = vld [vmem:[%s8558_s10 + $0x148] sm:$0xff]  ;;  %v3752_v19 = vld [vmem:[%s8558_s10 + $0x150] sm:$0xff]  ;;  %v7189_v14 = vclamps-f32 %v11029_v54, 2.0  ;;  %v4126_v54 = vmul.f32 %v10541_v44, %v3758_v53  ;;  %v4127_v27 = vmul.f32 %v10550_v47, %v3759_v59  ;;  %v11166_v11 = vpop.permute.xlu1 %4000 }
 0x570   : > { %3643 = vst.msk [vmem:[%s8558_s10 + $0x68] sm:$0xff] %vm1077_vm1, %v7176_v63  ;;  %3644 = vst.msk [vmem:[%s8558_s10 + $0x70] sm:$0xff] %vm1077_vm1, %v7177_v55  ;;  %v7190_v8 = vclamps-f32 %v11033_v30, 2.0  ;;  %v7191_v42 = vclamps-f32 %v11037_v16, 2.0  ;;  %v7192_v13 = vclamps-f32 %v11041_v9, 2.0  ;;  %v7193_v45 = vclamps-f32 %v11045_v28, 2.0  ;;  %v11147_v30 = vpop.permute.xlu0 %4034 }
 0x571   : > { %3645 = vst.msk [vmem:[%s8558_s10 + $0x78] sm:$0xff] %vm1077_vm1, %v7178_v20  ;;  %3646 = vst.msk [vmem:[%s8558_s10 + $0x80] sm:$0xff] %vm1077_vm1, %v7179_v43  ;;  %v7194_v40 = vclamps-f32 %v11049_v49, 2.0  ;;  %v4119_v16 = vmul.f32 %v10523_v10, %v3751_v26  ;;  %v4120_v9 = vmul.f32 %v14194_v32, %v3752_v19  ;;  %v3767_v28 = vld [vmem:[%s8558_s10 + $0x1c8] sm:$0xff]  ;;  %v3760_v49 = vld [vmem:[%s8558_s10 + $0x190] sm:$0xff] }
 0x572   : > { %3647 = vst.msk [vmem:[%s8558_s10 + $0x88] sm:$0xff] %vm1077_vm1, %v7180_v56  ;;  %3648 = vst.msk [vmem:[%s8558_s10 + $0x90] sm:$0xff] %vm1077_vm1, %v7181_v15  ;;  %v11169_v3 = vld [vmem:[#allocation9 + $0x60] sm:$0xff]  ;;  %v11173_v6 = vld [vmem:[#allocation9 + $0x68] sm:$0xff]  ;;  %v4135_v17 = vmul.f32 %v10997_v51, %v3767_v28  ;;  %v4128_v63 = vmul.f32 %v10921_v29, %v3760_v49 }
 0x573   : > { %3649 = vst.msk [vmem:[%s8558_s10 + $0x98] sm:$0xff] %vm1077_vm1, %v7182_v39  ;;  %3650 = vst.msk [vmem:[%s8558_s10 + $0xa0] sm:$0xff] %vm1077_vm1, %v7183_v0  ;;  %v4190_v34 = vmul.f32 %v11169_v3, %v4126_v54  ;;  %v4182_v25 = vmul.f32 %v11169_v3, %v4118_v1  ;;  %v4183_v46 = vmul.f32 %v11173_v6, %v4119_v16  ;;  %v11176_v18 = vld [vmem:[#allocation9 + $0x70] sm:$0xff]  ;;  %v3766_v48 = vld [vmem:[%s8558_s10 + $0x1c0] sm:$0xff] }
 0x574   : > { %3651 = vst.msk [vmem:[%s8558_s10 + $0xa8] sm:$0xff] %vm1077_vm1, %v7184_v33  ;;  %3652 = vst.msk [vmem:[%s8558_s10 + $0xb0] sm:$0xff] %vm1077_vm1, %v7185_v23  ;;  %v4184_v7 = vmul.f32 %v11176_v18, %v4120_v9  ;;  %v4191_v58 = vmul.f32 %v11173_v6, %v4127_v27  ;;  %v11183_v2 = vld [vmem:[#allocation9 + $0x78] sm:$0xff]  ;;  %v11189_v43 = vpop.permute.xlu0 %4068  ;;  %v4134_v15 = vmul.f32 %v11025_v4, %v3766_v48  ;;  %v14198_v19 = vld [vmem:[#allocation142_spill] sm:$0xff] }
 0x575   : > { %3653 = vst.msk [vmem:[%s8558_s10 + $0xb8] sm:$0xff] %vm1077_vm1, %v7186_v38  ;;  %3654 = vst.msk [vmem:[%s8558_s10 + $0xc0] sm:$0xff] %vm1077_vm1, %v7187_v36  ;;  %v4336_v21 = vsel %vm1077_vm1, %v4182_v25, 0.0  ;;  %v4337_v41 = vsel %vm1077_vm1, %v4183_v46, 0.0  ;;  %v4185_v5 = vmul.f32 %v11183_v2, %v4121_v62  ;;  %v4362_v56 = vsel %vm1077_vm1, %v4190_v34, 0.0  ;;  %v14201_v16 = vld [vmem:[#allocation112_spill] sm:$0xff] }
 0x576   : > { %3655 = vst.msk [vmem:[%s8558_s10 + $0xc8] sm:$0xff] %vm1077_vm1, %v7188_v61  ;;  %14193 = vst [vmem:[#allocation124_spill] sm:$0xff] %v11147_v30  ;;  %v4338_v55 = vadd.f32 %v4337_v41, %v4336_v21  ;;  %v4339_v60 = vsel %vm1077_vm1, %v4184_v7, 0.0  ;;  %v4363_v23 = vsel %vm1077_vm1, %v4191_v58, 0.0  ;;  %v14197_v61 = vld [vmem:[#allocation136_spill] sm:$0xff]  ;;  %v4198_v35 = vmul.f32 %v11169_v3, %v4134_v15  ;;  %v14241_v29 = vld [vmem:[#allocation93_spill] sm:$0xff] }
 0x577   : > { %3656 = vst.msk [vmem:[%s8558_s10 + $0xd0] sm:$0xff] %vm1077_vm1, %v7189_v14  ;;  %3657 = vst.msk [vmem:[%s8558_s10 + $0xd8] sm:$0xff] %vm1077_vm1, %v7190_v8  ;;  %v11203_v8 = vpop.permute.xlu1 %4064  ;;  %v4192_v27 = vmul.f32 %v11176_v18, %v4128_v63  ;;  %v4364_v28 = vadd.f32 %v4363_v23, %v4362_v56  ;;  %v3755_v23 = vld [vmem:[%s8558_s10 + $0x168] sm:$0xff]  ;;  %v14242_v47 = vld [vmem:[#allocation111_spill] sm:$0xff] }
 0x578   : > { %3658 = vst.msk [vmem:[%s8558_s10 + $0xe0] sm:$0xff] %vm1077_vm1, %v7191_v42  ;;  %3659 = vst.msk [vmem:[%s8558_s10 + $0xe8] sm:$0xff] %vm1077_vm1, %v7192_v13  ;;  %v3726_v20 = vld [vmem:[%s8558_s10 + $0x80] sm:$0xff]  ;;  %v4340_v38 = vadd.f32 %v4339_v60, %v4338_v55  ;;  %v4341_v42 = vsel %vm1077_vm1, %v4185_v5, 0.0  ;;  %v4199_v13 = vmul.f32 %v11173_v6, %v4135_v17  ;;  %v11217_v58 = vpop.permute.xlu0 %3920  ;;  %v4388_v21 = vsel %vm1077_vm1, %v4198_v35, 0.0  ;;  %v14248_v32 = vld [vmem:[#allocation98_spill] sm:$0xff] }
 0x579   : > { %3660 = vst.msk [vmem:[%s8558_s10 + $0xf0] sm:$0xff] %vm1077_vm1, %v7193_v45  ;;  %3661 = vst.msk [vmem:[%s8558_s10 + $0xf8] sm:$0xff] %vm1077_vm1, %v7194_v40  ;;  %v3727_v33 = vld [vmem:[%s8558_s10 + $0x88] sm:$0xff]  ;;  %v14200_v45 = vld [vmem:[#allocation116_spill] sm:$0xff]  ;;  %v4365_v17 = vsel %vm1077_vm1, %v4192_v27, 0.0 }
 0x57a   : > { %14195 = vst [vmem:[#allocation70_spill] sm:$0xff] %v11166_v11  ;;  %14196 = vst [vmem:[#allocation120_spill] sm:$0xff] %v11189_v43  ;;  %v4094_v40 = vmul.f32 %v14200_v45, %v3726_v20  ;;  %v4342_v1 = vadd.f32 %v4341_v42, %v4340_v38  ;;  %v4095_v9 = vmul.f32 %v14201_v16, %v3727_v33  ;;  %v3728_v7 = vld [vmem:[%s8558_s10 + $0x90] sm:$0xff]  ;;  %v4389_v48 = vsel %vm1077_vm1, %v4199_v13, 0.0  ;;  %v3729_v63 = vld [vmem:[%s8558_s10 + $0x98] sm:$0xff] }
 0x57b   : > { %14199 = vst [vmem:[#allocation121_spill] sm:$0xff] %v11203_v8  ;;  %14202 = vst [vmem:[#allocation74_spill] sm:$0xff] %v11217_v58  ;;  %v3762_v20 = vld [vmem:[%s8558_s10 + $0x1a0] sm:$0xff]  ;;  %v11227_v56 = vpop.permute.xlu1 %3886  ;;  %v11230_v15 = vadd.f32 %v4365_v17, %v4364_v28  ;;  %v4097_v35 = vmul.f32 %v11092_v52, %v3729_v63  ;;  %v3756_v27 = vld [vmem:[%s8558_s10 + $0x170] sm:$0xff] }
 0x57c   : > { %v3734_v39 = vld [vmem:[%s8558_s10 + $0xc0] sm:$0xff]  ;;  %v4343_v34 = vrot.slane %v4342_v1, 4  ;;  %v4158_v41 = vmul.f32 %v11169_v3, %v4094_v40  ;;  %v4159_v55 = vmul.f32 %v11173_v6, %v4095_v9  ;;  %14203 = vst [vmem:[#allocation89_spill] sm:$0xff] %v11227_v56  ;;  %v14205_v40 = vld [vmem:[#allocation76_spill] sm:$0xff]  ;;  %v11385_v45 = vld [vmem:[%s8558_s10 + $0x108] sm:$0xff] }
 0x57d   : > { %v3735_v0 = vld [vmem:[%s8558_s10 + $0xc8] sm:$0xff]  ;;  %v4102_v26 = vmul.f32 %v14197_v61, %v3734_v39  ;;  %v3757_v63 = vld [vmem:[%s8558_s10 + $0x178] sm:$0xff]  ;;  %v14216_v52 = vld [vmem:[#allocation149_spill] sm:$0xff]  ;;  %14225 = vst [vmem:[#allocation84_spill] sm:$0xff] %v11385_v45 }
 0x57e   : > { %v3736_v36 = vld [vmem:[%s8558_s10 + $0xd0] sm:$0xff]  ;;  %v4103_v14 = vmul.f32 %v14198_v19, %v3735_v0  ;;  %v4344_v38 = vadd.f32 %v4343_v34, %v4342_v1  ;;  %v4258_v42 = vsel %vm1077_vm1, %v4158_v41, 0.0  ;;  %v4259_v13 = vsel %vm1077_vm1, %v4159_v55, 0.0  ;;  %v3770_v19 = vld [vmem:[%s8558_s10 + $0x1e0] sm:$0xff]  ;;  %v14252_v31 = vld [vmem:[#allocation100_spill] sm:$0xff] }
 0x57f   : > { %v3739_v53 = vld [vmem:[%s8558_s10 + $0xe8] sm:$0xff]  ;;  %v3738_v59 = vld [vmem:[%s8558_s10 + $0xe0] sm:$0xff]  ;;  %v4104_v49 = vmul.f32 %v11065_v57, %v3736_v36  ;;  %v4166_v25 = vmul.f32 %v11169_v3, %v4102_v26  ;;  %v14204_v0 = vld [vmem:[#allocation135_spill] sm:$0xff]  ;;  %v11237_v36 = vadd.f32 %v4389_v48, %v4388_v21 }
 0x580   : > { %v4107_v54 = vmul.f32 %v10889_v24, %v3739_v53  ;;  %v4106_v62 = vmul.f32 %v10899_v37, %v3738_v59  ;;  %v4167_v46 = vmul.f32 %v11173_v6, %v4103_v14  ;;  %v4096_v33 = vmul.f32 %v14204_v0, %v3728_v7  ;;  %v3763_v53 = vld [vmem:[%s8558_s10 + $0x1a8] sm:$0xff]  ;;  %v3754_v59 = vld [vmem:[%s8558_s10 + $0x160] sm:$0xff]  ;;  %v14206_v1 = vld [vmem:[#allocation67_spill] sm:$0xff] }
 0x581   : > { %v4168_v39 = vmul.f32 %v11176_v18, %v4104_v49  ;;  %v4284_v26 = vsel %vm1077_vm1, %v4166_v25, 0.0  ;;  %v4131_v28 = vmul.f32 %v14206_v1, %v3763_v53  ;;  %v14207_v49 = vld [vmem:[#allocation54_spill] sm:$0xff]  ;;  %v14208_v25 = vld [vmem:[#allocation65_spill] sm:$0xff]  ;;  %v4345_v55 = vrot.slane %v4344_v38, 2 }
 0x582   : > { %v4171_v5 = vmul.f32 %v11173_v6, %v4107_v54  ;;  %v4170_v60 = vmul.f32 %v11169_v3, %v4106_v62  ;;  %v4285_v14 = vsel %vm1077_vm1, %v4167_v46, 0.0  ;;  %v4130_v54 = vmul.f32 %v14205_v40, %v3762_v20  ;;  %v3764_v62 = vld [vmem:[%s8558_s10 + $0x1b0] sm:$0xff]  ;;  %v11251_v46 = vpop.permute.xlu0 %4053  ;;  %v14240_v1 = vld [vmem:[#allocation94_spill] sm:$0xff] }
 0x583   : > { %v4122_v34 = vmul.f32 %v14207_v49, %v3754_v59  ;;  %v4123_v7 = vmul.f32 %v14208_v25, %v3755_v23  ;;  %14209 = vst [vmem:[#allocation125_spill] sm:$0xff] %v11251_v46  ;;  %v4286_v21 = vadd.f32 %v4285_v14, %v4284_v26  ;;  %v4287_v41 = vsel %vm1077_vm1, %v4168_v39, 0.0  ;;  %v14210_v20 = vld [vmem:[#allocation83_spill] sm:$0xff]  ;;  %v11259_v59 = vpop.permute.xlu1 %4019  ;;  %v3725_v25 = vld [vmem:[%s8558_s10 + $0x78] sm:$0xff]  ;;  %v14244_v49 = vld [vmem:[#allocation73_spill] sm:$0xff] }
 0x584   : > { %v4298_v9 = vsel %vm1077_vm1, %v4171_v5, 0.0  ;;  %v4297_v48 = vsel %vm1077_vm1, %v4170_v60, 0.0  ;;  %v4160_v17 = vmul.f32 %v11176_v18, %v4096_v33  ;;  %v4260_v5 = vadd.f32 %v4259_v13, %v4258_v42  ;;  %14211 = vst [vmem:[#allocation126_spill] sm:$0xff] %v11259_v59 }
 0x585   : > { %v4124_v24 = vmul.f32 %v14210_v20, %v3756_v27  ;;  %v4186_v53 = vmul.f32 %v11169_v3, %v4122_v34  ;;  %v4161_v23 = vmul.f32 %v11183_v2, %v4097_v35  ;;  %v4194_v60 = vmul.f32 %v11169_v3, %v4130_v54  ;;  %v3730_v27 = vld [vmem:[%s8558_s10 + $0xa0] sm:$0xff]  ;;  %v3724_v20 = vld [vmem:[%s8558_s10 + $0x70] sm:$0xff] }
 0x586   : > { %v4132_v26 = vmul.f32 %v11147_v30, %v3764_v62  ;;  %v4187_v39 = vmul.f32 %v11173_v6, %v4123_v7  ;;  %v4195_v33 = vmul.f32 %v11173_v6, %v4131_v28  ;;  %v4125_v13 = vmul.f32 %v11166_v11, %v3757_v63  ;;  %v3731_v7 = vld [vmem:[%s8558_s10 + $0xa8] sm:$0xff]  ;;  %v3732_v63 = vld [vmem:[%s8558_s10 + $0xb0] sm:$0xff]  ;;  %v11283_v61 = vpop.permute.xlu0 %4038 }
 0x587   : > { %v4188_v14 = vmul.f32 %v11176_v18, %v4124_v24  ;;  %v4349_v42 = vsel %vm1077_vm1, %v4186_v53, 0.0  ;;  %v11270_v34 = vadd.f32 %v4298_v9, %v4297_v48  ;;  %v11272_v35 = vadd.f32 %v4287_v41, %v4286_v21  ;;  %v3771_v53 = vld [vmem:[%s8558_s10 + $0x1e8] sm:$0xff]  ;;  %14212 = vst [vmem:[#allocation75_spill] sm:$0xff] %v11283_v61  ;;  %v14213_v41 = vld [vmem:[#allocation137_spill] sm:$0xff] }
 0x588   : > { %v4261_v54 = vsel %vm1077_vm1, %v4160_v17, 0.0  ;;  %v4350_v62 = vsel %vm1077_vm1, %v4187_v39, 0.0  ;;  %v11277_v37 = vadd.f32 %v4345_v55, %v4344_v38  ;;  %v4189_v24 = vmul.f32 %v11183_v2, %v4125_v13  ;;  %v3740_v39 = vld [vmem:[%s8558_s10 + $0xf0] sm:$0xff]  ;;  %v14243_v11 = vld [vmem:[#allocation82_spill] sm:$0xff] }
 0x589   : > { %v4262_v28 = vadd.f32 %v4261_v54, %v4260_v5  ;;  %v4351_v57 = vadd.f32 %v4350_v62, %v4349_v42  ;;  %v4263_v9 = vsel %vm1077_vm1, %v4161_v23, 0.0  ;;  %v4375_v48 = vsel %vm1077_vm1, %v4194_v60, 0.0  ;;  %v14214_v42 = vld [vmem:[#allocation132_spill] sm:$0xff]  ;;  %v11293_v54 = vpop.permute.xlu1 %3905 }
 0x58a   : > { %v4352_v21 = vsel %vm1077_vm1, %v4188_v14, 0.0  ;;  %v4098_v17 = vmul.f32 %v14213_v41, %v3730_v27  ;;  %v4376_v38 = vsel %vm1077_vm1, %v4195_v33, 0.0  ;;  %v4196_v55 = vmul.f32 %v11176_v18, %v4132_v26  ;;  %14215 = vst [vmem:[#allocation86_spill] sm:$0xff] %v11293_v54  ;;  %v3733_v33 = vld [vmem:[%s8558_s10 + $0xb8] sm:$0xff] }
 0x58b   : > { %v4353_v5 = vadd.f32 %v4352_v21, %v4351_v57  ;;  %v4099_v13 = vmul.f32 %v14214_v42, %v3731_v7  ;;  %v4354_v62 = vsel %vm1077_vm1, %v4189_v24, 0.0  ;;  %v4139_v23 = vmul.f32 %v11189_v43, %v3771_v53  ;;  %v14236_v43 = vld [vmem:[#allocation66_spill] sm:$0xff] }
 0x58c   : > { %v4138_v60 = vmul.f32 %v11203_v8, %v3770_v19  ;;  %v4100_v14 = vmul.f32 %v14216_v52, %v3732_v63  ;;  %v4162_v57 = vmul.f32 %v11169_v3, %v4098_v17  ;;  %v11303_v7 = vadd.f32 %v4263_v9, %v4262_v28  ;;  %v11310_v17 = vpop.permute.xlu0 %3924 }
 0x58d   : > { %v4355_v41 = vadd.f32 %v4354_v62, %v4353_v5  ;;  %v4163_v26 = vmul.f32 %v11173_v6, %v4099_v13  ;;  %v4377_v24 = vadd.f32 %v4376_v38, %v4375_v48  ;;  %v4108_v53 = vmul.f32 %v11217_v58, %v3740_v39  ;;  %14217 = vst [vmem:[#allocation57_spill] sm:$0xff] %v11310_v17  ;;  %v3768_v38 = vld [vmem:[%s8558_s10 + $0x1d0] sm:$0xff]  ;;  %v3761_v39 = vld [vmem:[%s8558_s10 + $0x198] sm:$0xff]  ;;  %v11322_v52 = vpop.permute.xlu1 %4072 }
 0x58e   : > { %v4164_v19 = vmul.f32 %v11176_v18, %v4100_v14  ;;  %v4378_v63 = vsel %vm1077_vm1, %v4196_v55, 0.0  ;;  %v4271_v5 = vsel %vm1077_vm1, %v4162_v57, 0.0  ;;  %v4203_v13 = vmul.f32 %v11173_v6, %v4139_v23  ;;  %v3765_v14 = vld [vmem:[%s8558_s10 + $0x1b8] sm:$0xff]  ;;  %14218 = vst [vmem:[#allocation56_spill] sm:$0xff] %v11322_v52 }
 0x58f   : > { %v4356_v21 = vrot.slane %v4355_v41, 4  ;;  %v4272_v62 = vsel %vm1077_vm1, %v4163_v26, 0.0  ;;  %v4202_v28 = vmul.f32 %v11169_v3, %v4138_v60  ;;  %v4101_v48 = vmul.f32 %v11227_v56, %v3733_v33  ;;  %v3737_v58 = vld [vmem:[%s8558_s10 + $0xd8] sm:$0xff] }
 0x590   : > { %v4273_v9 = vadd.f32 %v4272_v62, %v4271_v5  ;;  %v4136_v27 = vmul.f32 %v11251_v46, %v3768_v38  ;;  %v4129_v57 = vmul.f32 %v11259_v59, %v3761_v39  ;;  %v4133_v26 = vmul.f32 %v11283_v61, %v3765_v14  ;;  %v3741_v38 = vld [vmem:[%s8558_s10 + $0xf8] sm:$0xff]  ;;  %v3772_v39 = vld [vmem:[%s8558_s10 + $0x1f0] sm:$0xff] }
 0x591   : > { %v4357_v55 = vadd.f32 %v4356_v21, %v4355_v41  ;;  %v4172_v23 = vmul.f32 %v11176_v18, %v4108_v53  ;;  %v4274_v60 = vsel %vm1077_vm1, %v4164_v19, 0.0  ;;  %v4165_v33 = vmul.f32 %v11183_v2, %v4101_v48 }
 0x592   : > { %v4105_v5 = vmul.f32 %v11293_v54, %v3737_v58  ;;  %v4275_v56 = vadd.f32 %v4274_v60, %v4273_v9  ;;  %v4193_v41 = vmul.f32 %v11183_v2, %v4129_v57  ;;  %v4197_v21 = vmul.f32 %v11183_v2, %v4133_v26  ;;  %v11339_v60 = vpop.permute.xlu0 %4076 }
 0x593   : > { %v4358_v62 = vrot.slane %v4357_v55, 2  ;;  %v4265_v14 = vrot.slane %v11303_v7, 4  ;;  %v4379_v42 = vadd.f32 %v4378_v63, %v4377_v24  ;;  %v4109_v53 = vmul.f32 %v11310_v17, %v3741_v38  ;;  %14219 = vst [vmem:[#allocation101_spill] sm:$0xff] %v11339_v60  ;;  %v3773_v17 = vld [vmem:[%s8558_s10 + $0x1f8] sm:$0xff] }
 0x594   : > { %v4140_v19 = vmul.f32 %v11322_v52, %v3772_v39  ;;  %v4402_v48 = vsel %vm1077_vm1, %v4203_v13, 0.0  ;;  %v4401_v58 = vsel %vm1077_vm1, %v4202_v28, 0.0  ;;  %v4200_v9 = vmul.f32 %v11176_v18, %v4136_v27 }
 0x595   : > { %v4367_v57 = vsel %vm1077_vm1, %v4193_v41, 0.0  ;;  %v4276_v26 = vsel %vm1077_vm1, %v4165_v33, 0.0  ;;  %v4380_v24 = vsel %vm1077_vm1, %v4197_v21, 0.0  ;;  %v4169_v63 = vmul.f32 %v11183_v2, %v4105_v5 }
 0x596   : > { %v4368_v54 = vadd.f32 %v4367_v57, %v11230_v15  ;;  %v4359_v38 = vadd.f32 %v4358_v62, %v4357_v55  ;;  %v4300_v39 = vsel %vm1077_vm1, %v4172_v23, 0.0  ;;  %v4277_v13 = vadd.f32 %v4276_v26, %v4275_v56  ;;  %v11352_v62 = vpop.permute.xlu1 %4057  ;;  %v11358_v57 = vld [vmem:[%s8558_s10 + $0x100] sm:$0xff] }
 0x597   : > { %v4381_v28 = vadd.f32 %v4380_v24, %v4379_v42  ;;  %v4173_v41 = vmul.f32 %v11183_v2, %v4109_v53  ;;  %v4204_v0 = vmul.f32 %v11176_v18, %v4140_v19  ;;  %v4141_v33 = vmul.f32 %v11339_v60, %v3773_v17  ;;  %14220 = vst [vmem:[#allocation88_spill] sm:$0xff] %v11352_v62  ;;  %v7558_v24 = vpop.f32.mrf.mxu1 }
 0x598   : > { %v4369_v27 = vrot.slane %v4368_v54, 4  ;;  %v4403_v15 = vadd.f32 %v4402_v48, %v4401_v58  ;;  %v4301_v21 = vadd.f32 %v4300_v39, %v11270_v34  ;;  %v4391_v5 = vsel %vm1077_vm1, %v4200_v9, 0.0  ;;  %14221 = vst [vmem:[#allocation81_spill] sm:$0xff] %v11358_v57  ;;  %v11362_v34 = vld [vmem:[%s8558_s10 + $0x1d8] sm:$0xff] }
 0x599   : > { %v4382_v55 = vrot.slane %v4381_v28, 4  ;;  %v4289_v42 = vsel %vm1077_vm1, %v4169_v63, 0.0  ;;  %v4404_v23 = vsel %vm1077_vm1, %v4204_v0, 0.0  ;;  %v4205_v53 = vmul.f32 %v11183_v2, %v4141_v33  ;;  %14222 = vst [vmem:[#allocation80_spill] sm:$0xff] %v11362_v34  ;;  %v11370_v63 = vld [vmem:[%s13897_s12] ss:$0 sm:$0xff] }
 0x59a   : > { %v4370_v56 = vadd.f32 %v4369_v27, %v4368_v54  ;;  %v4360_v19 = vrot.slane %v4359_v38, 1  ;;  %v4278_v26 = vrot.slane %v4277_v13, 4  ;;  %v4302_v48 = vsel %vm1077_vm1, %v4173_v41, 0.0  ;;  %v14223_v27 = vld [vmem:[#allocation52_spill] sm:$0xff] }
 0x59b   : > { %v4383_v17 = vadd.f32 %v4382_v55, %v4381_v28  ;;  %v4405_v9 = vadd.f32 %v4404_v23, %v4403_v15  ;;  %v4406_v54 = vsel %vm1077_vm1, %v4205_v53, 0.0  ;;  %v4137_v0 = vmul.f32 %v11352_v62, %v11362_v34 }
 0x59c   : > { %v4371_v58 = vrot.slane %v4370_v56, 2  ;;  %v4290_v28 = vadd.f32 %v4289_v42, %v11272_v35  ;;  %v4110_v41 = vmul.f32 %v14223_v27, %v11358_v57  ;;  %v11376_v33 = vadd.f32 %v7558_v24, %v11370_v63  ;;  %v11388_v35 = vld [vmem:[%s8558_s10 + $0x110] sm:$0xff] }
 0x59d   : > { %v4384_v39 = vrot.slane %v4383_v17, 2  ;;  %v14224_v15 = vrot.slane %v11277_v37, 1  ;;  %v4303_v23 = vadd.f32 %v4302_v48, %v4301_v21  ;;  %v4407_v53 = vadd.f32 %v4406_v54, %v4405_v9  ;;  %14226 = vst [vmem:[#allocation97_spill] sm:$0xff] %v11388_v35 }
 0x59e   : > { %v4201_v16 = vmul.f32 %v11183_v2, %v4137_v0  ;;  %v11391_v42 = vadd.f32 %v4265_v14, %v11303_v7  ;;  %v4392_v24 = vadd.f32 %v4391_v5, %v11237_v36  ;;  %v4372_v34 = vadd.f32 %v4371_v58, %v4370_v56  ;;  %v11406_v0 = vld [vmem:[%s8558_s10 + $0x128] sm:$0xff]  ;;  %v11409_v14 = vld [vmem:[%s8558_s10 + $0x130] sm:$0xff]  ;;  %v11412_v36 = vld [vmem:[%s8558_s10 + $0x138] sm:$0xff] }
 0x59f   : > { %v11381_v55 = vadd.f32 %v14224_v15, %v11277_v37  ;;  %v4385_v57 = vadd.f32 %v4384_v39, %v4383_v17  ;;  %v11395_v37 = vld [vmem:[%s8558_s10 + $0x118] sm:$0xff]  ;;  %v11398_v15 = vld [vmem:[%s8558_s10 + $0x120] sm:$0xff]  ;;  %v11400_v21 = vadd.f32 %v4360_v19, %v4359_v38  ;;  %v11402_v48 = vadd.f32 %v4278_v26, %v4277_v13  ;;  %14229 = vst [vmem:[#allocation92_spill] sm:$0xff] %v11406_v0  ;;  %v14232_v5 = vld [vmem:[#allocation46_spill] sm:$0xff] }
 0x5a0   : > { %14227 = vst [vmem:[#allocation96_spill] sm:$0xff] %v11395_v37  ;;  %14228 = vst [vmem:[#allocation103_spill] sm:$0xff] %v11398_v15  ;;  %v4408_v9 = vrot.slane %v4407_v53, 4  ;;  %v4393_v54 = vsel %vm1077_vm1, %v4201_v16, 0.0  ;;  %v4291_v60 = vrot.slane %v4290_v28, 4  ;;  %v4111_v56 = vmul.f32 %v14232_v5, %v11385_v45  ;;  %v14233_v17 = vld [vmem:[#allocation69_spill] sm:$0xff] }
 0x5a1   : > { %v4394_v7 = vadd.f32 %v4393_v54, %v4392_v24  ;;  %14230 = vst [vmem:[#allocation91_spill] sm:$0xff] %v11409_v14  ;;  %14231 = vst [vmem:[#allocation99_spill] sm:$0xff] %v11412_v36  ;;  %v4112_v38 = vmul.f32 %v14233_v17, %v11388_v35  ;;  %v4304_v19 = vrot.slane %v4303_v23, 4  ;;  %v14234_v26 = vld [vmem:[#allocation60_spill] sm:$0xff]  ;;  %v14235_v16 = vld [vmem:[#allocation49_spill] sm:$0xff]  ;;  %v4373_v52 = vrot.slane %v4372_v34, 1 }
 0x5a2   : > { %v4409_v13 = vadd.f32 %v4408_v9, %v4407_v53  ;;  %v4113_v58 = vmul.f32 %v14234_v26, %v11395_v37  ;;  %v4114_v39 = vmul.f32 %v14235_v16, %v11398_v15  ;;  %v4386_v24 = vrot.slane %v4385_v57, 1  ;;  %v14237_v45 = vld [vmem:[#allocation55_spill] sm:$0xff]  ;;  %v14238_v35 = vld [vmem:[#allocation68_spill] sm:$0xff] }
 0x5a3   : > { %v4395_v54 = vrot.slane %v4394_v7, 4  ;;  %v4115_v8 = vmul.f32 %v14236_v43, %v11406_v0  ;;  %v4116_v46 = vmul.f32 %v14237_v45, %v11409_v14  ;;  %v4117_v51 = vmul.f32 %v14238_v35, %v11412_v36  ;;  %v14253_v45 = vld [vmem:[#allocation141_spill] sm:$0xff] }
 0x5a4   : > { %v4410_v62 = vrot.slane %v4409_v13, 2  ;;  %v4174_v53 = vmul.f32 %v11169_v3, %v4110_v41  ;;  %v4175_v37 = vmul.f32 %v11173_v6, %v4111_v56  ;;  %v4176_v15 = vmul.f32 %v11176_v18, %v4112_v38 }
 0x5a5   : > { %v4396_v9 = vadd.f32 %v4395_v54, %v4394_v7  ;;  %v4177_v4 = vmul.f32 %v11183_v2, %v4113_v58  ;;  %v4178_v0 = vmul.f32 %v11169_v3, %v4114_v39  ;;  %v4179_v14 = vmul.f32 %v11173_v6, %v4115_v8  ;;  %v3711_v54 = vld [vmem:[%s8558_s10 + $0x8] sm:$0xff] }
 0x5a6   : > { %v11432_v61 = vadd.f32 %v4410_v62, %v4409_v13  ;;  %v4180_v36 = vmul.f32 %v11176_v18, %v4116_v46  ;;  %v4181_v41 = vmul.f32 %v11183_v2, %v4117_v51  ;;  %v4310_v7 = vsel %vm1077_vm1, %v4174_v53, 0.0 }
 0x5a7   : > { %v4397_v30 = vrot.slane %v4396_v9, 2  ;;  %v4311_v56 = vsel %vm1077_vm1, %v4175_v37, 0.0  ;;  %v11440_v38 = vadd.f32 %v4291_v60, %v4290_v28  ;;  %v11442_v62 = vadd.f32 %v4304_v19, %v4303_v23  ;;  %v3710_v37 = vld [vmem:[%s8558_s10] sm:$0xff]  ;;  %v3712_v60 = vld [vmem:[%s8558_s10 + $0x10] sm:$0xff] }
 0x5a8   : > { %v4312_v13 = vadd.f32 %v4311_v56, %v4310_v7  ;;  %v4323_v8 = vsel %vm1077_vm1, %v4178_v0, 0.0  ;;  %v11445_v58 = vadd.f32 %v4373_v52, %v4372_v34  ;;  %v4313_v39 = vsel %vm1077_vm1, %v4176_v15, 0.0  ;;  %v3713_v34 = vld [vmem:[%s8558_s10 + $0x18] sm:$0xff]  ;;  %v3715_v15 = vld [vmem:[%s8558_s10 + $0x28] sm:$0xff] }
 0x5a9   : > { %v4398_v46 = vadd.f32 %v4397_v30, %v4396_v9  ;;  %v4324_v51 = vsel %vm1077_vm1, %v4179_v14, 0.0  ;;  %v11452_v28 = vadd.f32 %v4386_v24, %v4385_v57  ;;  %v4315_v0 = vsel %vm1077_vm1, %v4177_v4, 0.0  ;;  %v3714_v30 = vld [vmem:[%s8558_s10 + $0x20] sm:$0xff]  ;;  %v3716_v57 = vld [vmem:[%s8558_s10 + $0x30] sm:$0xff]  ;;  %v3717_v24 = vld [vmem:[%s8558_s10 + $0x38] sm:$0xff] }
 0x5aa   : > { %v4314_v23 = vadd.f32 %v4313_v39, %v4312_v13  ;;  %v4325_v52 = vadd.f32 %v4324_v51, %v4323_v8  ;;  %v4326_v14 = vsel %vm1077_vm1, %v4180_v36, 0.0  ;;  %v4328_v53 = vsel %vm1077_vm1, %v4181_v41, 0.0  ;;  %v3718_v4 = vld [vmem:[%s8558_s10 + $0x40] sm:$0xff]  ;;  %v3719_v13 = vld [vmem:[%s8558_s10 + $0x48] sm:$0xff]  ;;  %v3720_v8 = vld [vmem:[%s8558_s10 + $0x50] sm:$0xff] }
 0x5ab   : > { %v4399_v19 = vrot.slane %v4398_v46, 1  ;;  %v14239_v39 = vld [vmem:[#allocation71_spill] sm:$0xff]  ;;  %v4079_v40 = vmul.f32 %v14240_v1, %v3711_v54  ;;  %v3721_v36 = vld [vmem:[%s8558_s10 + $0x58] sm:$0xff]  ;;  %v3722_v41 = vld [vmem:[%s8558_s10 + $0x60] sm:$0xff]  ;;  %v4080_v9 = vmul.f32 %v14241_v29, %v3712_v60  ;;  %v4081_v44 = vmul.f32 %v14242_v47, %v3713_v34 }
 0x5ac   : > { %v4316_v7 = vadd.f32 %v4315_v0, %v4314_v23  ;;  %v4327_v56 = vadd.f32 %v4326_v14, %v4325_v52  ;;  %v4078_v51 = vmul.f32 %v14239_v39, %v3710_v37  ;;  %v4082_v23 = vmul.f32 %v14243_v11, %v3714_v30  ;;  %v3723_v14 = vld [vmem:[%s8558_s10 + $0x68] sm:$0xff]  ;;  %v14246_v54 = vld [vmem:[#allocation131_spill] sm:$0xff] }
 0x5ad   : > { %v11468_v59 = vadd.f32 %v4399_v19, %v4398_v46  ;;  %v4083_v22 = vmul.f32 %v14244_v49, %v3715_v15  ;;  %v14245_v37 = vld [vmem:[#allocation78_spill] sm:$0xff]  ;;  %v4085_v46 = vmul.f32 %v14246_v54, %v3717_v24  ;;  %v14247_v19 = vld [vmem:[#allocation79_spill] sm:$0xff]  ;;  %v4087_v10 = vmul.f32 %v14248_v32, %v3719_v13 }
 0x5ae   : > { %v4317_v0 = vrot.slane %v4316_v7, 4  ;;  %v4329_v52 = vadd.f32 %v4328_v53, %v4327_v56  ;;  %v4084_v39 = vmul.f32 %v14245_v37, %v3716_v57  ;;  %v4086_v1 = vmul.f32 %v14247_v19, %v3718_v4  ;;  %v14249_v60 = vld [vmem:[#allocation122_spill] sm:$0xff]  ;;  %v14254_v49 = vld [vmem:[#allocation151_spill] sm:$0xff] }
 0x5af   : > { %v4088_v29 = vmul.f32 %v14249_v60, %v3720_v8  ;;  %v14250_v30 = vld [vmem:[#allocation146_spill] sm:$0xff]  ;;  %v4091_v35 = vmul.f32 %v14252_v31, %v3723_v14  ;;  %v4092_v15 = vmul.f32 %v14253_v45, %v3724_v20  ;;  %v4093_v57 = vmul.f32 %v14254_v49, %v3725_v25 }
 0x5b0   : > { %v4318_v34 = vadd.f32 %v4317_v0, %v4316_v7  ;;  %v4330_v47 = vrot.slane %v4329_v52, 4  ;;  %v4089_v11 = vmul.f32 %v14250_v30, %v3721_v36  ;;  %v14251_v53 = vld [vmem:[#allocation110_spill] sm:$0xff]  ;;  %v4142_v24 = vmul.f32 %v11169_v3, %v4078_v51 }
 0x5b1   : > { %v4090_v56 = vmul.f32 %v14251_v53, %v3722_v41  ;;  %v4143_v13 = vmul.f32 %v11173_v6, %v4079_v40  ;;  %v4144_v8 = vmul.f32 %v11176_v18, %v4080_v9  ;;  %v4145_v7 = vmul.f32 %v11183_v2, %v4081_v44 }
 0x5b2   : > { %v4319_v54 = vrot.slane %v4318_v34, 2  ;;  %v4331_v4 = vadd.f32 %v4330_v47, %v4329_v52  ;;  %v4146_v36 = vmul.f32 %v11169_v3, %v4082_v23  ;;  %v4147_v41 = vmul.f32 %v11173_v6, %v4083_v22 }
 0x5b3   : > { %v4148_v0 = vmul.f32 %v11176_v18, %v4084_v39  ;;  %v4149_v25 = vmul.f32 %v11183_v2, %v4085_v46  ;;  %v4150_v51 = vmul.f32 %v11169_v3, %v4086_v1  ;;  %v4151_v47 = vmul.f32 %v11173_v6, %v4087_v10 }
 0x5b4   : > { %v4320_v14 = vadd.f32 %v4319_v54, %v4318_v34  ;;  %v4332_v20 = vrot.slane %v4331_v4, 2  ;;  %v4152_v40 = vmul.f32 %v11176_v18, %v4088_v29  ;;  %v4153_v9 = vmul.f32 %v11183_v2, %v4089_v11 }
 0x5b5   : > { %v4154_v44 = vmul.f32 %v11169_v3, %v4090_v56  ;;  %v4206_v22 = vsel %vm1077_vm1, %v4142_v24, 0.0  ;;  %v4207_v39 = vsel %vm1077_vm1, %v4143_v13, 0.0  ;;  %v4155_v54 = vmul.f32 %v11173_v6, %v4091_v35 }
 0x5b6   : > { %v4321_v52 = vrot.slane %v4320_v14, 1  ;;  %v4333_v23 = vadd.f32 %v4332_v20, %v4331_v4  ;;  %v4156_v46 = vmul.f32 %v11176_v18, %v4092_v15  ;;  %v4208_v34 = vadd.f32 %v4207_v39, %v4206_v22 }
 0x5b7   : > { %v4219_v1 = vsel %vm1077_vm1, %v4146_v36, 0.0  ;;  %v4157_v29 = vmul.f32 %v11183_v2, %v4093_v57  ;;  %v4209_v11 = vsel %vm1077_vm1, %v4144_v8, 0.0  ;;  %v4220_v3 = vsel %vm1077_vm1, %v4147_v41, 0.0 }
 0x5b8   : > { %v4334_v10 = vrot.slane %v4333_v23, 1  ;;  %v4210_v56 = vadd.f32 %v4209_v11, %v4208_v34  ;;  %v4211_v4 = vsel %vm1077_vm1, %v4145_v7, 0.0  ;;  %v4221_v24 = vadd.f32 %v4220_v3, %v4219_v1 }
 0x5b9   : > { %v4232_v13 = vsel %vm1077_vm1, %v4150_v51, 0.0  ;;  %v4322_v20 = vadd.f32 %v4321_v52, %v4320_v14  ;;  %v4222_v18 = vsel %vm1077_vm1, %v4148_v0, 0.0  ;;  %v4233_v35 = vsel %vm1077_vm1, %v4151_v47, 0.0 }
 0x5ba   : > { %v4335_v6 = vadd.f32 %v4334_v10, %v4333_v23  ;;  %v4212_v15 = vadd.f32 %v4211_v4, %v4210_v56  ;;  %v4223_v36 = vadd.f32 %v4222_v18, %v4221_v24  ;;  %v4234_v22 = vadd.f32 %v4233_v35, %v4232_v13 }
 0x5bb   : > { %v4245_v2 = vsel %vm1077_vm1, %v4154_v44, 0.0  ;;  %v4224_v8 = vsel %vm1077_vm1, %v4149_v25, 0.0  ;;  %v4235_v7 = vsel %vm1077_vm1, %v4152_v40, 0.0  ;;  %v4246_v41 = vsel %vm1077_vm1, %v4155_v54, 0.0 }
 0x5bc   : > { %v4437_v57 = vsel %vm1302_vm2, %v4335_v6, %v4322_v20  ;;  %v4213_v51 = vrot.slane %v4212_v15, 4  ;;  %v4225_v0 = vadd.f32 %v4224_v8, %v4223_v36  ;;  %v4236_v52 = vadd.f32 %v4235_v7, %v4234_v22 }
 0x5bd   : > { %v4438_v14 = vsel %vm1304_vm3, %v11381_v55, %v4437_v57  ;;  %v4237_v23 = vsel %vm1077_vm1, %v4153_v9, 0.0  ;;  %v4247_v44 = vadd.f32 %v4246_v41, %v4245_v2  ;;  %v4248_v39 = vsel %vm1077_vm1, %v4156_v46, 0.0 }
 0x5be   : > { %v4439_v47 = vsel %vm1306_vm4, %v11400_v21, %v4438_v14  ;;  %v4214_v40 = vadd.f32 %v4213_v51, %v4212_v15  ;;  %v4226_v34 = vrot.slane %v4225_v0, 4  ;;  %v4238_v54 = vadd.f32 %v4237_v23, %v4236_v52 }
 0x5bf   : > { %v4440_v25 = vsel %vm1308_vm5, %v11445_v58, %v4439_v47  ;;  %v14255_v55 = vrot.slane %v11432_v61, 1  ;;  %v4249_v11 = vadd.f32 %v4248_v39, %v4247_v44  ;;  %v4250_v21 = vsel %vm1077_vm1, %v4157_v29, 0.0  ;;  %v7547_v58 = vpop.f32.mrf.mxu0 }
 0x5c0   : > { %v4441_v10 = vsel %vm1310_vm6, %v11452_v28, %v4440_v25  ;;  %v4215_v46 = vrot.slane %v4214_v40, 2  ;;  %v4227_v3 = vadd.f32 %v4226_v34, %v4225_v0  ;;  %v4239_v56 = vrot.slane %v4238_v54, 4 }
 0x5c1   : > { %v4413_v1 = vadd.f32 %v14255_v55, %v11432_v61  ;;  %v4442_v9 = vsel %vm1312_vm7, %v11468_v59, %v4441_v10  ;;  %v4267_v4 = vrot.slane %v11391_v42, 2  ;;  %v4293_v24 = vrot.slane %v11440_v38, 2 }
 0x5c2   : > { %v4251_v61 = vadd.f32 %v4250_v21, %v4249_v11  ;;  %v4216_v6 = vadd.f32 %v4215_v46, %v4214_v40  ;;  %v4228_v28 = vrot.slane %v4227_v3, 2  ;;  %v4240_v18 = vadd.f32 %v4239_v56, %v4238_v54 }
 0x5c3   : > { %v4443_v13 = vsel %vm1314_vm8, %v4413_v1, %v4442_v9  ;;  %v4280_v29 = vrot.slane %v11402_v48, 2  ;;  %v4306_v35 = vrot.slane %v11442_v62, 2  ;;  %v4268_v57 = vadd.f32 %v4267_v4, %v11391_v42  ;;  %v4602_v9 = vpop.f32.mrf.mxu1 }
 0x5c4   : > { %v4518_v20 = vadd.f32 %v7547_v58, %v4443_v13  ;;  %v4252_v59 = vrot.slane %v4251_v61, 4  ;;  %v4217_v36 = vrot.slane %v4216_v6, 1  ;;  %v4229_v22 = vadd.f32 %v4228_v28, %v4227_v3  ;;  %v14257_v28 = vld [vmem:[#allocation37_spill] sm:$0xff] }
 0x5c5   : > { %v4241_v2 = vrot.slane %v4240_v18, 2  ;;  %v4294_v7 = vadd.f32 %v4293_v24, %v11440_v38  ;;  %v4281_v51 = vadd.f32 %v4280_v29, %v11402_v48  ;;  %v4307_v0 = vadd.f32 %v4306_v35, %v11442_v62  ;;  %v4512_v24 = vpop.f32.mrf.mxu0  ;;  %v14258_v29 = vld [vmem:[#allocation38_spill] sm:$0xff] }
 0x5c6   : > { %v4612_v15 = vadd.f32 %v11376_v33, %v4518_v20  ;;  %v4253_v8 = vadd.f32 %v4252_v59, %v4251_v61  ;;  %v4230_v41 = vrot.slane %v4229_v22, 1  ;;  %v4218_v47 = vadd.f32 %v4217_v36, %v4216_v6  ;;  %v14260_v59 = vld [vmem:[#allocation39_spill] sm:$0xff]  ;;  %v14261_v36 = vld [vmem:[#allocation40_spill] sm:$0xff] }
 0x5c7   : > { %v4242_v14 = vadd.f32 %v4241_v2, %v4240_v18  ;;  %v4269_v39 = vrot.slane %v4268_v57, 1  ;;  %v4295_v25 = vrot.slane %v4294_v7, 1  ;;  %v4282_v34 = vrot.slane %v4281_v51, 1  ;;  %v14262_v2 = vld [vmem:[#allocation41_spill] sm:$0xff] }
 0x5c8   : > { %7773 = vtanh.f32 %v4612_v15  ;;  %v4254_v52 = vrot.slane %v4253_v8, 2  ;;  %v4231_v23 = vadd.f32 %v4230_v41, %v4229_v22  ;;  %v4308_v38 = vrot.slane %v4307_v0, 1 }
 0x5c9   : > { %v4243_v44 = vrot.slane %v4242_v14, 1  ;;  %v4270_v10 = vadd.f32 %v4269_v39, %v4268_v57  ;;  %v4296_v48 = vadd.f32 %v4295_v25, %v4294_v7  ;;  %v4283_v11 = vadd.f32 %v4282_v34, %v4281_v51  ;;  %v6074_v39 = vld [vmem:[#allocation9] sm:$0xff]  ;;  %v7305_v25 = vld [vmem:[%s8534_s24 + $0x30] sm:$0xff] }
 0x5ca   : > { %v4255_v33 = vadd.f32 %v4254_v52, %v4253_v8  ;;  %v4430_v42 = vsel %vm1302_vm2, %v4231_v23, %v4218_v47  ;;  %v4309_v62 = vadd.f32 %v4308_v38, %v4307_v0  ;;  %v4603_v58 = vadd.f32 %v11370_v63, %v4602_v9  ;;  %v6077_v0 = vld [vmem:[#allocation9 + $0x18] sm:$0xff]  ;;  %v14263_v47 = vld [vmem:[#allocation42_spill] sm:$0xff] }
 0x5cb   : > { %v4244_v40 = vadd.f32 %v4243_v44, %v4242_v14  ;;  %7581 = vmatprep.subr.mxu0 %v6077_v0  ;;  %v6076_v44 = vld [vmem:[#allocation9 + $0x10] sm:$0xff] }
 0x5cc   : > { %v4256_v54 = vrot.slane %v4255_v33, 1 }
 0x5cd   : > { %v4431_v55 = vsel %vm1304_vm3, %v4244_v40, %v4430_v42  ;;  %v7306_v40 = vld [vmem:[%s8534_s24 + $0x38] sm:$0xff]  ;;  %v7236_v42 = vld [vmem:[%s13897_s12 + $0x1] ss:$0 sm:$0xff] }
 0x5ce   : > { %v4257_v1 = vadd.f32 %v4256_v54, %v4255_v33  ;;  %v6075_v33 = vld [vmem:[#allocation9 + $0x8] sm:$0xff] }
 0x5d0   : > { %v4432_v21 = vsel %vm1306_vm4, %v4257_v1, %v4431_v55 }
 0x5d1   : > { %v4433_v46 = vsel %vm1308_vm5, %v4270_v10, %v4432_v21 }
 0x5d2   : > { %v4434_v3 = vsel %vm1310_vm6, %v4283_v11, %v4433_v46 }
 0x5d3   : > { %v4435_v56 = vsel %vm1312_vm7, %v4296_v48, %v4434_v3 }
 0x5d4   : > { %v4436_v13 = vsel %vm1314_vm8, %v4309_v62, %v4435_v56  ;;  %v14266_v62 = vld [vmem:[#allocation43_spill] sm:$0xff] }
 0x5d5   : > { %v11552_v4 = vpop.eup %7773  ;;  %v4513_v61 = vadd.f32 %v4512_v24, %v4436_v13 }
 0x5d6   : > { %14256 = vst [vmem:[#allocation102_spill] sm:$0xff] %v11552_v4  ;;  %v5482_v20 = vrot.slane %v11552_v4, %v8766_v12  ;;  %v5501_v18 = vrot.slane %v11552_v4, %v14257_v28  ;;  %v11561_v63 = vrot.slane %v11552_v4, %v14258_v29  ;;  %v11573_v15 = vrot.slane %v11552_v4, %v14260_v59 }
 0x5d7   : > { %v4611_v6 = vadd.f32 %v4603_v58, %v4513_v61  ;;  %v11583_v22 = vrot.slane %v11552_v4, %v14261_v36  ;;  %v11591_v57 = vrot.slane %v11552_v4, %v14262_v2  ;;  %v5596_v3 = vrot.slane %v11552_v4, %v14263_v47 }
 0x5d8   : > { %5488 = vbcast.lane.b32.xlu0 %v5482_v20, 264  ;;  %5484 = vbcast.lane.b32.xlu1 %v5482_v20, 256  ;;  %v5615_v61 = vrot.slane %v11552_v4, %v14266_v62 }
 0x5d9   : > { %7775 = vtanh.f32 %v4611_v6 }
 0x5dc   : > { %5507 = vbcast.lane.b32.xlu0 %v5501_v18, 264  ;;  %5503 = vbcast.lane.b32.xlu1 %v5501_v18, 256 }
 0x5e0   : > { %5526 = vbcast.lane.b32.xlu0 %v11561_v63, 264  ;;  %5522 = vbcast.lane.b32.xlu1 %v11561_v63, 256 }
 0x5e4   : > { %5492 = vbcast.lane.b32.xlu0 %v5482_v20, 272  ;;  %5511 = vbcast.lane.b32.xlu1 %v5501_v18, 272 }
 0x5e6   : > { %v11565_v35 = vpop.eup %7775 }
 0x5e7   : > { %14259 = vst [vmem:[#allocation45_spill] sm:$0xff] %v11565_v35  ;;  %7567 = vmatprep.mubr.msk.f32.mxu0 %vm1077_vm1, %v11565_v35  ;;  %7578 = vmatprep.mubr.msk.f32.mxu1 %vm1077_vm1, %v11565_v35  ;;  %v5330_v8 = vrot.slane %v11565_v35, %v8766_v12  ;;  %v5349_v7 = vrot.slane %v11565_v35, %v14257_v28 }
 0x5e8   : > { %7568 = vmatmul.mubr.msk.f32.vlgmr.msra.gmra.mxu0 %vm1077_vm1, %v11552_v4  ;;  %7579 = vmatmul.mubr.msk.f32.vlgmr.msra.gmra.mxu1 %vm1077_vm1, %v11552_v4  ;;  %v5368_v41 = vrot.slane %v11565_v35, %v14258_v29  ;;  %v5387_v14 = vrot.slane %v11565_v35, %v14260_v59  ;;  %v5406_v51 = vrot.slane %v11565_v35, %v14261_v36 }
 0x5e9   : > { %5541 = vbcast.lane.b32.xlu0 %v11573_v15, 256  ;;  %5545 = vbcast.lane.b32.xlu1 %v11573_v15, 264  ;;  %v5425_v52 = vrot.slane %v11565_v35, %v14262_v2  ;;  %v5444_v23 = vrot.slane %v11565_v35, %v14263_v47  ;;  %v5463_v21 = vrot.slane %v11565_v35, %v14266_v62 }
 0x5ea   : > { %7582 = vmatpush3.msra.mxu0 %v6077_v0  ;;  %7589 = vmatprep.mubr.msk.f32.mxu0 %vm1077_vm1, %v7305_v25 }
 0x5eb   : > { %7583 = vmatprep.subr.mxu0 %v6076_v44 }
 0x5ec   : > { %7584 = vmatpush3.msra.mxu0 %v6076_v44 }
 0x5ed   : > { %5560 = vbcast.lane.b32.xlu0 %v11583_v22, 256  ;;  %5530 = vbcast.lane.b32.xlu1 %v11561_v63, 272 }
 0x5ee   : > { %7585 = vmatprep.subr.mxu0 %v6075_v33 }
 0x5ef   : > { %7586 = vmatpush3.msra.mxu0 %v6075_v33 }
 0x5f0   : > { %7587 = vmatprep.subr.mxu0 %v6074_v39 }
 0x5f1   : > { %5496 = vbcast.lane.b32.xlu0 %v5482_v20, 280  ;;  %5564 = vbcast.lane.b32.xlu1 %v11583_v22, 264 }
 0x5f2   : > { %7588 = vmatpush3.msra.mxu0 %v6074_v39  ;;  %v14293_v39 = vld [vmem:[#allocation44_spill] sm:$0xff] }
 0x5f3   : > { %7590 = vmatmul.mubr.msk.f32.vlgmr.msra.gmra.mxu0 %vm1077_vm1, %v7306_v40 }
 0x5f5   : > { %5549 = vbcast.lane.b32.xlu0 %v11573_v15, 272  ;;  %5515 = vbcast.lane.b32.xlu1 %v5501_v18, 280 }
 0x5f9   : > { %5583 = vbcast.lane.b32.xlu0 %v11591_v57, 264  ;;  %5579 = vbcast.lane.b32.xlu1 %v11591_v57, 256 }
 0x5fd   : > { %5336 = vbcast.lane.b32.xlu0 %v5330_v8, 264  ;;  %5332 = vbcast.lane.b32.xlu1 %v5330_v8, 256 }
 0x601   : > { %5355 = vbcast.lane.b32.xlu0 %v5349_v7, 264  ;;  %5351 = vbcast.lane.b32.xlu1 %v5349_v7, 256 }
 0x605   : > { %5374 = vbcast.lane.b32.xlu0 %v5368_v41, 264  ;;  %5370 = vbcast.lane.b32.xlu1 %v5368_v41, 256 }
 0x609   : > { %5359 = vbcast.lane.b32.xlu0 %v5349_v7, 272  ;;  %5340 = vbcast.lane.b32.xlu1 %v5330_v8, 272 }
 0x60d   : > { %5393 = vbcast.lane.b32.xlu0 %v5387_v14, 264  ;;  %5389 = vbcast.lane.b32.xlu1 %v5387_v14, 256 }
 0x611   : > { %5408 = vbcast.lane.b32.xlu0 %v5406_v51, 256  ;;  %5378 = vbcast.lane.b32.xlu1 %v5368_v41, 272 }
 0x615   : > { %5344 = vbcast.lane.b32.xlu0 %v5330_v8, 280  ;;  %5412 = vbcast.lane.b32.xlu1 %v5406_v51, 264 }
 0x619   : > { %5397 = vbcast.lane.b32.xlu0 %v5387_v14, 272  ;;  %5363 = vbcast.lane.b32.xlu1 %v5349_v7, 280 }
 0x61d   : > { %5431 = vbcast.lane.b32.xlu0 %v5425_v52, 264  ;;  %5427 = vbcast.lane.b32.xlu1 %v5425_v52, 256 }
 0x621   : > { %5382 = vbcast.lane.b32.xlu0 %v5368_v41, 280  ;;  %5416 = vbcast.lane.b32.xlu1 %v5406_v51, 272  ;;  %v14285_v41 = vlaneseq }
 0x625   : > { %5446 = vbcast.lane.b32.xlu0 %v5444_v23, 256  ;;  %5450 = vbcast.lane.b32.xlu1 %v5444_v23, 264 }
 0x629   : > { %5435 = vbcast.lane.b32.xlu0 %v5425_v52, 272  ;;  %5401 = vbcast.lane.b32.xlu1 %v5387_v14, 280  ;;  %v11679_v14 = vand.u32 127, %v14285_v41 }
 0x62b   : > { %14286 = vst [vmem:[#allocation104_spill] sm:$0xff] %v11679_v14  ;;  %vm576_vm9 = vcmp.lt.s32.totalorder %v11679_v14, 2 }
 0x62c   : > { %v11700_v25 = vsel %vm576_vm9, %v14293_v39, -1e+30 }
 0x62d   : > { %14294 = vst [vmem:[#allocation46_spill] sm:$0xff] %v11700_v25 }
 0x64a   : > { %v11622_v10 = vpop.permute.xlu0 %5488  ;;  %v11624_v11 = vpop.permute.xlu1 %5484 }
 0x64b   : > { %14264 = vst [vmem:[#allocation87_spill] sm:$0xff] %v11622_v10  ;;  %14265 = vst [vmem:[#allocation85_spill] sm:$0xff] %v11624_v11  ;;  %v14323_v10 = vld [vmem:[#allocation54_spill] sm:$0xff] }
 0x64c   : > { %v14335_v11 = vld [vmem:[#allocation62_spill] sm:$0xff] }
 0x64e   : > { %v11628_v9 = vpop.permute.xlu0 %5507  ;;  %v11630_v46 = vpop.permute.xlu1 %5503 }
 0x64f   : > { %14267 = vst [vmem:[#allocation127_spill] sm:$0xff] %v11628_v9  ;;  %14268 = vst [vmem:[#allocation128_spill] sm:$0xff] %v11630_v46  ;;  %v14319_v9 = vld [vmem:[#allocation59_spill] sm:$0xff]  ;;  %v14320_v46 = vld [vmem:[#allocation48_spill] sm:$0xff] }
 0x652   : > { %v11636_v56 = vpop.permute.xlu0 %5526  ;;  %v11638_v58 = vpop.permute.xlu1 %5522 }
 0x656   : > { %v11640_v24 = vpop.permute.xlu0 %5492  ;;  %v11642_v13 = vpop.permute.xlu1 %5511 }
 0x657   : > { %14269 = vst [vmem:[#allocation133_spill] sm:$0xff] %v11640_v24  ;;  %14270 = vst [vmem:[#allocation140_spill] sm:$0xff] %v11642_v13  ;;  %v14322_v24 = vld [vmem:[#allocation114_spill] sm:$0xff] }
 0x65b   : > { %v11648_v20 = vpop.permute.xlu0 %5541  ;;  %v11650_v6 = vpop.permute.xlu1 %5545 }
 0x65c   : > { %14271 = vst [vmem:[#allocation129_spill] sm:$0xff] %v11648_v20  ;;  %14272 = vst [vmem:[#allocation130_spill] sm:$0xff] %v11650_v6  ;;  %v14330_v6 = vld [vmem:[#allocation126_spill] sm:$0xff]  ;;  %v14331_v20 = vld [vmem:[#allocation76_spill] sm:$0xff] }
 0x65f   : > { %v11652_v28 = vpop.permute.xlu0 %5560  ;;  %v11654_v18 = vpop.permute.xlu1 %5530 }
 0x660   : > { %14273 = vst [vmem:[#allocation134_spill] sm:$0xff] %v11652_v28  ;;  %14274 = vst [vmem:[#allocation138_spill] sm:$0xff] %v11654_v18 }
 0x663   : > { %v11657_v29 = vpop.permute.xlu0 %5496 }
 0x664   : > { %14275 = vst [vmem:[#allocation139_spill] sm:$0xff] %v11657_v29  ;;  %v14321_v29 = vld [vmem:[#allocation58_spill] sm:$0xff] }
 0x667   : > { %v11662_v59 = vpop.permute.xlu0 %5549 }
 0x668   : > { %14277 = vst [vmem:[#allocation61_spill] sm:$0xff] %v11662_v59  ;;  %v14328_v59 = vld [vmem:[#allocation72_spill] sm:$0xff] }
 0x66b   : > { %v11666_v36 = vpop.permute.xlu0 %5583 }
 0x66c   : > { %14279 = vst [vmem:[#allocation144_spill] sm:$0xff] %v11666_v36  ;;  %v14332_v36 = vld [vmem:[#allocation67_spill] sm:$0xff] }
 0x6a8   : > { %v7569_v34 = vpop.f32.mrf.mxu0 }
 0x6a9   : > { %v11616_v54 = vadd.f32 %v7569_v34, %v7236_v42 }
 0x6aa   : > { %v4696_v38 = vpop.f32.mrf.mxu0 }
 0x6ab   : > { %7777 = vtanh.f32 %v11616_v54  ;;  %v11619_v55 = vadd.f32 %v7236_v42, %v4696_v38  ;;  %v14296_v42 = vld [vmem:[#allocation109_spill] sm:$0xff]  ;;  %v3154_v38 = vsel %vm1077_vm1, %v11700_v25, -inf }
 0x6ac   : > { %v11707_v34 = vsel %vm576_vm9, %v14296_v42, -1e+30 }
 0x6ad   : > { %7779 = vtanh.f32 %v11619_v55  ;;  %14297 = vst [vmem:[#allocation60_spill] sm:$0xff] %v11707_v34  ;;  %v1593_v62 = vsel %vm1077_vm1, %v11707_v34, -inf  ;;  %v7945_v34 = vld [vmem:[%s13897_s12 + $0x3] ss:$0 sm:$0xff] }
 0x6b8   : > { %v7778_v1 = vpop.eup %7777 }
 0x6b9   : > { %4738 = vperm.xlu0 %7756, %v7778_v1  }
 0x6ba   : > { %v7780_v48 = vpop.eup %7779 }
 0x6bb   : > { %4733 = vperm.xlu1 %7755, %v7780_v48   ;;  %v11716_v48 = vsel %vm576_vm9, %v11619_v55, -1e+30 }
 0x6bc   : > { %14299 = vst [vmem:[#allocation66_spill] sm:$0xff] %v11716_v48 }
 0x6bd   : > { %5469 = vbcast.lane.b32.xlu0 %v5463_v21, 264 }
 0x6bf   : > { %5465 = vbcast.lane.b32.xlu1 %v5463_v21, 256 }
 0x6c1   : > { %5568 = vbcast.lane.b32.xlu0 %v11583_v22, 272 }
 0x6c3   : > { %5534 = vbcast.lane.b32.xlu1 %v11561_v63, 280  ;;  %v11660_v63 = vpop.permute.xlu1 %5564 }
 0x6c4   : > { %14276 = vst [vmem:[#allocation145_spill] sm:$0xff] %v11660_v63 }
 0x6c5   : > { %5602 = vbcast.lane.b32.xlu0 %v5596_v3, 264 }
 0x6c7   : > { %5598 = vbcast.lane.b32.xlu1 %v5596_v3, 256 }
 0x6c9   : > { %5454 = vbcast.lane.b32.xlu0 %v5444_v23, 272 }
 0x6cb   : > { %5420 = vbcast.lane.b32.xlu1 %v5406_v51, 280 }
 0x6cd   : > { %5587 = vbcast.lane.b32.xlu0 %v11591_v57, 272 }
 0x6cf   : > { %5553 = vbcast.lane.b32.xlu1 %v11573_v15, 280  ;;  %v11664_v15 = vpop.permute.xlu1 %5515 }
 0x6d0   : > { %14278 = vst [vmem:[#allocation143_spill] sm:$0xff] %v11664_v15 }
 0x6d1   : > { %5621 = vbcast.lane.b32.xlu0 %v5615_v61, 264 }
 0x6d3   : > { %5617 = vbcast.lane.b32.xlu1 %v5615_v61, 256  ;;  %v11668_v2 = vpop.permute.xlu1 %5579 }
 0x6d4   : > { %14280 = vst [vmem:[#allocation150_spill] sm:$0xff] %v11668_v2  ;;  %v14334_v2 = vld [vmem:[#allocation75_spill] sm:$0xff] }
 0x6d5   : > { %5473 = vbcast.lane.b32.xlu0 %v5463_v21, 272 }
 0x6d7   : > { %5439 = vbcast.lane.b32.xlu1 %v5425_v52, 280  ;;  %v11672_v8 = vpop.permute.xlu1 %5332  ;;  %v14289_v52 = vld [vmem:[#allocation108_spill] sm:$0xff] }
 0x6d8   : > { %14282 = vst [vmem:[#allocation148_spill] sm:$0xff] %v11672_v8  ;;  %v11689_v47 = vsel %vm576_vm9, %v14289_v52, -1e+30 }
 0x6d9   : > { %5606 = vbcast.lane.b32.xlu0 %v5596_v3, 272  ;;  %14290 = vst [vmem:[#allocation90_spill] sm:$0xff] %v11689_v47  ;;  %v1596_v33 = vsel %vm1077_vm1, %v11689_v47, -inf }
 0x6db   : > { %5572 = vbcast.lane.b32.xlu1 %v11583_v22, 280  ;;  %v11670_v22 = vpop.permute.xlu0 %5336  ;;  %v11676_v7 = vpop.permute.xlu1 %5351 }
 0x6dc   : > { %14281 = vst [vmem:[#allocation105_spill] sm:$0xff] %v11670_v22  ;;  %14284 = vst [vmem:[#allocation64_spill] sm:$0xff] %v11676_v7 }
 0x6dd   : > { %5591 = vbcast.lane.b32.xlu0 %v11591_v57, 280 }
 0x6df   : > { %5458 = vbcast.lane.b32.xlu1 %v5444_v23, 280  ;;  %v11674_v57 = vpop.permute.xlu0 %5355  ;;  %v11683_v0 = vpop.permute.xlu1 %5370 }
 0x6e0   : > { %14283 = vst [vmem:[#allocation147_spill] sm:$0xff] %v11674_v57  ;;  %14288 = vst [vmem:[#allocation50_spill] sm:$0xff] %v11683_v0 }
 0x6e1   : > { %5477 = vbcast.lane.b32.xlu0 %v5463_v21, 280  ;;  %v14300_v21 = vld [vmem:[#allocation63_spill] sm:$0xff] }
 0x6e3   : > { %5625 = vbcast.lane.b32.xlu1 %v5615_v61, 272  ;;  %v11681_v51 = vpop.permute.xlu0 %5374  ;;  %v11693_v44 = vpop.permute.xlu1 %5340 }
 0x6e4   : > { %14287 = vst [vmem:[#allocation51_spill] sm:$0xff] %v11681_v51  ;;  %14292 = vst [vmem:[#allocation52_spill] sm:$0xff] %v11693_v44 }
 0x6e5   : > { %5629 = vbcast.lane.b32.xlu0 %v5615_v61, 280  ;;  %v4707_v61 = vsel %vm1077_vm1, %v11716_v48, -inf }
 0x6e7   : > { %5610 = vbcast.lane.b32.xlu1 %v5596_v3, 280  ;;  %v11691_v23 = vpop.permute.xlu0 %5359  ;;  %v11711_v1 = vpop.permute.xlu1 %5389  ;;  %v11723_v3 = vsel %vm576_vm9, %v14300_v21, -1e+30 }
 0x6e8   : > { %14291 = vst [vmem:[#allocation95_spill] sm:$0xff] %v11691_v23  ;;  %14298 = vst [vmem:[#allocation49_spill] sm:$0xff] %v11711_v1  ;;  %v3157_v55 = vsel %vm1077_vm1, %v11723_v3, -inf }
 0x6e9   : > { %14301 = vst [vmem:[#allocation78_spill] sm:$0xff] %v11723_v3 }
 0x6eb   : > { %v11702_v40 = vpop.permute.xlu0 %5393  ;;  %v11729_v52 = vpop.permute.xlu1 %5378 }
 0x6ec   : > { %14295 = vst [vmem:[#allocation69_spill] sm:$0xff] %v11702_v40  ;;  %14303 = vst [vmem:[#allocation98_spill] sm:$0xff] %v11729_v52  ;;  %v7946_v40 = vld [vmem:[%s13897_s12 + $0x2] ss:$0 sm:$0xff] }
 0x6ef   : > { %v11727_v41 = vpop.permute.xlu0 %5408 }
 0x6f0   : > { %14302 = vst [vmem:[#allocation79_spill] sm:$0xff] %v11727_v41 }
 0x6f3   : > { %v11738_v39 = vpop.permute.xlu0 %5344 }
 0x6f4   : > { %14305 = vst [vmem:[#allocation146_spill] sm:$0xff] %v11738_v39 }
 0x704   : > { %1597 = vmax.xlane.f32.xlu0 %v1596_v33  ;;  %v11736_v33 = vsel %vm576_vm9, %v11616_v54, -1e+30 }
 0x705   : > { %14304 = vst [vmem:[#allocation122_spill] sm:$0xff] %v11736_v33  ;;  %v4710_v42 = vsel %vm1077_vm1, %v11736_v33, -inf }
 0x708   : > { %3155 = vmax.xlane.f32.xlu0 %v3154_v38  ;;  %v11742_v38 = vpop.permute.xlu1 %5412 }
 0x709   : > { %14306 = vst [vmem:[#allocation110_spill] sm:$0xff] %v11742_v38  ;;  %v14339_v38 = vld [vmem:[#allocation121_spill] sm:$0xff] }
 0x70b   : > { %1594 = vmax.xlane.f32.xlu1 %v1593_v62  ;;  %v11744_v62 = vpop.permute.xlu0 %5397 }
 0x70c   : > { %4708 = vmax.xlane.f32.xlu0 %v4707_v61  ;;  %14307 = vst [vmem:[#allocation100_spill] sm:$0xff] %v11744_v62  ;;  %v11746_v21 = vpop.permute.xlu1 %5363 }
 0x70d   : > { %14308 = vst [vmem:[#allocation141_spill] sm:$0xff] %v11746_v21 }
 0x70f   : > { %3158 = vmax.xlane.f32.xlu1 %v3157_v55  ;;  %v11748_v61 = vpop.permute.xlu0 %5431 }
 0x710   : > { %14309 = vst [vmem:[#allocation151_spill] sm:$0xff] %v11748_v61  ;;  %v11750_v48 = vpop.permute.xlu1 %5427  ;;  %v14326_v61 = vld [vmem:[#allocation70_spill] sm:$0xff] }
 0x711   : > { %14310 = vst [vmem:[#allocation37_spill] sm:$0xff] %v11750_v48  ;;  %v14327_v48 = vld [vmem:[#allocation77_spill] sm:$0xff] }
 0x713   : > { %4711 = vmax.xlane.f32.xlu1 %v4710_v42  ;;  %v11752_v14 = vpop.permute.xlu0 %5382 }
 0x714   : > { %14311 = vst [vmem:[#allocation38_spill] sm:$0xff] %v11752_v14  ;;  %v11754_v54 = vpop.permute.xlu1 %5416 }
 0x715   : > { %14312 = vst [vmem:[#allocation39_spill] sm:$0xff] %v11754_v54  ;;  %v14336_v54 = vld [vmem:[#allocation119_spill] sm:$0xff] }
 0x717   : > { %v11756_v55 = vpop.permute.xlu0 %5446 }
 0x718   : > { %14313 = vst [vmem:[#allocation40_spill] sm:$0xff] %v11756_v55  ;;  %v11758_v3 = vpop.permute.xlu1 %5450  ;;  %v14344_v55 = vld [vmem:[#allocation84_spill] sm:$0xff] }
 0x719   : > { %14314 = vst [vmem:[#allocation41_spill] sm:$0xff] %v11758_v3 }
 0x71b   : > { %v11760_v33 = vpop.permute.xlu0 %5435 }
 0x71c   : > { %14315 = vst [vmem:[#allocation42_spill] sm:$0xff] %v11760_v33  ;;  %v11762_v42 = vpop.permute.xlu1 %5401  ;;  %v14325_v33 = vld [vmem:[#allocation83_spill] sm:$0xff] }
 0x71d   : > { %14316 = vst [vmem:[#allocation43_spill] sm:$0xff] %v11762_v42 }
 0x734   : > { %v4739_v25 = vpop.permute.xlu0 %4738 }
 0x735   : > { %v4742_v47 = vmul.f32 %v7945_v34, %v4739_v25 }
 0x736   : > { %v4734_v62 = vpop.permute.xlu1 %4733 }
 0x737   : > { %v4744_v1 = vadd.f32 %v7946_v40, %v4742_v47  ;;  %v4741_v14 = vmul.f32 %v7945_v34, %v4734_v62 }
 0x739   : > { %v4746_v52 = vmul.f32 %v11552_v4, %v4744_v1  ;;  %v4743_v51 = vadd.f32 %v7946_v40, %v4741_v14 }
 0x73b   : > { %v4798_v0 = vcombine.high %v4746_v52, %v4746_v52  ;;  %v4805_v21 = vrot.slane %v4746_v52, %v9506_v50  ;;  %v4745_v42 = vmul.f32 %v11565_v35, %v4743_v51 }
 0x73d   : > { %v4812_v23 = vrot.slane %v4798_v0, %v9506_v50  ;;  %v4813_v57 = vcombine.high %v4805_v21, %v4805_v21  ;;  %v4821_v25 = vrot.slane %v4805_v21, %v9506_v50  ;;  %v4749_v7 = vcombine.high %v4745_v42, %v4745_v42 }
 0x73e   : > { %v11776_v39 = vrot.slane %v4745_v42, %v9506_v50 }
 0x73f   : > { %v4814_v44 = vcombine.high %v4812_v23, %v4812_v23  ;;  %v4828_v47 = vrot.slane %v4812_v23, %v9506_v50  ;;  %v4835_v34 = vrot.slane %v4813_v57, %v9506_v50  ;;  %v4843_v14 = vcombine.high %v4821_v25, %v4821_v25 }
 0x740   : > { %v4882_v40 = vrot.slane %v4821_v25, %v8766_v12  ;;  %v11782_v1 = vrot.slane %v4749_v7, %v9506_v50  ;;  %v11788_v0 = vrot.slane %v11776_v39, %v9506_v50 }
 0x741   : > { %v4842_v52 = vrot.slane %v4814_v44, %v9506_v50  ;;  %v4844_v62 = vcombine.high %v4828_v47, %v4828_v47  ;;  %v4845_v21 = vcombine.high %v4835_v34, %v4835_v34  ;;  %v4886_v23 = vrot.slane %v4835_v34, %v8766_v12 }
 0x742   : > { %v4890_v57 = vrot.slane %v4843_v14, %v8766_v12  ;;  %v4898_v42 = vrot.slane %v4828_v47, %v8766_v12  ;;  %v4959_v7 = vmul.f32 %v4882_v40, %v14223_v27  ;;  %v4960_v25 = vmul.f32 %v4882_v40, %v14232_v5  ;;  %v14317_v27 = vld [vmem:[#allocation55_spill] sm:$0xff]  ;;  %v14318_v5 = vld [vmem:[#allocation68_spill] sm:$0xff] }
 0x743   : > { %v4846_v4 = vcombine.high %v4842_v52, %v4842_v52  ;;  %v4894_v51 = vrot.slane %v4845_v21, %v8766_v12  ;;  %v4902_v35 = vrot.slane %v4842_v52, %v8766_v12  ;;  %v4906_v22 = vrot.slane %v4844_v62, %v8766_v12 }
 0x744   : > { %v4961_v44 = vmul.f32 %v4882_v40, %v14233_v17  ;;  %v4962_v8 = vmul.f32 %v4882_v40, %v14234_v26  ;;  %v4963_v34 = vmul.f32 %v4886_v23, %v14235_v16  ;;  %v4964_v14 = vmul.f32 %v4886_v23, %v14236_v43  ;;  %v14324_v40 = vld [vmem:[#allocation65_spill] sm:$0xff] }
 0x745   : > { %v4910_v47 = vrot.slane %v4846_v4, %v8766_v12  ;;  %v4965_v15 = vmul.f32 %v4886_v23, %v14317_v27  ;;  %v4966_v13 = vmul.f32 %v4886_v23, %v14318_v5  ;;  %v4967_v21 = vmul.f32 %v4890_v57, %v14319_v9  ;;  %v14329_v5 = vld [vmem:[#allocation113_spill] sm:$0xff] }
 0x746   : > { %v4968_v52 = vmul.f32 %v4890_v57, %v14320_v46  ;;  %v4969_v62 = vmul.f32 %v4890_v57, %v14321_v29  ;;  %v4970_v17 = vmul.f32 %v4890_v57, %v14322_v24  ;;  %v4971_v26 = vmul.f32 %v4894_v51, %v14323_v10  ;;  %v14333_v57 = vld [vmem:[#allocation124_spill] sm:$0xff] }
 0x747   : > { %v4972_v16 = vmul.f32 %v4894_v51, %v14324_v40  ;;  %v4973_v43 = vmul.f32 %v4894_v51, %v14325_v33  ;;  %v4974_v4 = vmul.f32 %v4894_v51, %v14326_v61  ;;  %v4975_v27 = vmul.f32 %v4898_v42, %v14327_v48  ;;  %v14337_v48 = vld [vmem:[#allocation125_spill] sm:$0xff] }
 0x748   : > { %v4976_v23 = vmul.f32 %v4898_v42, %v14328_v59  ;;  %v4977_v9 = vmul.f32 %v4898_v42, %v14329_v5  ;;  %v4978_v46 = vmul.f32 %v4898_v42, %v14330_v6  ;;  %v4979_v29 = vmul.f32 %v4902_v35, %v14331_v20  ;;  %v14338_v59 = vld [vmem:[#allocation88_spill] sm:$0xff] }
 0x749   : > { %v4980_v24 = vmul.f32 %v4902_v35, %v14332_v36  ;;  %v4981_v10 = vmul.f32 %v4902_v35, %v14333_v57  ;;  %v4982_v40 = vmul.f32 %v4902_v35, %v14334_v2  ;;  %v4983_v33 = vmul.f32 %v4906_v22, %v14335_v11  ;;  %v14340_v42 = vld [vmem:[#allocation120_spill] sm:$0xff]  ;;  %v14342_v57 = vld [vmem:[#allocation101_spill] sm:$0xff] }
 0x74a   : > { %v4984_v61 = vmul.f32 %v4906_v22, %v14336_v54  ;;  %v4985_v51 = vmul.f32 %v4906_v22, %v14337_v48  ;;  %v4986_v5 = vmul.f32 %v4906_v22, %v14338_v59  ;;  %v4987_v6 = vmul.f32 %v4910_v47, %v14339_v38  ;;  %v14341_v36 = vld [vmem:[#allocation56_spill] sm:$0xff]  ;;  %v14343_v2 = vld [vmem:[#allocation81_spill] sm:$0xff]  ;;  %v14347_v59 = vld [vmem:[#allocation103_spill] sm:$0xff] }
 0x74b   : > { %v4988_v20 = vmul.f32 %v4910_v47, %v14340_v42  ;;  %v4989_v3 = vmul.f32 %v4910_v47, %v14341_v36  ;;  %v4990_v35 = vmul.f32 %v4910_v47, %v14342_v57  ;;  %v11831_v11 = vadd.f32 %v4959_v7, %v14343_v2  ;;  %v14345_v48 = vld [vmem:[#allocation97_spill] sm:$0xff]  ;;  %v14346_v22 = vld [vmem:[#allocation96_spill] sm:$0xff]  ;;  %v14349_v7 = vld [vmem:[#allocation91_spill] sm:$0xff] }
 0x74c   : > { %v11834_v54 = vadd.f32 %v4960_v25, %v14344_v55  ;;  %v11837_v41 = vadd.f32 %v4961_v44, %v14345_v48  ;;  %v11840_v38 = vadd.f32 %v4962_v8, %v14346_v22  ;;  %v11843_v42 = vadd.f32 %v4963_v34, %v14347_v59  ;;  %v14348_v36 = vld [vmem:[#allocation92_spill] sm:$0xff]  ;;  %v14350_v2 = vld [vmem:[#allocation99_spill] sm:$0xff]  ;;  %v7947_v25 = vld [vmem:[%s8558_s10 + $0x140] sm:$0xff] }
 0x74d   : > { %v11846_v47 = vadd.f32 %v4964_v14, %v14348_v36  ;;  %v11849_v57 = vadd.f32 %v4965_v15, %v14349_v7  ;;  %v11852_v55 = vadd.f32 %v4966_v13, %v14350_v2  ;;  %v11855_v44 = vadd.f32 %v7947_v25, %v4967_v21  ;;  %v7948_v8 = vld [vmem:[%s8558_s10 + $0x148] sm:$0xff]  ;;  %v7949_v34 = vld [vmem:[%s8558_s10 + $0x150] sm:$0xff]  ;;  %v7950_v14 = vld [vmem:[%s8558_s10 + $0x158] sm:$0xff] }
 0x74e   : > { %v11858_v48 = vadd.f32 %v7948_v8, %v4968_v52  ;;  %v11861_v22 = vadd.f32 %v7949_v34, %v4969_v62  ;;  %v11864_v15 = vadd.f32 %v7950_v14, %v4970_v17  ;;  %v7951_v59 = vld [vmem:[%s8558_s10 + $0x160] sm:$0xff]  ;;  %v7952_v36 = vld [vmem:[%s8558_s10 + $0x168] sm:$0xff]  ;;  %v7953_v7 = vld [vmem:[%s8558_s10 + $0x170] sm:$0xff] }
 0x74f   : > { %v11867_v13 = vadd.f32 %v7951_v59, %v4971_v26  ;;  %v11870_v21 = vadd.f32 %v7952_v36, %v4972_v16  ;;  %v11873_v52 = vadd.f32 %v7953_v7, %v4973_v43  ;;  %v7954_v2 = vld [vmem:[%s8558_s10 + $0x178] sm:$0xff]  ;;  %v7955_v25 = vld [vmem:[%s8558_s10 + $0x180] sm:$0xff]  ;;  %v7956_v8 = vld [vmem:[%s8558_s10 + $0x188] sm:$0xff] }
 0x750   : > { %v11876_v62 = vadd.f32 %v7954_v2, %v4974_v4  ;;  %v11879_v17 = vadd.f32 %v7955_v25, %v4975_v27  ;;  %v11882_v26 = vadd.f32 %v7956_v8, %v4976_v23  ;;  %v7957_v34 = vld [vmem:[%s8558_s10 + $0x190] sm:$0xff]  ;;  %v7958_v14 = vld [vmem:[%s8558_s10 + $0x198] sm:$0xff]  ;;  %v7959_v43 = vld [vmem:[%s8558_s10 + $0x1a0] sm:$0xff] }
 0x751   : > { %v11885_v16 = vadd.f32 %v7957_v34, %v4977_v9  ;;  %v11888_v59 = vadd.f32 %v7958_v14, %v4978_v46  ;;  %v11891_v36 = vadd.f32 %v7959_v43, %v4979_v29  ;;  %v7960_v4 = vld [vmem:[%s8558_s10 + $0x1a8] sm:$0xff]  ;;  %v7961_v27 = vld [vmem:[%s8558_s10 + $0x1b0] sm:$0xff]  ;;  %v7962_v23 = vld [vmem:[%s8558_s10 + $0x1b8] sm:$0xff] }
 0x752   : > { %v11894_v7 = vadd.f32 %v7960_v4, %v4980_v24  ;;  %v11897_v2 = vadd.f32 %v7961_v27, %v4981_v10  ;;  %v11900_v25 = vadd.f32 %v7962_v23, %v4982_v40  ;;  %v7963_v9 = vld [vmem:[%s8558_s10 + $0x1c0] sm:$0xff]  ;;  %v7964_v46 = vld [vmem:[%s8558_s10 + $0x1c8] sm:$0xff]  ;;  %v7965_v29 = vld [vmem:[%s8558_s10 + $0x1d0] sm:$0xff] }
 0x753   : > { %v11903_v8 = vadd.f32 %v7963_v9, %v4983_v33  ;;  %v11906_v34 = vadd.f32 %v7964_v46, %v4984_v61  ;;  %v11909_v14 = vadd.f32 %v7965_v29, %v4985_v51  ;;  %v14351_v43 = vld [vmem:[#allocation80_spill] sm:$0xff]  ;;  %v7966_v4 = vld [vmem:[%s8558_s10 + $0x1e0] sm:$0xff]  ;;  %v7967_v10 = vld [vmem:[%s8558_s10 + $0x1e8] sm:$0xff]  ;;  %v7271_v51 = vclamps-f32 %v11831_v11, 2.0 }
 0x754   : > { %v11912_v24 = vadd.f32 %v4986_v5, %v14351_v43  ;;  %v11915_v18 = vadd.f32 %v7966_v4, %v4987_v6  ;;  %v11918_v27 = vadd.f32 %v7967_v10, %v4988_v20  ;;  %v7968_v40 = vld [vmem:[%s8558_s10 + $0x1f0] sm:$0xff]  ;;  %v7969_v33 = vld [vmem:[%s8558_s10 + $0x1f8] sm:$0xff]  ;;  %v7272_v5 = vclamps-f32 %v11834_v54, 2.0 }
 0x755   : > { %v11921_v23 = vadd.f32 %v7968_v40, %v4989_v3  ;;  %v11924_v61 = vadd.f32 %v7969_v33, %v4990_v35  ;;  %v7273_v6 = vclamps-f32 %v11837_v41, 2.0  ;;  %v7274_v9 = vclamps-f32 %v11840_v38, 2.0  ;;  %5215 = vst.msk [vmem:[%s8558_s10 + $0x100] sm:$0xff] %vm1077_vm1, %v7271_v51 }
 0x756   : > { %v7275_v20 = vclamps-f32 %v11843_v42, 2.0  ;;  %v7276_v3 = vclamps-f32 %v11846_v47, 2.0  ;;  %v7277_v46 = vclamps-f32 %v11849_v57, 2.0  ;;  %v7278_v35 = vclamps-f32 %v11852_v55, 2.0  ;;  %5216 = vst.msk [vmem:[%s8558_s10 + $0x108] sm:$0xff] %vm1077_vm1, %v7272_v5  ;;  %v14354_v5 = vld [vmem:[#allocation94_spill] sm:$0xff] }
 0x757   : > { %v7279_v11 = vclamps-f32 %v11855_v44, 2.0  ;;  %v7280_v41 = vclamps-f32 %v11858_v48, 2.0  ;;  %v7281_v54 = vclamps-f32 %v11861_v22, 2.0  ;;  %v7282_v38 = vclamps-f32 %v11864_v15, 2.0  ;;  %5217 = vst.msk [vmem:[%s8558_s10 + $0x110] sm:$0xff] %vm1077_vm1, %v7273_v6  ;;  %5218 = vst.msk [vmem:[%s8558_s10 + $0x118] sm:$0xff] %vm1077_vm1, %v7274_v9 }
 0x758   : > { %v7283_v42 = vclamps-f32 %v11867_v13, 2.0  ;;  %5219 = vst.msk [vmem:[%s8558_s10 + $0x120] sm:$0xff] %vm1077_vm1, %v7275_v20  ;;  %v7284_v47 = vclamps-f32 %v11870_v21, 2.0  ;;  %v7285_v57 = vclamps-f32 %v11873_v52, 2.0  ;;  %v7286_v55 = vclamps-f32 %v11876_v62, 2.0  ;;  %5220 = vst.msk [vmem:[%s8558_s10 + $0x128] sm:$0xff] %vm1077_vm1, %v7276_v3  ;;  %v12044_v3 = vpop.permute.xlu0 %5469 }
 0x759   : > { %v7287_v44 = vclamps-f32 %v11879_v17, 2.0  ;;  %5221 = vst.msk [vmem:[%s8558_s10 + $0x130] sm:$0xff] %vm1077_vm1, %v7277_v46  ;;  %5222 = vst.msk [vmem:[%s8558_s10 + $0x138] sm:$0xff] %vm1077_vm1, %v7278_v35  ;;  %v7288_v48 = vclamps-f32 %v11882_v26, 2.0  ;;  %v7289_v22 = vclamps-f32 %v11885_v16, 2.0  ;;  %v7290_v15 = vclamps-f32 %v11888_v59, 2.0 }
 0x75a   : > { %5223 = vst.msk [vmem:[%s8558_s10 + $0x140] sm:$0xff] %vm1077_vm1, %v7279_v11  ;;  %v7291_v13 = vclamps-f32 %v11891_v36, 2.0  ;;  %5224 = vst.msk [vmem:[%s8558_s10 + $0x148] sm:$0xff] %vm1077_vm1, %v7280_v41  ;;  %v7292_v21 = vclamps-f32 %v11894_v7, 2.0  ;;  %v7293_v52 = vclamps-f32 %v11897_v2, 2.0  ;;  %v7294_v62 = vclamps-f32 %v11900_v25, 2.0 }
 0x75b   : > { %5225 = vst.msk [vmem:[%s8558_s10 + $0x150] sm:$0xff] %vm1077_vm1, %v7281_v54  ;;  %5226 = vst.msk [vmem:[%s8558_s10 + $0x158] sm:$0xff] %vm1077_vm1, %v7282_v38  ;;  %v7295_v17 = vclamps-f32 %v11903_v8, 2.0  ;;  %v7296_v26 = vclamps-f32 %v11906_v34, 2.0  ;;  %v7297_v16 = vclamps-f32 %v11909_v14, 2.0  ;;  %v7298_v59 = vclamps-f32 %v11912_v24, 2.0 }
 0x75c   : > { %5227 = vst.msk [vmem:[%s8558_s10 + $0x160] sm:$0xff] %vm1077_vm1, %v7283_v42  ;;  %5228 = vst.msk [vmem:[%s8558_s10 + $0x168] sm:$0xff] %vm1077_vm1, %v7284_v47  ;;  %v7299_v36 = vclamps-f32 %v11915_v18, 2.0  ;;  %v7300_v7 = vclamps-f32 %v11918_v27, 2.0  ;;  %v7301_v2 = vclamps-f32 %v11921_v23, 2.0  ;;  %v7302_v25 = vclamps-f32 %v11924_v61, 2.0 }
 0x75d   : > { %5229 = vst.msk [vmem:[%s8558_s10 + $0x170] sm:$0xff] %vm1077_vm1, %v7285_v57  ;;  %5230 = vst.msk [vmem:[%s8558_s10 + $0x178] sm:$0xff] %vm1077_vm1, %v7286_v55  ;;  %v4765_v18 = vcombine.high %v11782_v1, %v11782_v1  ;;  %v4779_v8 = vrot.slane %v11782_v1, %v9506_v50  ;;  %v14352_v34 = vcombine.high %v11776_v39, %v11776_v39  ;;  %v14355_v9 = vld [vmem:[#allocation93_spill] sm:$0xff]  ;;  %v14357_v35 = vld [vmem:[#allocation111_spill] sm:$0xff] }
 0x75e   : > { %5231 = vst.msk [vmem:[%s8558_s10 + $0x180] sm:$0xff] %vm1077_vm1, %v7287_v44  ;;  %5232 = vst.msk [vmem:[%s8558_s10 + $0x188] sm:$0xff] %vm1077_vm1, %v7288_v48  ;;  %v4794_v14 = vcombine.high %v11788_v0, %v11788_v0  ;;  %v4850_v43 = vrot.slane %v11788_v0, %v8766_v12  ;;  %v14353_v0 = vld [vmem:[#allocation71_spill] sm:$0xff]  ;;  %v14358_v41 = vld [vmem:[#allocation82_spill] sm:$0xff] }
 0x75f   : > { %5233 = vst.msk [vmem:[%s8558_s10 + $0x190] sm:$0xff] %vm1077_vm1, %v7289_v22  ;;  %5234 = vst.msk [vmem:[%s8558_s10 + $0x198] sm:$0xff] %vm1077_vm1, %v7290_v15  ;;  %v4786_v29 = vrot.slane %v14352_v34, %v9506_v50  ;;  %v4793_v24 = vrot.slane %v4765_v18, %v9506_v50  ;;  %v4795_v1 = vcombine.high %v4779_v8, %v4779_v8  ;;  %v14359_v38 = vld [vmem:[#allocation73_spill] sm:$0xff]  ;;  %v14360_v57 = vld [vmem:[#allocation131_spill] sm:$0xff]  ;;  %v12054_v22 = vpop.permute.xlu1 %5465 }
 0x760   : > { %5235 = vst.msk [vmem:[%s8558_s10 + $0x1a0] sm:$0xff] %vm1077_vm1, %v7291_v13  ;;  %5236 = vst.msk [vmem:[%s8558_s10 + $0x1a8] sm:$0xff] %vm1077_vm1, %v7292_v21  ;;  %v4858_v39 = vrot.slane %v4794_v14, %v8766_v12  ;;  %v4866_v40 = vrot.slane %v4779_v8, %v8766_v12  ;;  %v4927_v33 = vmul.f32 %v4850_v43, %v14353_v0  ;;  %v14369_v18 = vld [vmem:[#allocation89_spill] sm:$0xff]  ;;  %v14371_v34 = vld [vmem:[#allocation142_spill] sm:$0xff]  ;;  %v12074_v14 = vpop.permute.xlu0 %5568 }
 0x761   : > { %5237 = vst.msk [vmem:[%s8558_s10 + $0x1b0] sm:$0xff] %vm1077_vm1, %v7293_v52  ;;  %5238 = vst.msk [vmem:[%s8558_s10 + $0x1b8] sm:$0xff] %vm1077_vm1, %v7294_v62  ;;  %v4796_v4 = vcombine.high %v4786_v29, %v4786_v29  ;;  %v4854_v10 = vrot.slane %v4786_v29, %v8766_v12  ;;  %v4797_v27 = vcombine.high %v4793_v24, %v4793_v24 }
 0x762   : > { %5239 = vst.msk [vmem:[%s8558_s10 + $0x1c0] sm:$0xff] %vm1077_vm1, %v7295_v17  ;;  %5240 = vst.msk [vmem:[%s8558_s10 + $0x1c8] sm:$0xff] %vm1077_vm1, %v7296_v26  ;;  %v4870_v23 = vrot.slane %v4793_v24, %v8766_v12  ;;  %v4874_v51 = vrot.slane %v4795_v1, %v8766_v12  ;;  %v4928_v6 = vmul.f32 %v4850_v43, %v14354_v5  ;;  %v14362_v17 = vld [vmem:[#allocation116_spill] sm:$0xff]  ;;  %v14374_v1 = vld [vmem:[#allocation86_spill] sm:$0xff] }
 0x763   : > { %5241 = vst.msk [vmem:[%s8558_s10 + $0x1d0] sm:$0xff] %vm1077_vm1, %v7297_v16  ;;  %5242 = vst.msk [vmem:[%s8558_s10 + $0x1d8] sm:$0xff] %vm1077_vm1, %v7298_v59  ;;  %v4862_v61 = vrot.slane %v4796_v4, %v8766_v12  ;;  %v4929_v20 = vmul.f32 %v4850_v43, %v14355_v9  ;;  %v4878_v46 = vrot.slane %v4797_v27, %v8766_v12  ;;  %v14363_v16 = vld [vmem:[#allocation112_spill] sm:$0xff]  ;;  %v14364_v59 = vld [vmem:[#allocation135_spill] sm:$0xff] }
 0x764   : > { %5243 = vst.msk [vmem:[%s8558_s10 + $0x1e0] sm:$0xff] %vm1077_vm1, %v7299_v36  ;;  %5244 = vst.msk [vmem:[%s8558_s10 + $0x1e8] sm:$0xff] %vm1077_vm1, %v7300_v7  ;;  %v4930_v11 = vmul.f32 %v4850_v43, %v14357_v35  ;;  %v4931_v54 = vmul.f32 %v4854_v10, %v14358_v41  ;;  %v4932_v42 = vmul.f32 %v4854_v10, %v14359_v38  ;;  %v14365_v36 = vld [vmem:[#allocation117_spill] sm:$0xff]  ;;  %v14373_v43 = vld [vmem:[#allocation118_spill] sm:$0xff]  ;;  %v12100_v38 = vpop.permute.xlu1 %5534 }
 0x765   : > { %5245 = vst.msk [vmem:[%s8558_s10 + $0x1f0] sm:$0xff] %vm1077_vm1, %v7301_v2  ;;  %5246 = vst.msk [vmem:[%s8558_s10 + $0x1f8] sm:$0xff] %vm1077_vm1, %v7302_v25  ;;  %v4933_v47 = vmul.f32 %v4854_v10, %v14245_v37  ;;  %v4934_v55 = vmul.f32 %v4854_v10, %v14360_v57  ;;  %v4935_v44 = vmul.f32 %v4858_v39, %v14247_v19  ;;  %v14367_v2 = vld [vmem:[#allocation132_spill] sm:$0xff]  ;;  %v14368_v25 = vld [vmem:[#allocation149_spill] sm:$0xff] }
 0x766   : > { %14356 = vst [vmem:[#allocation108_spill] sm:$0xff] %v12044_v3  ;;  %v4936_v48 = vmul.f32 %v4858_v39, %v14248_v32  ;;  %14361 = vst [vmem:[#allocation44_spill] sm:$0xff] %v12054_v22  ;;  %v4937_v15 = vmul.f32 %v4858_v39, %v14249_v60  ;;  %v4938_v13 = vmul.f32 %v4858_v39, %v14250_v30  ;;  %v14366_v60 = vld [vmem:[#allocation137_spill] sm:$0xff]  ;;  %v14375_v10 = vld [vmem:[#allocation123_spill] sm:$0xff] }
 0x767   : > { %v4939_v21 = vmul.f32 %v4862_v61, %v14251_v53  ;;  %v4940_v52 = vmul.f32 %v4862_v61, %v14252_v31  ;;  %v4941_v62 = vmul.f32 %v4862_v61, %v14253_v45  ;;  %v4942_v37 = vmul.f32 %v4862_v61, %v14254_v49  ;;  %v14370_v49 = vld [vmem:[#allocation136_spill] sm:$0xff]  ;;  %14372 = vst [vmem:[#allocation109_spill] sm:$0xff] %v12074_v14  ;;  %v14376_v27 = vld [vmem:[#allocation115_spill] sm:$0xff]  ;;  %v14378_v61 = vld [vmem:[#allocation57_spill] sm:$0xff] }
 0x768   : > { %v4943_v26 = vmul.f32 %v4866_v40, %v14362_v17  ;;  %v4944_v19 = vmul.f32 %v4866_v40, %v14363_v16  ;;  %v4945_v32 = vmul.f32 %v4866_v40, %v14364_v59  ;;  %v4946_v7 = vmul.f32 %v4866_v40, %v14365_v36  ;;  %v7970_v9 = vld [vmem:[%s8558_s10] sm:$0xff]  ;;  %14379 = vst [vmem:[#allocation63_spill] sm:$0xff] %v12100_v38  ;;  %v7972_v57 = vld [vmem:[%s8558_s10 + $0x10] sm:$0xff]  ;;  %v7973_v16 = vld [vmem:[%s8558_s10 + $0x18] sm:$0xff] }
 0x769   : > { %v4947_v30 = vmul.f32 %v4870_v23, %v14366_v60  ;;  %v4948_v53 = vmul.f32 %v4870_v23, %v14367_v2  ;;  %v4949_v31 = vmul.f32 %v4870_v23, %v14368_v25  ;;  %v4950_v45 = vmul.f32 %v4870_v23, %v14369_v18  ;;  %v14377_v23 = vld [vmem:[#allocation74_spill] sm:$0xff]  ;;  %v7977_v25 = vld [vmem:[%s8558_s10 + $0x38] sm:$0xff]  ;;  %v7978_v18 = vld [vmem:[%s8558_s10 + $0x40] sm:$0xff] }
 0x76a   : > { %v4951_v8 = vmul.f32 %v4874_v51, %v14370_v49  ;;  %v12072_v29 = vmul.f32 %v4874_v51, %v14371_v34  ;;  %v12077_v24 = vmul.f32 %v4874_v51, %v14373_v43  ;;  %v12080_v4 = vmul.f32 %v4874_v51, %v14374_v1  ;;  %v7971_v51 = vld [vmem:[%s8558_s10 + $0x8] sm:$0xff]  ;;  %v7980_v34 = vld [vmem:[%s8558_s10 + $0x50] sm:$0xff] }
 0x76b   : > { %v12083_v39 = vmul.f32 %v4878_v46, %v14375_v10  ;;  %v12086_v40 = vmul.f32 %v4878_v46, %v14376_v27  ;;  %v12089_v0 = vmul.f32 %v4878_v46, %v14377_v23  ;;  %v12092_v5 = vmul.f32 %v4878_v46, %v14378_v61  ;;  %v7974_v46 = vld [vmem:[%s8558_s10 + $0x20] sm:$0xff]  ;;  %v7979_v49 = vld [vmem:[%s8558_s10 + $0x48] sm:$0xff] }
 0x76c   : > { %v12095_v35 = vadd.f32 %v7970_v9, %v4927_v33  ;;  %v12098_v41 = vadd.f32 %v7971_v51, %v4928_v6  ;;  %v12103_v17 = vadd.f32 %v7972_v57, %v4929_v20  ;;  %v12106_v59 = vadd.f32 %v7973_v16, %v4930_v11  ;;  %v7975_v33 = vld [vmem:[%s8558_s10 + $0x28] sm:$0xff]  ;;  %v7976_v6 = vld [vmem:[%s8558_s10 + $0x30] sm:$0xff] }
 0x76d   : > { %v12109_v36 = vadd.f32 %v7974_v46, %v4931_v54  ;;  %v12112_v60 = vadd.f32 %v7975_v33, %v4932_v42  ;;  %v12115_v2 = vadd.f32 %v7976_v6, %v4933_v47  ;;  %v12118_v20 = vadd.f32 %v7977_v25, %v4934_v55  ;;  %v7981_v42 = vld [vmem:[%s8558_s10 + $0x58] sm:$0xff]  ;;  %v7982_v47 = vld [vmem:[%s8558_s10 + $0x60] sm:$0xff]  ;;  %v7983_v55 = vld [vmem:[%s8558_s10 + $0x68] sm:$0xff] }
 0x76e   : > { %v12121_v11 = vadd.f32 %v7978_v18, %v4935_v44  ;;  %v12124_v54 = vadd.f32 %v7979_v49, %v4936_v48  ;;  %v12127_v43 = vadd.f32 %v7980_v34, %v4937_v15  ;;  %v12130_v1 = vadd.f32 %v7981_v42, %v4938_v13  ;;  %v7984_v44 = vld [vmem:[%s8558_s10 + $0x70] sm:$0xff]  ;;  %v7985_v48 = vld [vmem:[%s8558_s10 + $0x78] sm:$0xff]  ;;  %v7986_v15 = vld [vmem:[%s8558_s10 + $0x80] sm:$0xff] }
 0x76f   : > { %v12133_v10 = vadd.f32 %v7982_v47, %v4939_v21  ;;  %v12136_v27 = vadd.f32 %v7983_v55, %v4940_v52  ;;  %v12139_v23 = vadd.f32 %v7984_v44, %v4941_v62  ;;  %v12142_v61 = vadd.f32 %v7985_v48, %v4942_v37  ;;  %v7987_v13 = vld [vmem:[%s8558_s10 + $0x88] sm:$0xff]  ;;  %v12150_v21 = vpop.permute.xlu0 %5602  ;;  %v7988_v52 = vld [vmem:[%s8558_s10 + $0x90] sm:$0xff]  ;;  %v7989_v62 = vld [vmem:[%s8558_s10 + $0x98] sm:$0xff] }
 0x770   : > { %v12145_v9 = vadd.f32 %v7986_v15, %v4943_v26  ;;  %v12148_v51 = vadd.f32 %v7987_v13, %v4944_v19  ;;  %14380 = vst [vmem:[#allocation55_spill] sm:$0xff] %v12150_v21  ;;  %v12153_v57 = vadd.f32 %v7988_v52, %v4945_v32  ;;  %v12156_v16 = vadd.f32 %v7989_v62, %v4946_v7  ;;  %v7990_v37 = vld [vmem:[%s8558_s10 + $0xa0] sm:$0xff]  ;;  %v7991_v26 = vld [vmem:[%s8558_s10 + $0xa8] sm:$0xff]  ;;  %v6171_v19 = vld [vmem:[#allocation9 + $0x38] sm:$0xff] }
 0x771   : > { %v12159_v46 = vadd.f32 %v7990_v37, %v4947_v30  ;;  %v12162_v33 = vadd.f32 %v7991_v26, %v4948_v53  ;;  %v6170_v6 = vld [vmem:[#allocation9 + $0x30] sm:$0xff]  ;;  %v7993_v32 = vld [vmem:[%s8558_s10 + $0xb8] sm:$0xff]  ;;  %v7994_v7 = vld [vmem:[%s8558_s10 + $0xc0] sm:$0xff]  ;;  %v12177_v53 = vpop.permute.xlu1 %5598  ;;  %7592 = vmatprep.subr.mxu1 %v6171_v19  ;;  %v7239_v62 = vclamps-f32 %v12095_v35, 2.0  ;;  %v7242_v37 = vclamps-f32 %v12106_v59, 2.0 }
 0x772   : > { %v7992_v25 = vld [vmem:[%s8558_s10 + $0xb0] sm:$0xff]  ;;  %v12168_v49 = vadd.f32 %v7993_v32, %v4950_v45  ;;  %v12171_v34 = vadd.f32 %v7994_v7, %v4951_v8  ;;  %v7995_v30 = vld [vmem:[%s8558_s10 + $0xc8] sm:$0xff]  ;;  %14381 = vst [vmem:[#allocation68_spill] sm:$0xff] %v12177_v53  ;;  %v7998_v44 = vld [vmem:[%s8558_s10 + $0xe0] sm:$0xff]  ;;  %7593 = vmatpush3.msra.mxu1 %v6171_v19  ;;  %v7243_v26 = vclamps-f32 %v12109_v36, 2.0  ;;  %v7246_v35 = vclamps-f32 %v12118_v20, 2.0 }
 0x773   : > { %v12165_v18 = vadd.f32 %v7992_v25, %v4949_v31  ;;  %v12175_v42 = vadd.f32 %v7995_v30, %v12072_v29  ;;  %v7996_v47 = vld [vmem:[%s8558_s10 + $0xd0] sm:$0xff]  ;;  %v7997_v31 = vld [vmem:[%s8558_s10 + $0xd8] sm:$0xff]  ;;  %v12189_v8 = vadd.f32 %v7998_v44, %v12083_v39  ;;  %v7999_v48 = vld [vmem:[%s8558_s10 + $0xe8] sm:$0xff]  ;;  %v7240_v39 = vclamps-f32 %v12098_v41, 2.0  ;;  %7594 = vmatprep.subr.mxu1 %v6170_v6  ;;  %5183 = vst.msk [vmem:[%s8558_s10] sm:$0xff] %vm1077_vm1, %v7239_v62  ;;  %v12217_v59 = vpop.permute.xlu0 %5454 }
 0x774   : > { %v12181_v55 = vadd.f32 %v7996_v47, %v12077_v24  ;;  %v12185_v45 = vadd.f32 %v7997_v31, %v12080_v4  ;;  %v12193_v15 = vadd.f32 %v7999_v48, %v12086_v40  ;;  %v6169_v29 = vld [vmem:[#allocation9 + $0x28] sm:$0xff]  ;;  %v8000_v13 = vld [vmem:[%s8558_s10 + $0xf0] sm:$0xff]  ;;  %v8001_v24 = vld [vmem:[%s8558_s10 + $0xf8] sm:$0xff]  ;;  %v7241_v40 = vclamps-f32 %v12103_v17, 2.0  ;;  %7595 = vmatpush3.msra.mxu1 %v6170_v6  ;;  %14382 = vst [vmem:[#allocation59_spill] sm:$0xff] %v12217_v59 }
 0x775   : > { %v12197_v52 = vadd.f32 %v8000_v13, %v12089_v0  ;;  %v12201_v4 = vadd.f32 %v8001_v24, %v12092_v5  ;;  %v7244_v0 = vclamps-f32 %v12112_v60, 2.0  ;;  %v6168_v19 = vld [vmem:[#allocation9 + $0x20] sm:$0xff]  ;;  %v7245_v5 = vclamps-f32 %v12115_v2, 2.0  ;;  %5184 = vst.msk [vmem:[%s8558_s10 + $0x8] sm:$0xff] %vm1077_vm1, %v7240_v39  ;;  %7596 = vmatprep.subr.mxu1 %v6169_v29  ;;  %5186 = vst.msk [vmem:[%s8558_s10 + $0x18] sm:$0xff] %vm1077_vm1, %v7242_v37  ;;  %v5312_v6 = vld [vmem:[%s8558_s10 + $0x188] sm:$0xff] }
 0x776   : > { %v7247_v41 = vclamps-f32 %v12121_v11, 2.0  ;;  %v7248_v17 = vclamps-f32 %v12124_v54, 2.0  ;;  %v7249_v36 = vclamps-f32 %v12127_v43, 2.0  ;;  %v7250_v60 = vclamps-f32 %v12130_v1, 2.0  ;;  %5185 = vst.msk [vmem:[%s8558_s10 + $0x10] sm:$0xff] %vm1077_vm1, %v7241_v40  ;;  %5187 = vst.msk [vmem:[%s8558_s10 + $0x20] sm:$0xff] %vm1077_vm1, %v7243_v26  ;;  %7597 = vmatpush3.msra.mxu1 %v6169_v29 }
 0x777   : > { %v7251_v2 = vclamps-f32 %v12133_v10, 2.0  ;;  %v7252_v20 = vclamps-f32 %v12136_v27, 2.0  ;;  %5188 = vst.msk [vmem:[%s8558_s10 + $0x28] sm:$0xff] %vm1077_vm1, %v7244_v0  ;;  %v7253_v11 = vclamps-f32 %v12139_v23, 2.0  ;;  %v7254_v54 = vclamps-f32 %v12142_v61, 2.0  ;;  %5189 = vst.msk [vmem:[%s8558_s10 + $0x30] sm:$0xff] %vm1077_vm1, %v7245_v5  ;;  %v12244_v27 = vpop.permute.xlu1 %5420  ;;  %7598 = vmatprep.subr.mxu1 %v6168_v19  ;;  %v12299_v44 = vpop.permute.xlu0 %5587 }
 0x778   : > { %v7255_v43 = vclamps-f32 %v12145_v9, 2.0  ;;  %v7256_v1 = vclamps-f32 %v12148_v51, 2.0  ;;  %5190 = vst.msk [vmem:[%s8558_s10 + $0x38] sm:$0xff] %vm1077_vm1, %v7246_v35  ;;  %5191 = vst.msk [vmem:[%s8558_s10 + $0x40] sm:$0xff] %vm1077_vm1, %v7247_v41  ;;  %v5303_v10 = vld [vmem:[%s8558_s10 + $0x140] sm:$0xff]  ;;  %v7257_v23 = vclamps-f32 %v12153_v57, 2.0  ;;  %7599 = vmatpush3.msra.mxu1 %v6168_v19 }
 0x779   : > { %5192 = vst.msk [vmem:[%s8558_s10 + $0x48] sm:$0xff] %vm1077_vm1, %v7248_v17  ;;  %14383 = vst [vmem:[#allocation48_spill] sm:$0xff] %v12244_v27  ;;  %v7258_v61 = vclamps-f32 %v12156_v16, 2.0  ;;  %v7259_v9 = vclamps-f32 %v12159_v46, 2.0  ;;  %v7260_v51 = vclamps-f32 %v12162_v33, 2.0  ;;  %v5311_v57 = vld [vmem:[%s8558_s10 + $0x180] sm:$0xff]  ;;  %v5671_v48 = vmul.f32 %v11638_v58, %v5303_v10 }
 0x77a   : > { %5193 = vst.msk [vmem:[%s8558_s10 + $0x50] sm:$0xff] %vm1077_vm1, %v7249_v36  ;;  %5194 = vst.msk [vmem:[%s8558_s10 + $0x58] sm:$0xff] %vm1077_vm1, %v7250_v60  ;;  %v7261_v16 = vclamps-f32 %v12165_v18, 2.0  ;;  %v7262_v46 = vclamps-f32 %v12168_v49, 2.0  ;;  %v7263_v33 = vclamps-f32 %v12171_v34, 2.0  ;;  %v7264_v25 = vclamps-f32 %v12175_v42, 2.0 }
 0x77b   : > { %5195 = vst.msk [vmem:[%s8558_s10 + $0x60] sm:$0xff] %vm1077_vm1, %v7251_v2  ;;  %5196 = vst.msk [vmem:[%s8558_s10 + $0x68] sm:$0xff] %vm1077_vm1, %v7252_v20  ;;  %v5304_v18 = vld [vmem:[%s8558_s10 + $0x148] sm:$0xff]  ;;  %v5305_v32 = vld [vmem:[%s8558_s10 + $0x150] sm:$0xff]  ;;  %v7265_v49 = vclamps-f32 %v12181_v55, 2.0  ;;  %v7266_v7 = vclamps-f32 %v12185_v45, 2.0  ;;  %v5679_v31 = vmul.f32 %v11652_v28, %v5311_v57  ;;  %v5680_v45 = vmul.f32 %v11660_v63, %v5312_v6  ;;  %v12325_v37 = vpop.permute.xlu1 %5553  ;;  %v12343_v10 = vpop.permute.xlu0 %5621 }
 0x77c   : > { %5197 = vst.msk [vmem:[%s8558_s10 + $0x70] sm:$0xff] %vm1077_vm1, %v7253_v11  ;;  %5198 = vst.msk [vmem:[%s8558_s10 + $0x78] sm:$0xff] %vm1077_vm1, %v7254_v54  ;;  %v7267_v34 = vclamps-f32 %v12189_v8, 2.0  ;;  %v7268_v30 = vclamps-f32 %v12193_v15, 2.0  ;;  %v5306_v42 = vld [vmem:[%s8558_s10 + $0x158] sm:$0xff]  ;;  %v7269_v47 = vclamps-f32 %v12197_v52, 2.0  ;;  %v5672_v15 = vmul.f32 %v11636_v56, %v5304_v18 }
 0x77d   : > { %5199 = vst.msk [vmem:[%s8558_s10 + $0x80] sm:$0xff] %vm1077_vm1, %v7255_v43  ;;  %5200 = vst.msk [vmem:[%s8558_s10 + $0x88] sm:$0xff] %vm1077_vm1, %v7256_v1  ;;  %v7270_v55 = vclamps-f32 %v12201_v4, 2.0  ;;  %v5313_v8 = vld [vmem:[%s8558_s10 + $0x190] sm:$0xff]  ;;  %v14385_v29 = vld [vmem:[#allocation138_spill] sm:$0xff]  ;;  %v5674_v39 = vmul.f32 %v12100_v38, %v5306_v42 }
 0x77e   : > { %5201 = vst.msk [vmem:[%s8558_s10 + $0x90] sm:$0xff] %vm1077_vm1, %v7257_v23  ;;  %5202 = vst.msk [vmem:[%s8558_s10 + $0x98] sm:$0xff] %vm1077_vm1, %v7258_v61  ;;  %v5673_v13 = vmul.f32 %v14385_v29, %v5305_v32  ;;  %v12317_v52 = vld [vmem:[#allocation9 + $0x60] sm:$0xff]  ;;  %v12320_v4 = vld [vmem:[#allocation9 + $0x68] sm:$0xff]  ;;  %v5681_v35 = vmul.f32 %v12074_v14, %v5313_v8 }
 0x77f   : > { %5203 = vst.msk [vmem:[%s8558_s10 + $0xa0] sm:$0xff] %vm1077_vm1, %v7259_v9  ;;  %5204 = vst.msk [vmem:[%s8558_s10 + $0xa8] sm:$0xff] %vm1077_vm1, %v7260_v51  ;;  %v5743_v24 = vmul.f32 %v12317_v52, %v5679_v31  ;;  %v5744_v62 = vmul.f32 %v12320_v4, %v5680_v45  ;;  %v5320_v40 = vld [vmem:[%s8558_s10 + $0x1c8] sm:$0xff]  ;;  %v5735_v26 = vmul.f32 %v12317_v52, %v5671_v48  ;;  %v12329_v19 = vld [vmem:[#allocation9 + $0x70] sm:$0xff]  ;;  %v12357_v42 = vpop.permute.xlu1 %5617 }
 0x780   : > { %5205 = vst.msk [vmem:[%s8558_s10 + $0xb0] sm:$0xff] %vm1077_vm1, %v7261_v16  ;;  %5206 = vst.msk [vmem:[%s8558_s10 + $0xb8] sm:$0xff] %vm1077_vm1, %v7262_v46  ;;  %v5736_v0 = vmul.f32 %v12320_v4, %v5672_v15  ;;  %v5737_v5 = vmul.f32 %v12329_v19, %v5673_v13  ;;  %v5319_v41 = vld [vmem:[%s8558_s10 + $0x1c0] sm:$0xff]  ;;  %v12336_v60 = vld [vmem:[#allocation9 + $0x78] sm:$0xff]  ;;  %v5688_v20 = vmul.f32 %v12150_v21, %v5320_v40 }
 0x781   : > { %5207 = vst.msk [vmem:[%s8558_s10 + $0xc0] sm:$0xff] %vm1077_vm1, %v7263_v33  ;;  %5208 = vst.msk [vmem:[%s8558_s10 + $0xc8] sm:$0xff] %vm1077_vm1, %v7264_v25  ;;  %v5889_v17 = vsel %vm1077_vm1, %v5735_v26, 0.0  ;;  %v5738_v2 = vmul.f32 %v12336_v60, %v5674_v39  ;;  %v5915_v54 = vsel %vm1077_vm1, %v5743_v24, 0.0  ;;  %v5916_v43 = vsel %vm1077_vm1, %v5744_v62, 0.0  ;;  %v14388_v6 = vld [vmem:[#allocation79_spill] sm:$0xff] }
 0x782   : > { %14384 = vst [vmem:[#allocation58_spill] sm:$0xff] %v12299_v44  ;;  %5209 = vst.msk [vmem:[%s8558_s10 + $0xd0] sm:$0xff] %vm1077_vm1, %v7265_v49  ;;  %v5890_v36 = vsel %vm1077_vm1, %v5736_v0, 0.0  ;;  %v5892_v23 = vsel %vm1077_vm1, %v5737_v5, 0.0  ;;  %v5687_v61 = vmul.f32 %v12177_v53, %v5319_v41  ;;  %v5745_v25 = vmul.f32 %v12329_v19, %v5681_v35  ;;  %v14389_v32 = vld [vmem:[#allocation40_spill] sm:$0xff]  ;;  %v5295_v8 = vld [vmem:[%s8558_s10 + $0x100] sm:$0xff] }
 0x783   : > { %5210 = vst.msk [vmem:[%s8558_s10 + $0xd8] sm:$0xff] %vm1077_vm1, %v7266_v7  ;;  %5211 = vst.msk [vmem:[%s8558_s10 + $0xe0] sm:$0xff] %vm1077_vm1, %v7267_v34  ;;  %v5891_v1 = vadd.f32 %v5890_v36, %v5889_v17  ;;  %v14390_v7 = vld [vmem:[#allocation41_spill] sm:$0xff]  ;;  %v5894_v31 = vsel %vm1077_vm1, %v5738_v2, 0.0  ;;  %v5752_v45 = vmul.f32 %v12320_v4, %v5688_v20  ;;  %v14392_v62 = vld [vmem:[#allocation110_spill] sm:$0xff]  ;;  %v12373_v2 = vpop.permute.xlu0 %5473 }
 0x784   : > { %5212 = vst.msk [vmem:[%s8558_s10 + $0xe8] sm:$0xff] %vm1077_vm1, %v7268_v30  ;;  %5213 = vst.msk [vmem:[%s8558_s10 + $0xf0] sm:$0xff] %vm1077_vm1, %v7269_v47  ;;  %v5279_v11 = vld [vmem:[%s8558_s10 + $0x80] sm:$0xff]  ;;  %v5280_v57 = vld [vmem:[%s8558_s10 + $0x88] sm:$0xff]  ;;  %v5751_v13 = vmul.f32 %v12317_v52, %v5687_v61  ;;  %v5918_v35 = vsel %vm1077_vm1, %v5745_v25, 0.0 }
 0x785   : > { %5214 = vst.msk [vmem:[%s8558_s10 + $0xf8] sm:$0xff] %vm1077_vm1, %v7270_v55  ;;  %14386 = vst [vmem:[#allocation114_spill] sm:$0xff] %v12325_v37  ;;  %v5647_v16 = vmul.f32 %v14388_v6, %v5279_v11  ;;  %v5893_v18 = vadd.f32 %v5892_v23, %v5891_v1  ;;  %v5281_v30 = vld [vmem:[%s8558_s10 + $0x90] sm:$0xff]  ;;  %v5917_v55 = vadd.f32 %v5916_v43, %v5915_v54  ;;  %v5315_v36 = vld [vmem:[%s8558_s10 + $0x1a0] sm:$0xff]  ;;  %v5942_v1 = vsel %vm1077_vm1, %v5752_v45, 0.0 }
 0x786   : > { %14387 = vst [vmem:[#allocation54_spill] sm:$0xff] %v12343_v10  ;;  %14391 = vst [vmem:[#allocation65_spill] sm:$0xff] %v12357_v42  ;;  %v5648_v39 = vmul.f32 %v14392_v62, %v5280_v57  ;;  %v14393_v26 = vld [vmem:[#allocation39_spill] sm:$0xff]  ;;  %v14395_v20 = vld [vmem:[#allocation85_spill] sm:$0xff] }
 0x787   : > { %v5895_v15 = vadd.f32 %v5894_v31, %v5893_v18  ;;  %v5649_v0 = vmul.f32 %v14393_v26, %v5281_v30  ;;  %v5711_v5 = vmul.f32 %v12317_v52, %v5647_v16  ;;  %14394 = vst [vmem:[#allocation83_spill] sm:$0xff] %v12373_v2  ;;  %v12376_v11 = vmul.f32 %v14395_v20, %v5295_v8  ;;  %v5282_v61 = vld [vmem:[%s8558_s10 + $0x98] sm:$0xff]  ;;  %v14406_v6 = vld [vmem:[#allocation151_spill] sm:$0xff]  ;;  %v12668_v28 = vld [vmem:[%s8558_s10 + $0x68] sm:$0xff] }
 0x788   : > { %v5287_v9 = vld [vmem:[%s8558_s10 + $0xc0] sm:$0xff]  ;;  %v5288_v51 = vld [vmem:[%s8558_s10 + $0xc8] sm:$0xff]  ;;  %v12379_v43 = vadd.f32 %v5918_v35, %v5917_v55  ;;  %v5941_v16 = vsel %vm1077_vm1, %v5751_v13, 0.0  ;;  %v5650_v8 = vmul.f32 %v12244_v27, %v5282_v61  ;;  %v14432_v21 = vld [vmem:[#allocation140_spill] sm:$0xff]  ;;  %14453 = vst [vmem:[#allocation135_spill] sm:$0xff] %v12668_v28 }
 0x789   : > { %v5655_v49 = vmul.f32 %v14389_v32, %v5287_v9  ;;  %v5656_v34 = vmul.f32 %v14390_v7, %v5288_v51  ;;  %v5289_v24 = vld [vmem:[%s8558_s10 + $0xd0] sm:$0xff]  ;;  %v5896_v41 = vrot.slane %v5895_v15, 4  ;;  %v5316_v9 = vld [vmem:[%s8558_s10 + $0x1a8] sm:$0xff]  ;;  %v5713_v18 = vmul.f32 %v12329_v19, %v5649_v0  ;;  %v5283_v7 = vld [vmem:[%s8558_s10 + $0xa0] sm:$0xff] }
 0x78a   : > { %v5291_v33 = vld [vmem:[%s8558_s10 + $0xe0] sm:$0xff]  ;;  %v5657_v23 = vmul.f32 %v12217_v59, %v5289_v24  ;;  %v5308_v55 = vld [vmem:[%s8558_s10 + $0x168] sm:$0xff]  ;;  %v12401_v24 = vadd.f32 %v5942_v1, %v5941_v16  ;;  %v5317_v0 = vld [vmem:[%s8558_s10 + $0x1b0] sm:$0xff] }
 0x78b   : > { %v5292_v46 = vld [vmem:[%s8558_s10 + $0xe8] sm:$0xff]  ;;  %v5659_v48 = vmul.f32 %v12054_v22, %v5291_v33  ;;  %v5719_v40 = vmul.f32 %v12317_v52, %v5655_v49  ;;  %v5720_v17 = vmul.f32 %v12320_v4, %v5656_v34  ;;  %v5897_v57 = vadd.f32 %v5896_v41, %v5895_v15  ;;  %v12388_v33 = vpop.permute.xlu1 %5439  ;;  %v5310_v16 = vld [vmem:[%s8558_s10 + $0x178] sm:$0xff]  ;;  %v14405_v27 = vld [vmem:[#allocation37_spill] sm:$0xff] }
 0x78c   : > { %v5660_v47 = vmul.f32 %v12044_v3, %v5292_v46  ;;  %v5712_v46 = vmul.f32 %v12320_v4, %v5648_v39  ;;  %14396 = vst [vmem:[#allocation70_spill] sm:$0xff] %v12388_v33  ;;  %v5811_v49 = vsel %vm1077_vm1, %v5711_v5, 0.0  ;;  %v14397_v34 = vld [vmem:[#allocation150_spill] sm:$0xff]  ;;  %v5721_v39 = vmul.f32 %v12329_v19, %v5657_v23  ;;  %v5309_v5 = vld [vmem:[%s8558_s10 + $0x170] sm:$0xff]  ;;  %v12409_v3 = vpop.permute.xlu0 %5606 }
 0x78d   : > { %v5723_v51 = vmul.f32 %v12317_v52, %v5659_v48  ;;  %v5837_v25 = vsel %vm1077_vm1, %v5719_v40, 0.0  ;;  %v5683_v30 = vmul.f32 %v14397_v34, %v5315_v36  ;;  %v5838_v31 = vsel %vm1077_vm1, %v5720_v17, 0.0  ;;  %v14398_v48 = vld [vmem:[#allocation144_spill] sm:$0xff]  ;;  %v14399_v17 = vld [vmem:[#allocation129_spill] sm:$0xff]  ;;  %14401 = vst [vmem:[#allocation77_spill] sm:$0xff] %v12409_v3  ;;  %v5324_v22 = vld [vmem:[%s8558_s10 + $0x1e8] sm:$0xff] }
 0x78e   : > { %v5724_v54 = vmul.f32 %v12320_v4, %v5660_v47  ;;  %v5307_v47 = vld [vmem:[%s8558_s10 + $0x160] sm:$0xff]  ;;  %v5812_v45 = vsel %vm1077_vm1, %v5712_v46, 0.0  ;;  %v5684_v15 = vmul.f32 %v14398_v48, %v5316_v9  ;;  %v5898_v41 = vrot.slane %v5897_v57, 2  ;;  %v14400_v46 = vld [vmem:[#allocation130_spill] sm:$0xff]  ;;  %v14447_v48 = vld [vmem:[#allocation52_spill] sm:$0xff] }
 0x78f   : > { %v5813_v40 = vadd.f32 %v5812_v45, %v5811_v49  ;;  %v5850_v35 = vsel %vm1077_vm1, %v5723_v51, 0.0  ;;  %v5675_v36 = vmul.f32 %v14399_v17, %v5307_v47  ;;  %v5676_v61 = vmul.f32 %v14400_v46, %v5308_v55  ;;  %v14402_v45 = vld [vmem:[#allocation61_spill] sm:$0xff]  ;;  %v14461_v17 = vld [vmem:[#allocation38_spill] sm:$0xff] }
 0x790   : > { %v5851_v13 = vsel %vm1077_vm1, %v5724_v54, 0.0  ;;  %v5839_v9 = vadd.f32 %v5838_v31, %v5837_v25  ;;  %v5814_v54 = vsel %vm1077_vm1, %v5713_v18, 0.0  ;;  %v5747_v1 = vmul.f32 %v12317_v52, %v5683_v30  ;;  %v12420_v25 = vpop.permute.xlu1 %5572  ;;  %v12443_v32 = vpop.permute.xlu0 %5591 }
 0x791   : > { %v5748_v23 = vmul.f32 %v12320_v4, %v5684_v15  ;;  %v5714_v49 = vmul.f32 %v12336_v60, %v5650_v8  ;;  %v5685_v51 = vmul.f32 %v12299_v44, %v5317_v0  ;;  %v5677_v47 = vmul.f32 %v14402_v45, %v5309_v5  ;;  %14403 = vst [vmem:[#allocation72_spill] sm:$0xff] %v12420_v25  ;;  %v12643_v44 = vld [vmem:[%s8558_s10 + $0x40] sm:$0xff] }
 0x792   : > { %v5739_v55 = vmul.f32 %v12317_v52, %v5675_v36  ;;  %v12422_v18 = vadd.f32 %v5851_v13, %v5850_v35  ;;  %v5840_v30 = vsel %vm1077_vm1, %v5721_v39, 0.0  ;;  %v5815_v31 = vadd.f32 %v5814_v54, %v5813_v40  ;;  %v5323_v36 = vld [vmem:[%s8558_s10 + $0x1e0] sm:$0xff]  ;;  %14404 = vst [vmem:[#allocation113_spill] sm:$0xff] %v12443_v32  ;;  %14444 = vst [vmem:[#allocation82_spill] sm:$0xff] %v12643_v44 }
 0x793   : > { %v5740_v15 = vmul.f32 %v12320_v4, %v5676_v61  ;;  %v12426_v59 = vadd.f32 %v5898_v41, %v5897_v57  ;;  %v5741_v8 = vmul.f32 %v12329_v19, %v5677_v47  ;;  %v5678_v5 = vmul.f32 %v12325_v37, %v5310_v16  ;;  %v5284_v61 = vld [vmem:[%s8558_s10 + $0xa8] sm:$0xff]  ;;  %v5285_v16 = vld [vmem:[%s8558_s10 + $0xb0] sm:$0xff]  ;;  %v14457_v37 = vld [vmem:[#allocation141_spill] sm:$0xff] }
 0x794   : > { %v5902_v0 = vsel %vm1077_vm1, %v5739_v55, 0.0  ;;  %v5928_v13 = vsel %vm1077_vm1, %v5747_v1, 0.0  ;;  %v5929_v35 = vsel %vm1077_vm1, %v5748_v23, 0.0  ;;  %v5692_v40 = vmul.f32 %v12343_v10, %v5324_v22  ;;  %v5293_v55 = vld [vmem:[%s8558_s10 + $0xf0] sm:$0xff] }
 0x795   : > { %v5903_v39 = vsel %vm1077_vm1, %v5740_v15, 0.0  ;;  %v5816_v57 = vsel %vm1077_vm1, %v5714_v49, 0.0  ;;  %v5749_v41 = vmul.f32 %v12329_v19, %v5685_v51  ;;  %v5742_v47 = vmul.f32 %v12336_v60, %v5678_v5 }
 0x796   : > { %v5904_v54 = vadd.f32 %v5903_v39, %v5902_v0  ;;  %v5817_v1 = vadd.f32 %v5816_v57, %v5815_v31  ;;  %v5905_v23 = vsel %vm1077_vm1, %v5741_v8, 0.0  ;;  %v5691_v15 = vmul.f32 %v12357_v42, %v5323_v36  ;;  %v12449_v0 = vpop.permute.xlu1 %5458  ;;  %v14408_v31 = vld [vmem:[#allocation42_spill] sm:$0xff]  ;;  %v5286_v42 = vld [vmem:[%s8558_s10 + $0xb8] sm:$0xff] }
 0x797   : > { %v5651_v22 = vmul.f32 %v14405_v27, %v5283_v7  ;;  %v5841_v26 = vadd.f32 %v5840_v30, %v5839_v9  ;;  %v5930_v62 = vadd.f32 %v5929_v35, %v5928_v13  ;;  %v5652_v51 = vmul.f32 %v14406_v6, %v5284_v61  ;;  %14407 = vst [vmem:[#allocation126_spill] sm:$0xff] %v12449_v0  ;;  %v5294_v8 = vld [vmem:[%s8558_s10 + $0xf8] sm:$0xff] }
 0x798   : > { %v5906_v49 = vadd.f32 %v5905_v23, %v5904_v54  ;;  %v5907_v5 = vsel %vm1077_vm1, %v5742_v47, 0.0  ;;  %v5756_v39 = vmul.f32 %v12320_v4, %v5692_v40  ;;  %v5661_v10 = vmul.f32 %v12373_v2, %v5293_v55  ;;  %v12490_v2 = vld [vmem:[%s8558_s10 + $0x1f0] sm:$0xff] }
 0x799   : > { %v5653_v57 = vmul.f32 %v14408_v31, %v5285_v16  ;;  %v5715_v7 = vmul.f32 %v12317_v52, %v5651_v22  ;;  %v5716_v9 = vmul.f32 %v12320_v4, %v5652_v51  ;;  %v5818_v30 = vrot.slane %v5817_v1, 4  ;;  %v12464_v16 = vpop.permute.xlu0 %5477  ;;  %v12470_v51 = vld [vmem:[%s8558_s10 + $0x198] sm:$0xff]  ;;  %14413 = vst [vmem:[#allocation62_spill] sm:$0xff] %v12490_v2  ;;  %v12494_v31 = vld [vmem:[%s8558_s10 + $0x1d0] sm:$0xff] }
 0x79a   : > { %v5908_v36 = vadd.f32 %v5907_v5, %v5906_v49  ;;  %v5931_v13 = vsel %vm1077_vm1, %v5749_v41, 0.0  ;;  %v5755_v35 = vmul.f32 %v12317_v52, %v5691_v15  ;;  %14409 = vst [vmem:[#allocation76_spill] sm:$0xff] %v12464_v16  ;;  %v5955_v23 = vsel %vm1077_vm1, %v5756_v39, 0.0  ;;  %14410 = vst [vmem:[#allocation67_spill] sm:$0xff] %v12470_v51  ;;  %v12473_v15 = vld [vmem:[%s8558_s10 + $0x1b8] sm:$0xff] }
 0x79b   : > { %v5717_v40 = vmul.f32 %v12329_v19, %v5653_v57  ;;  %v5932_v61 = vadd.f32 %v5931_v13, %v5930_v62  ;;  %v5824_v47 = vsel %vm1077_vm1, %v5715_v7, 0.0  ;;  %v5825_v55 = vsel %vm1077_vm1, %v5716_v9, 0.0  ;;  %14411 = vst [vmem:[#allocation124_spill] sm:$0xff] %v12473_v15  ;;  %v12481_v7 = vpop.permute.xlu1 %5625  ;;  %14414 = vst [vmem:[#allocation119_spill] sm:$0xff] %v12494_v31 }
 0x79c   : > { %v5909_v54 = vrot.slane %v5908_v36, 4  ;;  %v5725_v22 = vmul.f32 %v12329_v19, %v5661_v10  ;;  %v5826_v49 = vadd.f32 %v5825_v55, %v5824_v47  ;;  %v5654_v41 = vmul.f32 %v12388_v33, %v5286_v42  ;;  %v5290_v10 = vld [vmem:[%s8558_s10 + $0xd8] sm:$0xff]  ;;  %14412 = vst [vmem:[#allocation75_spill] sm:$0xff] %v12481_v7 }
 0x79d   : > { %v5827_v5 = vsel %vm1077_vm1, %v5717_v40, 0.0  ;;  %v5682_v57 = vmul.f32 %v12420_v25, %v12470_v51  ;;  %v5686_v39 = vmul.f32 %v12443_v32, %v12473_v15  ;;  %v5954_v42 = vsel %vm1077_vm1, %v5755_v35, 0.0  ;;  %v12567_v15 = vld [vmem:[%s8558_s10 + $0x128] sm:$0xff] }
 0x79e   : > { %v5910_v62 = vadd.f32 %v5909_v54, %v5908_v36  ;;  %v5828_v9 = vadd.f32 %v5827_v5, %v5826_v49  ;;  %v5718_v13 = vmul.f32 %v12336_v60, %v5654_v41  ;;  %v5658_v47 = vmul.f32 %v12449_v0, %v5290_v10  ;;  %14424 = vst [vmem:[#allocation97_spill] sm:$0xff] %v12567_v15 }
 0x79f   : > { %v5819_v36 = vadd.f32 %v5818_v30, %v5817_v1  ;;  %v5746_v40 = vmul.f32 %v12336_v60, %v5682_v57  ;;  %v5750_v55 = vmul.f32 %v12336_v60, %v5686_v39  ;;  %v5662_v49 = vmul.f32 %v12464_v16, %v5294_v8  ;;  %v12503_v39 = vpop.permute.xlu0 %5629 }
 0x7a0   : > { %v5911_v54 = vrot.slane %v5910_v62, 2  ;;  %v5829_v33 = vsel %vm1077_vm1, %v5718_v13, 0.0  ;;  %v5722_v35 = vmul.f32 %v12336_v60, %v5658_v47  ;;  %v5693_v1 = vmul.f32 %v12481_v7, %v12490_v2  ;;  %14415 = vst [vmem:[#allocation125_spill] sm:$0xff] %v12503_v39  ;;  %v14431_v7 = vld [vmem:[#allocation127_spill] sm:$0xff] }
 0x7a1   : > { %v5956_v30 = vadd.f32 %v5955_v23, %v5954_v42  ;;  %v5830_v41 = vadd.f32 %v5829_v33, %v5828_v9  ;;  %v5689_v5 = vmul.f32 %v12409_v3, %v12494_v31  ;;  %v5920_v57 = vsel %vm1077_vm1, %v5746_v40, 0.0  ;;  %v12511_v42 = vld [vmem:[%s8558_s10 + $0x1f8] sm:$0xff] }
 0x7a2   : > { %v5853_v10 = vsel %vm1077_vm1, %v5725_v22, 0.0  ;;  %v5921_v13 = vadd.f32 %v5920_v57, %v12379_v43  ;;  %v5933_v47 = vsel %vm1077_vm1, %v5750_v55, 0.0  ;;  %v5842_v8 = vsel %vm1077_vm1, %v5722_v35, 0.0  ;;  %14416 = vst [vmem:[#allocation88_spill] sm:$0xff] %v12511_v42 }
 0x7a3   : > { %v5912_v16 = vadd.f32 %v5911_v54, %v5910_v62  ;;  %v5854_v0 = vadd.f32 %v5853_v10, %v12422_v18  ;;  %v5934_v23 = vadd.f32 %v5933_v47, %v5932_v61  ;;  %v5843_v33 = vadd.f32 %v5842_v8, %v5841_v26  ;;  %v12518_v54 = vpop.permute.xlu1 %5610  ;;  %v12524_v8 = vld [vmem:[%s8558_s10 + $0x1d8] sm:$0xff] }
 0x7a4   : > { %v5922_v9 = vrot.slane %v5921_v13, 4  ;;  %v5726_v40 = vmul.f32 %v12336_v60, %v5662_v49  ;;  %v5757_v6 = vmul.f32 %v12329_v19, %v5693_v1  ;;  %v5694_v43 = vmul.f32 %v12503_v39, %v12511_v42  ;;  %14417 = vst [vmem:[#allocation121_spill] sm:$0xff] %v12518_v54  ;;  %14418 = vst [vmem:[#allocation120_spill] sm:$0xff] %v12524_v8 }
 0x7a5   : > { %v5831_v22 = vrot.slane %v5830_v41, 4  ;;  %v5753_v55 = vmul.f32 %v12329_v19, %v5689_v5  ;;  %v5935_v35 = vrot.slane %v5934_v23, 4  ;;  %v5844_v62 = vrot.slane %v5843_v33, 4 }
 0x7a6   : > { %v5923_v18 = vadd.f32 %v5922_v9, %v5921_v13  ;;  %v5855_v26 = vsel %vm1077_vm1, %v5726_v40, 0.0  ;;  %v5957_v61 = vsel %vm1077_vm1, %v5757_v6, 0.0  ;;  %v5758_v49 = vmul.f32 %v12336_v60, %v5694_v43 }
 0x7a7   : > { %v5820_v57 = vrot.slane %v5819_v36, 2  ;;  %v5913_v10 = vrot.slane %v5912_v16, 1  ;;  %v5936_v1 = vadd.f32 %v5935_v35, %v5934_v23  ;;  %v5856_v47 = vadd.f32 %v5855_v26, %v5854_v0  ;;  %v7591_v23 = vpop.f32.mrf.mxu0  ;;  %v12537_v0 = vld [vmem:[%s13897_s12] ss:$0 sm:$0xff] }
 0x7a8   : > { %v5924_v5 = vrot.slane %v5923_v18, 2  ;;  %v5958_v27 = vadd.f32 %v5957_v61, %v5956_v30  ;;  %v5959_v42 = vsel %vm1077_vm1, %v5758_v49, 0.0  ;;  %v5690_v13 = vmul.f32 %v12518_v54, %v12524_v8 }
 0x7a9   : > { %v12529_v9 = vadd.f32 %v5831_v22, %v5830_v41  ;;  %v5944_v6 = vsel %vm1077_vm1, %v5753_v55, 0.0  ;;  %v5937_v40 = vrot.slane %v5936_v1, 2  ;;  %v12532_v43 = vadd.f32 %v5844_v62, %v5843_v33  ;;  %v12541_v41 = vld [vmem:[%s8558_s10 + $0x108] sm:$0xff]  ;;  %v12544_v22 = vld [vmem:[%s8558_s10 + $0x110] sm:$0xff] }
 0x7aa   : > { %v5857_v30 = vrot.slane %v5856_v47, 4  ;;  %v5960_v35 = vadd.f32 %v5959_v42, %v5958_v27  ;;  %v5754_v26 = vmul.f32 %v12336_v60, %v5690_v13  ;;  %14419 = vst [vmem:[#allocation56_spill] sm:$0xff] %v12541_v41  ;;  %14420 = vst [vmem:[#allocation101_spill] sm:$0xff] %v12544_v22  ;;  %v12547_v33 = vadd.f32 %v7591_v23, %v12537_v0  ;;  %v12557_v42 = vld [vmem:[%s8558_s10 + $0x118] sm:$0xff]  ;;  %v12564_v23 = vld [vmem:[%s8558_s10 + $0x120] sm:$0xff] }
 0x7ab   : > { %v14421_v55 = vrot.slane %v12426_v59, 1  ;;  %v12554_v61 = vadd.f32 %v5820_v57, %v5819_v36  ;;  %v5925_v49 = vadd.f32 %v5924_v5, %v5923_v18  ;;  %v5938_v27 = vadd.f32 %v5937_v40, %v5936_v1  ;;  %14422 = vst [vmem:[#allocation81_spill] sm:$0xff] %v12557_v42  ;;  %14423 = vst [vmem:[#allocation84_spill] sm:$0xff] %v12564_v23  ;;  %v12572_v57 = vld [vmem:[%s8558_s10 + $0x130] sm:$0xff]  ;;  %v12575_v18 = vld [vmem:[%s8558_s10 + $0x138] sm:$0xff] }
 0x7ac   : > { %v12559_v13 = vadd.f32 %v5913_v10, %v5912_v16  ;;  %v5945_v2 = vadd.f32 %v5944_v6, %v12401_v24  ;;  %v5961_v8 = vrot.slane %v5960_v35, 4  ;;  %v5946_v31 = vsel %vm1077_vm1, %v5754_v26, 0.0  ;;  %14425 = vst [vmem:[#allocation96_spill] sm:$0xff] %v12572_v57  ;;  %14426 = vst [vmem:[#allocation103_spill] sm:$0xff] %v12575_v18  ;;  %v14427_v16 = vld [vmem:[#allocation87_spill] sm:$0xff]  ;;  %v14428_v24 = vld [vmem:[#allocation133_spill] sm:$0xff] }
 0x7ad   : > { %v12552_v62 = vadd.f32 %v14421_v55, %v12426_v59  ;;  %v5664_v10 = vmul.f32 %v14427_v16, %v12541_v41  ;;  %v5665_v1 = vmul.f32 %v14428_v24, %v12544_v22  ;;  %v12581_v5 = vadd.f32 %v5857_v30, %v5856_v47  ;;  %v14429_v26 = vld [vmem:[#allocation139_spill] sm:$0xff]  ;;  %v14430_v36 = vld [vmem:[#allocation128_spill] sm:$0xff] }
 0x7ae   : > { %v5962_v6 = vadd.f32 %v5961_v8, %v5960_v35  ;;  %v5947_v40 = vadd.f32 %v5946_v31, %v5945_v2  ;;  %v5666_v55 = vmul.f32 %v14429_v26, %v12557_v42  ;;  %v5926_v59 = vrot.slane %v5925_v49, 1  ;;  %v14433_v47 = vld [vmem:[#allocation143_spill] sm:$0xff] }
 0x7af   : > { %v5939_v51 = vrot.slane %v5938_v27, 1  ;;  %v5667_v39 = vmul.f32 %v14430_v36, %v12564_v23  ;;  %v5668_v54 = vmul.f32 %v14431_v7, %v12567_v15  ;;  %v5669_v22 = vmul.f32 %v14432_v21, %v12572_v57 }
 0x7b0   : > { %v5963_v3 = vrot.slane %v5962_v6, 2  ;;  %v5948_v41 = vrot.slane %v5947_v40, 4  ;;  %v5670_v8 = vmul.f32 %v14433_v47, %v12575_v18  ;;  %v5727_v2 = vmul.f32 %v12317_v52, %v12376_v11 }
 0x7b1   : > { %v5728_v31 = vmul.f32 %v12320_v4, %v5664_v10  ;;  %v5729_v30 = vmul.f32 %v12329_v19, %v5665_v1  ;;  %v5730_v35 = vmul.f32 %v12336_v60, %v5666_v55  ;;  %v5731_v42 = vmul.f32 %v12317_v52, %v5667_v39 }
 0x7b2   : > { %v5964_v15 = vadd.f32 %v5963_v3, %v5962_v6  ;;  %v5949_v23 = vadd.f32 %v5948_v41, %v5947_v40  ;;  %v5732_v57 = vmul.f32 %v12320_v4, %v5668_v54  ;;  %v5733_v18 = vmul.f32 %v12329_v19, %v5669_v22  ;;  %v12609_v41 = vld [vmem:[%s8558_s10] sm:$0xff]  ;;  %v12612_v54 = vld [vmem:[%s8558_s10 + $0x8] sm:$0xff] }
 0x7b3   : > { %v5734_v53 = vmul.f32 %v12336_v60, %v5670_v8  ;;  %v5863_v11 = vsel %vm1077_vm1, %v5727_v2, 0.0  ;;  %v5864_v10 = vsel %vm1077_vm1, %v5728_v31, 0.0  ;;  %v12604_v32 = vadd.f32 %v5926_v59, %v5925_v49  ;;  %14434 = vst [vmem:[#allocation92_spill] sm:$0xff] %v12609_v41  ;;  %14435 = vst [vmem:[#allocation91_spill] sm:$0xff] %v12612_v54  ;;  %v12619_v59 = vld [vmem:[%s8558_s10 + $0x10] sm:$0xff]  ;;  %v12622_v2 = vld [vmem:[%s8558_s10 + $0x18] sm:$0xff] }
 0x7b4   : > { %v12606_v1 = vadd.f32 %v5939_v51, %v5938_v27  ;;  %v5950_v3 = vrot.slane %v5949_v23, 2  ;;  %v5865_v39 = vadd.f32 %v5864_v10, %v5863_v11  ;;  %v5866_v22 = vsel %vm1077_vm1, %v5729_v30, 0.0  ;;  %14436 = vst [vmem:[#allocation99_spill] sm:$0xff] %v12619_v59  ;;  %14437 = vst [vmem:[#allocation80_spill] sm:$0xff] %v12622_v2  ;;  %v12625_v31 = vld [vmem:[%s8558_s10 + $0x20] sm:$0xff]  ;;  %v12628_v30 = vld [vmem:[%s8558_s10 + $0x28] sm:$0xff] }
 0x7b5   : > { %v5868_v6 = vsel %vm1077_vm1, %v5730_v35, 0.0  ;;  %v5876_v40 = vsel %vm1077_vm1, %v5731_v42, 0.0  ;;  %v5877_v49 = vsel %vm1077_vm1, %v5732_v57, 0.0  ;;  %v5965_v8 = vrot.slane %v5964_v15, 1  ;;  %14438 = vst [vmem:[#allocation71_spill] sm:$0xff] %v12625_v31  ;;  %14439 = vst [vmem:[#allocation94_spill] sm:$0xff] %v12628_v30 }
 0x7b6   : > { %v5951_v51 = vadd.f32 %v5950_v3, %v5949_v23  ;;  %v5867_v27 = vadd.f32 %v5866_v22, %v5865_v39  ;;  %v5878_v55 = vadd.f32 %v5877_v49, %v5876_v40  ;;  %v5879_v42 = vsel %vm1077_vm1, %v5733_v18, 0.0  ;;  %v12633_v35 = vld [vmem:[%s8558_s10 + $0x30] sm:$0xff]  ;;  %v12636_v23 = vld [vmem:[%s8558_s10 + $0x38] sm:$0xff]  ;;  %v14443_v3 = vld [vmem:[#allocation105_spill] sm:$0xff] }
 0x7b7   : > { %v5881_v57 = vsel %vm1077_vm1, %v5734_v53, 0.0  ;;  %14440 = vst [vmem:[#allocation93_spill] sm:$0xff] %v12633_v35  ;;  %14441 = vst [vmem:[#allocation111_spill] sm:$0xff] %v12636_v23  ;;  %v14442_v11 = vld [vmem:[#allocation148_spill] sm:$0xff]  ;;  %v5632_v39 = vmul.f32 %v14443_v3, %v12612_v54  ;;  %v12646_v18 = vld [vmem:[%s8558_s10 + $0x48] sm:$0xff]  ;;  %v5633_v34 = vmul.f32 %v14447_v48, %v12619_v59  ;;  %v12653_v25 = vadd.f32 %v5965_v8, %v5964_v15 }
 0x7b8   : > { %v5631_v10 = vmul.f32 %v14442_v11, %v12609_v41  ;;  %v5952_v22 = vrot.slane %v5951_v51, 1  ;;  %v5869_v40 = vadd.f32 %v5868_v6, %v5867_v27  ;;  %v5880_v49 = vadd.f32 %v5879_v42, %v5878_v55  ;;  %14445 = vst [vmem:[#allocation73_spill] sm:$0xff] %v12646_v18  ;;  %v12649_v53 = vld [vmem:[%s8558_s10 + $0x50] sm:$0xff]  ;;  %v12656_v41 = vld [vmem:[%s8558_s10 + $0x58] sm:$0xff]  ;;  %v12659_v54 = vld [vmem:[%s8558_s10 + $0x60] sm:$0xff] }
 0x7b9   : > { %14446 = vst [vmem:[#allocation131_spill] sm:$0xff] %v12649_v53  ;;  %14448 = vst [vmem:[#allocation116_spill] sm:$0xff] %v12656_v41  ;;  %v14450_v3 = vld [vmem:[#allocation146_spill] sm:$0xff]  ;;  %v14451_v27 = vld [vmem:[#allocation64_spill] sm:$0xff]  ;;  %v5642_v38 = vmul.f32 %v14461_v17, %v12656_v41  ;;  %v5697_v41 = vmul.f32 %v12329_v19, %v5633_v34 }
 0x7ba   : > { %14449 = vst [vmem:[#allocation112_spill] sm:$0xff] %v12659_v54  ;;  %v5634_v6 = vmul.f32 %v14450_v3, %v12622_v2  ;;  %v5635_v55 = vmul.f32 %v14451_v27, %v12625_v31  ;;  %v14452_v42 = vld [vmem:[#allocation147_spill] sm:$0xff]  ;;  %v5870_v14 = vrot.slane %v5869_v40, 4  ;;  %v5882_v63 = vadd.f32 %v5881_v57, %v5880_v49  ;;  %v12674_v15 = vld [vmem:[%s8558_s10 + $0x78] sm:$0xff]  ;;  %v14458_v31 = vld [vmem:[#allocation50_spill] sm:$0xff] }
 0x7bb   : > { %v5636_v11 = vmul.f32 %v14452_v42, %v12628_v30  ;;  %v12671_v59 = vld [vmem:[%s8558_s10 + $0x70] sm:$0xff]  ;;  %14455 = vst [vmem:[#allocation137_spill] sm:$0xff] %v12674_v15  ;;  %v5638_v2 = vmul.f32 %v14457_v37, %v12636_v23  ;;  %v12680_v3 = vadd.f32 %v5952_v22, %v5951_v51  ;;  %v5639_v27 = vmul.f32 %v14458_v31, %v12643_v44  ;;  %v14460_v49 = vld [vmem:[#allocation98_spill] sm:$0xff]  ;;  %v14463_v51 = vld [vmem:[#allocation69_spill] sm:$0xff] }
 0x7bc   : > { %14454 = vst [vmem:[#allocation117_spill] sm:$0xff] %v12671_v59  ;;  %v14456_v8 = vld [vmem:[#allocation95_spill] sm:$0xff]  ;;  %v5641_v42 = vmul.f32 %v14460_v49, %v12649_v53  ;;  %v5871_v45 = vadd.f32 %v5870_v14, %v5869_v40  ;;  %v5883_v46 = vrot.slane %v5882_v63, 4  ;;  %v5644_v22 = vmul.f32 %v14463_v51, %v12668_v28  ;;  %v14464_v23 = vld [vmem:[#allocation100_spill] sm:$0xff] }
 0x7bd   : > { %v5637_v48 = vmul.f32 %v14456_v8, %v12633_v35  ;;  %v14459_v30 = vld [vmem:[#allocation51_spill] sm:$0xff]  ;;  %v14462_v35 = vld [vmem:[#allocation49_spill] sm:$0xff]  ;;  %v5645_v44 = vmul.f32 %v14464_v23, %v12671_v59  ;;  %v5696_v40 = vmul.f32 %v12320_v4, %v5632_v39  ;;  %v5698_v17 = vmul.f32 %v12336_v60, %v5634_v6 }
 0x7be   : > { %v5640_v57 = vmul.f32 %v14459_v30, %v12646_v18  ;;  %v5643_v8 = vmul.f32 %v14462_v35, %v12659_v54  ;;  %v14465_v31 = vld [vmem:[#allocation43_spill] sm:$0xff]  ;;  %v5695_v30 = vmul.f32 %v12317_v52, %v5631_v10  ;;  %v5872_v53 = vrot.slane %v5871_v45, 2 }
 0x7bf   : > { %v5646_v18 = vmul.f32 %v14465_v31, %v12674_v15  ;;  %v5884_v14 = vadd.f32 %v5883_v46, %v5882_v63  ;;  %v5699_v54 = vmul.f32 %v12317_v52, %v5635_v55  ;;  %v5700_v28 = vmul.f32 %v12320_v4, %v5636_v11 }
 0x7c0   : > { %v5701_v51 = vmul.f32 %v12329_v19, %v5637_v48  ;;  %v5873_v59 = vadd.f32 %v5872_v53, %v5871_v45  ;;  %v5702_v15 = vmul.f32 %v12336_v60, %v5638_v2  ;;  %v5703_v10 = vmul.f32 %v12317_v52, %v5639_v27 }
 0x7c1   : > { %v5885_v23 = vrot.slane %v5884_v14, 2  ;;  %v5704_v63 = vmul.f32 %v12320_v4, %v5640_v57  ;;  %v5705_v46 = vmul.f32 %v12329_v19, %v5641_v42  ;;  %v5706_v34 = vmul.f32 %v12336_v60, %v5642_v38 }
 0x7c2   : > { %v5707_v39 = vmul.f32 %v12317_v52, %v5643_v8  ;;  %v5874_v6 = vrot.slane %v5873_v59, 1  ;;  %v5708_v11 = vmul.f32 %v12320_v4, %v5644_v22  ;;  %v5759_v48 = vsel %vm1077_vm1, %v5695_v30, 0.0 }
 0x7c3   : > { %v5886_v55 = vadd.f32 %v5885_v23, %v5884_v14  ;;  %v5709_v45 = vmul.f32 %v12329_v19, %v5645_v44  ;;  %v5710_v2 = vmul.f32 %v12336_v60, %v5646_v18  ;;  %v5760_v53 = vsel %vm1077_vm1, %v5696_v40, 0.0 }
 0x7c4   : > { %v5772_v27 = vsel %vm1077_vm1, %v5699_v54, 0.0  ;;  %v5761_v42 = vadd.f32 %v5760_v53, %v5759_v48  ;;  %v5762_v38 = vsel %vm1077_vm1, %v5697_v41, 0.0  ;;  %v5773_v52 = vsel %vm1077_vm1, %v5700_v28, 0.0 }
 0x7c5   : > { %v5887_v57 = vrot.slane %v5886_v55, 1  ;;  %v5875_v8 = vadd.f32 %v5874_v6, %v5873_v59  ;;  %v5764_v23 = vsel %vm1077_vm1, %v5698_v17, 0.0  ;;  %v5774_v4 = vadd.f32 %v5773_v52, %v5772_v27  ;;  %v14466_v52 = vld [vmem:[#allocation90_spill] sm:$0xff] }
 0x7c6   : > { %v5785_v30 = vsel %vm1077_vm1, %v5703_v10, 0.0  ;;  %v5763_v44 = vadd.f32 %v5762_v38, %v5761_v42  ;;  %v5775_v19 = vsel %vm1077_vm1, %v5701_v51, 0.0  ;;  %v5786_v60 = vsel %vm1077_vm1, %v5704_v63, 0.0  ;;  %v1598_v63 = vpop.xlane.xlu0 %1597 }
 0x7c7   : > { %v5888_v22 = vadd.f32 %v5887_v57, %v5886_v55  ;;  %v5776_v18 = vadd.f32 %v5775_v19, %v5774_v4  ;;  %v5777_v54 = vsel %vm1077_vm1, %v5702_v15, 0.0  ;;  %v5787_v14 = vadd.f32 %v5786_v60, %v5785_v30  ;;  %v1595_v4 = vpop.xlane.xlu1 %1594  ;;  %v7580_v30 = vpop.f32.mrf.mxu1 }
 0x7c8   : > { %v5798_v41 = vsel %vm1077_vm1, %v5707_v39, 0.0  ;;  %v5765_v59 = vadd.f32 %v5764_v23, %v5763_v44  ;;  %v5788_v17 = vsel %vm1077_vm1, %v5705_v46, 0.0  ;;  %v5799_v40 = vsel %vm1077_vm1, %v5708_v11, 0.0 }
 0x7c9   : > { %v5990_v28 = vsel %vm1302_vm2, %v5888_v22, %v5875_v8  ;;  %v5778_v6 = vadd.f32 %v5777_v54, %v5776_v18  ;;  %v5789_v51 = vadd.f32 %v5788_v17, %v5787_v14  ;;  %v5800_v55 = vadd.f32 %v5799_v40, %v5798_v41  ;;  %v14468_v41 = vld [vmem:[#allocation60_spill] sm:$0xff] }
 0x7ca   : > { %v5991_v10 = vsel %vm1304_vm3, %v12552_v62, %v5990_v28  ;;  %v5766_v48 = vrot.slane %v5765_v59, 4  ;;  %v5790_v39 = vsel %vm1077_vm1, %v5706_v34, 0.0  ;;  %v5801_v53 = vsel %vm1077_vm1, %v5709_v45, 0.0 }
 0x7cb   : > { %v5992_v15 = vsel %vm1306_vm4, %v12559_v13, %v5991_v10  ;;  %v5779_v27 = vrot.slane %v5778_v6, 4  ;;  %v5791_v11 = vadd.f32 %v5790_v39, %v5789_v51  ;;  %v5802_v57 = vadd.f32 %v5801_v53, %v5800_v55 }
 0x7cc   : > { %v5993_v46 = vsel %vm1308_vm5, %v12604_v32, %v5992_v15  ;;  %v5767_v42 = vadd.f32 %v5766_v48, %v5765_v59  ;;  %v5803_v38 = vsel %vm1077_vm1, %v5710_v2, 0.0  ;;  %v1600_v8 = vsub.f32 %v14466_v52, %v1598_v63 }
 0x7cd   : > { %v5994_v62 = vsel %vm1310_vm6, %v12606_v1, %v5993_v46  ;;  %v5780_v34 = vadd.f32 %v5779_v27, %v5778_v6  ;;  %v5792_v23 = vrot.slane %v5791_v11, 4  ;;  %v5804_v45 = vadd.f32 %v5803_v38, %v5802_v57 }
 0x7ce   : > { %v5995_v13 = vsel %vm1312_vm7, %v12680_v3, %v5994_v62  ;;  %v5859_v32 = vrot.slane %v12581_v5, 2  ;;  %v5768_v44 = vrot.slane %v5767_v42, 2  ;;  %v1603_v1 = vmul.f32 1.442695, %v1600_v8 }
 0x7cf   : > { %v5996_v22 = vsel %vm1314_vm8, %v12653_v25, %v5995_v13  ;;  %v5781_v60 = vrot.slane %v5780_v34, 2  ;;  %v5793_v2 = vadd.f32 %v5792_v23, %v5791_v11  ;;  %v5805_v18 = vrot.slane %v5804_v45, 4 }
 0x7d0   : > { %v6071_v19 = vadd.f32 %v7580_v30, %v5996_v22  ;;  %v14467_v54 = vrot.slane %v12529_v9, 2  ;;  %v5769_v14 = vadd.f32 %v5768_v44, %v5767_v42  ;;  %7781 = vpow2.f32 %v1603_v1 }
 0x7d1   : > { %v1599_v28 = vsub.f32 %v14468_v41, %v1595_v4  ;;  %v5782_v17 = vadd.f32 %v5781_v60, %v5780_v34  ;;  %v5794_v40 = vrot.slane %v5793_v2, 2  ;;  %v5806_v10 = vadd.f32 %v5805_v18, %v5804_v45  ;;  %v6155_v4 = vpop.f32.mrf.mxu0  ;;  %v6065_v60 = vpop.f32.mrf.mxu1 }
 0x7d2   : > { %v5834_v3 = vadd.f32 %v14467_v54, %v12529_v9  ;;  %v6165_v59 = vadd.f32 %v12547_v33, %v6071_v19  ;;  %v14469_v25 = vrot.slane %v12532_v43, 2  ;;  %v5860_v51 = vadd.f32 %v5859_v32, %v12581_v5 }
 0x7d3   : > { %v5770_v55 = vrot.slane %v5769_v14, 1  ;;  %v1601_v63 = vmul.f32 1.442695, %v1599_v28  ;;  %v5783_v15 = vrot.slane %v5782_v17, 1  ;;  %v5795_v9 = vadd.f32 %v5794_v40, %v5793_v2  ;;  %v3156_v28 = vpop.xlane.xlu0 %3155 }
 0x7d4   : > { %v5847_v6 = vadd.f32 %v14469_v25, %v12532_v43  ;;  %7783 = vtanh.f32 %v6165_v59  ;;  %v5807_v48 = vrot.slane %v5806_v10, 2  ;;  %v5822_v33 = vrot.slane %v12554_v61, 1  ;;  %v14471_v59 = vld [vmem:[#allocation106_spill] sm:$0xff] }
 0x7d5   : > { %v5771_v39 = vadd.f32 %v5770_v55, %v5769_v14  ;;  %v5784_v53 = vadd.f32 %v5783_v15, %v5782_v17  ;;  %v5796_v46 = vrot.slane %v5795_v9, 1  ;;  %7785 = vpow2.f32 %v1601_v63  ;;  %v14472_v17 = vld [vmem:[#allocation46_spill] sm:$0xff] }
 0x7d6   : > { %v5808_v27 = vadd.f32 %v5807_v48, %v5806_v10  ;;  %v5835_v11 = vrot.slane %v5834_v3, 1  ;;  %v5848_v57 = vrot.slane %v5847_v6, 1  ;;  %v5861_v43 = vrot.slane %v5860_v51, 1  ;;  %v3159_v10 = vpop.xlane.xlu1 %3158 }
 0x7d7   : > { %v5797_v62 = vadd.f32 %v5796_v46, %v5795_v9  ;;  %v5983_v5 = vsel %vm1302_vm2, %v5784_v53, %v5771_v39  ;;  %v5823_v8 = vadd.f32 %v5822_v33, %v12554_v61  ;;  %v6156_v1 = vadd.f32 %v12537_v0, %v6155_v4  ;;  %v14470_v0 = vld [vmem:[#allocation107_spill] sm:$0xff]  ;;  %v4709_v46 = vpop.xlane.xlu0 %4708 }
 0x7d8   : > { %v5809_v42 = vrot.slane %v5808_v27, 1  ;;  %v5849_v13 = vadd.f32 %v5848_v57, %v5847_v6  ;;  %v5836_v34 = vadd.f32 %v5835_v11, %v5834_v3  ;;  %v5862_v23 = vadd.f32 %v5861_v43, %v5860_v51  ;;  %v14473_v6 = vld [vmem:[#allocation78_spill] sm:$0xff] }
 0x7d9   : > { %v5984_v52 = vsel %vm1304_vm3, %v5797_v62, %v5983_v5  ;;  %v3160_v40 = vsub.f32 %v14472_v17, %v3156_v28  ;;  %v3161_v51 = vsub.f32 %v14473_v6, %v3159_v10  ;;  %v14479_v10 = vld [vmem:[#allocation45_spill] sm:$0xff]  ;;  %v14480_v6 = vld [vmem:[#allocation102_spill] sm:$0xff] }
 0x7da   : > { %v5810_v38 = vadd.f32 %v5809_v42, %v5808_v27  ;;  %v4712_v39 = vpop.xlane.xlu1 %4711 }
 0x7db   : > { %v3162_v25 = vmul.f32 1.442695, %v3160_v40  ;;  %v3164_v55 = vmul.f32 1.442695, %v3161_v51 }
 0x7dc   : > { %v5985_v45 = vsel %vm1306_vm4, %v5810_v38, %v5984_v52 }
 0x7dd   : > { %v5986_v30 = vsel %vm1308_vm5, %v5823_v8, %v5985_v45  ;;  %v7782_v32 = vpop.eup %7781 }
 0x7de   : > { %v5987_v22 = vsel %vm1310_vm6, %v5836_v34, %v5986_v30  ;;  %v1608_v19 = vsel %vm1077_vm1, %v7782_v32, 0.0 }
 0x7df   : > { %v5988_v44 = vsel %vm1312_vm7, %v5849_v13, %v5987_v22  ;;  %1609 = vadd.xlane.f32.xlu1 %v1608_v19  ;;  %v7312_v13 = vld [vmem:[%s13897_s12 + $0x1] ss:$0 sm:$0xff] }
 0x7e0   : > { %v5989_v61 = vsel %vm1314_vm8, %v5862_v23, %v5988_v44  ;;  %v14475_v19 = vld [vmem:[#allocation47_spill] sm:$0xff] }
 0x7e1   : > { %v12765_v2 = vpop.eup %7783  ;;  %v6066_v18 = vadd.f32 %v6065_v60, %v5989_v61  ;;  %v14476_v60 = vld [vmem:[#allocation53_spill] sm:$0xff]  ;;  %v14477_v61 = vld [vmem:[#allocation66_spill] sm:$0xff] }
 0x7e2   : > { %6814 = vst.msk [vmem:[#allocation2 + $0x8] sm:$0xff] %vm1077_vm1, %v12765_v2  ;;  %v7786_v54 = vpop.eup %7785 }
 0x7e3   : > { %v6164_v3 = vadd.f32 %v6156_v1, %v6066_v18  ;;  %v1605_v14 = vsel %vm1077_vm1, %v7786_v54, 0.0  ;;  %v4713_v18 = vsub.f32 %v14477_v61, %v4709_v46 }
 0x7e4   : > { %1606 = vadd.xlane.f32.xlu0 %v1605_v14 }
 0x7e5   : > { %7787 = vtanh.f32 %v6164_v3  ;;  %v4715_v14 = vmul.f32 1.442695, %v4713_v18 }
 0x7e6   : > { %7789 = vpow2.f32 %v3162_v25 }
 0x7e7   : > { %7791 = vpow2.f32 %v3164_v55 }
 0x7f0   : > { %2143 = vrot.lane.b32.xlu1 %v14470_v0, %s8270_s29 }
 0x7f2   : > { %v12772_v41 = vpop.eup %7787 }
 0x7f3   : > { %6813 = vst.msk [vmem:[#allocation2] sm:$0xff] %vm1077_vm1, %v12772_v41  ;;  %7600 = vmatprep.mubr.msk.f32.mxu1 %vm1077_vm1, %v12772_v41  ;;  %v12784_v63 = vpop.eup %7789 }
 0x7f4   : > { %7601 = vmatmul.mubr.msk.f32.vlgmr.msra.gmra.mxu1 %vm1077_vm1, %v12765_v2  ;;  %v3166_v15 = vsel %vm1077_vm1, %v12784_v63, 0.0  ;;  %v12788_v9 = vpop.eup %7791 }
 0x7f5   : > { %v3169_v48 = vsel %vm1077_vm1, %v12788_v9, 0.0 }
 0x7fa   : > { %2141 = vrot.lane.b32.xlu0 %v14471_v59, %s8270_s29 }
 0x814   : > { %3167 = vadd.xlane.f32.xlu1 %v3166_v15 }
 0x819   : > { %3170 = vadd.xlane.f32.xlu0 %v3169_v48 }
 0x868   : > { %v1610_v53 = vpop.xlane.xlu1 %1609 }
 0x869   : > { %7793 = vrcp.f32 %v1610_v53 }
 0x86c   : > { %v2144_v57 = vpop.permute.xlu1 %2143 }
 0x86d   : > { %v1607_v27 = vpop.xlane.xlu0 %1606 }
 0x86e   : > { %7795 = vrcp.f32 %v1607_v27 }
 0x86f   : > { %7797 = vpow2.f32 %v4715_v14 }
 0x871   : > { %v2142_v38 = vpop.permute.xlu0 %2141 }
 0x876   : > { %v7794_v33 = vpop.eup %7793 }
 0x877   : > { %v1614_v11 = vmul.f32 %v7794_v33, %v7782_v32 }
 0x879   : > { %v2148_v62 = vsel %vm1077_vm1, %v1614_v11, %v2144_v57 }
 0x87a   : > { %v2151_v42 = vsel %vm2149_vm10, %v2148_v62, 0.0 }
 0x87b   : > { %v7796_v43 = vpop.eup %7795  ;;  %2153 = vst [vmem:[%s8556_s28 + $0x8] sm:$0xff] %v2151_v42 }
 0x87c   : > { %v1613_v5 = vmul.f32 %v7796_v43, %v7786_v54  ;;  %v14478_v54 = vld [vmem:[#allocation122_spill] sm:$0xff]  ;;  %v7798_v28 = vpop.eup %7797 }
 0x87d   : > { %v4714_v3 = vsub.f32 %v14478_v54, %v4712_v39  ;;  %v4719_v17 = vsel %vm1077_vm1, %v7798_v28, 0.0 }
 0x87e   : > { %v2147_v52 = vsel %vm1077_vm1, %v1613_v5, %v2142_v38 }
 0x87f   : > { %v2150_v8 = vsel %vm2149_vm10, %v2147_v52, 0.0  ;;  %v4717_v0 = vmul.f32 1.442695, %v4714_v3 }
 0x880   : > { %2152 = vst [vmem:[%s8556_s28] sm:$0xff] %v2150_v8 }
 0x881   : > { %7799 = vpow2.f32 %v4717_v0 }
 0x88e   : > { %v12813_v59 = vpop.eup %7799 }
 0x88f   : > { %v4722_v40 = vsel %vm1077_vm1, %v12813_v59, 0.0 }
 0x89d   : > { %v3168_v15 = vpop.xlane.xlu1 %3167 }
 0x8a2   : > { %v3171_v55 = vpop.xlane.xlu0 %3170 }
 0x8b4   : > { %v7602_v34 = vpop.f32.mrf.mxu1 }
 0x8b5   : > { %v6255_v23 = vadd.f32 %v7602_v34, %v7312_v13 }
 0x8b6   : > { %v6249_v45 = vpop.f32.mrf.mxu1 }
 0x8b7   : > { %v6259_v30 = vsel %vm576_vm9, %v6255_v23, -1e+30  ;;  %v6250_v32 = vadd.f32 %v7312_v13, %v6249_v45  ;;  %7801 = vtanh.f32 %v6255_v23 }
 0x8b8   : > { %v6263_v22 = vsel %vm1077_vm1, %v6259_v30, -inf }
 0x8b9   : > { %v6258_v44 = vsel %vm576_vm9, %v6250_v32, -1e+30  ;;  %6264 = vmax.xlane.f32.xlu1 %v6263_v22  ;;  %7803 = vtanh.f32 %v6250_v32  ;;  %v8006_v22 = vld [vmem:[%s13897_s12 + $0x3] ss:$0 sm:$0xff] }
 0x8ba   : > { %v6260_v1 = vsel %vm1077_vm1, %v6258_v44, -inf  ;;  %7805 = vrcp.f32 %v3171_v55 }
 0x8bb   : > { %6261 = vmax.xlane.f32.xlu0 %v6260_v1  ;;  %7807 = vrcp.f32 %v3168_v15 }
 0x8c4   : > { %v7802_v25 = vpop.eup %7801 }
 0x8c6   : > { %v7804_v51 = vpop.eup %7803 }
 0x8c7   : > { %v7806_v48 = vpop.eup %7805 }
 0x8c8   : > { %v7808_v46 = vpop.eup %7807  ;;  %v3175_v57 = vmul.f32 %v7806_v48, %v12788_v9 }
 0x8c9   : > { %v3174_v5 = vmul.f32 %v7808_v46, %v12784_v63 }
 0x8ca   : > { %3696 = vrot.lane.b32.xlu1 %v14475_v19, %s8270_s29  ;;  %v8007_v19 = vld [vmem:[%s13897_s12 + $0x2] ss:$0 sm:$0xff] }
 0x8d1   : > { %3694 = vrot.lane.b32.xlu0 %v14476_v60, %s8270_s29 }
 0x8ee   : > { %4720 = vadd.xlane.f32.xlu1 %v4719_v17 }
 0x8f0   : > { %4723 = vadd.xlane.f32.xlu0 %v4722_v40 }
 0x8ff   : > { %5247 = vrot.lane.b32.xlu1 %v14479_v10, %s8270_s29 }
 0x903   : > { %6291 = vperm.xlu1 %7755, %v7802_v25  }
 0x906   : > { %5249 = vrot.lane.b32.xlu0 %v14480_v6, %s8270_s29 }
 0x90a   : > { %6286 = vperm.xlu0 %7756, %v7804_v51  }
 0x942   : > { %v6265_v39 = vpop.xlane.xlu1 %6264 }
 0x943   : > { %v6267_v53 = vsub.f32 %v6259_v30, %v6265_v39 }
 0x944   : > { %v6262_v27 = vpop.xlane.xlu0 %6261 }
 0x945   : > { %v6270_v33 = vmul.f32 1.442695, %v6267_v53  ;;  %v6266_v11 = vsub.f32 %v6258_v44, %v6262_v27 }
 0x946   : > { %v3697_v62 = vpop.permute.xlu1 %3696 }
 0x947   : > { %7809 = vpow2.f32 %v6270_v33  ;;  %v6268_v42 = vmul.f32 1.442695, %v6266_v11  ;;  %v3701_v43 = vsel %vm1077_vm1, %v3175_v57, %v3697_v62 }
 0x948   : > { %v3703_v38 = vsel %vm2149_vm10, %v3701_v43, 0.0  ;;  %v3695_v52 = vpop.permute.xlu0 %3694 }
 0x949   : > { %7811 = vpow2.f32 %v6268_v42  ;;  %7228 = vst [vmem:[%s8556_s28 + $0x18] sm:$0xff] %v3703_v38  ;;  %v3700_v8 = vsel %vm1077_vm1, %v3174_v5, %v3695_v52 }
 0x94a   : > { %v3702_v13 = vsel %vm2149_vm10, %v3700_v8, 0.0 }
 0x94b   : > { %7227 = vst [vmem:[%s8556_s28 + $0x10] sm:$0xff] %v3702_v13 }
 0x954   : > { %v12830_v34 = vpop.eup %7809 }
 0x955   : > { %v6275_v9 = vsel %vm1077_vm1, %v12830_v34, 0.0 }
 0x956   : > { %v12834_v23 = vpop.eup %7811  ;;  %6276 = vadd.xlane.f32.xlu1 %v6275_v9 }
 0x957   : > { %v6272_v63 = vsel %vm1077_vm1, %v12834_v23, 0.0 }
 0x958   : > { %6273 = vadd.xlane.f32.xlu0 %v6272_v63 }
 0x967   : > { %6800 = vrot.lane.b32.xlu1 %v12772_v41, %s8270_s29 }
 0x96e   : > { %6802 = vrot.lane.b32.xlu0 %v12765_v2, %s8270_s29 }
 0x977   : > { %v4721_v45 = vpop.xlane.xlu1 %4720 }
 0x978   : > { %7813 = vrcp.f32 %v4721_v45 }
 0x979   : > { %v4724_v4 = vpop.xlane.xlu0 %4723 }
 0x97a   : > { %7815 = vrcp.f32 %v4724_v4 }
 0x97b   : > { %v5248_v30 = vpop.permute.xlu1 %5247 }
 0x97d   : > { %v5250_v1 = vpop.permute.xlu0 %5249 }
 0x97f   : > { %v6292_v32 = vpop.permute.xlu1 %6291 }
 0x980   : > { %v6295_v44 = vmul.f32 %v8006_v22, %v6292_v32 }
 0x982   : > { %v6297_v60 = vadd.f32 %v8007_v19, %v6295_v44 }
 0x984   : > { %v6299_v61 = vmul.f32 %v12765_v2, %v6297_v60  ;;  %v14482_v60 = vld [vmem:[#allocation129_spill] sm:$0xff] }
 0x985   : > { %v7814_v18 = vpop.eup %7813  ;;  %v6287_v54 = vpop.permute.xlu0 %6286 }
 0x986   : > { %v4727_v3 = vmul.f32 %v7814_v18, %v7798_v28  ;;  %v6351_v14 = vcombine.high %v6299_v61, %v6299_v61  ;;  %v6358_v0 = vrot.slane %v6299_v61, %v9506_v50  ;;  %v6294_v17 = vmul.f32 %v8006_v22, %v6287_v54  ;;  %v14483_v61 = vld [vmem:[#allocation130_spill] sm:$0xff]  ;;  %v14484_v18 = vld [vmem:[#allocation61_spill] sm:$0xff] }
 0x987   : > { %v7816_v40 = vpop.eup %7815  ;;  %v14485_v54 = vld [vmem:[#allocation114_spill] sm:$0xff] }
 0x988   : > { %v5253_v10 = vsel %vm1077_vm1, %v4727_v3, %v5248_v30  ;;  %v4728_v25 = vmul.f32 %v7816_v40, %v12813_v59  ;;  %v6365_v6 = vrot.slane %v6351_v14, %v9506_v50  ;;  %v6366_v51 = vcombine.high %v6358_v0, %v6358_v0  ;;  %v14486_v14 = vld [vmem:[#allocation134_spill] sm:$0xff] }
 0x989   : > { %v5255_v55 = vsel %vm2149_vm10, %v5253_v10, 0.0  ;;  %v6374_v2 = vrot.slane %v6358_v0, %v9506_v50  ;;  %v6296_v15 = vadd.f32 %v8007_v19, %v6294_v17  ;;  %v14481_v19 = vld [vmem:[#allocation63_spill] sm:$0xff]  ;;  %v14487_v0 = vld [vmem:[#allocation145_spill] sm:$0xff] }
 0x98a   : > { %7303 = vst [vmem:[%s8556_s28 + $0x20] sm:$0xff] %v5255_v55  ;;  %v5254_v28 = vsel %vm1077_vm1, %v4728_v25, %v5250_v1  ;;  %v6367_v48 = vcombine.high %v6365_v6, %v6365_v6  ;;  %v6381_v39 = vrot.slane %v6365_v6, %v9506_v50  ;;  %v6388_v53 = vrot.slane %v6366_v51, %v9506_v50  ;;  %v14491_v25 = vld [vmem:[#allocation144_spill] sm:$0xff]  ;;  %v14492_v51 = vld [vmem:[#allocation58_spill] sm:$0xff] }
 0x98b   : > { %v5256_v46 = vsel %vm2149_vm10, %v5254_v28, 0.0  ;;  %v6396_v27 = vcombine.high %v6374_v2, %v6374_v2  ;;  %v6435_v59 = vrot.slane %v6374_v2, %v8766_v12  ;;  %v12862_v33 = vmul.f32 %v12772_v41, %v6296_v15  ;;  %v14493_v2 = vld [vmem:[#allocation113_spill] sm:$0xff]  ;;  %v14494_v28 = vld [vmem:[#allocation68_spill] sm:$0xff] }
 0x98c   : > { %7304 = vst [vmem:[%s8556_s28 + $0x28] sm:$0xff] %v5256_v46  ;;  %v6395_v11 = vrot.slane %v6367_v48, %v9506_v50  ;;  %v6397_v57 = vcombine.high %v6381_v39, %v6381_v39  ;;  %v6398_v62 = vcombine.high %v6388_v53, %v6388_v53  ;;  %v6439_v42 = vrot.slane %v6388_v53, %v8766_v12  ;;  %v14496_v46 = vld [vmem:[#allocation77_spill] sm:$0xff] }
 0x98d   : > { %v6443_v43 = vrot.slane %v6396_v27, %v8766_v12  ;;  %v6451_v5 = vrot.slane %v6381_v39, %v8766_v12  ;;  %v6512_v38 = vmul.f32 %v6435_v59, %v14395_v20  ;;  %v6513_v52 = vmul.f32 %v6435_v59, %v14427_v16  ;;  %v14495_v39 = vld [vmem:[#allocation55_spill] sm:$0xff] }
 0x98e   : > { %v6399_v8 = vcombine.high %v6395_v11, %v6395_v11  ;;  %v6447_v13 = vrot.slane %v6398_v62, %v8766_v12  ;;  %v6455_v41 = vrot.slane %v6395_v11, %v8766_v12  ;;  %v6459_v9 = vrot.slane %v6397_v57, %v8766_v12  ;;  %v14498_v57 = vld [vmem:[#allocation65_spill] sm:$0xff] }
 0x98f   : > { %v6514_v63 = vmul.f32 %v6435_v59, %v14428_v24  ;;  %v6515_v45 = vmul.f32 %v6435_v59, %v14429_v26  ;;  %v6516_v4 = vmul.f32 %v6439_v42, %v14430_v36  ;;  %v6517_v30 = vmul.f32 %v6439_v42, %v14431_v7  ;;  %v14497_v59 = vld [vmem:[#allocation121_spill] sm:$0xff] }
 0x990   : > { %v6463_v32 = vrot.slane %v6399_v8, %v8766_v12  ;;  %v6518_v20 = vmul.f32 %v6439_v42, %v14432_v21  ;;  %v6519_v16 = vmul.f32 %v6439_v42, %v14433_v47  ;;  %v6520_v22 = vmul.f32 %v6443_v43, %v11638_v58  ;;  %v14488_v58 = vld [vmem:[#allocation109_spill] sm:$0xff]  ;;  %v14499_v42 = vld [vmem:[#allocation54_spill] sm:$0xff] }
 0x991   : > { %v6521_v44 = vmul.f32 %v6443_v43, %v11636_v56  ;;  %v6522_v1 = vmul.f32 %v6443_v43, %v14385_v29  ;;  %v6523_v24 = vmul.f32 %v6443_v43, %v14481_v19  ;;  %v6524_v26 = vmul.f32 %v6447_v13, %v14482_v60  ;;  %v14489_v56 = vld [vmem:[#allocation72_spill] sm:$0xff]  ;;  %v14490_v29 = vld [vmem:[#allocation150_spill] sm:$0xff] }
 0x992   : > { %v6525_v36 = vmul.f32 %v6447_v13, %v14483_v61  ;;  %v6526_v7 = vmul.f32 %v6447_v13, %v14484_v18  ;;  %v6527_v3 = vmul.f32 %v6447_v13, %v14485_v54  ;;  %v6528_v21 = vmul.f32 %v6451_v5, %v14486_v14  ;;  %v14501_v13 = vld [vmem:[#allocation125_spill] sm:$0xff]  ;;  %v14502_v61 = vld [vmem:[#allocation56_spill] sm:$0xff] }
 0x993   : > { %v6529_v47 = vmul.f32 %v6451_v5, %v14487_v0  ;;  %v6530_v17 = vmul.f32 %v6451_v5, %v14488_v58  ;;  %v6531_v40 = vmul.f32 %v6451_v5, %v14489_v56  ;;  %v6532_v10 = vmul.f32 %v6455_v41, %v14490_v29  ;;  %v14500_v5 = vld [vmem:[#allocation75_spill] sm:$0xff]  ;;  %v14503_v54 = vld [vmem:[#allocation101_spill] sm:$0xff]  ;;  %v14505_v58 = vld [vmem:[#allocation84_spill] sm:$0xff] }
 0x994   : > { %v6533_v6 = vmul.f32 %v6455_v41, %v14491_v25  ;;  %v6534_v55 = vmul.f32 %v6455_v41, %v14492_v51  ;;  %v6535_v15 = vmul.f32 %v6455_v41, %v14493_v2  ;;  %v6536_v48 = vmul.f32 %v6459_v9, %v14494_v28  ;;  %v8008_v41 = vld [vmem:[%s8558_s10 + $0x100] sm:$0xff]  ;;  %v14507_v25 = vld [vmem:[#allocation96_spill] sm:$0xff]  ;;  %v14508_v51 = vld [vmem:[#allocation103_spill] sm:$0xff] }
 0x995   : > { %v6537_v53 = vmul.f32 %v6459_v9, %v14495_v39  ;;  %v6538_v27 = vmul.f32 %v6459_v9, %v14496_v46  ;;  %v6539_v11 = vmul.f32 %v6459_v9, %v14497_v59  ;;  %v6540_v62 = vmul.f32 %v6463_v32, %v14498_v57  ;;  %v14504_v9 = vld [vmem:[#allocation81_spill] sm:$0xff] }
 0x996   : > { %v6541_v43 = vmul.f32 %v6463_v32, %v14499_v42  ;;  %v6542_v8 = vmul.f32 %v6463_v32, %v14500_v5  ;;  %v6543_v19 = vmul.f32 %v6463_v32, %v14501_v13  ;;  %v6576_v60 = vadd.f32 %v8008_v41, %v6512_v38  ;;  %v14506_v29 = vld [vmem:[#allocation97_spill] sm:$0xff]  ;;  %v8018_v13 = vld [vmem:[%s8558_s10 + $0x188] sm:$0xff] }
 0x997   : > { %v12907_v18 = vadd.f32 %v6513_v52, %v14502_v61  ;;  %v12910_v14 = vadd.f32 %v6514_v63, %v14503_v54  ;;  %v12913_v0 = vadd.f32 %v6515_v45, %v14504_v9  ;;  %v12916_v56 = vadd.f32 %v6516_v4, %v14505_v58  ;;  %v8009_v63 = vld [vmem:[%s8558_s10 + $0x140] sm:$0xff]  ;;  %v8010_v45 = vld [vmem:[%s8558_s10 + $0x148] sm:$0xff]  ;;  %v8011_v4 = vld [vmem:[%s8558_s10 + $0x150] sm:$0xff] }
 0x998   : > { %v12919_v32 = vadd.f32 %v6517_v30, %v14506_v29  ;;  %v12922_v38 = vadd.f32 %v6518_v20, %v14507_v25  ;;  %v12925_v52 = vadd.f32 %v6519_v16, %v14508_v51  ;;  %v12928_v2 = vadd.f32 %v8009_v63, %v6520_v22  ;;  %v8012_v30 = vld [vmem:[%s8558_s10 + $0x158] sm:$0xff]  ;;  %v8013_v20 = vld [vmem:[%s8558_s10 + $0x160] sm:$0xff]  ;;  %v8014_v16 = vld [vmem:[%s8558_s10 + $0x168] sm:$0xff] }
 0x999   : > { %v12931_v28 = vadd.f32 %v8010_v45, %v6521_v44  ;;  %v12934_v39 = vadd.f32 %v8011_v4, %v6522_v1  ;;  %v12937_v46 = vadd.f32 %v8012_v30, %v6523_v24  ;;  %v12940_v59 = vadd.f32 %v8013_v20, %v6524_v26  ;;  %v8015_v22 = vld [vmem:[%s8558_s10 + $0x170] sm:$0xff]  ;;  %v8016_v44 = vld [vmem:[%s8558_s10 + $0x178] sm:$0xff]  ;;  %v8017_v1 = vld [vmem:[%s8558_s10 + $0x180] sm:$0xff] }
 0x99a   : > { %v12943_v57 = vadd.f32 %v8014_v16, %v6525_v36  ;;  %v12946_v42 = vadd.f32 %v8015_v22, %v6526_v7  ;;  %v12949_v5 = vadd.f32 %v8016_v44, %v6527_v3  ;;  %v12952_v24 = vadd.f32 %v8017_v1, %v6528_v21  ;;  %v8019_v26 = vld [vmem:[%s8558_s10 + $0x190] sm:$0xff]  ;;  %v8020_v7 = vld [vmem:[%s8558_s10 + $0x1a0] sm:$0xff]  ;;  %v8021_v3 = vld [vmem:[%s8558_s10 + $0x1a8] sm:$0xff] }
 0x99b   : > { %v12955_v41 = vadd.f32 %v8018_v13, %v6529_v47  ;;  %v12958_v61 = vadd.f32 %v8019_v26, %v6530_v17  ;;  %v14509_v36 = vld [vmem:[#allocation67_spill] sm:$0xff]  ;;  %v12964_v9 = vadd.f32 %v8020_v7, %v6532_v10  ;;  %v12967_v58 = vadd.f32 %v8021_v3, %v6533_v6  ;;  %v14510_v25 = vld [vmem:[#allocation124_spill] sm:$0xff]  ;;  %v8023_v51 = vld [vmem:[%s8558_s10 + $0x1c0] sm:$0xff] }
 0x99c   : > { %v12961_v54 = vadd.f32 %v6531_v40, %v14509_v36  ;;  %v8022_v29 = vld [vmem:[%s8558_s10 + $0x1b0] sm:$0xff]  ;;  %v12973_v47 = vadd.f32 %v6535_v15, %v14510_v25  ;;  %v12976_v63 = vadd.f32 %v8023_v51, %v6536_v48  ;;  %v8024_v17 = vld [vmem:[%s8558_s10 + $0x1c8] sm:$0xff]  ;;  %v14512_v10 = vld [vmem:[#allocation120_spill] sm:$0xff]  ;;  %v7349_v44 = vclamps-f32 %v12910_v14, 2.0 }
 0x99d   : > { %v12970_v21 = vadd.f32 %v8022_v29, %v6534_v55  ;;  %v12979_v45 = vadd.f32 %v8024_v17, %v6537_v53  ;;  %v14511_v40 = vld [vmem:[#allocation119_spill] sm:$0xff]  ;;  %v12985_v30 = vadd.f32 %v6539_v11, %v14512_v10  ;;  %v8025_v6 = vld [vmem:[%s8558_s10 + $0x1e0] sm:$0xff]  ;;  %v8026_v55 = vld [vmem:[%s8558_s10 + $0x1e8] sm:$0xff]  ;;  %v7348_v11 = vclamps-f32 %v12907_v18, 2.0 }
 0x99e   : > { %v12982_v4 = vadd.f32 %v6538_v27, %v14511_v40  ;;  %v12988_v20 = vadd.f32 %v8025_v6, %v6540_v62  ;;  %v12991_v16 = vadd.f32 %v8026_v55, %v6541_v43  ;;  %v14513_v15 = vld [vmem:[#allocation62_spill] sm:$0xff]  ;;  %v14514_v48 = vld [vmem:[#allocation88_spill] sm:$0xff]  ;;  %v7347_v27 = vclamps-f32 %v6576_v60, 2.0  ;;  %6770 = vst.msk [vmem:[%s8558_s10 + $0x110] sm:$0xff] %vm1077_vm1, %v7349_v44 }
 0x99f   : > { %v12994_v22 = vadd.f32 %v6542_v8, %v14513_v15  ;;  %v12997_v53 = vadd.f32 %v6543_v19, %v14514_v48  ;;  %v7350_v62 = vclamps-f32 %v12913_v0, 2.0  ;;  %v7351_v43 = vclamps-f32 %v12916_v56, 2.0  ;;  %6769 = vst.msk [vmem:[%s8558_s10 + $0x108] sm:$0xff] %vm1077_vm1, %v7348_v11  ;;  %v14515_v6 = vld [vmem:[#allocation148_spill] sm:$0xff]  ;;  %v14518_v11 = vld [vmem:[#allocation146_spill] sm:$0xff] }
 0x9a0   : > { %v7352_v1 = vclamps-f32 %v12919_v32, 2.0  ;;  %v7353_v8 = vclamps-f32 %v12922_v38, 2.0  ;;  %v7354_v19 = vclamps-f32 %v12925_v52, 2.0  ;;  %v7355_v60 = vclamps-f32 %v12928_v2, 2.0  ;;  %6768 = vst.msk [vmem:[%s8558_s10 + $0x100] sm:$0xff] %vm1077_vm1, %v7347_v27 }
 0x9a1   : > { %v7356_v18 = vclamps-f32 %v12931_v28, 2.0  ;;  %v7357_v14 = vclamps-f32 %v12934_v39, 2.0  ;;  %v7358_v0 = vclamps-f32 %v12937_v46, 2.0  ;;  %v7359_v56 = vclamps-f32 %v12940_v59, 2.0  ;;  %6771 = vst.msk [vmem:[%s8558_s10 + $0x118] sm:$0xff] %vm1077_vm1, %v7350_v62  ;;  %6772 = vst.msk [vmem:[%s8558_s10 + $0x120] sm:$0xff] %vm1077_vm1, %v7351_v43 }
 0x9a2   : > { %v7360_v32 = vclamps-f32 %v12943_v57, 2.0  ;;  %v7361_v38 = vclamps-f32 %v12946_v42, 2.0  ;;  %v7362_v52 = vclamps-f32 %v12949_v5, 2.0  ;;  %v7363_v2 = vclamps-f32 %v12952_v24, 2.0  ;;  %6773 = vst.msk [vmem:[%s8558_s10 + $0x128] sm:$0xff] %vm1077_vm1, %v7352_v1  ;;  %6774 = vst.msk [vmem:[%s8558_s10 + $0x130] sm:$0xff] %vm1077_vm1, %v7353_v8 }
 0x9a3   : > { %6775 = vst.msk [vmem:[%s8558_s10 + $0x138] sm:$0xff] %vm1077_vm1, %v7354_v19  ;;  %6776 = vst.msk [vmem:[%s8558_s10 + $0x140] sm:$0xff] %vm1077_vm1, %v7355_v60  ;;  %v7364_v28 = vclamps-f32 %v12955_v41, 2.0  ;;  %v7365_v39 = vclamps-f32 %v12958_v61, 2.0  ;;  %v7366_v46 = vclamps-f32 %v12961_v54, 2.0  ;;  %v7367_v59 = vclamps-f32 %v12964_v9, 2.0 }
 0x9a4   : > { %6777 = vst.msk [vmem:[%s8558_s10 + $0x148] sm:$0xff] %vm1077_vm1, %v7356_v18  ;;  %6778 = vst.msk [vmem:[%s8558_s10 + $0x150] sm:$0xff] %vm1077_vm1, %v7357_v14  ;;  %v7368_v57 = vclamps-f32 %v12967_v58, 2.0  ;;  %v7369_v42 = vclamps-f32 %v12970_v21, 2.0  ;;  %v7370_v5 = vclamps-f32 %v12973_v47, 2.0  ;;  %v7371_v24 = vclamps-f32 %v12976_v63, 2.0 }
 0x9a5   : > { %6779 = vst.msk [vmem:[%s8558_s10 + $0x158] sm:$0xff] %vm1077_vm1, %v7358_v0  ;;  %6780 = vst.msk [vmem:[%s8558_s10 + $0x160] sm:$0xff] %vm1077_vm1, %v7359_v56  ;;  %v7372_v13 = vclamps-f32 %v12979_v45, 2.0  ;;  %v7373_v41 = vclamps-f32 %v12982_v4, 2.0  ;;  %v7374_v26 = vclamps-f32 %v12985_v30, 2.0  ;;  %v7375_v61 = vclamps-f32 %v12988_v20, 2.0 }
 0x9a6   : > { %6781 = vst.msk [vmem:[%s8558_s10 + $0x168] sm:$0xff] %vm1077_vm1, %v7360_v32  ;;  %6782 = vst.msk [vmem:[%s8558_s10 + $0x170] sm:$0xff] %vm1077_vm1, %v7361_v38  ;;  %v7376_v36 = vclamps-f32 %v12991_v16, 2.0  ;;  %v7377_v54 = vclamps-f32 %v12994_v22, 2.0  ;;  %v7378_v7 = vclamps-f32 %v12997_v53, 2.0  ;;  %v6302_v9 = vcombine.high %v12862_v33, %v12862_v33  ;;  %v14516_v22 = vld [vmem:[#allocation105_spill] sm:$0xff] }
 0x9a7   : > { %6783 = vst.msk [vmem:[%s8558_s10 + $0x178] sm:$0xff] %vm1077_vm1, %v7362_v52  ;;  %6784 = vst.msk [vmem:[%s8558_s10 + $0x180] sm:$0xff] %vm1077_vm1, %v7363_v2  ;;  %v6309_v3 = vrot.slane %v12862_v33, %v9506_v50  ;;  %v14519_v62 = vld [vmem:[#allocation64_spill] sm:$0xff]  ;;  %v14520_v8 = vld [vmem:[#allocation147_spill] sm:$0xff] }
 0x9a8   : > { %6785 = vst.msk [vmem:[%s8558_s10 + $0x188] sm:$0xff] %vm1077_vm1, %v7364_v28  ;;  %6786 = vst.msk [vmem:[%s8558_s10 + $0x190] sm:$0xff] %vm1077_vm1, %v7365_v39  ;;  %v6316_v58 = vrot.slane %v6302_v9, %v9506_v50  ;;  %v14521_v60 = vld [vmem:[#allocation95_spill] sm:$0xff]  ;;  %v14522_v0 = vld [vmem:[#allocation50_spill] sm:$0xff] }
 0x9a9   : > { %6787 = vst.msk [vmem:[%s8558_s10 + $0x198] sm:$0xff] %vm1077_vm1, %v7366_v46  ;;  %6788 = vst.msk [vmem:[%s8558_s10 + $0x1a0] sm:$0xff] %vm1077_vm1, %v7367_v59  ;;  %v6317_v29 = vcombine.high %v6309_v3, %v6309_v3  ;;  %v6325_v21 = vrot.slane %v6309_v3, %v9506_v50  ;;  %v14523_v32 = vld [vmem:[#allocation51_spill] sm:$0xff]  ;;  %v14524_v2 = vld [vmem:[#allocation38_spill] sm:$0xff] }
 0x9aa   : > { %6789 = vst.msk [vmem:[%s8558_s10 + $0x1a8] sm:$0xff] %vm1077_vm1, %v7368_v57  ;;  %6790 = vst.msk [vmem:[%s8558_s10 + $0x1b0] sm:$0xff] %vm1077_vm1, %v7369_v42  ;;  %v6318_v25 = vcombine.high %v6316_v58, %v6316_v58  ;;  %v6332_v47 = vrot.slane %v6316_v58, %v9506_v50  ;;  %v14525_v46 = vld [vmem:[#allocation69_spill] sm:$0xff]  ;;  %v14526_v57 = vld [vmem:[#allocation100_spill] sm:$0xff] }
 0x9ab   : > { %6791 = vst.msk [vmem:[%s8558_s10 + $0x1b8] sm:$0xff] %vm1077_vm1, %v7370_v5  ;;  %6792 = vst.msk [vmem:[%s8558_s10 + $0x1c0] sm:$0xff] %vm1077_vm1, %v7371_v24  ;;  %v6339_v51 = vrot.slane %v6317_v29, %v9506_v50  ;;  %v6347_v63 = vcombine.high %v6325_v21, %v6325_v21  ;;  %v6403_v17 = vrot.slane %v6325_v21, %v8766_v12  ;;  %v14527_v5 = vld [vmem:[#allocation79_spill] sm:$0xff]  ;;  %v14533_v3 = vld [vmem:[#allocation42_spill] sm:$0xff] }
 0x9ac   : > { %6793 = vst.msk [vmem:[%s8558_s10 + $0x1c8] sm:$0xff] %vm1077_vm1, %v7372_v13  ;;  %6794 = vst.msk [vmem:[%s8558_s10 + $0x1d0] sm:$0xff] %vm1077_vm1, %v7373_v41  ;;  %v6346_v33 = vrot.slane %v6318_v25, %v9506_v50  ;;  %v6348_v45 = vcombine.high %v6332_v47, %v6332_v47  ;;  %v6419_v40 = vrot.slane %v6332_v47, %v8766_v12  ;;  %v14517_v50 = vld [vmem:[#allocation52_spill] sm:$0xff]  ;;  %v14528_v13 = vld [vmem:[#allocation110_spill] sm:$0xff] }
 0x9ad   : > { %6795 = vst.msk [vmem:[%s8558_s10 + $0x1d8] sm:$0xff] %vm1077_vm1, %v7374_v26  ;;  %6796 = vst.msk [vmem:[%s8558_s10 + $0x1e0] sm:$0xff] %vm1077_vm1, %v7375_v61  ;;  %v6349_v4 = vcombine.high %v6339_v51, %v6339_v51  ;;  %v6407_v10 = vrot.slane %v6339_v51, %v8766_v12  ;;  %v6411_v30 = vrot.slane %v6347_v63, %v8766_v12  ;;  %v14529_v41 = vld [vmem:[#allocation39_spill] sm:$0xff]  ;;  %v14530_v61 = vld [vmem:[#allocation48_spill] sm:$0xff] }
 0x9ae   : > { %6797 = vst.msk [vmem:[%s8558_s10 + $0x1e8] sm:$0xff] %vm1077_vm1, %v7376_v36  ;;  %6798 = vst.msk [vmem:[%s8558_s10 + $0x1f0] sm:$0xff] %vm1077_vm1, %v7377_v54  ;;  %v6480_v20 = vmul.f32 %v6403_v17, %v14515_v6  ;;  %v6350_v55 = vcombine.high %v6346_v33, %v6346_v33  ;;  %v6423_v16 = vrot.slane %v6346_v33, %v8766_v12  ;;  %v14531_v54 = vld [vmem:[#allocation37_spill] sm:$0xff]  ;;  %v14534_v58 = vld [vmem:[#allocation70_spill] sm:$0xff] }
 0x9af   : > { %6799 = vst.msk [vmem:[%s8558_s10 + $0x1f8] sm:$0xff] %vm1077_vm1, %v7378_v7  ;;  %v6427_v15 = vrot.slane %v6348_v45, %v8766_v12  ;;  %v6481_v48 = vmul.f32 %v6403_v17, %v14516_v22  ;;  %v6415_v53 = vrot.slane %v6349_v4, %v8766_v12  ;;  %v6482_v27 = vmul.f32 %v6403_v17, %v14517_v50  ;;  %v14532_v7 = vld [vmem:[#allocation151_spill] sm:$0xff]  ;;  %v14535_v21 = vld [vmem:[#allocation40_spill] sm:$0xff]  ;;  %v14536_v47 = vld [vmem:[#allocation41_spill] sm:$0xff] }
 0x9b0   : > { %v6483_v44 = vmul.f32 %v6403_v17, %v14518_v11  ;;  %v6484_v43 = vmul.f32 %v6407_v10, %v14519_v62  ;;  %v6431_v1 = vrot.slane %v6350_v55, %v8766_v12  ;;  %v6485_v19 = vmul.f32 %v6407_v10, %v14520_v8  ;;  %v14537_v51 = vld [vmem:[#allocation59_spill] sm:$0xff]  ;;  %v14538_v17 = vld [vmem:[#allocation126_spill] sm:$0xff]  ;;  %v14539_v45 = vld [vmem:[#allocation44_spill] sm:$0xff] }
 0x9b1   : > { %v6486_v18 = vmul.f32 %v6407_v10, %v14521_v60  ;;  %v6487_v14 = vmul.f32 %v6407_v10, %v14457_v37  ;;  %v6488_v56 = vmul.f32 %v6411_v30, %v14522_v0  ;;  %v6489_v38 = vmul.f32 %v6411_v30, %v14523_v32  ;;  %v14540_v10 = vld [vmem:[#allocation108_spill] sm:$0xff]  ;;  %v14544_v11 = vld [vmem:[#allocation91_spill] sm:$0xff] }
 0x9b2   : > { %v6490_v52 = vmul.f32 %v6411_v30, %v14460_v49  ;;  %v6491_v28 = vmul.f32 %v6411_v30, %v14524_v2  ;;  %v6492_v39 = vmul.f32 %v6415_v53, %v14462_v35  ;;  %v6493_v59 = vmul.f32 %v6415_v53, %v14525_v46  ;;  %v14541_v30 = vld [vmem:[#allocation83_spill] sm:$0xff]  ;;  %v14542_v55 = vld [vmem:[#allocation76_spill] sm:$0xff]  ;;  %v14548_v2 = vld [vmem:[#allocation94_spill] sm:$0xff] }
 0x9b3   : > { %v6494_v12 = vmul.f32 %v6415_v53, %v14526_v57  ;;  %v6495_v42 = vmul.f32 %v6415_v53, %v14465_v31  ;;  %v6496_v24 = vmul.f32 %v6419_v40, %v14527_v5  ;;  %v6497_v37 = vmul.f32 %v6419_v40, %v14528_v13  ;;  %v14543_v53 = vld [vmem:[#allocation92_spill] sm:$0xff]  ;;  %v14545_v62 = vld [vmem:[#allocation99_spill] sm:$0xff]  ;;  %v14549_v57 = vld [vmem:[#allocation93_spill] sm:$0xff] }
 0x9b4   : > { %v6498_v26 = vmul.f32 %v6419_v40, %v14529_v41  ;;  %v6499_v36 = vmul.f32 %v6419_v40, %v14530_v61  ;;  %v6500_v49 = vmul.f32 %v6423_v16, %v14531_v54  ;;  %v6501_v9 = vmul.f32 %v6423_v16, %v14532_v7  ;;  %v14546_v60 = vld [vmem:[#allocation80_spill] sm:$0xff]  ;;  %v14547_v32 = vld [vmem:[#allocation71_spill] sm:$0xff] }
 0x9b5   : > { %v6502_v35 = vmul.f32 %v6423_v16, %v14533_v3  ;;  %v6503_v29 = vmul.f32 %v6423_v16, %v14534_v58  ;;  %v6504_v25 = vmul.f32 %v6427_v15, %v14535_v21  ;;  %v6505_v31 = vmul.f32 %v6427_v15, %v14536_v47  ;;  %v14554_v61 = vld [vmem:[#allocation116_spill] sm:$0xff]  ;;  %v14556_v7 = vld [vmem:[#allocation135_spill] sm:$0xff]  ;;  %v14558_v58 = vld [vmem:[#allocation137_spill] sm:$0xff] }
 0x9b6   : > { %v6506_v63 = vmul.f32 %v6427_v15, %v14537_v51  ;;  %v6507_v33 = vmul.f32 %v6427_v15, %v14538_v17  ;;  %v6508_v4 = vmul.f32 %v6431_v1, %v14539_v45  ;;  %v6509_v40 = vmul.f32 %v6431_v1, %v14540_v10  ;;  %v8031_v17 = vld [vmem:[%s8558_s10 + $0xa0] sm:$0xff]  ;;  %v8032_v45 = vld [vmem:[%s8558_s10 + $0xa8] sm:$0xff]  ;;  %v8033_v10 = vld [vmem:[%s8558_s10 + $0xb0] sm:$0xff] }
 0x9b7   : > { %v6510_v6 = vmul.f32 %v6431_v1, %v14541_v30  ;;  %v6511_v22 = vmul.f32 %v6431_v1, %v14542_v55  ;;  %v6544_v50 = vadd.f32 %v6480_v20, %v14543_v53  ;;  %v6545_v16 = vadd.f32 %v6481_v48, %v14544_v11  ;;  %v14550_v1 = vld [vmem:[#allocation111_spill] sm:$0xff]  ;;  %v14551_v48 = vld [vmem:[#allocation82_spill] sm:$0xff]  ;;  %v8034_v30 = vld [vmem:[%s8558_s10 + $0xb8] sm:$0xff] }
 0x9b8   : > { %v6546_v8 = vadd.f32 %v6482_v27, %v14545_v62  ;;  %v6547_v0 = vadd.f32 %v6483_v44, %v14546_v60  ;;  %v13148_v15 = vadd.f32 %v6484_v43, %v14547_v32  ;;  %v13151_v46 = vadd.f32 %v6485_v19, %v14548_v2  ;;  %v14552_v27 = vld [vmem:[#allocation73_spill] sm:$0xff]  ;;  %v14553_v43 = vld [vmem:[#allocation131_spill] sm:$0xff]  ;;  %v8038_v60 = vld [vmem:[%s8558_s10 + $0xd8] sm:$0xff] }
 0x9b9   : > { %v13154_v5 = vadd.f32 %v6486_v18, %v14549_v57  ;;  %v13157_v20 = vadd.f32 %v6487_v14, %v14550_v1  ;;  %v13160_v13 = vadd.f32 %v6488_v56, %v14551_v48  ;;  %v13163_v44 = vadd.f32 %v6489_v38, %v14552_v27  ;;  %v14555_v18 = vld [vmem:[#allocation112_spill] sm:$0xff]  ;;  %v14557_v56 = vld [vmem:[#allocation117_spill] sm:$0xff] }
 0x9ba   : > { %v13166_v41 = vadd.f32 %v6490_v52, %v14553_v43  ;;  %v13169_v19 = vadd.f32 %v6491_v28, %v14554_v61  ;;  %v13172_v54 = vadd.f32 %v6492_v39, %v14555_v18  ;;  %v13175_v14 = vadd.f32 %v6493_v59, %v14556_v7  ;;  %v8027_v52 = vld [vmem:[%s8558_s10 + $0x80] sm:$0xff]  ;;  %v8028_v28 = vld [vmem:[%s8558_s10 + $0x88] sm:$0xff]  ;;  %v8029_v39 = vld [vmem:[%s8558_s10 + $0x90] sm:$0xff] }
 0x9bb   : > { %v13178_v3 = vadd.f32 %v6494_v12, %v14557_v56  ;;  %v13181_v38 = vadd.f32 %v6495_v42, %v14558_v58  ;;  %v13184_v21 = vadd.f32 %v8027_v52, %v6496_v24  ;;  %v13187_v47 = vadd.f32 %v8028_v28, %v6497_v37  ;;  %v8030_v59 = vld [vmem:[%s8558_s10 + $0x98] sm:$0xff]  ;;  %v8035_v55 = vld [vmem:[%s8558_s10 + $0xc0] sm:$0xff] }
 0x9bc   : > { %v13190_v51 = vadd.f32 %v8029_v39, %v6498_v26  ;;  %v13193_v12 = vadd.f32 %v8030_v59, %v6499_v36  ;;  %v13196_v42 = vadd.f32 %v8031_v17, %v6500_v49  ;;  %v13199_v24 = vadd.f32 %v8032_v45, %v6501_v9  ;;  %v8036_v36 = vld [vmem:[%s8558_s10 + $0xc8] sm:$0xff]  ;;  %v8037_v49 = vld [vmem:[%s8558_s10 + $0xd0] sm:$0xff]  ;;  %v8039_v32 = vld [vmem:[%s8558_s10 + $0xe0] sm:$0xff] }
 0x9bd   : > { %v13202_v37 = vadd.f32 %v8033_v10, %v6502_v35  ;;  %v13205_v26 = vadd.f32 %v8034_v30, %v6503_v29  ;;  %v13208_v53 = vadd.f32 %v8035_v55, %v6504_v25  ;;  %v13211_v11 = vadd.f32 %v8036_v36, %v6505_v31  ;;  %v8040_v35 = vld [vmem:[%s8558_s10 + $0xe8] sm:$0xff]  ;;  %v8041_v29 = vld [vmem:[%s8558_s10 + $0xf0] sm:$0xff]  ;;  %v8042_v25 = vld [vmem:[%s8558_s10 + $0xf8] sm:$0xff] }
 0x9be   : > { %v13214_v62 = vadd.f32 %v8037_v49, %v6506_v63  ;;  %v13217_v9 = vadd.f32 %v8038_v60, %v6507_v33  ;;  %v13220_v2 = vadd.f32 %v8039_v32, %v6508_v4  ;;  %v13223_v57 = vadd.f32 %v8040_v35, %v6509_v40 }
 0x9bf   : > { %v13226_v1 = vadd.f32 %v8041_v29, %v6510_v6  ;;  %v13229_v31 = vadd.f32 %v8042_v25, %v6511_v22  ;;  %v7315_v63 = vclamps-f32 %v6544_v50, 2.0  ;;  %v7316_v48 = vclamps-f32 %v6545_v16, 2.0 }
 0x9c0   : > { %v7317_v33 = vclamps-f32 %v6546_v8, 2.0  ;;  %v7318_v27 = vclamps-f32 %v6547_v0, 2.0  ;;  %v7319_v4 = vclamps-f32 %v13148_v15, 2.0  ;;  %v7320_v40 = vclamps-f32 %v13151_v46, 2.0 }
 0x9c1   : > { %v7321_v43 = vclamps-f32 %v13154_v5, 2.0  ;;  %v7322_v6 = vclamps-f32 %v13157_v20, 2.0  ;;  %v7323_v22 = vclamps-f32 %v13160_v13, 2.0  ;;  %v7324_v61 = vclamps-f32 %v13163_v44, 2.0  ;;  %6736 = vst.msk [vmem:[%s8558_s10] sm:$0xff] %vm1077_vm1, %v7315_v63  ;;  %6737 = vst.msk [vmem:[%s8558_s10 + $0x8] sm:$0xff] %vm1077_vm1, %v7316_v48 }
 0x9c2   : > { %v7325_v50 = vclamps-f32 %v13166_v41, 2.0  ;;  %v7326_v16 = vclamps-f32 %v13169_v19, 2.0  ;;  %6738 = vst.msk [vmem:[%s8558_s10 + $0x10] sm:$0xff] %vm1077_vm1, %v7317_v33  ;;  %6739 = vst.msk [vmem:[%s8558_s10 + $0x18] sm:$0xff] %vm1077_vm1, %v7318_v27  ;;  %v7327_v8 = vclamps-f32 %v13172_v54, 2.0  ;;  %v7328_v0 = vclamps-f32 %v13175_v14, 2.0 }
 0x9c3   : > { %v7329_v15 = vclamps-f32 %v13178_v3, 2.0  ;;  %v7330_v46 = vclamps-f32 %v13181_v38, 2.0  ;;  %6740 = vst.msk [vmem:[%s8558_s10 + $0x20] sm:$0xff] %vm1077_vm1, %v7319_v4  ;;  %6741 = vst.msk [vmem:[%s8558_s10 + $0x28] sm:$0xff] %vm1077_vm1, %v7320_v40  ;;  %v7331_v5 = vclamps-f32 %v13184_v21, 2.0  ;;  %v7332_v20 = vclamps-f32 %v13187_v47, 2.0 }
 0x9c4   : > { %6742 = vst.msk [vmem:[%s8558_s10 + $0x30] sm:$0xff] %vm1077_vm1, %v7321_v43  ;;  %6743 = vst.msk [vmem:[%s8558_s10 + $0x38] sm:$0xff] %vm1077_vm1, %v7322_v6  ;;  %v7333_v13 = vclamps-f32 %v13190_v51, 2.0  ;;  %v7334_v44 = vclamps-f32 %v13193_v12, 2.0  ;;  %v7335_v41 = vclamps-f32 %v13196_v42, 2.0  ;;  %v7336_v19 = vclamps-f32 %v13199_v24, 2.0 }
 0x9c5   : > { %6744 = vst.msk [vmem:[%s8558_s10 + $0x40] sm:$0xff] %vm1077_vm1, %v7323_v22  ;;  %6745 = vst.msk [vmem:[%s8558_s10 + $0x48] sm:$0xff] %vm1077_vm1, %v7324_v61  ;;  %v7337_v18 = vclamps-f32 %v13202_v37, 2.0  ;;  %v7338_v54 = vclamps-f32 %v13205_v26, 2.0  ;;  %v7339_v7 = vclamps-f32 %v13208_v53, 2.0  ;;  %v7340_v14 = vclamps-f32 %v13211_v11, 2.0 }
 0x9c6   : > { %6746 = vst.msk [vmem:[%s8558_s10 + $0x50] sm:$0xff] %vm1077_vm1, %v7325_v50  ;;  %6747 = vst.msk [vmem:[%s8558_s10 + $0x58] sm:$0xff] %vm1077_vm1, %v7326_v16  ;;  %v7341_v56 = vclamps-f32 %v13214_v62, 2.0  ;;  %v7342_v3 = vclamps-f32 %v13217_v9, 2.0  ;;  %v7343_v58 = vclamps-f32 %v13220_v2, 2.0  ;;  %v7344_v38 = vclamps-f32 %v13223_v57, 2.0 }
 0x9c7   : > { %6748 = vst.msk [vmem:[%s8558_s10 + $0x60] sm:$0xff] %vm1077_vm1, %v7327_v8  ;;  %6749 = vst.msk [vmem:[%s8558_s10 + $0x68] sm:$0xff] %vm1077_vm1, %v7328_v0  ;;  %v7345_v52 = vclamps-f32 %v13226_v1, 2.0  ;;  %v7346_v21 = vclamps-f32 %v13229_v31, 2.0 }
 0x9c8   : > { %6750 = vst.msk [vmem:[%s8558_s10 + $0x70] sm:$0xff] %vm1077_vm1, %v7329_v15  ;;  %6751 = vst.msk [vmem:[%s8558_s10 + $0x78] sm:$0xff] %vm1077_vm1, %v7330_v46 }
 0x9c9   : > { %6752 = vst.msk [vmem:[%s8558_s10 + $0x80] sm:$0xff] %vm1077_vm1, %v7331_v5  ;;  %6753 = vst.msk [vmem:[%s8558_s10 + $0x88] sm:$0xff] %vm1077_vm1, %v7332_v20 }
 0x9ca   : > { %6754 = vst.msk [vmem:[%s8558_s10 + $0x90] sm:$0xff] %vm1077_vm1, %v7333_v13  ;;  %6755 = vst.msk [vmem:[%s8558_s10 + $0x98] sm:$0xff] %vm1077_vm1, %v7334_v44 }
 0x9cb   : > { %6756 = vst.msk [vmem:[%s8558_s10 + $0xa0] sm:$0xff] %vm1077_vm1, %v7335_v41  ;;  %6757 = vst.msk [vmem:[%s8558_s10 + $0xa8] sm:$0xff] %vm1077_vm1, %v7336_v19 }
 0x9cc   : > { %6758 = vst.msk [vmem:[%s8558_s10 + $0xb0] sm:$0xff] %vm1077_vm1, %v7337_v18  ;;  %6759 = vst.msk [vmem:[%s8558_s10 + $0xb8] sm:$0xff] %vm1077_vm1, %v7338_v54 }
 0x9cd   : > { %6760 = vst.msk [vmem:[%s8558_s10 + $0xc0] sm:$0xff] %vm1077_vm1, %v7339_v7  ;;  %6761 = vst.msk [vmem:[%s8558_s10 + $0xc8] sm:$0xff] %vm1077_vm1, %v7340_v14 }
 0x9ce   : > { %6762 = vst.msk [vmem:[%s8558_s10 + $0xd0] sm:$0xff] %vm1077_vm1, %v7341_v56  ;;  %6763 = vst.msk [vmem:[%s8558_s10 + $0xd8] sm:$0xff] %vm1077_vm1, %v7342_v3 }
 0x9cf   : > { %6764 = vst.msk [vmem:[%s8558_s10 + $0xe0] sm:$0xff] %vm1077_vm1, %v7343_v58  ;;  %6765 = vst.msk [vmem:[%s8558_s10 + $0xe8] sm:$0xff] %vm1077_vm1, %v7344_v38 }
 0x9d0   : > { %6766 = vst.msk [vmem:[%s8558_s10 + $0xf0] sm:$0xff] %vm1077_vm1, %v7345_v52  ;;  %6767 = vst.msk [vmem:[%s8558_s10 + $0xf8] sm:$0xff] %vm1077_vm1, %v7346_v21 }
 0x9df   : > { %v6277_v28 = vpop.xlane.xlu1 %6276 }
 0x9e0   : > { %7817 = vrcp.f32 %v6277_v28 }
 0x9e1   : > { %v6274_v47 = vpop.xlane.xlu0 %6273 }
 0x9e2   : > { %7819 = vrcp.f32 %v6274_v47 }
 0x9e3   : > { %v6801_v45 = vpop.permute.xlu1 %6800 }
 0x9e5   : > { %v6803_v12 = vpop.permute.xlu0 %6802 }
 0x9ed   : > { %v7818_v39 = vpop.eup %7817 }
 0x9ee   : > { %v6281_v51 = vmul.f32 %v7818_v39, %v12830_v34 }
 0x9ef   : > { %v7820_v59 = vpop.eup %7819 }
 0x9f0   : > { %v6280_v17 = vmul.f32 %v7820_v59, %v12834_v23  ;;  %v6807_v42 = vsel %vm1077_vm1, %v6281_v51, %v6803_v12 }
 0x9f1   : > { %v6809_v24 = vsel %vm2149_vm10, %v6807_v42, 0.0 }
 0x9f2   : > { %v6806_v10 = vsel %vm1077_vm1, %v6280_v17, %v6801_v45  ;;  %7380 = vst [vmem:[%s8556_s28 + $0x38] sm:$0xff] %v6809_v24 }
 0x9f3   : > { %v6808_v37 = vsel %vm2149_vm10, %v6806_v10, 0.0 }
 0x9f4   : > { %7379 = vst [vmem:[%s8556_s28 + $0x30] sm:$0xff] %v6808_v37 }
 0x9f5   : > { %s14559_s8 = sld [smem:[#allocation27_spill]]  ;;  %s7396_s24 = sshll.u32 %s8237_s27, 4 }
 0x9f6   : > { %s14560_s11 = sld [smem:[#allocation33_spill]]  ;;  %s6847_s6 = sshll.u32 %s8556_s28, 4  ;;  %s6848_s6 = int_to_ptr.vmem [resolvable:$true] %s6847_s6 }
 0x9f7   : > { %s14561_s15 = sld [smem:[#allocation155_spill]]  ;;  %s8271_s18 = smov 256  }
 0x9f8   : > { %s8272_s17 = smov 512   ;;  %s8273_s19 = smov 2  }
 0x9f9   : > { %s8274_s27 = smov 128   ;;  %s8275_s28 = smov 8  }
 0x9fa   : > { %s8276_s20 = smov 131072   ;;  %s8277_s5 = smov 0  }
 0x9fb   : > { %s7384_s3 = sshll.u32 %s14559_s8, 1 }
 0x9fc   : > { %s6834_s26 = sadd.s32 %s7396_s24, %s7384_s3  ;;  %p14562_p8 = scmp.ne.s32.totalorder %s14560_s11, 0 }
 0x9fd   : > { %s7386_s21 = sshll.u32 %s6834_s26, 7  ;;  %s7398_s3 = sshll.u32 %s14559_s8, 13 }
 0x9fe   : > { %s6836_s29 = scalar_lea.hbm %s14561_s15, %s7386_s21  ;;  %7620 = sst [smem:[#allocation17]] (%p14562_p8), %s8271_s18 }
 0x9ff   : > { %7621 = sst [smem:[#allocation17 + $0x1]] (%p14562_p8), %s8272_s17  ;;  %s6877_s24 = sshll.u32 %s8558_s10, 4  ;;  %s13360_s24 = int_to_ptr.vmem [resolvable:$true] %s6877_s24 }
 0xa00   : > { %7622 = sst [smem:[#allocation17 + $0x2]] (%p14562_p8), %s8273_s19  ;;  %s8121_s15 = scalar_lea.vmem %s13360_s24, 8192 }
 0xa01   : > { %7623 = sst [smem:[#allocation17 + $0x3]] (%p14562_p8), %s8274_s27  ;;  %p8122_p0 = scmp.ne.s32.totalorder %s13360_s24, %s8121_s15 }
 0xa02   : > { %7624 = sst [smem:[#allocation17 + $0x4]] (%p14562_p8), %s8274_s27 }
 0xa03   : > { %7625 = sst [smem:[#allocation17 + $0x5]] (%p14562_p8), %s8275_s28 }
 0xa04   : > { %7626 = dma.general (%p14562_p8), %s6848_s6, 1024, %s6836_s29, %s6816_s0, %s8276_s20, [#allocation17], %s8277_s5, 0  }
 0xa05   : > { %s14563_s4 = sld [smem:[#allocation34_spill]]  ;;  %s8278_s0 = smov [#allocation12]  }
 0xa06   : > { %s14564_s13 = sld [smem:[#allocation156_spill]]  ;;  %s8125_s11 = sshll.u32 %s8278_s0, 4  ;;  %s8126_s11 = int_to_ptr.vmem [resolvable:$false] %s8125_s11 }
 0xa07   : > { %s8127_s8 = scalar_lea.vmem %s8126_s11, 16384  ;;  %p8128_p5 = scmp.lt.s32.totalorder %s13360_s24, %s8126_s11 }
 0xa08   : > { %p8129_p13 = scmp.lt.s32.totalorder %s8127_s8, %s8121_s15 }
 0xa0a   : > { %p8130_p3 = por %p8129_p13, %p8128_p5 }
 0xa0b   : > { %p14565_p10 = scmp.ne.s32.totalorder %s14563_s4, 0 }
 0xa0c   : > { %s13358_s14 = scalar_lea.hbm %s14564_s13, %s7398_s3 }
 0xa0d   : > { %p8123_p9 = pnand %p8122_p0, %p14565_p10 }
 0xa0f   : > { %p8124_p4 = pneg %p8123_p9 }
 0xa11   : > { %p8131_p7 = pnand %p8130_p3, %p8124_p4 }
 0xa13   : > { %8134 = shalt.err (!%p8131_p7)
}
 0xa14   : > { %s8135_s10 = scalar_lea.hbm %s13358_s14, 8192  ;;  %s8139_s18 = scalar_lea.hbm %s14564_s13, 16384 }
 0xa15   : > { %p8136_p12 = scmp.ne.s32.totalorder %s13358_s14, %s8135_s10  ;;  %p8140_p2 = scmp.lt.s32.totalorder %s13358_s14, %s14564_s13 }
 0xa16   : > { %p8141_p11 = scmp.lt.s32.totalorder %s8139_s18, %s8135_s10 }
 0xa17   : > { %p8137_p1 = pnand %p8136_p12, %p14565_p10 }
 0xa18   : > { %p8142_p8 = por %p8141_p11, %p8140_p2 }
 0xa19   : > { %p8138_p6 = pneg %p8137_p1 }
 0xa1b   : > { %p8143_p0 = pnand %p8142_p8, %p8138_p6 }
 0xa1d   : > { %8146 = shalt.err (!%p8143_p0)
}
 0xa1e   : > { %s8279_s27 = smov 128   ;;  %s8280_s28 = smov 8  }
 0xa1f   : > { %7627 = dma.vmem_to_hbm [thread:$0]  (%p14565_p10), %s13360_s24, 8192, %s13358_s14, %s6821_s16, %s8279_s27, %s8279_s27, %s8280_s28  }
 0xa20 PF: > { %s14566_s20 = sld [smem:[#allocation25_spill]]  ;;  %p7643_p9 = scmp.ge.s32.totalorder %s8253_s7, 2 }
 0xa21   : > { %s14567_s5 = sld [smem:[#allocation35_spill]] }
 0xa26   : > { %s6892_s3 = sand.u32 1, %s14566_s20  }
 0xa27   : > { %p14568_p4 = scmp.ne.s32.totalorder %s14567_s5, 0  ;;  %s6893_s26 = scalar_lea.sflag [#allocation5], %s6892_s3 }
 0xa29   : > { %p7635_p5 = pnand %p7643_p9, %p14568_p4 }
 0xa2b   : > { %p7636_p13 = pneg %p7635_p5 }
 0xa2d   : > { %8204 = dma.done.wait (%p7636_p13), %s6893_s26, 1024  }
 0xa2e   : > { %8206 = vsyncadd (%p7636_p13), %s6893_s26, 4294966272  ;;  %s14569_s21 = sld [smem:[#allocation24_spill]] }
 0xa2f   : > { %s14570_s15 = sld [smem:[#allocation36_spill]] }
 0xa34   : > { %s6901_s0 = sand.u32 1, %s14569_s21  }
 0xa35   : > { %p14571_p3 = scmp.ne.s32.totalorder %s14570_s15, 0  ;;  %s6902_s9 = scalar_lea.sflag [#allocation13], %s6901_s0 }
 0xa37   : > { %p7638_p7 = pnand %p7643_p9, %p14571_p3 }
 0xa39   : > { %p7639_p12 = pneg %p7638_p7 }
 0xa3b   : > { %8208 = dma.done.wait (%p7639_p12), %s6902_s9, 8192  }
 0xa3c   : > { %8210 = vsyncadd (%p7639_p12), %s6902_s9, 4294959104  ;;  %s30_s7 = sadd.s32 1, %s8253_s7   ;;  %s14572_s16 = sld [smem:[#allocation31_spill]] }
 0xa3d   : > { %p27_p10 = scmp.ge.s32.totalorder %s30_s7, 6   ;;  %s14573_s4 = sld [smem:[#allocation26_spill]] }
 0xa3e   : > { %s14574_s26 = sld [smem:[#allocation32_spill]]  ;;  %s14578_s21 = smov %s8217_s22 }
 0xa3f   : > { %s14575_s27 = sld [smem:[#allocation28_spill]]  ;;  %s14579_s22 = smov %s8221_s23 }
 0xa40   : > { %s14576_s29 = sld [smem:[#allocation29_spill]]  ;;  %s14581_s24 = smov %s8229_s25 }
 0xa41   : > { %s14577_s14 = sld [smem:[#allocation30_spill]]  ;;  %s14583_s28 = smov %s8249_s30 }
 0xa42   : > { %s14580_s23 = smov %s14572_s16 }
 0xa43   : > { %s14582_s25 = smov %s14573_s4  ;;  %29 = sbr.rel (!%p27_p10) target bundleno = 20 (0x14), region = 153 }
 0xa47   : > { %s14584_s30 = smov %s14577_s14 }
 0xa48   :  { %6907 = vsyncpa [#allocation4], 1 }
 0xa49   :  { %6909 = vsyncpa [#allocation4 + $0x1], 1 }
 0xa4a   :  { %6910 = vsyncpa [#allocation7], 1 }
 0xa4b   :  { %6912 = vsyncpa [#allocation7 + $0x1], 1 }
 0xa4c   :  { %6913 = vsyncpa [#allocation10], 1 }
 0xa4d   :  { %6914 = vsyncpa [#allocation5], 1 }
 0xa4e   :  { %6916 = vsyncpa [#allocation5 + $0x1], 1 }
 0xa4f   :  { %6917 = vsyncpa [#allocation13], 1 }
 0xa50   :  { %6919 = vsyncpa [#allocation13 + $0x1], 1 }

</bundles_post_ra>
